<compile_context>
chip_gen: v7x
topology: tpu7x:2x2x1
jax: 0.10.0
libtpu: 0.0.40
codegen_flags: <defaults>
</compile_context>

<pallas_src>
import math

import numpy as np
import jax
import jax.numpy as jnp
from jax.experimental import pallas as pl
from jax.experimental.pallas import tpu as pltpu


_PAD = 1                     # the module hard-codes padding=1 for every conv
_MXU_DTYPE = jnp.bfloat16    # operand dtype for all MXU matmuls (f32 accumulate)


# ----------------------------------------------------------------------------
# Constant-matrix construction (pack time, outside the hot path).
# ----------------------------------------------------------------------------
def _bilinear_matrix(n_in, scale):
    """Interp matrix matching torch interpolate(mode='bilinear', align_corners=False)."""
    n_out = n_in * scale
    m = np.zeros((n_out, n_in), np.float32)
    for o in range(n_out):
        src = max((o + 0.5) / scale - 0.5, 0.0)
        i0 = min(int(np.floor(src)), n_in - 1)
        i1 = min(i0 + 1, n_in - 1)
        w1 = src - i0
        m[o, i0] += 1.0 - w1
        m[o, i1] += w1
    return m


def _conv_right_matrix(w, width, pad):
    """w: (K, K, Cin, Cout) -> block-Toeplitz (K*width*Cin, width*Cout).

    Rows ordered (dy, iw, ci), cols (ow, co): the W-direction taps, W zero
    padding and the channel mixing of a stride-1 "same" conv all folded into
    this constant (the H-taps are handled by row-shifted slab writes).
    """
    k, _, cin, cout = w.shape
    sel = np.zeros((k, width, width), np.float32)
    for dx in range(k):
        for ow in range(width):
            iw = ow + dx - pad
            if 0 <= iw < width:
                sel[dx, iw, ow] = 1.0
    m = jnp.einsum("xio,yxcf->yicof", jnp.asarray(sel), w)   # (K, W, Cin, W, Cout)
    return m.reshape(k * width * cin, width * cout)


def _deconv_phase_blocks(w_t, w_in, stride, pad):
    """PyTorch ConvTranspose2d weight (Cin, Cout, K, K) -> per-kernel-row maps.

    Returns blocks[ky] of shape (w_in*Cin, w_out*Cout): the map from the fused
    (iw, ci) lane axis to the fused upsampled (ow, co) lane axis contributed by
    kernel row ky (ow = stride*iw - pad + kx), plus w_out.
    """
    cin, cout, k, _ = w_t.shape
    w_out = (w_in - 1) * stride - 2 * pad + k
    sel = np.zeros((k, w_in, w_out), np.float32)
    for kx in range(k):
        for iw in range(w_in):
            ow = stride * iw - pad + kx
            if 0 <= ow < w_out:
                sel[kx, iw, ow] = 1.0
    m = jnp.einsum("xio,cfyx->yicof", jnp.asarray(sel), w_t)  # (ky, Win, Cin, Wout, Cout)
    blocks = [m[ky].reshape(w_in * cin, w_out * cout) for ky in range(k)]
    return blocks, w_out


# ----------------------------------------------------------------------------
# The fused kernel.
# ----------------------------------------------------------------------------
def _fill_slab3(s_ref, act_b, wc, height):
    """3-tap H-direction im2col (pad=1) into a VMEM slab.

    Only the two border row-stripes the shifted writes never touch are zeroed.
    """
    batch = s_ref.shape[0]
    zrow = jnp.zeros((batch, 1, wc), s_ref.dtype)
    s_ref[:, 0:1, 0:wc] = zrow
    s_ref[:, height - 1:height, 2 * wc:3 * wc] = zrow
    for dy in range(3):
        lo = max(0, _PAD - dy)
        hi = min(height, height + _PAD - dy)
        s_ref[:, lo:hi, dy * wc:(dy + 1) * wc] = act_b[:, lo + dy - _PAD:hi + dy - _PAD, :]


def _build_fused_kernel(num_conv):
    """refs = (x, [w_i, b_i]*num_conv, wd_e, wd_o, bd, bw, bh, out, scratches)."""

    def kernel(*refs):
        x_ref = refs[0]
        conv_refs = refs[1:1 + 2 * num_conv]
        (wde_ref, wdo_ref, bd_ref, bw_ref, bh_ref, o_ref) = refs[
            1 + 2 * num_conv:7 + 2 * num_conv]
        scratch = refs[7 + 2 * num_conv:]
        slab_refs = scratch[:num_conv]
        sd_ref = scratch[num_conv]          # deconv slab
        d_ref = scratch[num_conv + 1]       # phase-stacked post-sigmoid (bf16)

        batch = x_ref.shape[0]
        height = x_ref.shape[1]

        # ---------------- conv stack: 3x3 "same" conv + bias + ReLU -----------
        act = x_ref[...]                                   # (B, H, W*Cin) f32
        for li in range(num_conv):
            w_ref, b_ref = conv_refs[2 * li], conv_refs[2 * li + 1]
            s_ref = slab_refs[li]
            wc = act.shape[-1]
            _fill_slab3(s_ref, act.astype(s_ref.dtype), wc, height)
            # One MXU matmul per conv layer; M = B*H rows, bf16 ops, f32 acc.
            pre = jax.lax.dot_general(
                s_ref[...].reshape(batch * height, 3 * wc), w_ref[...],
                (((1,), (0,)), ((), ())), preferred_element_type=jnp.float32)
            act = jnp.maximum(
                pre.reshape(batch, height, -1) + b_ref[...].reshape(1, 1, -1), 0.0)

        # -------- ConvTranspose2d(k=4, s=2, p=1): 2-phase polyphase over a
        #          3-tap H slab (even rows use taps [m-1, m]; odd use [m, m+1]).
        wc = act.shape[-1]                                 # W * C_last
        _fill_slab3(sd_ref, act.astype(sd_ref.dtype), wc, height)
        woc = bd_ref.shape[-1]                             # W_deconv * num_kp
        bias_d = bd_ref[...].reshape(1, 1, woc)
        even = jax.lax.dot_general(
            sd_ref[:, :, 0:2 * wc].reshape(batch * height, 2 * wc), wde_ref[...],
            (((1,), (0,)), ((), ())), preferred_element_type=jnp.float32
        ).reshape(batch, height, woc)
        odd = jax.lax.dot_general(
            sd_ref[:, :, wc:3 * wc].reshape(batch * height, 2 * wc), wdo_ref[...],
            (((1,), (0,)), ((), ())), preferred_element_type=jnp.float32
        ).reshape(batch, height, woc)
        # bias + sigmoid, stored phase-stacked (rows [0,H)=even, [H,2H)=odd)
        d_ref[:, 0:height, :] = jax.nn.sigmoid(even + bias_d).astype(d_ref.dtype)
        d_ref[:, height:2 * height, :] = jax.nn.sigmoid(odd + bias_d).astype(d_ref.dtype)

        # -------- 2x bilinear (align_corners=False): lane/W upsample FIRST
        #          (cheaper: 32 rows), then row/H upsample (64 rows).
        hd = 2 * height                                    # deconv output height
        u = jax.lax.dot_general(
            d_ref[...].reshape(batch * hd, woc), bw_ref[...],
            (((1,), (0,)), ((), ())), preferred_element_type=jnp.float32)
        u = u.astype(_MXU_DTYPE).reshape(batch, hd, 2 * woc)
        # bh also folds the even/odd deconv-row interleave; single batched dot.
        bh = jnp.broadcast_to(bh_ref[...][None, :, :], (batch,) + bh_ref.shape)
        out = jax.lax.dot_general(
            bh, u, (((2,), (1,)), ((0,), (0,))),
            preferred_element_type=jnp.float32)            # (B, Ho, Wo*C)
        o_ref[...] = out.astype(o_ref.dtype)               # one lane-dense store

    return kernel


def _fused_forward(x2d, packed, b_block):
    n, height, wc_in = x2d.shape
    num_conv = len(packed["convs"])
    h_out, woc_out = packed["out_hw"]
    wc_last = int(packed["convs"][-1][0].shape[1])
    woc_d = int(packed["bd"].shape[1])

    in_arrays = [x2d]
    in_specs = [pl.BlockSpec((b_block, height, wc_in), lambda g: (g, 0, 0))]
    for w, brow in packed["convs"]:
        in_arrays += [w, brow]
        in_specs += [pl.BlockSpec(w.shape, lambda g: (0, 0)),
                     pl.BlockSpec(brow.shape, lambda g: (0, 0))]
    for name in ("wd_e", "wd_o", "bd", "bw", "bh"):
        arr = packed[name]
        in_arrays.append(arr)
        in_specs.append(pl.BlockSpec(arr.shape, lambda g: (0, 0)))

    scratch_shapes = (
        [pltpu.VMEM((b_block, height, int(w.shape[0])), _MXU_DTYPE)
         for w, _ in packed["convs"]]
        + [pltpu.VMEM((b_block, height, 3 * wc_last), _MXU_DTYPE),
           pltpu.VMEM((b_block, 2 * height, woc_d), _MXU_DTYPE)])

    return pl.pallas_call(
        _build_fused_kernel(num_conv),
        out_shape=jax.ShapeDtypeStruct((n, h_out, woc_out), jnp.float32),
        grid=(n // b_block,),
        in_specs=in_specs,
        out_specs=pl.BlockSpec((b_block, h_out, woc_out), lambda g: (g, 0, 0)),
        scratch_shapes=scratch_shapes,
        compiler_params=pltpu.CompilerParams(
            dimension_semantics=("parallel",),
            vmem_limit_bytes=48 * 1024 * 1024),
    )(*in_arrays)


# ----------------------------------------------------------------------------
# Parameters (deterministic; mirrors kaiming fan_out / zero-bias init) and the
# one-time packing of the fused constant matrices.
# ----------------------------------------------------------------------------
def init_params(key, in_channels, conv_channels, conv_sizes, num_out, deconv_k=4):
    params = {"convs": []}
    c = in_channels
    for ch, ks in zip(conv_channels, conv_sizes):
        key, k1 = jax.random.split(key)
        fan_out = ch * ks * ks
        w = jax.random.normal(k1, (ks, ks, c, ch), jnp.float32) * np.sqrt(2.0 / fan_out)
        b = jnp.zeros((ch,), jnp.float32)
        params["convs"].append((w, b))
        c = ch
    key, k1 = jax.random.split(key)
    fan_out = num_out * deconv_k * deconv_k
    params["deconv_w"] = jax.random.normal(
        k1, (c, num_out, deconv_k, deconv_k), jnp.float32) * np.sqrt(2.0 / fan_out)
    params["deconv_b"] = jnp.zeros((num_out,), jnp.float32)
    return params


def pack_params(params, height, width):
    """Build (once) the constant fused matrices consumed by the kernel."""
    convs_src = list(params["convs"])

    # pad layer-0 input channels so W*Cin is lane-aligned (multiple of 128)
    w0, b0 = convs_src[0]
    cin = int(w0.shape[2])
    cin_p = cin
    if (width * cin) % 128 != 0:
        step = 128 // math.gcd(width, 128)
        cand = -(-cin // step) * step
        if cand <= 4 * cin:              # avoid pathological padding factors
            cin_p = cand
    if cin_p > cin:
        w0 = jnp.pad(w0, ((0, 0), (0, 0), (0, cin_p - cin), (0, 0)))
    convs_src[0] = (w0, b0)

    convs = []
    for w, b in convs_src:
        assert int(w.shape[0]) == 3 and int(w.shape[1]) == 3, \
            "fused kernel assumes 3x3 convs (padding=1, 'same')"
        cout = int(w.shape[-1])
        wcat = _conv_right_matrix(w, width, _PAD).astype(_MXU_DTYPE)
        brow = jnp.tile(b, width).reshape(1, width * cout).astype(jnp.float32)
        convs.append((wcat, brow))

    w_t, b_d = params["deconv_w"], params["deconv_b"]
    cout = int(w_t.shape[1])
    k_d = int(w_t.shape[2])
    assert k_d == 4, "phase-decomposed deconv assumes kernel=4, stride=2, pad=1"
    blocks, w_up = _deconv_phase_blocks(w_t, width, stride=2, pad=k_d // 2 - 1)
    # even output rows (oy=2m): ky=3 applied to act[m-1], ky=1 to act[m]
    wd_e = jnp.concatenate([blocks[3], blocks[1]], axis=0).astype(_MXU_DTYPE)
    # odd  output rows (oy=2m+1): ky=2 applied to act[m],  ky=0 to act[m+1]
    wd_o = jnp.concatenate([blocks[2], blocks[0]], axis=0).astype(_MXU_DTYPE)
    bd = jnp.tile(b_d, w_up).reshape(1, w_up * cout).astype(jnp.float32)
    h_up = 2 * height                      # deconv output height (k=4, s=2, p=1)

    m_h = _bilinear_matrix(h_up, 2)        # taps indexed over interleaved rows
    m_w = _bilinear_matrix(w_up, 2)
    # reorder bh columns so they address the phase-stacked [even; odd] rows
    bh = np.concatenate([m_h[:, 0::2], m_h[:, 1::2]], axis=1)          # (Ho, Hs)
    bw = np.kron(m_w.T, np.eye(cout, dtype=np.float32))               # (Ws*C, Wo*C)

    return {
        "convs": convs,
        "cin_padded": cin_p,
        "wd_e": wd_e,
        "wd_o": wd_o,
        "bd": bd,
        "bw": jnp.asarray(bw, _MXU_DTYPE),
        "bh": jnp.asarray(bh, _MXU_DTYPE),
        "num_out": cout,
        "out_hw": (2 * h_up, 2 * w_up * cout),
    }


def rcnn_heatmap_head_forward(x_nchw, packed, b_block=8):
    """Forward pass: convs+ReLU -> deconv -> sigmoid -> 2x bilinear upsample.

    b_block=8 gives M = B*H = 128 matmul rows (fills a v5e MXU); use 16 on
    v6e/v7x (256-row MXU) when the ROI count is large enough to keep the
    grid length >= 2 (two TensorCores on v7x).
    """
    n, c, h, w = x_nchw.shape
    num_out = packed["num_out"]
    h_out, woc_out = packed["out_hw"]
    w_out = woc_out // num_out
    cin_p = packed["cin_padded"]

    x_nhwc = jnp.transpose(x_nchw, (0, 2, 3, 1))
    if cin_p > c:
        x_nhwc = jnp.pad(x_nhwc, ((0, 0), (0, 0), (0, 0), (0, cin_p - c)))
    x2d = x_nhwc.reshape(n, h, w * cin_p)

    n_pad = -(-n // b_block) * b_block            # pad ROI count to the block
    if n_pad > n:
        x2d = jnp.pad(x2d, ((0, n_pad - n), (0, 0), (0, 0)))

    out = _fused_forward(x2d, packed, b_block)[:n]        # (N, Ho, Wo*C) lane-dense
    # NOTE: the kernel output is lane-dense fused-NHWC; the NCHW rearrange below
    # is one extra HBM pass -- drop it if the consumer can take NHWC directly.
    return jnp.transpose(out.reshape(n, h_out, w_out, num_out), (0, 3, 1, 2))


# ----------------------------------------------------------------------------
# Pure-JAX reference (correctness check only).
# ----------------------------------------------------------------------------
def _reference_forward(x_nchw, params):
    x = x_nchw
    for w, b in params["convs"]:
        y = jax.lax.conv_general_dilated(
            x, w, window_strides=(1, 1), padding=((_PAD, _PAD), (_PAD, _PAD)),
            dimension_numbers=("NCHW", "HWIO", "NCHW"))
        x = jax.nn.relu(y + b.reshape(1, -1, 1, 1))
    w_t, b_d = params["deconv_w"], params["deconv_b"]
    k = w_t.shape[2]
    stride, pad = 2, k // 2 - 1
    w_conv = jnp.transpose(w_t[:, :, ::-1, ::-1], (2, 3, 0, 1))       # (K,K,Cin,Cout)
    y = jax.lax.conv_general_dilated(
        x, w_conv, window_strides=(1, 1),
        padding=((k - 1 - pad, k - 1 - pad), (k - 1 - pad, k - 1 - pad)),
        lhs_dilation=(stride, stride),
        dimension_numbers=("NCHW", "HWIO", "NCHW"))
    s = jax.nn.sigmoid(y + b_d.reshape(1, -1, 1, 1))
    m_h = jnp.asarray(_bilinear_matrix(s.shape[2], 2))
    m_w = jnp.asarray(_bilinear_matrix(s.shape[3], 2))
    return jnp.einsum("ih,jw,nchw->ncij", m_h, m_w, s)


if __name__ == "__main__":
    key = jax.random.PRNGKey(0)
    key, kx, kp = jax.random.split(key, 3)

    N, C, H, W = 2, 4, 16, 16
    NUM_KP = 8
    x = jax.random.normal(kx, (N, C, H, W), jnp.float32)
    params = init_params(kp, C, conv_channels=[32, 32], conv_sizes=[3, 3],
                         num_out=NUM_KP, deconv_k=4)
    packed = pack_params(params, H, W)

    y = rcnn_heatmap_head_forward(x, packed)
    y = jax.block_until_ready(y)

    assert y.shape == (N, NUM_KP, 4 * H, 4 * W), y.shape
    assert bool(jnp.all(jnp.isfinite(y)))
    # post-sigmoid + convex bilinear interp => values stay (essentially) in [0, 1]
    assert bool(jnp.all((y >= -1e-3) & (y <= 1.0 + 1e-3)))

    # numerical check against a plain-JAX reference (bf16 MXU operands => loose tol)
    y_ref = jax.block_until_ready(_reference_forward(x, params))
    max_err = float(jnp.max(jnp.abs(y - y_ref)))
    assert max_err < 3e-2, max_err

    print("KERNEL_OK")
</pallas_src>

<mosaic_0001>
module attributes {stable_mosaic.version = 11 : i64} {
  func.func @kernel(%arg0: i32, %arg1: memref<8x16x128xf32, #tpu.memory_space<vmem>>, %arg2: memref<384x512xbf16, #tpu.memory_space<vmem>>, %arg3: memref<1x512xf32, #tpu.memory_space<vmem>>, %arg4: memref<1536x512xbf16, #tpu.memory_space<vmem>>, %arg5: memref<1x512xf32, #tpu.memory_space<vmem>>, %arg6: memref<1024x256xbf16, #tpu.memory_space<vmem>>, %arg7: memref<1024x256xbf16, #tpu.memory_space<vmem>>, %arg8: memref<1x256xf32, #tpu.memory_space<vmem>>, %arg9: memref<256x512xbf16, #tpu.memory_space<vmem>>, %arg10: memref<64x32xbf16, #tpu.memory_space<vmem>>, %arg11: memref<8x64x512xf32, #tpu.memory_space<vmem>>, %arg12: memref<8x16x384xbf16, #tpu.memory_space<vmem>>, %arg13: memref<8x16x1536xbf16, #tpu.memory_space<vmem>>, %arg14: memref<8x16x1536xbf16, #tpu.memory_space<vmem>>, %arg15: memref<8x32x256xbf16, #tpu.memory_space<vmem>>) attributes {dimension_semantics = [#tpu.dimension_semantics<parallel>], iteration_bounds = array<i64: 1>, scalar_prefetch = 0 : i64, scratch_operands = 4 : i64, tpu.core_type = #tpu.core_type<tc>, window_params = [{transform_indices = @transform_0, window_bounds = array<i64: 8, 16, 128>}, {pipeline_mode = #tpu.pipeline_mode<synchronous>, transform_indices = @transform_1, window_bounds = array<i64: 384, 512>}, {pipeline_mode = #tpu.pipeline_mode<synchronous>, transform_indices = @transform_2, window_bounds = array<i64: 1, 512>}, {pipeline_mode = #tpu.pipeline_mode<synchronous>, transform_indices = @transform_3, window_bounds = array<i64: 1536, 512>}, {pipeline_mode = #tpu.pipeline_mode<synchronous>, transform_indices = @transform_4, window_bounds = array<i64: 1, 512>}, {pipeline_mode = #tpu.pipeline_mode<synchronous>, transform_indices = @transform_5, window_bounds = array<i64: 1024, 256>}, {pipeline_mode = #tpu.pipeline_mode<synchronous>, transform_indices = @transform_6, window_bounds = array<i64: 1024, 256>}, {pipeline_mode = #tpu.pipeline_mode<synchronous>, transform_indices = @transform_7, window_bounds = array<i64: 1, 256>}, {pipeline_mode = #tpu.pipeline_mode<synchronous>, transform_indices = @transform_8, window_bounds = array<i64: 256, 512>}, {pipeline_mode = #tpu.pipeline_mode<synchronous>, transform_indices = @transform_9, window_bounds = array<i64: 64, 32>}, {transform_indices = @transform_10, window_bounds = array<i64: 8, 64, 512>}]} {
    %c0 = arith.constant 0 : index
    %c0_0 = arith.constant 0 : index
    %c0_1 = arith.constant 0 : index
    %0 = vector.load %arg1[%c0, %c0_0, %c0_1] : memref<8x16x128xf32, #tpu.memory_space<vmem>>, vector<8x16x128xf32>
    %1 = arith.truncf %0 : vector<8x16x128xf32> to vector<8x16x128xbf16>
    %cst = arith.constant 0.000000e+00 : bf16
    %2 = vector.broadcast %cst : bf16 to vector<8x1x128xbf16>
    %c0_2 = arith.constant 0 : index
    %c0_3 = arith.constant 0 : index
    %c0_4 = arith.constant 0 : index
    %3 = vector.load %arg12[%c0_2, %c0_3, %c0_4] : memref<8x16x384xbf16, #tpu.memory_space<vmem>>, vector<8x1x128xbf16>
    tpu.vector_store %arg12[%c0_2, %c0_3, %c0_4], %2 {strides = array<i32>} : memref<8x16x384xbf16, #tpu.memory_space<vmem>>, vector<8x1x128xbf16>,
    %c0_5 = arith.constant 0 : index
    %c15 = arith.constant 15 : index
    %c256 = arith.constant 256 : index
    %4 = vector.load %arg12[%c0_5, %c15, %c256] : memref<8x16x384xbf16, #tpu.memory_space<vmem>>, vector<8x1x128xbf16>
    tpu.vector_store %arg12[%c0_5, %c15, %c256], %2 {strides = array<i32>} : memref<8x16x384xbf16, #tpu.memory_space<vmem>>, vector<8x1x128xbf16>,
    %5 = vector.extract_strided_slice %1 {offsets = [0, 0, 0], sizes = [8, 15, 128], strides = [1, 1, 1]} : vector<8x16x128xbf16> to vector<8x15x128xbf16>
    %c0_6 = arith.constant 0 : index
    %c1 = arith.constant 1 : index
    %c0_7 = arith.constant 0 : index
    %6 = vector.load %arg12[%c0_6, %c1, %c0_7] : memref<8x16x384xbf16, #tpu.memory_space<vmem>>, vector<8x15x128xbf16>
    tpu.vector_store %arg12[%c0_6, %c1, %c0_7], %5 {strides = array<i32>} : memref<8x16x384xbf16, #tpu.memory_space<vmem>>, vector<8x15x128xbf16>,
    %c0_8 = arith.constant 0 : index
    %c0_9 = arith.constant 0 : index
    %c128 = arith.constant 128 : index
    %7 = vector.load %arg12[%c0_8, %c0_9, %c128] : memref<8x16x384xbf16, #tpu.memory_space<vmem>>, vector<8x16x128xbf16>
    tpu.vector_store %arg12[%c0_8, %c0_9, %c128], %1 {strides = array<i32>} : memref<8x16x384xbf16, #tpu.memory_space<vmem>>, vector<8x16x128xbf16>,
    %8 = vector.extract_strided_slice %1 {offsets = [0, 1, 0], sizes = [8, 15, 128], strides = [1, 1, 1]} : vector<8x16x128xbf16> to vector<8x15x128xbf16>
    %c0_10 = arith.constant 0 : index
    %c0_11 = arith.constant 0 : index
    %c256_12 = arith.constant 256 : index
    %9 = vector.load %arg12[%c0_10, %c0_11, %c256_12] : memref<8x16x384xbf16, #tpu.memory_space<vmem>>, vector<8x15x128xbf16>
    tpu.vector_store %arg12[%c0_10, %c0_11, %c256_12], %8 {strides = array<i32>} : memref<8x16x384xbf16, #tpu.memory_space<vmem>>, vector<8x15x128xbf16>,
    %c0_13 = arith.constant 0 : index
    %c0_14 = arith.constant 0 : index
    %c0_15 = arith.constant 0 : index
    %10 = vector.load %arg12[%c0_13, %c0_14, %c0_15] : memref<8x16x384xbf16, #tpu.memory_space<vmem>>, vector<8x16x384xbf16>
    %11 = vector.shape_cast %10 : vector<8x16x384xbf16> to vector<128x384xbf16>
    %c0_16 = arith.constant 0 : index
    %c0_17 = arith.constant 0 : index
    %12 = vector.load %arg2[%c0_16, %c0_17] : memref<384x512xbf16, #tpu.memory_space<vmem>>, vector<384x512xbf16>
    %cst_18 = arith.constant dense<0.000000e+00> : vector<128x512xf32>
    %13 = tpu.matmul %11, %12, %cst_18 {dimension_numbers = #tpu.dot_dimension_numbers<[1], [0], [0], [1], [0, 0, 1, 1], [], []>} : vector<128x384xbf16>, vector<384x512xbf16>, vector<128x512xf32> -> vector<128x512xf32>
    %14 = vector.shape_cast %13 : vector<128x512xf32> to vector<8x16x512xf32>
    %c0_19 = arith.constant 0 : index
    %c0_20 = arith.constant 0 : index
    %15 = vector.load %arg3[%c0_19, %c0_20] : memref<1x512xf32, #tpu.memory_space<vmem>>, vector<1x512xf32>
    %16 = vector.shape_cast %15 : vector<1x512xf32> to vector<1x1x512xf32>
    %17 = vector.broadcast %16 : vector<1x1x512xf32> to vector<8x16x512xf32>
    %18 = arith.addf %14, %17 : vector<8x16x512xf32>
    %cst_21 = arith.constant 0.000000e+00 : f32
    %19 = vector.broadcast %cst_21 : f32 to vector<8x16x512xf32>
    %20 = arith.maximumf %18, %19 : vector<8x16x512xf32>
    %21 = arith.truncf %20 : vector<8x16x512xf32> to vector<8x16x512xbf16>
    %cst_22 = arith.constant 0.000000e+00 : bf16
    %22 = vector.broadcast %cst_22 : bf16 to vector<8x1x512xbf16>
    %c0_23 = arith.constant 0 : index
    %c0_24 = arith.constant 0 : index
    %c0_25 = arith.constant 0 : index
    %23 = vector.load %arg13[%c0_23, %c0_24, %c0_25] : memref<8x16x1536xbf16, #tpu.memory_space<vmem>>, vector<8x1x512xbf16>
    tpu.vector_store %arg13[%c0_23, %c0_24, %c0_25], %22 {strides = array<i32>} : memref<8x16x1536xbf16, #tpu.memory_space<vmem>>, vector<8x1x512xbf16>,
    %c0_26 = arith.constant 0 : index
    %c15_27 = arith.constant 15 : index
    %c1024 = arith.constant 1024 : index
    %24 = vector.load %arg13[%c0_26, %c15_27, %c1024] : memref<8x16x1536xbf16, #tpu.memory_space<vmem>>, vector<8x1x512xbf16>
    tpu.vector_store %arg13[%c0_26, %c15_27, %c1024], %22 {strides = array<i32>} : memref<8x16x1536xbf16, #tpu.memory_space<vmem>>, vector<8x1x512xbf16>,
    %25 = vector.extract_strided_slice %21 {offsets = [0, 0, 0], sizes = [8, 15, 512], strides = [1, 1, 1]} : vector<8x16x512xbf16> to vector<8x15x512xbf16>
    %c0_28 = arith.constant 0 : index
    %c1_29 = arith.constant 1 : index
    %c0_30 = arith.constant 0 : index
    %26 = vector.load %arg13[%c0_28, %c1_29, %c0_30] : memref<8x16x1536xbf16, #tpu.memory_space<vmem>>, vector<8x15x512xbf16>
    tpu.vector_store %arg13[%c0_28, %c1_29, %c0_30], %25 {strides = array<i32>} : memref<8x16x1536xbf16, #tpu.memory_space<vmem>>, vector<8x15x512xbf16>,
    %c0_31 = arith.constant 0 : index
    %c0_32 = arith.constant 0 : index
    %c512 = arith.constant 512 : index
    %27 = vector.load %arg13[%c0_31, %c0_32, %c512] : memref<8x16x1536xbf16, #tpu.memory_space<vmem>>, vector<8x16x512xbf16>
    tpu.vector_store %arg13[%c0_31, %c0_32, %c512], %21 {strides = array<i32>} : memref<8x16x1536xbf16, #tpu.memory_space<vmem>>, vector<8x16x512xbf16>,
    %28 = vector.extract_strided_slice %21 {offsets = [0, 1, 0], sizes = [8, 15, 512], strides = [1, 1, 1]} : vector<8x16x512xbf16> to vector<8x15x512xbf16>
    %c0_33 = arith.constant 0 : index
    %c0_34 = arith.constant 0 : index
    %c1024_35 = arith.constant 1024 : index
    %29 = vector.load %arg13[%c0_33, %c0_34, %c1024_35] : memref<8x16x1536xbf16, #tpu.memory_space<vmem>>, vector<8x15x512xbf16>
    tpu.vector_store %arg13[%c0_33, %c0_34, %c1024_35], %28 {strides = array<i32>} : memref<8x16x1536xbf16, #tpu.memory_space<vmem>>, vector<8x15x512xbf16>,
    %c0_36 = arith.constant 0 : index
    %c0_37 = arith.constant 0 : index
    %c0_38 = arith.constant 0 : index
    %30 = vector.load %arg13[%c0_36, %c0_37, %c0_38] : memref<8x16x1536xbf16, #tpu.memory_space<vmem>>, vector<8x16x1536xbf16>
    %31 = vector.shape_cast %30 : vector<8x16x1536xbf16> to vector<128x1536xbf16>
    %c0_39 = arith.constant 0 : index
    %c0_40 = arith.constant 0 : index
    %32 = vector.load %arg4[%c0_39, %c0_40] : memref<1536x512xbf16, #tpu.memory_space<vmem>>, vector<1536x512xbf16>
    %cst_41 = arith.constant dense<0.000000e+00> : vector<128x512xf32>
    %33 = tpu.matmul %31, %32, %cst_41 {dimension_numbers = #tpu.dot_dimension_numbers<[1], [0], [0], [1], [0, 0, 1, 1], [], []>} : vector<128x1536xbf16>, vector<1536x512xbf16>, vector<128x512xf32> -> vector<128x512xf32>
    %34 = vector.shape_cast %33 : vector<128x512xf32> to vector<8x16x512xf32>
    %c0_42 = arith.constant 0 : index
    %c0_43 = arith.constant 0 : index
    %35 = vector.load %arg5[%c0_42, %c0_43] : memref<1x512xf32, #tpu.memory_space<vmem>>, vector<1x512xf32>
    %36 = vector.shape_cast %35 : vector<1x512xf32> to vector<1x1x512xf32>
    %37 = vector.broadcast %36 : vector<1x1x512xf32> to vector<8x16x512xf32>
    %38 = arith.addf %34, %37 : vector<8x16x512xf32>
    %cst_44 = arith.constant 0.000000e+00 : f32
    %39 = vector.broadcast %cst_44 : f32 to vector<8x16x512xf32>
    %40 = arith.maximumf %38, %39 : vector<8x16x512xf32>
    %41 = arith.truncf %40 : vector<8x16x512xf32> to vector<8x16x512xbf16>
    %cst_45 = arith.constant 0.000000e+00 : bf16
    %42 = vector.broadcast %cst_45 : bf16 to vector<8x1x512xbf16>
    %c0_46 = arith.constant 0 : index
    %c0_47 = arith.constant 0 : index
    %c0_48 = arith.constant 0 : index
    %43 = vector.load %arg14[%c0_46, %c0_47, %c0_48] : memref<8x16x1536xbf16, #tpu.memory_space<vmem>>, vector<8x1x512xbf16>
    tpu.vector_store %arg14[%c0_46, %c0_47, %c0_48], %42 {strides = array<i32>} : memref<8x16x1536xbf16, #tpu.memory_space<vmem>>, vector<8x1x512xbf16>,
    %c0_49 = arith.constant 0 : index
    %c15_50 = arith.constant 15 : index
    %c1024_51 = arith.constant 1024 : index
    %44 = vector.load %arg14[%c0_49, %c15_50, %c1024_51] : memref<8x16x1536xbf16, #tpu.memory_space<vmem>>, vector<8x1x512xbf16>
    tpu.vector_store %arg14[%c0_49, %c15_50, %c1024_51], %42 {strides = array<i32>} : memref<8x16x1536xbf16, #tpu.memory_space<vmem>>, vector<8x1x512xbf16>,
    %45 = vector.extract_strided_slice %41 {offsets = [0, 0, 0], sizes = [8, 15, 512], strides = [1, 1, 1]} : vector<8x16x512xbf16> to vector<8x15x512xbf16>
    %c0_52 = arith.constant 0 : index
    %c1_53 = arith.constant 1 : index
    %c0_54 = arith.constant 0 : index
    %46 = vector.load %arg14[%c0_52, %c1_53, %c0_54] : memref<8x16x1536xbf16, #tpu.memory_space<vmem>>, vector<8x15x512xbf16>
    tpu.vector_store %arg14[%c0_52, %c1_53, %c0_54], %45 {strides = array<i32>} : memref<8x16x1536xbf16, #tpu.memory_space<vmem>>, vector<8x15x512xbf16>,
    %c0_55 = arith.constant 0 : index
    %c0_56 = arith.constant 0 : index
    %c512_57 = arith.constant 512 : index
    %47 = vector.load %arg14[%c0_55, %c0_56, %c512_57] : memref<8x16x1536xbf16, #tpu.memory_space<vmem>>, vector<8x16x512xbf16>
    tpu.vector_store %arg14[%c0_55, %c0_56, %c512_57], %41 {strides = array<i32>} : memref<8x16x1536xbf16, #tpu.memory_space<vmem>>, vector<8x16x512xbf16>,
    %48 = vector.extract_strided_slice %41 {offsets = [0, 1, 0], sizes = [8, 15, 512], strides = [1, 1, 1]} : vector<8x16x512xbf16> to vector<8x15x512xbf16>
    %c0_58 = arith.constant 0 : index
    %c0_59 = arith.constant 0 : index
    %c1024_60 = arith.constant 1024 : index
    %49 = vector.load %arg14[%c0_58, %c0_59, %c1024_60] : memref<8x16x1536xbf16, #tpu.memory_space<vmem>>, vector<8x15x512xbf16>
    tpu.vector_store %arg14[%c0_58, %c0_59, %c1024_60], %48 {strides = array<i32>} : memref<8x16x1536xbf16, #tpu.memory_space<vmem>>, vector<8x15x512xbf16>,
    %c0_61 = arith.constant 0 : index
    %c0_62 = arith.constant 0 : index
    %50 = vector.load %arg8[%c0_61, %c0_62] : memref<1x256xf32, #tpu.memory_space<vmem>>, vector<1x256xf32>
    %51 = vector.shape_cast %50 : vector<1x256xf32> to vector<1x1x256xf32>
    %c0_63 = arith.constant 0 : index
    %c0_64 = arith.constant 0 : index
    %c0_65 = arith.constant 0 : index
    %52 = vector.load %arg14[%c0_63, %c0_64, %c0_65] : memref<8x16x1536xbf16, #tpu.memory_space<vmem>>, vector<8x16x1024xbf16>
    %53 = vector.shape_cast %52 : vector<8x16x1024xbf16> to vector<128x1024xbf16>
    %c0_66 = arith.constant 0 : index
    %c0_67 = arith.constant 0 : index
    %54 = vector.load %arg6[%c0_66, %c0_67] : memref<1024x256xbf16, #tpu.memory_space<vmem>>, vector<1024x256xbf16>
    %cst_68 = arith.constant dense<0.000000e+00> : vector<128x256xf32>
    %55 = tpu.matmul %53, %54, %cst_68 {dimension_numbers = #tpu.dot_dimension_numbers<[1], [0], [0], [1], [0, 0, 1, 1], [], []>} : vector<128x1024xbf16>, vector<1024x256xbf16>, vector<128x256xf32> -> vector<128x256xf32>
    %56 = vector.shape_cast %55 : vector<128x256xf32> to vector<8x16x256xf32>
    %c0_69 = arith.constant 0 : index
    %c0_70 = arith.constant 0 : index
    %c512_71 = arith.constant 512 : index
    %57 = vector.load %arg14[%c0_69, %c0_70, %c512_71] : memref<8x16x1536xbf16, #tpu.memory_space<vmem>>, vector<8x16x1024xbf16>
    %58 = vector.shape_cast %57 : vector<8x16x1024xbf16> to vector<128x1024xbf16>
    %c0_72 = arith.constant 0 : index
    %c0_73 = arith.constant 0 : index
    %59 = vector.load %arg7[%c0_72, %c0_73] : memref<1024x256xbf16, #tpu.memory_space<vmem>>, vector<1024x256xbf16>
    %cst_74 = arith.constant dense<0.000000e+00> : vector<128x256xf32>
    %60 = tpu.matmul %58, %59, %cst_74 {dimension_numbers = #tpu.dot_dimension_numbers<[1], [0], [0], [1], [0, 0, 1, 1], [], []>} : vector<128x1024xbf16>, vector<1024x256xbf16>, vector<128x256xf32> -> vector<128x256xf32>
    %61 = vector.shape_cast %60 : vector<128x256xf32> to vector<8x16x256xf32>
    %62 = vector.broadcast %51 : vector<1x1x256xf32> to vector<8x16x256xf32>
    %63 = arith.addf %56, %62 : vector<8x16x256xf32>
    %64 = arith.negf %63 : vector<8x16x256xf32>
    %65 = math.exp %64 : vector<8x16x256xf32>
    %cst_75 = arith.constant 1.000000e+00 : f32
    %66 = vector.broadcast %cst_75 : f32 to vector<8x16x256xf32>
    %67 = arith.addf %66, %65 : vector<8x16x256xf32>
    %68 = arith.divf %66, %67 : vector<8x16x256xf32>
    %69 = arith.truncf %68 : vector<8x16x256xf32> to vector<8x16x256xbf16>
    %c0_76 = arith.constant 0 : index
    %c0_77 = arith.constant 0 : index
    %c0_78 = arith.constant 0 : index
    %70 = vector.load %arg15[%c0_76, %c0_77, %c0_78] : memref<8x32x256xbf16, #tpu.memory_space<vmem>>, vector<8x16x256xbf16>
    tpu.vector_store %arg15[%c0_76, %c0_77, %c0_78], %69 {strides = array<i32>} : memref<8x32x256xbf16, #tpu.memory_space<vmem>>, vector<8x16x256xbf16>,
    %71 = vector.broadcast %51 : vector<1x1x256xf32> to vector<8x16x256xf32>
    %72 = arith.addf %61, %71 : vector<8x16x256xf32>
    %73 = arith.negf %72 : vector<8x16x256xf32>
    %74 = math.exp %73 : vector<8x16x256xf32>
    %cst_79 = arith.constant 1.000000e+00 : f32
    %75 = vector.broadcast %cst_79 : f32 to vector<8x16x256xf32>
    %76 = arith.addf %75, %74 : vector<8x16x256xf32>
    %77 = arith.divf %75, %76 : vector<8x16x256xf32>
    %78 = arith.truncf %77 : vector<8x16x256xf32> to vector<8x16x256xbf16>
    %c0_80 = arith.constant 0 : index
    %c16 = arith.constant 16 : index
    %c0_81 = arith.constant 0 : index
    %79 = vector.load %arg15[%c0_80, %c16, %c0_81] : memref<8x32x256xbf16, #tpu.memory_space<vmem>>, vector<8x16x256xbf16>
    tpu.vector_store %arg15[%c0_80, %c16, %c0_81], %78 {strides = array<i32>} : memref<8x32x256xbf16, #tpu.memory_space<vmem>>, vector<8x16x256xbf16>,
    %c0_82 = arith.constant 0 : index
    %c0_83 = arith.constant 0 : index
    %c0_84 = arith.constant 0 : index
    %80 = vector.load %arg15[%c0_82, %c0_83, %c0_84] : memref<8x32x256xbf16, #tpu.memory_space<vmem>>, vector<8x32x256xbf16>
    %81 = vector.shape_cast %80 : vector<8x32x256xbf16> to vector<256x256xbf16>
    %c0_85 = arith.constant 0 : index
    %c0_86 = arith.constant 0 : index
    %82 = vector.load %arg9[%c0_85, %c0_86] : memref<256x512xbf16, #tpu.memory_space<vmem>>, vector<256x512xbf16>
    %cst_87 = arith.constant dense<0.000000e+00> : vector<256x512xf32>
    %83 = tpu.matmul %81, %82, %cst_87 {dimension_numbers = #tpu.dot_dimension_numbers<[1], [0], [0], [1], [0, 0, 1, 1], [], []>} : vector<256x256xbf16>, vector<256x512xbf16>, vector<256x512xf32> -> vector<256x512xf32>
    %84 = arith.truncf %83 : vector<256x512xf32> to vector<256x512xbf16>
    %85 = vector.shape_cast %84 : vector<256x512xbf16> to vector<8x32x512xbf16>
    %c0_88 = arith.constant 0 : index
    %c0_89 = arith.constant 0 : index
    %86 = vector.load %arg10[%c0_88, %c0_89] : memref<64x32xbf16, #tpu.memory_space<vmem>>, vector<64x32xbf16>
    %87 = vector.shape_cast %86 : vector<64x32xbf16> to vector<1x64x32xbf16>
    %88 = vector.shape_cast %87 : vector<1x64x32xbf16> to vector<1x64x32xbf16>
    %89 = vector.broadcast %88 : vector<1x64x32xbf16> to vector<8x64x32xbf16>
    %cst_90 = arith.constant dense<0.000000e+00> : vector<8x64x512xf32>
    %90 = tpu.matmul %89, %85, %cst_90 {dimension_numbers = #tpu.dot_dimension_numbers<[2], [1], [1], [2], [0, 0, 0, 1, 1, 2], [0], [0]>} : vector<8x64x32xbf16>, vector<8x32x512xbf16>, vector<8x64x512xf32> -> vector<8x64x512xf32>
    %c0_91 = arith.constant 0 : index
    %c0_92 = arith.constant 0 : index
    %c0_93 = arith.constant 0 : index
    %91 = vector.load %arg11[%c0_91, %c0_92, %c0_93] : memref<8x64x512xf32, #tpu.memory_space<vmem>>, vector<8x64x512xf32>
    tpu.vector_store %arg11[%c0_91, %c0_92, %c0_93], %90 {strides = array<i32>} : memref<8x64x512xf32, #tpu.memory_space<vmem>>, vector<8x64x512xf32>,
    return
  }
  func.func @transform_0(%arg0: i32) -> (i32, i32, i32) {
    %c0_i32 = arith.constant 0 : i32
    %c0_i32_0 = arith.constant 0 : i32
    %c0_i32_1 = arith.constant 0 : i32
    return %arg0, %c0_i32, %c0_i32_0 : i32, i32, i32
  }
  func.func @transform_1(%arg0: i32) -> (i32, i32) {
    %c0_i32 = arith.constant 0 : i32
    %c0_i32_0 = arith.constant 0 : i32
    %c0_i32_1 = arith.constant 0 : i32
    return %c0_i32, %c0_i32_0 : i32, i32
  }
  func.func @transform_2(%arg0: i32) -> (i32, i32) {
    %c0_i32 = arith.constant 0 : i32
    %c0_i32_0 = arith.constant 0 : i32
    %c0_i32_1 = arith.constant 0 : i32
    return %c0_i32, %c0_i32_0 : i32, i32
  }
  func.func @transform_3(%arg0: i32) -> (i32, i32) {
    %c0_i32 = arith.constant 0 : i32
    %c0_i32_0 = arith.constant 0 : i32
    %c0_i32_1 = arith.constant 0 : i32
    return %c0_i32, %c0_i32_0 : i32, i32
  }
  func.func @transform_4(%arg0: i32) -> (i32, i32) {
    %c0_i32 = arith.constant 0 : i32
    %c0_i32_0 = arith.constant 0 : i32
    %c0_i32_1 = arith.constant 0 : i32
    return %c0_i32, %c0_i32_0 : i32, i32
  }
  func.func @transform_5(%arg0: i32) -> (i32, i32) {
    %c0_i32 = arith.constant 0 : i32
    %c0_i32_0 = arith.constant 0 : i32
    %c0_i32_1 = arith.constant 0 : i32
    return %c0_i32, %c0_i32_0 : i32, i32
  }
  func.func @transform_6(%arg0: i32) -> (i32, i32) {
    %c0_i32 = arith.constant 0 : i32
    %c0_i32_0 = arith.constant 0 : i32
    %c0_i32_1 = arith.constant 0 : i32
    return %c0_i32, %c0_i32_0 : i32, i32
  }
  func.func @transform_7(%arg0: i32) -> (i32, i32) {
    %c0_i32 = arith.constant 0 : i32
    %c0_i32_0 = arith.constant 0 : i32
    %c0_i32_1 = arith.constant 0 : i32
    return %c0_i32, %c0_i32_0 : i32, i32
  }
  func.func @transform_8(%arg0: i32) -> (i32, i32) {
    %c0_i32 = arith.constant 0 : i32
    %c0_i32_0 = arith.constant 0 : i32
    %c0_i32_1 = arith.constant 0 : i32
    return %c0_i32, %c0_i32_0 : i32, i32
  }
  func.func @transform_9(%arg0: i32) -> (i32, i32) {
    %c0_i32 = arith.constant 0 : i32
    %c0_i32_0 = arith.constant 0 : i32
    %c0_i32_1 = arith.constant 0 : i32
    return %c0_i32, %c0_i32_0 : i32, i32
  }
  func.func @transform_10(%arg0: i32) -> (i32, i32, i32) {
    %c0_i32 = arith.constant 0 : i32
    %c0_i32_0 = arith.constant 0 : i32
    %c0_i32_1 = arith.constant 0 : i32
    return %arg0, %c0_i32, %c0_i32_0 : i32, i32, i32
  }
}

</mosaic_0001>

<bundles_post_ra>
// kernel: tpu_custom_call.1
= control target key start
LH: loop header
LB: loop body
LE: loop exit
PB: predicated region body
PF: predicated region fallthrough
CT: control target
= control target key end

     0   :  { %15 = vsyncpa [#allocation7], 0  ;;  %s18312_s0 = inlined_call_operand.hbm [shape: f32[8,16,128], index: 0, kind: input, shape index: {}]   ;;  %s18313_s1 = inlined_call_operand.hbm [shape: bf16[384,512], index: 1, kind: input, shape index: {}]   ;;  %s18314_s2 = inlined_call_operand.hbm [shape: f32[1,512], index: 2, kind: input, shape index: {}]   ;;  %s18315_s3 = inlined_call_operand.hbm [shape: bf16[1536,512], index: 3, kind: input, shape index: {}]   ;;  %s18316_s4 = inlined_call_operand.hbm [shape: f32[1,512], index: 4, kind: input, shape index: {}]   ;;  %s18317_s5 = inlined_call_operand.hbm [shape: bf16[1024,256], index: 5, kind: input, shape index: {}]   ;;  %s18318_s6 = inlined_call_operand.hbm [shape: bf16[1024,256], index: 6, kind: input, shape index: {}]   ;;  %s18319_s7 = inlined_call_operand.hbm [shape: f32[1,256], index: 7, kind: input, shape index: {}]   ;;  %s18320_s8 = inlined_call_operand.hbm [shape: bf16[256,512], index: 8, kind: input, shape index: {}]   ;;  %s18321_s9 = inlined_call_operand.vmem [shape: bf16[64,32], index: 9, kind: input, shape index: {}]   ;;  %s18322_s10 = inlined_call_operand.hbm [shape: f32[8,64,512], index: 10, kind: output, shape index: {}]  }
   0x1   :  { %16 = vsyncpa [#allocation10], 0 }
   0x2   :  { %17 = vsyncpa [#allocation13], 0 }
   0x3   :  { %18 = vsyncpa [#allocation16], 0 }
   0x4   :  { %19 = vsyncpa [#allocation19], 0 }
   0x5   :  { %20 = vsyncpa [#allocation8], 0  ;;  %s15749_s13 = smov [#allocation9]   ;;  %s15517_s17 = scalar_lea.hbm %s18313_s1, 12288 }
   0x6   :  { %s38_s14 = sshll.u32 %s15749_s13, 4  ;;  %p15518_p0 = scmp.ne.s32.totalorder %s18313_s1, %s15517_s17  ;;  %s39_s14 = int_to_ptr.vmem [resolvable:$true] %s38_s14 }
   0x7   :  { %p15521_p1 = scmp.lt.u32.totalorder %s15517_s17, %s18313_s1 }
   0x9   :  { %p15523_p2 = pnand %p15521_p1, %p15518_p0 }
   0xb   :  { %15526 = shalt.err (!%p15523_p2)
}
   0xc   :  { %s15527_s22 = scalar_lea.vmem %s39_s14, 12288  ;;  %p15532_p4 = scmp.lt.s32.totalorder %s39_s14, %s39_s14 }
   0xd   :  { %p15528_p3 = scmp.ne.s32.totalorder %s39_s14, %s15527_s22  ;;  %p15533_p5 = scmp.lt.s32.totalorder %s15527_s22, %s15527_s22 }
   0xf   :  { %p15534_p6 = por %p15533_p5, %p15532_p4 }
  0x11   :  { %p15535_p7 = pnand %p15534_p6, %p15528_p3 }
  0x13   :  { %15538 = shalt.err (!%p15535_p7)
}
  0x14   :  { %s15750_s23 = smov 256   ;;  %s15751_s24 = smov 16  }
  0x15   :  { %44 = dma.hbm_to_vmem [thread:$0]  %s18313_s1, 12288, %s39_s14, [#allocation10], %s15750_s23, %s15750_s23, %s15751_s24  }
  0x16   :  { %s15752_s27 = smov [#allocation12]   ;;  %s15539_s11 = scalar_lea.hbm %s18315_s3, 49152 }
  0x17   :  { %s60_s28 = sshll.u32 %s15752_s27, 4  ;;  %p15540_p8 = scmp.ne.s32.totalorder %s18315_s3, %s15539_s11  ;;  %s61_s28 = int_to_ptr.vmem [resolvable:$true] %s60_s28 }
  0x18   :  { %p15543_p9 = scmp.lt.u32.totalorder %s15539_s11, %s18315_s3 }
  0x1a   :  { %p15545_p10 = pnand %p15543_p9, %p15540_p8 }
  0x1c   :  { %15548 = shalt.err (!%p15545_p10)
}
  0x1d   :  { %s15549_s17 = scalar_lea.vmem %s61_s28, 49152  ;;  %p15554_p12 = scmp.lt.s32.totalorder %s61_s28, %s61_s28 }
  0x1e   :  { %p15550_p11 = scmp.ne.s32.totalorder %s61_s28, %s15549_s17  ;;  %p15555_p13 = scmp.lt.s32.totalorder %s15549_s17, %s15549_s17 }
  0x20   :  { %p15556_p0 = por %p15555_p13, %p15554_p12 }
  0x22   :  { %p15557_p1 = pnand %p15556_p0, %p15550_p11 }
  0x24   :  { %15560 = shalt.err (!%p15557_p1)
}
  0x25   :  { %66 = dma.hbm_to_vmem [thread:$0]  %s18315_s3, 49152, %s61_s28, [#allocation13], %s15750_s23, %s15750_s23, %s15751_s24  }
  0x26   :  { %s15753_s18 = smov [#allocation15]   ;;  %s15754_s20 = smov [#allocation18]  }
  0x27   :  { %s82_s19 = sshll.u32 %s15753_s18, 4  ;;  %s107_s21 = sshll.u32 %s15754_s20, 4  ;;  %s83_s19 = int_to_ptr.vmem [resolvable:$true] %s82_s19  ;;  %s108_s21 = int_to_ptr.vmem [resolvable:$true] %s107_s21 }
  0x28   :  { %s15561_s26 = scalar_lea.hbm %s18317_s5, 16384 }
  0x29   :  { %p15562_p2 = scmp.ne.s32.totalorder %s18317_s5, %s15561_s26  ;;  %p15565_p3 = scmp.lt.u32.totalorder %s15561_s26, %s18317_s5 }
  0x2b   :  { %p15567_p4 = pnand %p15565_p3, %p15562_p2 }
  0x2d   :  { %15570 = shalt.err (!%p15567_p4)
}
  0x2e   :  { %s15571_s3 = scalar_lea.vmem %s83_s19, 16384  ;;  %p15576_p6 = scmp.lt.s32.totalorder %s83_s19, %s83_s19 }
  0x2f   :  { %p15572_p5 = scmp.ne.s32.totalorder %s83_s19, %s15571_s3  ;;  %p15577_p7 = scmp.lt.s32.totalorder %s15571_s3, %s15571_s3 }
  0x31   :  { %p15578_p8 = por %p15577_p7, %p15576_p6 }
  0x33   :  { %p15579_p9 = pnand %p15578_p8, %p15572_p5 }
  0x35   :  { %15582 = shalt.err (!%p15579_p9)
}
  0x36   :  { %s15755_s28 = smov 128   ;;  %s15756_s12 = smov 8  }
  0x37   :  { %88 = dma.hbm_to_vmem [thread:$0]  %s18317_s5, 16384, %s83_s19, [#allocation16], %s15755_s28, %s15755_s28, %s15756_s12  }
  0x38   :  { %s15583_s1 = scalar_lea.hbm %s18319_s7, 32 }
  0x39   :  { %p15584_p10 = scmp.ne.s32.totalorder %s18319_s7, %s15583_s1  ;;  %p15587_p11 = scmp.lt.u32.totalorder %s15583_s1, %s18319_s7 }
  0x3b   :  { %p15589_p12 = pnand %p15587_p11, %p15584_p10 }
  0x3d   :  { %15592 = shalt.err (!%p15589_p12)
}
  0x3e   :  { %s15593_s25 = scalar_lea.vmem %s108_s21, 32  ;;  %p15598_p0 = scmp.lt.s32.totalorder %s108_s21, %s108_s21 }
  0x3f   :  { %p15594_p13 = scmp.ne.s32.totalorder %s108_s21, %s15593_s25  ;;  %p15599_p1 = scmp.lt.s32.totalorder %s15593_s25, %s15593_s25 }
  0x41   :  { %p15600_p2 = por %p15599_p1, %p15598_p0 }
  0x43   :  { %p15601_p3 = pnand %p15600_p2, %p15594_p13 }
  0x45   :  { %15604 = shalt.err (!%p15601_p3)
}
  0x46   :  { %110 = dma.hbm_to_vmem [thread:$0]  %s18319_s7, 32, %s108_s21, [#allocation19]  }
  0x47   :  { %s15757_s26 = smov [#allocation6]   ;;  %s15758_s29 = smov [#allocation11]  }
  0x48   :  { %s26_s27 = sshll.u32 %s15757_s26, 4  ;;  %s51_s30 = sshll.u32 %s15758_s29, 4  ;;  %s27_s27 = int_to_ptr.vmem [resolvable:$true] %s26_s27  ;;  %s52_s30 = int_to_ptr.vmem [resolvable:$true] %s51_s30 }
  0x49   :  { %s15605_s13 = scalar_lea.hbm %s18312_s0, 2048 }
  0x4a   :  { %p15606_p4 = scmp.ne.s32.totalorder %s18312_s0, %s15605_s13  ;;  %p15609_p5 = scmp.lt.u32.totalorder %s15605_s13, %s18312_s0 }
  0x4c   :  { %p15611_p6 = pnand %p15609_p5, %p15606_p4 }
  0x4e   :  { %15614 = shalt.err (!%p15611_p6)
}
  0x4f   :  { %s15615_s7 = scalar_lea.vmem %s27_s27, 2048  ;;  %p15620_p8 = scmp.lt.s32.totalorder %s27_s27, %s27_s27 }
  0x50   :  { %p15616_p7 = scmp.ne.s32.totalorder %s27_s27, %s15615_s7  ;;  %p15621_p9 = scmp.lt.s32.totalorder %s15615_s7, %s15615_s7 }
  0x52   :  { %p15622_p10 = por %p15621_p9, %p15620_p8 }
  0x54   :  { %p15623_p11 = pnand %p15622_p10, %p15616_p7 }
  0x56   :  { %15626 = shalt.err (!%p15623_p11)
}
  0x57   :  { %32 = dma.hbm_to_vmem [thread:$0]  %s18312_s0, 2048, %s27_s27, [#allocation7], %s15755_s28, %s15755_s28, %s15756_s12  }
  0x58   :  { %s15627_s22 = scalar_lea.hbm %s18314_s2, 64 }
  0x59   :  { %p15628_p12 = scmp.ne.s32.totalorder %s18314_s2, %s15627_s22  ;;  %p15631_p13 = scmp.lt.u32.totalorder %s15627_s22, %s18314_s2 }
  0x5b   :  { %p15633_p0 = pnand %p15631_p13, %p15628_p12 }
  0x5d   :  { %15636 = shalt.err (!%p15633_p0)
}
  0x5e   :  { %s15637_s29 = scalar_lea.vmem %s52_s30, 64  ;;  %p15642_p2 = scmp.lt.s32.totalorder %s52_s30, %s52_s30 }
  0x5f   :  { %p15638_p1 = scmp.ne.s32.totalorder %s52_s30, %s15637_s29  ;;  %p15643_p3 = scmp.lt.s32.totalorder %s15637_s29, %s15637_s29 }
  0x61   :  { %p15644_p4 = por %p15643_p3, %p15642_p2 }
  0x63   :  { %p15645_p5 = pnand %p15644_p4, %p15638_p1 }
  0x65   :  { %15648 = shalt.err (!%p15645_p5)
}
  0x66   :  { %54 = dma.hbm_to_vmem [thread:$0]  %s18314_s2, 64, %s52_s30, [#allocation10]  }
  0x67   :  { %s15759_s11 = smov [#allocation14]   ;;  %s15760_s13 = smov [#allocation17]  }
  0x68   :  { %s73_s3 = sshll.u32 %s15759_s11, 4  ;;  %s94_s15 = sshll.u32 %s15760_s13, 4  ;;  %s74_s3 = int_to_ptr.vmem [resolvable:$true] %s73_s3  ;;  %s15905_s15 = int_to_ptr.vmem [resolvable:$true] %s94_s15 }
  0x69   :  { %s15649_s1 = scalar_lea.hbm %s18316_s4, 64 }
  0x6a   :  { %p15650_p6 = scmp.ne.s32.totalorder %s18316_s4, %s15649_s1  ;;  %p15653_p7 = scmp.lt.u32.totalorder %s15649_s1, %s18316_s4 }
  0x6c   :  { %p15655_p8 = pnand %p15653_p7, %p15650_p6 }
  0x6e   :  { %15658 = shalt.err (!%p15655_p8)
}
  0x6f   :  { %s15659_s2 = scalar_lea.vmem %s74_s3, 64  ;;  %p15664_p10 = scmp.lt.s32.totalorder %s74_s3, %s74_s3 }
  0x70   :  { %p15660_p9 = scmp.ne.s32.totalorder %s74_s3, %s15659_s2  ;;  %p15665_p11 = scmp.lt.s32.totalorder %s15659_s2, %s15659_s2 }
  0x72   :  { %p15666_p12 = por %p15665_p11, %p15664_p10 }
  0x74   :  { %p15667_p13 = pnand %p15666_p12, %p15660_p9 }
  0x76   :  { %15670 = shalt.err (!%p15667_p13)
}
  0x77   :  { %76 = dma.hbm_to_vmem [thread:$0]  %s18316_s4, 64, %s74_s3, [#allocation13]  }
  0x78   :  { %s15671_s5 = scalar_lea.hbm %s18318_s6, 16384 }
  0x79   :  { %p15672_p0 = scmp.ne.s32.totalorder %s18318_s6, %s15671_s5  ;;  %p15675_p1 = scmp.lt.u32.totalorder %s15671_s5, %s18318_s6 }
  0x7b   :  { %p15677_p2 = pnand %p15675_p1, %p15672_p0 }
  0x7d   :  { %15680 = shalt.err (!%p15677_p2)
}
  0x7e   :  { %s15681_s27 = scalar_lea.vmem %s15905_s15, 16384  ;;  %p15686_p4 = scmp.lt.s32.totalorder %s15905_s15, %s15905_s15 }
  0x7f   :  { %p15682_p3 = scmp.ne.s32.totalorder %s15905_s15, %s15681_s27  ;;  %p15687_p5 = scmp.lt.s32.totalorder %s15681_s27, %s15681_s27 }
  0x81   :  { %p15688_p6 = por %p15687_p5, %p15686_p4 }
  0x83   :  { %p15689_p7 = pnand %p15688_p6, %p15682_p3 }
  0x85   :  { %15692 = shalt.err (!%p15689_p7)
}
  0x86   :  { %100 = dma.hbm_to_vmem [thread:$0]  %s18318_s6, 16384, %s15905_s15, [#allocation16], %s15755_s28, %s15755_s28, %s15756_s12  }
  0x87   :  { %s15761_s3 = smov [#allocation20]   ;;  %s15693_s1 = scalar_lea.hbm %s18320_s8, 8192 }
  0x88   :  { %s116_s13 = sshll.u32 %s15761_s3, 4  ;;  %p15694_p8 = scmp.ne.s32.totalorder %s18320_s8, %s15693_s1  ;;  %s117_s13 = int_to_ptr.vmem [resolvable:$true] %s116_s13 }
  0x89   :  { %p15697_p9 = scmp.lt.u32.totalorder %s15693_s1, %s18320_s8 }
  0x8b   :  { %p15699_p10 = pnand %p15697_p9, %p15694_p8 }
  0x8d   :  { %15702 = shalt.err (!%p15699_p10)
}
  0x8e   :  { %s15703_s2 = scalar_lea.vmem %s117_s13, 8192  ;;  %p15708_p12 = scmp.lt.s32.totalorder %s117_s13, %s117_s13 }
  0x8f   :  { %p15704_p11 = scmp.ne.s32.totalorder %s117_s13, %s15703_s2  ;;  %p15709_p13 = scmp.lt.s32.totalorder %s15703_s2, %s15703_s2 }
  0x91   :  { %p15710_p0 = por %p15709_p13, %p15708_p12 }
  0x93   :  { %p15711_p1 = pnand %p15710_p0, %p15704_p11 }
  0x95   :  { %15714 = shalt.err (!%p15711_p1)
}
  0x96   :  { %122 = dma.hbm_to_vmem [thread:$0]  %s18320_s8, 8192, %s117_s13, [#allocation19], %s15750_s23, %s15750_s23, %s15751_s24  }
  0x97   :  { %15737 = dma.done.wait [#allocation7], 2048  }
  0x98   :  { %15738 = vsyncadd [#allocation7], 4294965248 }
  0x99   :  { %15739 = dma.done.wait [#allocation10], 12352  }
  0x9a   :  { %15740 = vsyncadd [#allocation10], 4294954944 }
  0x9b   :  { %15741 = dma.done.wait [#allocation13], 49216  }
  0x9c   :  { %15742 = vsyncadd [#allocation13], 4294918080 }
  0x9d   :  { %15743 = dma.done.wait [#allocation16], 32768  }
  0x9e   :  { %15744 = vsyncadd [#allocation16], 4294934528 }
  0x9f   :  { %15745 = dma.done.wait [#allocation19], 8224  }
  0xa0   :  { %15746 = vsyncadd [#allocation19], 4294959072  ;;  %v14057_v0 = vld [vmem:[#allocation9 + $0x4] ss:$16 sps:$4 sm:$0xff]   ;;  %v14059_v1 = vld [vmem:[#allocation9 + $0xc] ss:$16 sps:$4 sm:$0xff]  }
  0xa1   :  { %980 = vmatprep.subr.bf16.mxu0 %v14057_v0  ;;  %v14061_v2 = vld [vmem:[#allocation9] ss:$16 sps:$4 sm:$0xff]   ;;  %v14062_v3 = vld [vmem:[#allocation9 + $0x8] ss:$16 sps:$4 sm:$0xff]   ;;  %1206 = vmatprep.subr.bf16.mxu1 %v14059_v1  ;;  %v14063_v4 = vld [vmem:[#allocation9 + $0x24] ss:$16 sps:$4 sm:$0xff]  }
  0xa2   :  { %981 = vmatpush1.bf16.msra.mxu0 %v14061_v2  ;;  %1207 = vmatpush1.bf16.msra.mxu1 %v14062_v3  ;;  %v14065_v5 = vld [vmem:[#allocation9 + $0x2c] ss:$16 sps:$4 sm:$0xff]   ;;  %v14067_v6 = vld [vmem:[#allocation9 + $0x20] ss:$16 sps:$4 sm:$0xff]   ;;  %v14068_v7 = vld [vmem:[#allocation9 + $0x28] ss:$16 sps:$4 sm:$0xff]  }
  0xa3   :  { %982 = vmatprep.subr.bf16.mxu0 %v14063_v4  ;;  %1208 = vmatprep.subr.bf16.mxu1 %v14065_v5  ;;  %v14069_v8 = vld [vmem:[#allocation9 + $0x44] ss:$16 sps:$4 sm:$0xff]   ;;  %v14071_v9 = vld [vmem:[#allocation9 + $0x4c] ss:$16 sps:$4 sm:$0xff]   ;;  %v14073_v10 = vld [vmem:[#allocation9 + $0x40] ss:$16 sps:$4 sm:$0xff]  }
  0xa4   :  { %v14074_v11 = vld [vmem:[#allocation9 + $0x48] ss:$16 sps:$4 sm:$0xff]   ;;  %v14075_v12 = vld [vmem:[#allocation9 + $0x64] ss:$16 sps:$4 sm:$0xff]   ;;  %v14077_v13 = vld [vmem:[#allocation9 + $0x6c] ss:$16 sps:$4 sm:$0xff]  }
  0xa5   :  { %v14079_v14 = vld [vmem:[#allocation9 + $0x60] ss:$16 sps:$4 sm:$0xff]   ;;  %v14080_v15 = vld [vmem:[#allocation9 + $0x68] ss:$16 sps:$4 sm:$0xff]   ;;  %v14081_v16 = vld [vmem:[#allocation9 + $0x84] ss:$16 sps:$4 sm:$0xff]  }
  0xa6   :  { %983 = vmatpush1.bf16.msra.mxu0 %v14067_v6  ;;  %1209 = vmatpush1.bf16.msra.mxu1 %v14068_v7  ;;  %v14083_v17 = vld [vmem:[#allocation9 + $0x8c] ss:$16 sps:$4 sm:$0xff]   ;;  %v14085_v18 = vld [vmem:[#allocation9 + $0x80] ss:$16 sps:$4 sm:$0xff]   ;;  %v14086_v19 = vld [vmem:[#allocation9 + $0x88] ss:$16 sps:$4 sm:$0xff]  }
  0xa7   :  { %984 = vmatprep.subr.bf16.mxu0 %v14069_v8  ;;  %1210 = vmatprep.subr.bf16.mxu1 %v14071_v9  ;;  %v14087_v20 = vld [vmem:[#allocation9 + $0xa4] ss:$16 sps:$4 sm:$0xff]   ;;  %v14089_v21 = vld [vmem:[#allocation9 + $0xac] ss:$16 sps:$4 sm:$0xff]   ;;  %v14091_v22 = vld [vmem:[#allocation9 + $0xa0] ss:$16 sps:$4 sm:$0xff]  }
  0xa8   :  { %v14092_v23 = vld [vmem:[#allocation9 + $0xa8] ss:$16 sps:$4 sm:$0xff]   ;;  %v14093_v24 = vld [vmem:[#allocation9 + $0xc4] ss:$16 sps:$4 sm:$0xff]   ;;  %v14095_v25 = vld [vmem:[#allocation9 + $0xcc] ss:$16 sps:$4 sm:$0xff]  }
  0xa9   :  { %v14097_v26 = vld [vmem:[#allocation9 + $0xc0] ss:$16 sps:$4 sm:$0xff]   ;;  %v14098_v27 = vld [vmem:[#allocation9 + $0xc8] ss:$16 sps:$4 sm:$0xff]   ;;  %v14099_v28 = vld [vmem:[#allocation9 + $0xe4] ss:$16 sps:$4 sm:$0xff]  }
  0xaa   :  { %985 = vmatpush1.bf16.msra.mxu0 %v14073_v10  ;;  %1211 = vmatpush1.bf16.msra.mxu1 %v14074_v11  ;;  %v14101_v29 = vld [vmem:[#allocation9 + $0xec] ss:$16 sps:$4 sm:$0xff]   ;;  %v14103_v30 = vld [vmem:[#allocation9 + $0xe0] ss:$16 sps:$4 sm:$0xff]   ;;  %v14104_v31 = vld [vmem:[#allocation9 + $0xe8] ss:$16 sps:$4 sm:$0xff]  }
  0xab   :  { %986 = vmatprep.subr.bf16.mxu0 %v14075_v12  ;;  %1212 = vmatprep.subr.bf16.mxu1 %v14077_v13  ;;  %v14105_v32 = vld [vmem:[#allocation9 + $0x104] ss:$16 sps:$4 sm:$0xff]   ;;  %v14107_v33 = vld [vmem:[#allocation9 + $0x10c] ss:$16 sps:$4 sm:$0xff]   ;;  %v14109_v34 = vld [vmem:[#allocation9 + $0x100] ss:$16 sps:$4 sm:$0xff]  }
  0xac   :  { %v14110_v35 = vld [vmem:[#allocation9 + $0x108] ss:$16 sps:$4 sm:$0xff]   ;;  %v14111_v36 = vld [vmem:[#allocation9 + $0x124] ss:$16 sps:$4 sm:$0xff]   ;;  %v14113_v37 = vld [vmem:[#allocation9 + $0x12c] ss:$16 sps:$4 sm:$0xff]  }
  0xad   :  { %v14115_v38 = vld [vmem:[#allocation9 + $0x120] ss:$16 sps:$4 sm:$0xff]   ;;  %vm178_vm0 = vsmask.f32 256  ;;  %v14116_v39 = vld [vmem:[#allocation9 + $0x128] ss:$16 sps:$4 sm:$0xff]  }
  0xae   :  { %987 = vmatpush1.bf16.msra.mxu0 %v14079_v14  ;;  %1213 = vmatpush1.bf16.msra.mxu1 %v14080_v15  ;;  %v14117_v40 = vld [vmem:[#allocation9 + $0x144] ss:$16 sps:$4 sm:$0xff]   ;;  %vm177_vm1 = vcmask 1040384   ;;  %v14119_v41 = vld [vmem:[#allocation9 + $0x14c] ss:$16 sps:$4 sm:$0xff]   ;;  %v18337_v44 = vmov 0 }
  0xaf   :  { %988 = vmatprep.subr.bf16.mxu0 %v14081_v16  ;;  %1214 = vmatprep.subr.bf16.mxu1 %v14083_v17  ;;  %v14121_v42 = vld [vmem:[#allocation9 + $0x140] ss:$16 sps:$4 sm:$0xff]   ;;  %v14122_v43 = vld [vmem:[#allocation9 + $0x148] ss:$16 sps:$4 sm:$0xff]   ;;  %vm15954_vm2 = vmand %vm177_vm1, %vm178_vm0  ;;  %vm296_vm3 = vsmask.f32 7938 }
  0xb0   :  { %v18338_v44 = vsel %vm15954_vm2, 4294967295, %v18337_v44  ;;  %v14123_v45 = vld [vmem:[#allocation9 + $0x164] ss:$16 sps:$4 sm:$0xff]   ;;  %v14125_v46 = vld [vmem:[#allocation9 + $0x16c] ss:$16 sps:$4 sm:$0xff]   ;;  %vm295_vm4 = vcmask 1047552  }
  0xb1   :  { %18339 = vst [vmem:[#allocation28_spill] sm:$0xff] %v18338_v44  ;;  %v14127_v47 = vld [vmem:[#allocation9 + $0x160] ss:$16 sps:$4 sm:$0xff]   ;;  %v14128_v48 = vld [vmem:[#allocation9 + $0x168] ss:$16 sps:$4 sm:$0xff]   ;;  %vm15992_vm5 = vmand %vm295_vm4, %vm296_vm3  ;;  %vm204_vm7 = vcmask 1047559  }
  0xb2   :  { %989 = vmatpush1.bf16.msra.mxu0 %v14085_v18  ;;  %1215 = vmatpush1.bf16.msra.mxu1 %v14086_v19  ;;  %v153_v49 = vld [vmem:[#allocation6] sm:$0xff]  ;;  %v14131_v51 = vld [vmem:[#allocation9 + $0x18c] ss:$16 sps:$4 sm:$0xff]   ;;  %v155_v54 = vld [vmem:[#allocation6 + $0x10] sm:$0xff]  ;;  %vm205_vm6 = vsmask.f32 7966 }
  0xb3   :  { %990 = vmatprep.subr.bf16.mxu0 %v14087_v20  ;;  %1216 = vmatprep.subr.bf16.mxu1 %v14089_v21  ;;  %v14129_v50 = vld [vmem:[#allocation9 + $0x184] ss:$16 sps:$4 sm:$0xff]   ;;  %v154_v52 = vld [vmem:[#allocation6 + $0x8] sm:$0xff]  ;;  %v180_v53 = vld [vmem:[#allocation2] sm:$0x1]  ;;  %vm11074_vm11 = vcmask 261120  }
  0xb4   :  { %v15958_v55 = vpack.c.bf16 %v154_v52, %v153_v49  ;;  %v181_v56 = vsel %vm15954_vm2, 0, %v180_v53  ;;  %v156_v57 = vld [vmem:[#allocation6 + $0x18] sm:$0xff]  ;;  %v157_v59 = vld [vmem:[#allocation6 + $0x20] sm:$0xff]  ;;  %v158_v62 = vld [vmem:[#allocation6 + $0x28] sm:$0xff]  ;;  %vm354_vm8 = vsmask.f32 7424 }
  0xb5   :  { %v183_v58 = vld [vmem:[#allocation2 + $0x18] sm:$0x1]  ;;  %182 = vst [vmem:[#allocation2] sm:$0x1] %v181_v56  ;;  %v15962_v60 = vpack.c.bf16 %v156_v57, %v155_v54  ;;  %v186_v63 = vld [vmem:[#allocation2 + $0x30] sm:$0x1]  ;;  %v15970_v5 = vpack.c.bf16 %v158_v62, %v157_v59  ;;  %vm16103_vm9 = vmand %vm204_vm7, %vm205_vm6 }
  0xb6   :  { %991 = vmatpush1.bf16.msra.mxu0 %v14091_v22  ;;  %1217 = vmatpush1.bf16.msra.mxu1 %v14092_v23  ;;  %v184_v61 = vsel %vm15954_vm2, 0, %v183_v58  ;;  %v159_v0 = vld [vmem:[#allocation6 + $0x30] sm:$0xff]  ;;  %v14134_v2 = vld [vmem:[#allocation9 + $0x188] ss:$16 sps:$4 sm:$0xff]   ;;  %v232_v3 = vshrl.u32 %v15958_v55, 16  ;;  %v235_v4 = vshll.u32 %v15958_v55, 16  ;;  %vm16143_vm10 = vmand %vm295_vm4, %vm354_vm8 }
  0xb7   :  { %992 = vmatprep.subr.bf16.mxu0 %v14093_v24  ;;  %1218 = vmatprep.subr.bf16.mxu1 %v14095_v25  ;;  %v14133_v1 = vld [vmem:[#allocation9 + $0x180] ss:$16 sps:$4 sm:$0xff]   ;;  %185 = vst [vmem:[#allocation2 + $0x18] sm:$0x1] %v184_v61  ;;  %v187_v6 = vsel %vm15954_vm2, 0, %v186_v63  ;;  %v160_v7 = vld [vmem:[#allocation6 + $0x38] sm:$0xff] }
  0xb8   :  { %1012 = vmatprep.mubr.bf16.mxu0 %v15958_v55  ;;  %1238 = vmatprep.mubr.bf16.mxu1 %v15958_v55  ;;  %v189_v8 = vld [vmem:[#allocation2 + $0x48] sm:$0x1]  ;;  %v14135_v9 = vld [vmem:[#allocation9 + $0x1a4] ss:$16 sps:$4 sm:$0xff]   ;;  %v14137_v10 = vld [vmem:[#allocation9 + $0x1ac] ss:$16 sps:$4 sm:$0xff]   ;;  %v15976_v13 = vpack.c.bf16 %v160_v7, %v159_v0 }
  0xb9   :  { %v239_v11 = vshrl.u32 %v15962_v60, 16  ;;  %v242_v12 = vshll.u32 %v15962_v60, 16  ;;  %188 = vst [vmem:[#allocation2 + $0x30] sm:$0x1] %v187_v6  ;;  %v190_v14 = vsel %vm15954_vm2, 0, %v189_v8  ;;  %v161_v15 = vld [vmem:[#allocation6 + $0x40] sm:$0xff] }
  0xba   :  { %993 = vmatpush1.bf16.msra.mxu0 %v14097_v26  ;;  %1219 = vmatpush1.bf16.msra.mxu1 %v14098_v27  ;;  %v234_v16 = vrot.slane %v232_v3, 7  ;;  %v246_v17 = vshrl.u32 %v15970_v5, 16  ;;  %v249_v18 = vshll.u32 %v15970_v5, 16  ;;  %191 = vst [vmem:[#allocation2 + $0x48] sm:$0x1] %v190_v14  ;;  %v162_v19 = vld [vmem:[#allocation6 + $0x48] sm:$0xff] }
  0xbb   :  { %994 = vmatprep.subr.bf16.mxu0 %v14099_v28  ;;  %1220 = vmatprep.subr.bf16.mxu1 %v14101_v29  ;;  %v192_v20 = vld [vmem:[#allocation2 + $0x60] sm:$0x1]  ;;  %v241_v21 = vrot.slane %v239_v11, 7  ;;  %v253_v22 = vshrl.u32 %v15976_v13, 16  ;;  %v256_v23 = vshll.u32 %v15976_v13, 16  ;;  %v164_v53 = vld [vmem:[#allocation6 + $0x58] sm:$0xff] }
  0xbc   :  { %v14139_v24 = vld [vmem:[#allocation9 + $0x1a0] ss:$16 sps:$4 sm:$0xff]   ;;  %v237_v25 = vor.u32 %v235_v4, %v234_v16  ;;  %v248_v27 = vrot.slane %v246_v17, 7  ;;  %v14140_v28 = vld [vmem:[#allocation9 + $0x1a8] ss:$16 sps:$4 sm:$0xff]  }
  0xbd   :  { %v244_v29 = vor.u32 %v242_v12, %v241_v21  ;;  %v195_v54 = vld [vmem:[#allocation2 + $0x78] sm:$0x1]  ;;  %v14149_v56 = vld [vmem:[#allocation9 + $0x1ec] ss:$16 sps:$4 sm:$0xff]   ;;  %v14151_v61 = vld [vmem:[#allocation9 + $0x1e0] ss:$16 sps:$4 sm:$0xff]  }
  0xbe   :  { %995 = vmatpush1.bf16.msra.mxu0 %v14103_v30  ;;  %1221 = vmatpush1.bf16.msra.mxu1 %v14104_v31  ;;  %v255_v30 = vrot.slane %v253_v22, 7  ;;  %v16002_v31 = vpack.c.bf16 %v162_v19, %v161_v15  ;;  %v196_v59 = vsel %vm15954_vm2, 0, %v195_v54  ;;  %v14152_v62 = vld [vmem:[#allocation9 + $0x1e8] ss:$16 sps:$4 sm:$0xff]   ;;  %v14155_v6 = vld [vmem:[#allocation9 + $0x204] ss:$16 sps:$4 sm:$0xff]  }
  0xbf   :  { %996 = vmatprep.subr.bf16.mxu0 %v14105_v32  ;;  %1222 = vmatprep.subr.bf16.mxu1 %v14107_v33  ;;  %v14141_v32 = vld [vmem:[#allocation9 + $0x1c4] ss:$16 sps:$4 sm:$0xff]   ;;  %197 = vst [vmem:[#allocation2 + $0x78] sm:$0x1] %v196_v59  ;;  %v14158_v7 = vld [vmem:[#allocation9 + $0x20c] ss:$16 sps:$4 sm:$0xff]  }
  0xc0   :  { %v298_v33 = vld [vmem:[#allocation2] sm:$0xff]  ;;  %v166_v15 = vld [vmem:[#allocation6 + $0x68] sm:$0xff]  ;;  %v198_v19 = vld [vmem:[#allocation2 + $0x90] sm:$0x1] }
  0xc1   :  { %v165_v14 = vld [vmem:[#allocation6 + $0x60] sm:$0xff]  ;;  %v14176_v59 = vld [vmem:[#allocation9 + $0x26c] ss:$16 sps:$4 sm:$0xff]  }
  0xc2   :  { %997 = vmatpush1.bf16.msra.mxu0 %v14109_v34  ;;  %1223 = vmatpush1.bf16.msra.mxu1 %v14110_v35  ;;  %v251_v34 = vor.u32 %v249_v18, %v248_v27  ;;  %v193_v35 = vsel %vm15954_vm2, 0, %v192_v20  ;;  %v16051_v16 = vpack.c.bf16 %v166_v15, %v165_v14  ;;  %v14156_v20 = vld [vmem:[#allocation9 + $0x208] ss:$16 sps:$4 sm:$0xff]   ;;  %v14161_v21 = vld [vmem:[#allocation9 + $0x224] ss:$16 sps:$4 sm:$0xff]  }
  0xc3   :  { %998 = vmatprep.subr.bf16.mxu0 %v14111_v36  ;;  %1224 = vmatprep.subr.bf16.mxu1 %v14113_v37  ;;  %v14143_v36 = vld [vmem:[#allocation9 + $0x1cc] ss:$16 sps:$4 sm:$0xff]   ;;  %v16010_v37 = vsel %vm15992_vm5, %v237_v25, %v298_v33  ;;  %194 = vst [vmem:[#allocation2 + $0x60] sm:$0x1] %v193_v35  ;;  %v199_v25 = vsel %vm15954_vm2, 0, %v198_v19 }
  0xc4   :  { %300 = vst [vmem:[#allocation2] sm:$0xff] %v16010_v37  ;;  %v14164_v27 = vld [vmem:[#allocation9 + $0x22c] ss:$16 sps:$4 sm:$0xff]   ;;  %200 = vst [vmem:[#allocation2 + $0x90] sm:$0x1] %v199_v25 }
  0xc5   :  { %v14162_v33 = vld [vmem:[#allocation9 + $0x228] ss:$16 sps:$4 sm:$0xff]   ;;  %v14167_v35 = vld [vmem:[#allocation9 + $0x244] ss:$16 sps:$4 sm:$0xff]   ;;  %v210_v14 = vld [vmem:[#allocation2 + $0x28] sm:$0x80] }
  0xc6   :  { %999 = vmatpush1.bf16.msra.mxu0 %v14115_v38  ;;  %1225 = vmatpush1.bf16.msra.mxu1 %v14116_v39  ;;  %v301_v38 = vld [vmem:[#allocation2 + $0x18] sm:$0xff]  ;;  %v258_v39 = vor.u32 %v256_v23, %v255_v30  ;;  %v277_v30 = vshll.u32 %v16051_v16, 16  ;;  %v213_v19 = vld [vmem:[#allocation2 + $0x40] sm:$0x80]  ;;  %v14183_v55 = vld [vmem:[#allocation9 + $0x2a0] ss:$16 sps:$4 sm:$0xff]  }
  0xc7   :  { %1000 = vmatprep.subr.bf16.mxu0 %v14117_v40  ;;  %1226 = vmatprep.subr.bf16.mxu1 %v14119_v41  ;;  %v260_v40 = vshrl.u32 %v16002_v31, 16  ;;  %v263_v41 = vshll.u32 %v16002_v31, 16  ;;  %v14972_v26 = vld [vmem:[#allocation17 + $0x210] ss:$8 sps:$4 sm:$0xff]  }
  0xc9   :  { %v262_v49 = vrot.slane %v260_v40, 7 }
  0xca   :  { %1001 = vmatpush1.bf16.msra.mxu0 %v14121_v42  ;;  %1227 = vmatpush1.bf16.msra.mxu1 %v14122_v43  ;;  %v14145_v42 = vld [vmem:[#allocation9 + $0x1c0] ss:$16 sps:$4 sm:$0xff]   ;;  %v16019_v43 = vsel %vm15992_vm5, %v244_v29, %v301_v38  ;;  %v274_v29 = vshrl.u32 %v16051_v16, 16 }
  0xcb   :  { %1002 = vmatprep.subr.bf16.mxu0 %v14123_v45  ;;  %1228 = vmatprep.subr.bf16.mxu1 %v14125_v46  ;;  %v304_v45 = vld [vmem:[#allocation2 + $0x30] sm:$0xff]  ;;  %v14146_v46 = vld [vmem:[#allocation9 + $0x1c8] ss:$16 sps:$4 sm:$0xff]   ;;  %303 = vst [vmem:[#allocation2 + $0x18] sm:$0xff] %v16019_v43  ;;  %v265_v57 = vor.u32 %v263_v41, %v262_v49 }
  0xcc   :  { %v167_v38 = vld [vmem:[#allocation6 + $0x70] sm:$0xff]  ;;  %v14168_v49 = vld [vmem:[#allocation9 + $0x248] ss:$16 sps:$4 sm:$0xff]  }
  0xce   :  { %1003 = vmatpush1.bf16.msra.mxu0 %v14127_v47  ;;  %1229 = vmatpush1.bf16.msra.mxu1 %v14128_v48  ;;  %v16024_v47 = vsel %vm15992_vm5, %v251_v34, %v304_v45  ;;  %v307_v48 = vld [vmem:[#allocation2 + $0x48] sm:$0xff]  ;;  %v276_v34 = vrot.slane %v274_v29, 7 }
  0xcf   :  { %1004 = vmatprep.subr.bf16.mxu0 %v14129_v50  ;;  %1230 = vmatprep.subr.bf16.mxu1 %v14131_v51  ;;  %v163_v50 = vld [vmem:[#allocation6 + $0x50] sm:$0xff]  ;;  %306 = vst [vmem:[#allocation2 + $0x30] sm:$0xff] %v16024_v47  ;;  %v16031_v52 = vsel %vm15992_vm5, %v258_v39, %v307_v48  ;;  %v168_v39 = vld [vmem:[#allocation6 + $0x78] sm:$0xff] }
  0xd0   :  { %v14147_v51 = vld [vmem:[#allocation9 + $0x1e4] ss:$16 sps:$4 sm:$0xff]   ;;  %309 = vst [vmem:[#allocation2 + $0x48] sm:$0xff] %v16031_v52  ;;  %v16036_v58 = vpack.c.bf16 %v164_v53, %v163_v50  ;;  %v16074_v45 = vpack.c.bf16 %v168_v39, %v167_v38  ;;  %v14165_v48 = vld [vmem:[#allocation9 + $0x240] ss:$16 sps:$4 sm:$0xff]  }
  0xd1   :  { %v316_v53 = vld [vmem:[#allocation2 + $0x90] sm:$0xff] }
  0xd2   :  { %1005 = vmatpush1.bf16.msra.mxu0 %v14133_v1  ;;  %1231 = vmatpush1.bf16.msra.mxu1 %v14134_v2  ;;  %v267_v63 = vshrl.u32 %v16036_v58, 16  ;;  %v270_v0 = vshll.u32 %v16036_v58, 16  ;;  %v310_v1 = vld [vmem:[#allocation2 + $0x60] sm:$0xff]  ;;  %v281_v54 = vshrl.u32 %v16074_v45, 16 }
  0xd3   :  { %1006 = vmatprep.subr.bf16.mxu0 %v14135_v9  ;;  %1232 = vmatprep.subr.bf16.mxu1 %v14137_v10  ;;  %v16044_v2 = vsel %vm15992_vm5, %v265_v57, %v310_v1  ;;  %v14153_v9 = vld [vmem:[#allocation9 + $0x200] ss:$16 sps:$4 sm:$0xff]   ;;  %v16086_v57 = vrot.slane %v249_v18, 1  ;;  %v14174_v1 = vld [vmem:[#allocation9 + $0x268] ss:$16 sps:$4 sm:$0xff]  }
  0xd4   :  { %v269_v8 = vrot.slane %v267_v63, 7  ;;  %312 = vst [vmem:[#allocation2 + $0x60] sm:$0xff] %v16044_v2  ;;  %v283_v18 = vrot.slane %v281_v54, 7 }
  0xd6   :  { %1007 = vmatpush1.bf16.msra.mxu0 %v14139_v24  ;;  %1233 = vmatpush1.bf16.msra.mxu1 %v14140_v28  ;;  %v272_v10 = vor.u32 %v270_v0, %v269_v8  ;;  %v313_v24 = vld [vmem:[#allocation2 + $0x78] sm:$0xff] }
  0xd7   :  { %1008 = vmatprep.subr.bf16.mxu0 %v14141_v32  ;;  %1234 = vmatprep.subr.bf16.mxu1 %v14143_v36  ;;  %v14159_v32 = vld [vmem:[#allocation9 + $0x220] ss:$16 sps:$4 sm:$0xff]   ;;  %v14170_v36 = vld [vmem:[#allocation9 + $0x24c] ss:$16 sps:$4 sm:$0xff]  }
  0xd8   :  { %v16057_v28 = vsel %vm15992_vm5, %v272_v10, %v313_v24  ;;  %v14182_v8 = vld [vmem:[#allocation9 + $0x28c] ss:$16 sps:$4 sm:$0xff]   ;;  %v207_v10 = vld [vmem:[#allocation2 + $0x10] sm:$0x80]  ;;  %v214_v24 = vsel %vm16103_vm9, 0, %v213_v19 }
  0xd9   :  { %315 = vst [vmem:[#allocation2 + $0x78] sm:$0xff] %v16057_v28  ;;  %v208_v15 = vsel %vm16103_vm9, 0, %v207_v10  ;;  %215 = vst [vmem:[#allocation2 + $0x40] sm:$0x80] %v214_v24  ;;  %v14195_v19 = vld [vmem:[#allocation9 + $0x2e0] ss:$16 sps:$4 sm:$0xff]  }
  0xda   :  { %1009 = vmatpush1.bf16.msra.mxu0 %v14145_v42  ;;  %1235 = vmatpush1.bf16.msra.mxu1 %v14146_v46  ;;  %v16072_v42 = vrot.slane %v235_v4, 1  ;;  %v201_v46 = vld [vmem:[#allocation2 + $0xa8] sm:$0x1]  ;;  %v16082_v4 = vrot.slane %v242_v12, 1  ;;  %v14171_v12 = vld [vmem:[#allocation9 + $0x260] ss:$16 sps:$4 sm:$0xff]  }
  0xdb   :  { %1010 = vmatprep.subr.bf16.mxu0 %v14147_v51  ;;  %1236 = vmatprep.subr.bf16.mxu1 %v14149_v56  ;;  %v202_v50 = vsel %vm15954_vm2, 0, %v201_v46  ;;  %v14173_v51 = vld [vmem:[#allocation9 + $0x264] ss:$16 sps:$4 sm:$0xff]   ;;  %v284_v56 = vshll.u32 %v16074_v45, 16  ;;  %209 = vst [vmem:[#allocation2 + $0x10] sm:$0x80] %v208_v15 }
  0xdc   :  { %203 = vst [vmem:[#allocation2 + $0xa8] sm:$0x1] %v202_v50  ;;  %v228_v46 = vld [vmem:[#allocation2 + $0xb8] sm:$0x80]  ;;  %v14218_v24 = vld [vmem:[#allocation12 + $0x4c] ss:$16 sps:$4 sm:$0xff]  }
  0xdd   :  { %v229_v50 = vsel %vm16103_vm9, 0, %v228_v46  ;;  %v14233_v46 = vld [vmem:[#allocation12 + $0xa4] ss:$16 sps:$4 sm:$0xff]  }
  0xde   :  { %1011 = vmatpush1.bf16.msra.mxu0 %v14151_v61  ;;  %1237 = vmatpush1.bf16.msra.mxu1 %v14152_v62  ;;  %v16096_v62 = vrot.slane %v256_v23, 1  ;;  %v338_v23 = vrot.slane %v263_v41, 1  ;;  %v211_v41 = vsel %vm16103_vm9, 0, %v210_v14  ;;  %230 = vst [vmem:[#allocation2 + $0xb8] sm:$0x80] %v229_v50 }
  0xdf   :  { %1093 = vmatprep.subr.bf16.mxu0 %v14155_v6  ;;  %1319 = vmatprep.subr.bf16.mxu1 %v14158_v7  ;;  %v18342_v6 = vmov 0  ;;  %v14179_v7 = vld [vmem:[#allocation9 + $0x284] ss:$16 sps:$4 sm:$0xff]   ;;  %212 = vst [vmem:[#allocation2 + $0x28] sm:$0x80] %v211_v41 }
  0xe0   :  { %v18343_v6 = vsel %vm16103_vm9, 4294967295, %v18342_v6  ;;  %v14234_v50 = vld [vmem:[#allocation12 + $0xa8] ss:$16 sps:$4 sm:$0xff]  }
  0xe1   :  { %1013 = vmatmul.mubr.bf16.vlgmr.msra.gmra.mrb[0].mxu0 %v16010_v37  ;;  %1239 = vmatmul.mubr.bf16.vlgmr.msra.gmra.mrb[0].mxu1 %v16010_v37  ;;  %v279_v37 = vor.u32 %v277_v30, %v276_v34  ;;  %18344 = vst [vmem:[#allocation29_spill] sm:$0xff] %v18343_v6 }
  0xe2   :  { %1022 = vmatprep.mubr.bf16.mxu0 %v15962_v60  ;;  %1248 = vmatprep.mubr.bf16.mxu1 %v15962_v60  ;;  %v14191_v60 = vld [vmem:[#allocation9 + $0x2c4] ss:$16 sps:$4 sm:$0xff]  }
  0xe3   :  { %1094 = vmatpush1.bf16.msra.mxu0 %v14153_v9  ;;  %1320 = vmatpush1.bf16.msra.mxu1 %v14156_v20  ;;  %v16090_v61 = vsel %vm15992_vm5, %v279_v37, %v316_v53  ;;  %v286_v9 = vor.u32 %v284_v56, %v283_v18  ;;  %v216_v20 = vld [vmem:[#allocation2 + $0x58] sm:$0x80]  ;;  %v14185_v37 = vld [vmem:[#allocation9 + $0x2a4] ss:$16 sps:$4 sm:$0xff]  }
  0xe4   :  { %1095 = vmatprep.subr.bf16.mxu0 %v14161_v21  ;;  %1321 = vmatprep.subr.bf16.mxu1 %v14164_v27  ;;  %318 = vst [vmem:[#allocation2 + $0x90] sm:$0xff] %v16090_v61  ;;  %v14180_v21 = vld [vmem:[#allocation9 + $0x288] ss:$16 sps:$4 sm:$0xff]   ;;  %v217_v25 = vsel %vm16103_vm9, 0, %v216_v20  ;;  %v219_v27 = vld [vmem:[#allocation2 + $0x70] sm:$0x80] }
  0xe5   :  { %218 = vst [vmem:[#allocation2 + $0x58] sm:$0x80] %v217_v25  ;;  %v220_v34 = vsel %vm16103_vm9, 0, %v219_v27  ;;  %v377_v15 = vld [vmem:[#allocation2 + $0xb8] sm:$0xff]  ;;  %v14213_v25 = vld [vmem:[#allocation12 + $0x40] ss:$16 sps:$4 sm:$0xff]  }
  0xe6   :  { %221 = vst [vmem:[#allocation2 + $0x70] sm:$0x80] %v220_v34  ;;  %v14198_v20 = vld [vmem:[#allocation9 + $0x2e8] ss:$16 sps:$4 sm:$0xff]   ;;  %v14216_v27 = vld [vmem:[#allocation12 + $0x48] ss:$16 sps:$4 sm:$0xff]  }
  0xe7   :  { %1096 = vmatpush1.bf16.msra.mxu0 %v14159_v32  ;;  %1322 = vmatpush1.bf16.msra.mxu1 %v14162_v33  ;;  %v222_v32 = vld [vmem:[#allocation2 + $0x88] sm:$0x80]  ;;  %v14219_v34 = vld [vmem:[#allocation12 + $0x60] ss:$16 sps:$4 sm:$0xff]  }
  0xe8   :  { %1097 = vmatprep.subr.bf16.mxu0 %v14167_v35  ;;  %1323 = vmatprep.subr.bf16.mxu1 %v14170_v36  ;;  %v319_v33 = vld [vmem:[#allocation2 + $0xa8] sm:$0xff]  ;;  %v223_v35 = vsel %vm16103_vm9, 0, %v222_v32  ;;  %v225_v36 = vld [vmem:[#allocation2 + $0xa0] sm:$0x80] }
  0xe9   :  { %1023 = vmatmul.mubr.bf16.gmra.mrb[4].mxu0 %v16019_v43  ;;  %1249 = vmatmul.mubr.bf16.gmra.mrb[4].mxu1 %v16019_v43  ;;  %v340_v43 = vrot.slane %v270_v0, 1  ;;  %v14177_v0 = vld [vmem:[#allocation9 + $0x280] ss:$16 sps:$4 sm:$0xff]   ;;  %v16129_v38 = vsel %vm15992_vm5, %v286_v9, %v319_v33  ;;  %224 = vst [vmem:[#allocation2 + $0x88] sm:$0x80] %v223_v35  ;;  %v226_v39 = vsel %vm16103_vm9, 0, %v225_v36 }
  0xea   :  { %1032 = vmatprep.mubr.bf16.mxu0 %v15970_v5  ;;  %1258 = vmatprep.mubr.bf16.mxu1 %v15970_v5  ;;  %321 = vst [vmem:[#allocation2 + $0xa8] sm:$0xff] %v16129_v38  ;;  %227 = vst [vmem:[#allocation2 + $0xa0] sm:$0x80] %v226_v39  ;;  %v359_v5 = vld [vmem:[#allocation2 + $0x28] sm:$0xff]  ;;  %v14224_v33 = vld [vmem:[#allocation12 + $0x6c] ss:$16 sps:$4 sm:$0xff]  }
  0xeb   :  { %1098 = vmatpush1.bf16.msra.mxu0 %v14165_v48  ;;  %1324 = vmatpush1.bf16.msra.mxu1 %v14168_v49  ;;  %v342_v48 = vrot.slane %v277_v30, 1  ;;  %v14188_v49 = vld [vmem:[#allocation9 + $0x2ac] ss:$16 sps:$4 sm:$0xff]   ;;  %v344_v30 = vrot.slane %v284_v56, 1  ;;  %v341_v56 = vor.u32 %v340_v43, %v267_v63  ;;  %v14221_v32 = vld [vmem:[#allocation12 + $0x64] ss:$16 sps:$4 sm:$0xff]  }
  0xec   :  { %1099 = vmatprep.subr.bf16.mxu0 %v14173_v51  ;;  %1325 = vmatprep.subr.bf16.mxu1 %v14176_v59  ;;  %v331_v51 = vor.u32 %v16072_v42, %v232_v3  ;;  %v333_v59 = vor.u32 %v16082_v4, %v239_v11  ;;  %v14186_v3 = vld [vmem:[#allocation9 + $0x2a8] ss:$16 sps:$4 sm:$0xff]   ;;  %v335_v42 = vor.u32 %v16086_v57, %v246_v17  ;;  %v14194_v4 = vld [vmem:[#allocation9 + $0x2cc] ss:$16 sps:$4 sm:$0xff]  }
  0xed   :  { %v339_v11 = vor.u32 %v338_v23, %v260_v40  ;;  %v343_v17 = vor.u32 %v342_v48, %v274_v29  ;;  %v14192_v57 = vld [vmem:[#allocation9 + $0x2c8] ss:$16 sps:$4 sm:$0xff]   ;;  %v368_v23 = vld [vmem:[#allocation2 + $0x70] sm:$0xff]  ;;  %v14222_v35 = vld [vmem:[#allocation12 + $0x68] ss:$16 sps:$4 sm:$0xff]  }
  0xee   :  { %v16174_v40 = vsel %vm16143_vm10, %v333_v59, %v359_v5  ;;  %v365_v63 = vld [vmem:[#allocation2 + $0x58] sm:$0xff]  ;;  %v14236_v48 = vld [vmem:[#allocation12 + $0xac] ss:$16 sps:$4 sm:$0xff]   ;;  %v14237_v59 = vld [vmem:[#allocation12 + $0xc0] ss:$16 sps:$4 sm:$0xff]  }
  0xef   :  { %1100 = vmatpush1.bf16.msra.mxu0 %v14171_v12  ;;  %1326 = vmatpush1.bf16.msra.mxu1 %v14174_v1  ;;  %v356_v12 = vld [vmem:[#allocation2 + $0x10] sm:$0xff]  ;;  %v345_v1 = vor.u32 %v344_v30, %v281_v54  ;;  %361 = vst [vmem:[#allocation2 + $0x28] sm:$0xff] %v16174_v40  ;;  %v16192_v54 = vsel %vm16143_vm10, %v339_v11, %v368_v23  ;;  %v14227_v36 = vld [vmem:[#allocation12 + $0x84] ss:$16 sps:$4 sm:$0xff]   ;;  %v14228_v39 = vld [vmem:[#allocation12 + $0x88] ss:$16 sps:$4 sm:$0xff]  }
  0xf0   :  { %1101 = vmatprep.subr.bf16.mxu0 %v14179_v7  ;;  %1327 = vmatprep.subr.bf16.mxu1 %v14182_v8  ;;  %v371_v43 = vld [vmem:[#allocation2 + $0x88] sm:$0xff]  ;;  %v14197_v7 = vld [vmem:[#allocation9 + $0x2e4] ss:$16 sps:$4 sm:$0xff]   ;;  %370 = vst [vmem:[#allocation2 + $0x70] sm:$0xff] %v16192_v54  ;;  %v14242_v30 = vld [vmem:[#allocation12 + $0xcc] ss:$16 sps:$4 sm:$0xff]  }
  0xf1   :  { %1033 = vmatmul.mubr.bf16.gmra.mrb[8].mxu0 %v16024_v47  ;;  %1259 = vmatmul.mubr.bf16.gmra.mrb[8].mxu1 %v16024_v47  ;;  %v337_v47 = vor.u32 %v16096_v62, %v253_v22  ;;  %v16170_v22 = vsel %vm16143_vm10, %v331_v51, %v356_v12  ;;  %v362_v62 = vld [vmem:[#allocation2 + $0x40] sm:$0xff]  ;;  %v14200_v8 = vld [vmem:[#allocation9 + $0x2ec] ss:$16 sps:$4 sm:$0xff]   ;;  %v16196_v9 = vsel %vm16143_vm10, %v341_v56, %v371_v43  ;;  %v14239_v51 = vld [vmem:[#allocation12 + $0xc4] ss:$16 sps:$4 sm:$0xff]  }
  0xf2   :  { %1042 = vmatprep.mubr.bf16.mxu0 %v15976_v13  ;;  %1268 = vmatprep.mubr.bf16.mxu1 %v15976_v13  ;;  %v14189_v13 = vld [vmem:[#allocation9 + $0x2c0] ss:$16 sps:$4 sm:$0xff]   ;;  %358 = vst [vmem:[#allocation2 + $0x10] sm:$0xff] %v16170_v22  ;;  %v16182_v29 = vsel %vm16143_vm10, %v335_v42, %v362_v62  ;;  %373 = vst [vmem:[#allocation2 + $0x88] sm:$0xff] %v16196_v9  ;;  %v16209_v41 = vsel %vm16143_vm10, %v345_v1, %v377_v15  ;;  %v14251_v11 = vld [vmem:[#allocation12 + $0x104] ss:$16 sps:$4 sm:$0xff]  }
  0xf3   :  { %1102 = vmatpush1.bf16.msra.mxu0 %v14177_v0  ;;  %1328 = vmatpush1.bf16.msra.mxu1 %v14180_v21  ;;  %v16186_v18 = vsel %vm16143_vm10, %v337_v47, %v365_v63  ;;  %364 = vst [vmem:[#allocation2 + $0x40] sm:$0xff] %v16182_v29  ;;  %v374_v10 = vld [vmem:[#allocation2 + $0xa0] sm:$0xff]  ;;  %379 = vst [vmem:[#allocation2 + $0xb8] sm:$0xff] %v16209_v41  ;;  %v14203_v0 = vld [vmem:[#allocation12 + $0x4] ss:$16 sps:$4 sm:$0xff]  }
  0xf4   :  { %1103 = vmatprep.subr.bf16.mxu0 %v14185_v37  ;;  %1329 = vmatprep.subr.bf16.mxu1 %v14188_v49  ;;  %367 = vst [vmem:[#allocation2 + $0x58] sm:$0xff] %v16186_v18  ;;  %v16202_v14 = vsel %vm16143_vm10, %v343_v17, %v374_v10  ;;  %v14210_v21 = vld [vmem:[#allocation12 + $0x28] ss:$16 sps:$4 sm:$0xff]   ;;  %v14230_v37 = vld [vmem:[#allocation12 + $0x8c] ss:$16 sps:$4 sm:$0xff]  }
  0xf5   :  { %376 = vst [vmem:[#allocation2 + $0xa0] sm:$0xff] %v16202_v14  ;;  %v14231_v49 = vld [vmem:[#allocation12 + $0xa0] ss:$16 sps:$4 sm:$0xff]   ;;  %v14248_v42 = vld [vmem:[#allocation12 + $0xec] ss:$16 sps:$4 sm:$0xff]  }
  0xf6   :  { %v14243_v47 = vld [vmem:[#allocation12 + $0xe0] ss:$16 sps:$4 sm:$0xff]   ;;  %v14254_v56 = vld [vmem:[#allocation12 + $0x10c] ss:$16 sps:$4 sm:$0xff]   ;;  %v14252_v12 = vld [vmem:[#allocation12 + $0x108] ss:$16 sps:$4 sm:$0xff]  }
  0xf7   :  { %1104 = vmatpush1.bf16.msra.mxu0 %v14183_v55  ;;  %1330 = vmatpush1.bf16.msra.mxu1 %v14186_v3  ;;  %v14240_v55 = vld [vmem:[#allocation12 + $0xc8] ss:$16 sps:$4 sm:$0xff]   ;;  %v14245_v3 = vld [vmem:[#allocation12 + $0xe4] ss:$16 sps:$4 sm:$0xff]   ;;  %v14260_v17 = vld [vmem:[#allocation12 + $0x12c] ss:$16 sps:$4 sm:$0xff]  }
  0xf8   :  { %1105 = vmatprep.subr.bf16.mxu0 %v14191_v60  ;;  %1331 = vmatprep.subr.bf16.mxu1 %v14194_v4  ;;  %v14246_v60 = vld [vmem:[#allocation12 + $0xe8] ss:$16 sps:$4 sm:$0xff]   ;;  %v14249_v4 = vld [vmem:[#allocation12 + $0x100] ss:$16 sps:$4 sm:$0xff]   ;;  %v14257_v5 = vld [vmem:[#allocation12 + $0x124] ss:$16 sps:$4 sm:$0xff]  }
  0xf9   :  { %1043 = vmatmul.mubr.bf16.gmra.mrb[12].mxu0 %v16031_v52  ;;  %1269 = vmatmul.mubr.bf16.gmra.mrb[12].mxu1 %v16031_v52  ;;  %v14206_v52 = vld [vmem:[#allocation12 + $0xc] ss:$16 sps:$4 sm:$0xff]   ;;  %v14261_v62 = vld [vmem:[#allocation12 + $0x140] ss:$16 sps:$4 sm:$0xff]   ;;  %v14264_v63 = vld [vmem:[#allocation12 + $0x148] ss:$16 sps:$4 sm:$0xff]  }
  0xfa   :  { %1052 = vmatprep.mubr.bf16.mxu0 %v16002_v31  ;;  %1278 = vmatprep.mubr.bf16.mxu1 %v16002_v31  ;;  %v18323_v31 = vmov 0   ;;  %v14269_v1 = vld [vmem:[#allocation12 + $0x164] ss:$16 sps:$4 sm:$0xff]   ;;  %v14270_v23 = vld [vmem:[#allocation12 + $0x168] ss:$16 sps:$4 sm:$0xff]  }
  0xfb   :  { %1106 = vmatpush1.bf16.msra.mxu0 %v14189_v13  ;;  %1332 = vmatpush1.bf16.msra.mxu1 %v14192_v57  ;;  %v14255_v13 = vld [vmem:[#allocation12 + $0x120] ss:$16 sps:$4 sm:$0xff]   ;;  %v14258_v57 = vld [vmem:[#allocation12 + $0x128] ss:$16 sps:$4 sm:$0xff]   ;;  %v1614_v43 = vld [vmem:[#allocation3] sm:$0x1] }
  0xfc   :  { %1107 = vmatprep.subr.bf16.mxu0 %v14197_v7  ;;  %1333 = vmatprep.subr.bf16.mxu1 %v14200_v8  ;;  %v1710_v7 = vld [vmem:[#allocation3 + $0x40] sm:$0x80]  ;;  %v1620_v8 = vld [vmem:[#allocation3 + $0x10] sm:$0x1]  ;;  %v14980_v53 = vld [vmem:[#allocation17 + $0x224] ss:$8 sps:$4 sm:$0xff]  }
  0xfd   :  { %v1621_v10 = vsel %vm15954_vm2, 0, %v1620_v8  ;;  %v1647_v8 = vld [vmem:[#allocation3 + $0xd8] sm:$0x1] }
  0xfe   :  { %1622 = vst [vmem:[#allocation3 + $0x10] sm:$0x1] %v1621_v10 }
  0xff   :  { %1108 = vmatpush1.bf16.msra.mxu0 %v14195_v19  ;;  %1334 = vmatpush1.bf16.msra.mxu1 %v14198_v20  ;;  %v1713_v19 = vld [vmem:[#allocation3 + $0x48] sm:$0x80] }
 0x100   :  { %4782 = vmatprep.subr.bf16.mxu0 %v14203_v0  ;;  %5460 = vmatprep.subr.bf16.mxu1 %v14206_v52  ;;  %v1714_v0 = vsel %vm16103_vm9, 0, %v1713_v19  ;;  %v1623_v52 = vld [vmem:[#allocation3 + $0x18] sm:$0x1]  ;;  %v1746_v19 = vld [vmem:[#allocation3 + $0x160] sm:$0x80] }
 0x101   :  { %1053 = vmatmul.mubr.bf16.gmra.mrb[16].mxu0 %v16044_v2  ;;  %1279 = vmatmul.mubr.bf16.gmra.mrb[16].mxu1 %v16044_v2  ;;  %v14204_v2 = vld [vmem:[#allocation12 + $0x8] ss:$16 sps:$4 sm:$0xff]   ;;  %1715 = vst [vmem:[#allocation3 + $0x48] sm:$0x80] %v1714_v0  ;;  %v1747_v0 = vsel %vm16103_vm9, 0, %v1746_v19 }
 0x102   :  { %1062 = vmatprep.mubr.bf16.mxu0 %v16036_v58  ;;  %1288 = vmatprep.mubr.bf16.mxu1 %v16036_v58  ;;  %v14201_v58 = vld [vmem:[#allocation12] ss:$16 sps:$4 sm:$0xff]   ;;  %1748 = vst [vmem:[#allocation3 + $0x160] sm:$0x80] %v1747_v0  ;;  %v1791_v19 = vld [vmem:[#allocation3 + $0x298] sm:$0x80] }
 0x103   :  { %v1792_v0 = vsel %vm16103_vm9, 0, %v1791_v19 }
 0x104   :  { %1793 = vst [vmem:[#allocation3 + $0x298] sm:$0x80] %v1792_v0 }
 0x109   :  { %1063 = vmatmul.mubr.bf16.gmra.mrb[20].mxu0 %v16057_v28  ;;  %1289 = vmatmul.mubr.bf16.gmra.mrb[20].mxu1 %v16057_v28  ;;  %v14212_v28 = vld [vmem:[#allocation12 + $0x2c] ss:$16 sps:$4 sm:$0xff]  }
 0x10a   :  { %1072 = vmatprep.mubr.bf16.mxu0 %v16051_v16  ;;  %1298 = vmatprep.mubr.bf16.mxu1 %v16051_v16  ;;  %v14209_v16 = vld [vmem:[#allocation12 + $0x24] ss:$16 sps:$4 sm:$0xff]  }
 0x111   :  { %1073 = vmatmul.mubr.bf16.gmra.mrb[24].mxu0 %v16090_v61  ;;  %1299 = vmatmul.mubr.bf16.gmra.mrb[24].mxu1 %v16090_v61  ;;  %v14207_v61 = vld [vmem:[#allocation12 + $0x20] ss:$16 sps:$4 sm:$0xff]  }
 0x112   :  { %1082 = vmatprep.mubr.bf16.mxu0 %v16074_v45  ;;  %1308 = vmatprep.mubr.bf16.mxu1 %v16074_v45  ;;  %v14215_v45 = vld [vmem:[#allocation12 + $0x44] ss:$16 sps:$4 sm:$0xff]  }
 0x119   :  { %1083 = vmatmul.mubr.bf16.gmra.mrb[28].mxu0 %v16129_v38  ;;  %1309 = vmatmul.mubr.bf16.gmra.mrb[28].mxu1 %v16129_v38  ;;  %v14225_v38 = vld [vmem:[#allocation12 + $0x80] ss:$16 sps:$4 sm:$0xff]  }
 0x11a   :  { %1125 = vmatprep.mubr.bf16.mxu0 %v18323_v31  ;;  %1351 = vmatprep.mubr.bf16.mxu1 %v18323_v31 }
 0x121   :  { %1126 = vmatmul.mubr.bf16.vlgmr.msra.gmra.mrb[0].mxu0 %v16170_v22  ;;  %1352 = vmatmul.mubr.bf16.vlgmr.msra.gmra.mrb[0].mxu1 %v16170_v22  ;;  %v14263_v22 = vld [vmem:[#allocation12 + $0x144] ss:$16 sps:$4 sm:$0xff]  }
 0x122   :  { %1135 = vmatprep.mubr.bf16.mxu0 %v18323_v31  ;;  %1361 = vmatprep.mubr.bf16.mxu1 %v18323_v31 }
 0x123   :  { %4783 = vmatpush1.bf16.msra.mxu0 %v14201_v58  ;;  %5461 = vmatpush1.bf16.msra.mxu1 %v14204_v2  ;;  %v1719_v58 = vld [vmem:[#allocation3 + $0x58] sm:$0x80]  ;;  %v1624_v2 = vsel %vm15954_vm2, 0, %v1623_v52 }
 0x124   :  { %4784 = vmatprep.subr.bf16.mxu0 %v14209_v16  ;;  %5462 = vmatprep.subr.bf16.mxu1 %v14212_v28  ;;  %v1720_v16 = vsel %vm16103_vm9, 0, %v1719_v58  ;;  %v14273_v28 = vld [vmem:[#allocation12 + $0x180] ss:$16 sps:$4 sm:$0xff]   ;;  %1625 = vst [vmem:[#allocation3 + $0x18] sm:$0x1] %v1624_v2 }
 0x125   :  { %1721 = vst [vmem:[#allocation3 + $0x58] sm:$0x80] %v1720_v16  ;;  %v1752_v58 = vld [vmem:[#allocation3 + $0x170] sm:$0x80]  ;;  %v1653_v2 = vld [vmem:[#allocation3 + $0x128] sm:$0x1] }
 0x126   :  { %v1753_v16 = vsel %vm16103_vm9, 0, %v1752_v58 }
 0x127   :  { %4785 = vmatpush1.bf16.msra.mxu0 %v14207_v61  ;;  %5463 = vmatpush1.bf16.msra.mxu1 %v14210_v21  ;;  %v14275_v61 = vld [vmem:[#allocation12 + $0x184] ss:$16 sps:$4 sm:$0xff]   ;;  %v14276_v21 = vld [vmem:[#allocation12 + $0x188] ss:$16 sps:$4 sm:$0xff]   ;;  %1754 = vst [vmem:[#allocation3 + $0x170] sm:$0x80] %v1753_v16 }
 0x128   :  { %4786 = vmatprep.subr.bf16.mxu0 %v14215_v45  ;;  %5464 = vmatprep.subr.bf16.mxu1 %v14218_v24  ;;  %v14278_v45 = vld [vmem:[#allocation12 + $0x18c] ss:$16 sps:$4 sm:$0xff]   ;;  %v14281_v24 = vld [vmem:[#allocation12 + $0x1a4] ss:$16 sps:$4 sm:$0xff]  }
 0x129   :  { %1136 = vmatmul.mubr.bf16.gmra.mrb[4].mxu0 %v16174_v40  ;;  %1362 = vmatmul.mubr.bf16.gmra.mrb[4].mxu1 %v16174_v40  ;;  %v14266_v40 = vld [vmem:[#allocation12 + $0x14c] ss:$16 sps:$4 sm:$0xff]  }
 0x12a   :  { %1145 = vmatprep.mubr.bf16.mxu0 %v18323_v31  ;;  %1371 = vmatprep.mubr.bf16.mxu1 %v18323_v31  ;;  %v1704_v16 = vld [vmem:[#allocation3 + $0x2b0] sm:$0x1] }
 0x12b   :  { %4787 = vmatpush1.bf16.msra.mxu0 %v14213_v25  ;;  %5465 = vmatpush1.bf16.msra.mxu1 %v14216_v27  ;;  %v14284_v25 = vld [vmem:[#allocation12 + $0x1ac] ss:$16 sps:$4 sm:$0xff]   ;;  %v14279_v27 = vld [vmem:[#allocation12 + $0x1a0] ss:$16 sps:$4 sm:$0xff]  }
 0x12c   :  { %4788 = vmatprep.subr.bf16.mxu0 %v14221_v32  ;;  %5466 = vmatprep.subr.bf16.mxu1 %v14224_v33  ;;  %v14282_v32 = vld [vmem:[#allocation12 + $0x1a8] ss:$16 sps:$4 sm:$0xff]   ;;  %v1626_v33 = vld [vmem:[#allocation3 + $0x60] sm:$0x1] }
 0x12f   :  { %4789 = vmatpush1.bf16.msra.mxu0 %v14219_v34  ;;  %5467 = vmatpush1.bf16.msra.mxu1 %v14222_v35  ;;  %v1722_v34 = vld [vmem:[#allocation3 + $0xa0] sm:$0x80]  ;;  %v1632_v35 = vld [vmem:[#allocation3 + $0x70] sm:$0x1] }
 0x130   :  { %4790 = vmatprep.subr.bf16.mxu0 %v14227_v36  ;;  %5468 = vmatprep.subr.bf16.mxu1 %v14230_v37  ;;  %v1627_v36 = vsel %vm15954_vm2, 0, %v1626_v33  ;;  %v1723_v37 = vsel %vm16103_vm9, 0, %v1722_v34  ;;  %v1758_v33 = vld [vmem:[#allocation3 + $0x1c0] sm:$0x80]  ;;  %v1668_v34 = vld [vmem:[#allocation3 + $0x190] sm:$0x1] }
 0x131   :  { %1146 = vmatmul.mubr.bf16.gmra.mrb[8].mxu0 %v16182_v29  ;;  %1372 = vmatmul.mubr.bf16.gmra.mrb[8].mxu1 %v16182_v29  ;;  %v14272_v29 = vld [vmem:[#allocation12 + $0x16c] ss:$16 sps:$4 sm:$0xff]   ;;  %1628 = vst [vmem:[#allocation3 + $0x60] sm:$0x1] %v1627_v36  ;;  %1724 = vst [vmem:[#allocation3 + $0xa0] sm:$0x80] %v1723_v37 }
 0x132   :  { %1155 = vmatprep.mubr.bf16.mxu0 %v18323_v31  ;;  %1381 = vmatprep.mubr.bf16.mxu1 %v18323_v31  ;;  %v1759_v36 = vsel %vm16103_vm9, 0, %v1758_v33  ;;  %v1669_v37 = vsel %vm15954_vm2, 0, %v1668_v34 }
 0x133   :  { %4791 = vmatpush1.bf16.msra.mxu0 %v14225_v38  ;;  %5469 = vmatpush1.bf16.msra.mxu1 %v14228_v39  ;;  %v1633_v38 = vsel %vm15954_vm2, 0, %v1632_v35  ;;  %v1728_v39 = vld [vmem:[#allocation3 + $0xb0] sm:$0x80]  ;;  %1760 = vst [vmem:[#allocation3 + $0x1c0] sm:$0x80] %v1759_v36 }
 0x134   :  { %4792 = vmatprep.subr.bf16.mxu0 %v14233_v46  ;;  %5470 = vmatprep.subr.bf16.mxu1 %v14236_v48  ;;  %1634 = vst [vmem:[#allocation3 + $0x70] sm:$0x1] %v1633_v38  ;;  %v1729_v46 = vsel %vm16103_vm9, 0, %v1728_v39  ;;  %v1629_v48 = vld [vmem:[#allocation3 + $0x68] sm:$0x1] }
 0x135   :  { %1730 = vst [vmem:[#allocation3 + $0xb0] sm:$0x80] %v1729_v46  ;;  %v1764_v38 = vld [vmem:[#allocation3 + $0x1d0] sm:$0x80]  ;;  %1670 = vst [vmem:[#allocation3 + $0x190] sm:$0x1] %v1669_v37  ;;  %v1434_v37 = vlaneseq }
 0x136   :  { %v1765_v39 = vsel %vm16103_vm9, 0, %v1764_v38  ;;  %v1665_v46 = vld [vmem:[#allocation3 + $0x188] sm:$0x1] }
 0x137   :  { %4793 = vmatpush1.bf16.msra.mxu0 %v14231_v49  ;;  %5471 = vmatpush1.bf16.msra.mxu1 %v14234_v50  ;;  %v1725_v49 = vld [vmem:[#allocation3 + $0xa8] sm:$0x80]  ;;  %v1630_v50 = vsel %vm15954_vm2, 0, %v1629_v48  ;;  %1766 = vst [vmem:[#allocation3 + $0x1d0] sm:$0x80] %v1765_v39  ;;  %v16388_v38 = vshrl.u32 %v1434_v37, 7 }
 0x138   :  { %4794 = vmatprep.subr.bf16.mxu0 %v14239_v51  ;;  %5472 = vmatprep.subr.bf16.mxu1 %v14242_v30  ;;  %v1726_v51 = vsel %vm16103_vm9, 0, %v1725_v49  ;;  %v1635_v30 = vld [vmem:[#allocation3 + $0x78] sm:$0x1]  ;;  %1631 = vst [vmem:[#allocation3 + $0x68] sm:$0x1] %v1630_v50  ;;  %v1666_v49 = vsel %vm15954_vm2, 0, %v1665_v46 }
 0x139   :  { %1156 = vmatmul.mubr.bf16.gmra.mrb[12].mxu0 %v16186_v18  ;;  %1382 = vmatmul.mubr.bf16.gmra.mrb[12].mxu1 %v16186_v18  ;;  %v14267_v18 = vld [vmem:[#allocation12 + $0x160] ss:$16 sps:$4 sm:$0xff]   ;;  %1727 = vst [vmem:[#allocation3 + $0xa8] sm:$0x80] %v1726_v51  ;;  %v1761_v48 = vld [vmem:[#allocation3 + $0x1c8] sm:$0x80] }
 0x13a   :  { %1165 = vmatprep.mubr.bf16.mxu0 %v18323_v31  ;;  %1391 = vmatprep.mubr.bf16.mxu1 %v18323_v31  ;;  %v1762_v50 = vsel %vm16103_vm9, 0, %v1761_v48  ;;  %v1671_v51 = vld [vmem:[#allocation3 + $0x198] sm:$0x1]  ;;  %1667 = vst [vmem:[#allocation3 + $0x188] sm:$0x1] %v1666_v49  ;;  %18347 = vst [vmem:[#allocation30_spill] sm:$0xff] %v16388_v38 }
 0x13b   :  { %4795 = vmatpush1.bf16.msra.mxu0 %v14237_v59  ;;  %5473 = vmatpush1.bf16.msra.mxu1 %v14240_v55  ;;  %v1731_v59 = vld [vmem:[#allocation3 + $0xb8] sm:$0x80]  ;;  %v1636_v55 = vsel %vm15954_vm2, 0, %v1635_v30  ;;  %1763 = vst [vmem:[#allocation3 + $0x1c8] sm:$0x80] %v1762_v50  ;;  %v16391_v39 = vsub.s32 0, %v16388_v38 }
 0x13c   :  { %4796 = vmatprep.subr.bf16.mxu0 %v14245_v3  ;;  %5474 = vmatprep.subr.bf16.mxu1 %v14248_v42  ;;  %v1732_v3 = vsel %vm16103_vm9, 0, %v1731_v59  ;;  %v14285_v42 = vld [vmem:[#allocation12 + $0x1c0] ss:$16 sps:$4 sm:$0xff]   ;;  %1637 = vst [vmem:[#allocation3 + $0x78] sm:$0x1] %v1636_v55  ;;  %v1672_v59 = vsel %vm15954_vm2, 0, %v1671_v51 }
 0x13d   :  { %1733 = vst [vmem:[#allocation3 + $0xb8] sm:$0x80] %v1732_v3  ;;  %v1767_v30 = vld [vmem:[#allocation3 + $0x1d8] sm:$0x80]  ;;  %1673 = vst [vmem:[#allocation3 + $0x198] sm:$0x1] %v1672_v59 }
 0x13e   :  { %v1768_v55 = vsel %vm16103_vm9, 0, %v1767_v30  ;;  %v1674_v3 = vld [vmem:[#allocation3 + $0x1e0] sm:$0x1]  ;;  %18348 = vst [vmem:[#allocation31_spill] sm:$0xff] %v16391_v39  ;;  %v18326_v46 = vsub.s32 2, %v16388_v38  ;;  %v16395_v49 = vsub.s32 1, %v16388_v38 }
 0x13f   :  { %4797 = vmatpush1.bf16.msra.mxu0 %v14243_v47  ;;  %5475 = vmatpush1.bf16.msra.mxu1 %v14246_v60  ;;  %v14287_v47 = vld [vmem:[#allocation12 + $0x1c4] ss:$16 sps:$4 sm:$0xff]   ;;  %v14288_v60 = vld [vmem:[#allocation12 + $0x1c8] ss:$16 sps:$4 sm:$0xff]   ;;  %1769 = vst [vmem:[#allocation3 + $0x1d8] sm:$0x80] %v1768_v55 }
 0x140   :  { %4798 = vmatprep.subr.bf16.mxu0 %v14251_v11  ;;  %5476 = vmatprep.subr.bf16.mxu1 %v14254_v56  ;;  %v14290_v11 = vld [vmem:[#allocation12 + $0x1cc] ss:$16 sps:$4 sm:$0xff]   ;;  %v14291_v56 = vld [vmem:[#allocation12 + $0x1e0] ss:$16 sps:$4 sm:$0xff]   ;;  %18349 = vst [vmem:[#allocation32_spill] sm:$0xff] %v16395_v49  ;;  %v18325_v50 = vsub.s32 3, %v16388_v38 }
 0x141   :  { %1166 = vmatmul.mubr.bf16.gmra.mrb[16].mxu0 %v16192_v54  ;;  %1392 = vmatmul.mubr.bf16.gmra.mrb[16].mxu1 %v16192_v54  ;;  %v1615_v54 = vsel %vm15954_vm2, 0, %v1614_v43  ;;  %v1432_v48 = vld [vmem:[#allocation11] sm:$0xf] }
 0x142   :  { %1175 = vmatprep.mubr.bf16.mxu0 %v18323_v31  ;;  %1401 = vmatprep.mubr.bf16.mxu1 %v18323_v31  ;;  %1616 = vst [vmem:[#allocation3] sm:$0x1] %v1615_v54  ;;  %v1743_v54 = vld [vmem:[#allocation3 + $0x118] sm:$0x80]  ;;  %v16399_v51 = vrot.slane %v1432_v48, %v16391_v39  ;;  %v16403_v30 = vrot.slane %v1432_v48, %v18326_v46 }
 0x143   :  { %4799 = vmatpush1.bf16.msra.mxu0 %v14249_v4  ;;  %5477 = vmatpush1.bf16.msra.mxu1 %v14252_v12  ;;  %v14293_v4 = vld [vmem:[#allocation12 + $0x1e4] ss:$16 sps:$4 sm:$0xff]   ;;  %v14294_v12 = vld [vmem:[#allocation12 + $0x1e8] ss:$16 sps:$4 sm:$0xff]   ;;  %v1744_v10 = vsel %vm16103_vm9, 0, %v1743_v54  ;;  %v16406_v59 = vrot.slane %v1432_v48, %v16395_v49  ;;  %v16410_v55 = vrot.slane %v1432_v48, %v18325_v50 }
 0x144   :  { %4800 = vmatprep.subr.bf16.mxu0 %v14257_v5  ;;  %5478 = vmatprep.subr.bf16.mxu1 %v14260_v17  ;;  %v14296_v5 = vld [vmem:[#allocation12 + $0x1ec] ss:$16 sps:$4 sm:$0xff]   ;;  %v14299_v17 = vld [vmem:[#allocation12 + $0x204] ss:$16 sps:$4 sm:$0xff]   ;;  %1745 = vst [vmem:[#allocation3 + $0x118] sm:$0x80] %v1744_v10 }
 0x145   :  { %v1785_v10 = vld [vmem:[#allocation3 + $0x288] sm:$0x80]  ;;  %v2307_v50 = vld [vmem:[#allocation3 + $0xb8] sm:$0xff] }
 0x147   :  { %4801 = vmatpush1.bf16.msra.mxu0 %v14255_v13  ;;  %5479 = vmatpush1.bf16.msra.mxu1 %v14258_v57  ;;  %v1638_v13 = vld [vmem:[#allocation3 + $0xc0] sm:$0x1]  ;;  %v1734_v57 = vld [vmem:[#allocation3 + $0x100] sm:$0x80] }
 0x148   :  { %4802 = vmatprep.subr.bf16.mxu0 %v14263_v22  ;;  %5480 = vmatprep.subr.bf16.mxu1 %v14266_v40  ;;  %v1644_v22 = vld [vmem:[#allocation3 + $0xd0] sm:$0x1]  ;;  %v1639_v40 = vsel %vm15954_vm2, 0, %v1638_v13  ;;  %v1773_v13 = vld [vmem:[#allocation3 + $0x228] sm:$0x80] }
 0x149   :  { %1176 = vmatmul.mubr.bf16.gmra.mrb[20].mxu0 %v16196_v9  ;;  %1402 = vmatmul.mubr.bf16.gmra.mrb[20].mxu1 %v16196_v9  ;;  %v1711_v9 = vsel %vm16103_vm9, 0, %v1710_v7  ;;  %1640 = vst [vmem:[#allocation3 + $0xc0] sm:$0x1] %v1639_v40 }
 0x14a   :  { %1185 = vmatprep.mubr.bf16.mxu0 %v18323_v31  ;;  %1411 = vmatprep.mubr.bf16.mxu1 %v18323_v31  ;;  %1712 = vst [vmem:[#allocation3 + $0x40] sm:$0x80] %v1711_v9  ;;  %v1648_v9 = vsel %vm15954_vm2, 0, %v1647_v8  ;;  %v1788_v8 = vld [vmem:[#allocation3 + $0x290] sm:$0x80] }
 0x14b   :  { %4803 = vmatpush1.bf16.msra.mxu0 %v14261_v62  ;;  %5481 = vmatpush1.bf16.msra.mxu1 %v14264_v63  ;;  %v1735_v62 = vsel %vm16103_vm9, 0, %v1734_v57  ;;  %v1645_v63 = vsel %vm15954_vm2, 0, %v1644_v22  ;;  %1649 = vst [vmem:[#allocation3 + $0xd8] sm:$0x1] %v1648_v9  ;;  %v1683_v57 = vld [vmem:[#allocation3 + $0x1f8] sm:$0x1] }
 0x14c   :  { %4804 = vmatprep.subr.bf16.mxu0 %v14269_v1  ;;  %5482 = vmatprep.subr.bf16.mxu1 %v14272_v29  ;;  %v1740_v1 = vld [vmem:[#allocation3 + $0x110] sm:$0x80]  ;;  %1736 = vst [vmem:[#allocation3 + $0x100] sm:$0x80] %v1735_v62  ;;  %1646 = vst [vmem:[#allocation3 + $0xd0] sm:$0x1] %v1645_v63 }
 0x14d   :  { %v1741_v29 = vsel %vm16103_vm9, 0, %v1740_v1  ;;  %v1774_v22 = vsel %vm16103_vm9, 0, %v1773_v13  ;;  %v1684_v40 = vsel %vm15954_vm2, 0, %v1683_v57  ;;  %v1779_v62 = vld [vmem:[#allocation3 + $0x238] sm:$0x80]  ;;  %v1789_v54 = vsel %vm16103_vm9, 0, %v1788_v8 }
 0x14e   :  { %1742 = vst [vmem:[#allocation3 + $0x110] sm:$0x80] %v1741_v29  ;;  %1775 = vst [vmem:[#allocation3 + $0x228] sm:$0x80] %v1774_v22  ;;  %v1780_v63 = vsel %vm16103_vm9, 0, %v1779_v62 }
 0x14f   :  { %4805 = vmatpush1.bf16.msra.mxu0 %v14267_v18  ;;  %5483 = vmatpush1.bf16.msra.mxu1 %v14270_v23  ;;  %v1641_v18 = vld [vmem:[#allocation3 + $0xc8] sm:$0x1]  ;;  %v1737_v23 = vld [vmem:[#allocation3 + $0x108] sm:$0x80]  ;;  %1685 = vst [vmem:[#allocation3 + $0x1f8] sm:$0x1] %v1684_v40 }
 0x150   :  { %4806 = vmatprep.subr.bf16.mxu0 %v14275_v61  ;;  %5484 = vmatprep.subr.bf16.mxu1 %v14278_v45  ;;  %v1642_v43 = vsel %vm15954_vm2, 0, %v1641_v18  ;;  %v1738_v7 = vsel %vm16103_vm9, 0, %v1737_v23  ;;  %v1749_v61 = vld [vmem:[#allocation3 + $0x168] sm:$0x80]  ;;  %1781 = vst [vmem:[#allocation3 + $0x238] sm:$0x80] %v1780_v63 }
 0x151   :  { %1186 = vmatmul.mubr.bf16.gmra.mrb[24].mxu0 %v16202_v14  ;;  %1412 = vmatmul.mubr.bf16.gmra.mrb[24].mxu1 %v16202_v14  ;;  %v1716_v14 = vld [vmem:[#allocation3 + $0x50] sm:$0x80]  ;;  %1643 = vst [vmem:[#allocation3 + $0xc8] sm:$0x1] %v1642_v43  ;;  %1739 = vst [vmem:[#allocation3 + $0x108] sm:$0x80] %v1738_v7 }
 0x152   :  { %1195 = vmatprep.mubr.bf16.mxu0 %v18323_v31  ;;  %1421 = vmatprep.mubr.bf16.mxu1 %v18323_v31  ;;  %v1717_v15 = vsel %vm16103_vm9, 0, %v1716_v14  ;;  %v14302_v14 = vld [vmem:[#allocation12 + $0x20c] ss:$16 sps:$4 sm:$0xff]   ;;  %v1750_v45 = vsel %vm16103_vm9, 0, %v1749_v61  ;;  %v1782_v29 = vld [vmem:[#allocation3 + $0x280] sm:$0x80] }
 0x153   :  { %1718 = vst [vmem:[#allocation3 + $0x50] sm:$0x80] %v1717_v15  ;;  %4807 = vmatpush1.bf16.msra.mxu0 %v14273_v28  ;;  %5485 = vmatpush1.bf16.msra.mxu1 %v14276_v21  ;;  %v1650_v15 = vld [vmem:[#allocation3 + $0x120] sm:$0x1]  ;;  %v1654_v28 = vsel %vm15954_vm2, 0, %v1653_v2  ;;  %v1783_v43 = vsel %vm16103_vm9, 0, %v1782_v29 }
 0x154   :  { %4808 = vmatprep.subr.bf16.mxu0 %v14281_v24  ;;  %5486 = vmatprep.subr.bf16.mxu1 %v14284_v25  ;;  %v1659_v21 = vld [vmem:[#allocation3 + $0x138] sm:$0x1]  ;;  %1655 = vst [vmem:[#allocation3 + $0x128] sm:$0x1] %v1654_v28  ;;  %v1755_v25 = vld [vmem:[#allocation3 + $0x178] sm:$0x80] }
 0x155   :  { %v1660_v24 = vsel %vm15954_vm2, 0, %v1659_v21  ;;  %1751 = vst [vmem:[#allocation3 + $0x168] sm:$0x80] %v1750_v45  ;;  %v1686_v1 = vld [vmem:[#allocation3 + $0x240] sm:$0x1]  ;;  %v1705_v61 = vsel %vm15954_vm2, 0, %v1704_v16 }
 0x156   :  { %1661 = vst [vmem:[#allocation3 + $0x138] sm:$0x1] %v1660_v24  ;;  %v1692_v18 = vld [vmem:[#allocation3 + $0x250] sm:$0x1]  ;;  %v1687_v23 = vsel %vm15954_vm2, 0, %v1686_v1  ;;  %v2083_v31 = vld [vmem:[#allocation3 + $0x78] sm:$0xff] }
 0x157   :  { %4809 = vmatpush1.bf16.msra.mxu0 %v14279_v27  ;;  %5487 = vmatpush1.bf16.msra.mxu1 %v14282_v32  ;;  %v1756_v27 = vsel %vm16103_vm9, 0, %v1755_v25  ;;  %v1662_v32 = vld [vmem:[#allocation3 + $0x180] sm:$0x1]  ;;  %v1693_v7 = vsel %vm15954_vm2, 0, %v1692_v18  ;;  %1688 = vst [vmem:[#allocation3 + $0x240] sm:$0x1] %v1687_v23 }
 0x158   :  { %4810 = vmatprep.subr.bf16.mxu0 %v14287_v47  ;;  %5488 = vmatprep.subr.bf16.mxu1 %v14290_v11  ;;  %1757 = vst [vmem:[#allocation3 + $0x178] sm:$0x80] %v1756_v27  ;;  %v1663_v35 = vsel %vm15954_vm2, 0, %v1662_v32  ;;  %v1770_v47 = vld [vmem:[#allocation3 + $0x220] sm:$0x80] }
 0x159   :  { %1196 = vmatmul.mubr.bf16.gmra.mrb[28].mxu0 %v16209_v41  ;;  %1422 = vmatmul.mubr.bf16.gmra.mrb[28].mxu1 %v16209_v41  ;;  %v1617_v41 = vld [vmem:[#allocation3 + $0x8] sm:$0x1]  ;;  %1664 = vst [vmem:[#allocation3 + $0x180] sm:$0x1] %v1663_v35  ;;  %v1771_v11 = vsel %vm16103_vm9, 0, %v1770_v47 }
 0x15a   :  { %v1618_v20 = vsel %vm15954_vm2, 0, %v1617_v41  ;;  %v1651_v41 = vsel %vm15954_vm2, 0, %v1650_v15  ;;  %1772 = vst [vmem:[#allocation3 + $0x220] sm:$0x80] %v1771_v11  ;;  %1784 = vst [vmem:[#allocation3 + $0x280] sm:$0x80] %v1783_v43 }
 0x15b   :  { %1619 = vst [vmem:[#allocation3 + $0x8] sm:$0x1] %v1618_v20  ;;  %4811 = vmatpush1.bf16.msra.mxu0 %v14285_v42  ;;  %5489 = vmatpush1.bf16.msra.mxu1 %v14288_v60  ;;  %v1656_v20 = vld [vmem:[#allocation3 + $0x130] sm:$0x1]  ;;  %1652 = vst [vmem:[#allocation3 + $0x120] sm:$0x1] %v1651_v41 }
 0x15c   :  { %4812 = vmatprep.subr.bf16.mxu0 %v14293_v4  ;;  %5490 = vmatprep.subr.bf16.mxu1 %v14296_v5  ;;  %v1657_v52 = vsel %vm15954_vm2, 0, %v1656_v20  ;;  %v1675_v42 = vsel %vm15954_vm2, 0, %v1674_v3  ;;  %v1680_v60 = vld [vmem:[#allocation3 + $0x1f0] sm:$0x1]  ;;  %v1776_v4 = vld [vmem:[#allocation3 + $0x230] sm:$0x80] }
 0x15d   :  { %1658 = vst [vmem:[#allocation3 + $0x130] sm:$0x1] %v1657_v52  ;;  %1676 = vst [vmem:[#allocation3 + $0x1e0] sm:$0x1] %v1675_v42  ;;  %v1777_v5 = vsel %vm16103_vm9, 0, %v1776_v4  ;;  %v1786_v15 = vsel %vm16103_vm9, 0, %v1785_v10 }
 0x15e   :  { %1778 = vst [vmem:[#allocation3 + $0x230] sm:$0x80] %v1777_v5  ;;  %1694 = vst [vmem:[#allocation3 + $0x250] sm:$0x1] %v1693_v7  ;;  %v1689_v9 = vld [vmem:[#allocation3 + $0x248] sm:$0x1] }
 0x15f   :  { %4813 = vmatpush1.bf16.msra.mxu0 %v14291_v56  ;;  %5491 = vmatpush1.bf16.msra.mxu1 %v14294_v12  ;;  %v1681_v56 = vsel %vm15954_vm2, 0, %v1680_v60  ;;  %v1677_v12 = vld [vmem:[#allocation3 + $0x1e8] sm:$0x1]  ;;  %1790 = vst [vmem:[#allocation3 + $0x290] sm:$0x80] %v1789_v54 }
 0x160   :  { %4895 = vmatprep.subr.bf16.mxu0 %v14299_v17  ;;  %5573 = vmatprep.subr.bf16.mxu1 %v14302_v14  ;;  %1682 = vst [vmem:[#allocation3 + $0x1f0] sm:$0x1] %v1681_v56  ;;  %v1678_v17 = vsel %vm15954_vm2, 0, %v1677_v12  ;;  %v1690_v14 = vsel %vm15954_vm2, 0, %v1689_v9  ;;  %v1695_v41 = vld [vmem:[#allocation3 + $0x258] sm:$0x1] }
 0x161   :  { %1679 = vst [vmem:[#allocation3 + $0x1e8] sm:$0x1] %v1678_v17  ;;  %1691 = vst [vmem:[#allocation3 + $0x248] sm:$0x1] %v1690_v14  ;;  %v1696_v20 = vsel %vm15954_vm2, 0, %v1695_v41 }
 0x162   :  { %1787 = vst [vmem:[#allocation3 + $0x288] sm:$0x80] %v1786_v15  ;;  %1697 = vst [vmem:[#allocation3 + $0x258] sm:$0x1] %v1696_v20  ;;  %v1698_v52 = vld [vmem:[#allocation3 + $0x2a0] sm:$0x1] }
 0x163   :  { %v1699_v58 = vsel %vm15954_vm2, 0, %v1698_v52  ;;  %v1794_v2 = vld [vmem:[#allocation3 + $0x2e0] sm:$0x80]  ;;  %v1800_v21 = vld [vmem:[#allocation3 + $0x2f0] sm:$0x80] }
 0x164   :  { %1700 = vst [vmem:[#allocation3 + $0x2a0] sm:$0x1] %v1699_v58  ;;  %v1795_v28 = vsel %vm16103_vm9, 0, %v1794_v2  ;;  %v1701_v45 = vld [vmem:[#allocation3 + $0x2a8] sm:$0x1]  ;;  %v1801_v24 = vsel %vm16103_vm9, 0, %v1800_v21 }
 0x165   :  { %1796 = vst [vmem:[#allocation3 + $0x2e0] sm:$0x80] %v1795_v28  ;;  %1706 = vst [vmem:[#allocation3 + $0x2b0] sm:$0x1] %v1705_v61  ;;  %v1702_v25 = vsel %vm15954_vm2, 0, %v1701_v45  ;;  %v2062_v28 = vld [vmem:[#allocation3] sm:$0xff] }
 0x166   :  { %v1797_v27 = vld [vmem:[#allocation3 + $0x2e8] sm:$0x80]  ;;  %v1707_v32 = vld [vmem:[#allocation3 + $0x2b8] sm:$0x1]  ;;  %1802 = vst [vmem:[#allocation3 + $0x2f0] sm:$0x80] %v1801_v24 }
 0x167   :  { %1703 = vst [vmem:[#allocation3 + $0x2a8] sm:$0x1] %v1702_v25  ;;  %v1798_v33 = vsel %vm16103_vm9, 0, %v1797_v27  ;;  %v1708_v34 = vsel %vm15954_vm2, 0, %v1707_v32  ;;  %v1803_v35 = vld [vmem:[#allocation3 + $0x2f8] sm:$0x80] }
 0x168   :  { %1799 = vst [vmem:[#allocation3 + $0x2e8] sm:$0x80] %v1798_v33  ;;  %1709 = vst [vmem:[#allocation3 + $0x2b8] sm:$0x1] %v1708_v34  ;;  %v1804_v36 = vsel %vm16103_vm9, 0, %v1803_v35  ;;  %v2286_v61 = vld [vmem:[#allocation3 + $0x40] sm:$0xff] }
 0x169   :  { %1805 = vst [vmem:[#allocation3 + $0x2f8] sm:$0x80] %v1804_v36  ;;  %v2068_v21 = vld [vmem:[#allocation3 + $0x10] sm:$0xff] }
 0x1f4   :  { %v1127_v3 = vpop.f32.mrb[0].mxu0  ;;  %v1353_v42 = vpop.f32.mrb[0].mxu1 }
 0x1f5   :  { %v1454_v47 = vadd.f32 %v16399_v51, %v1127_v3  ;;  %v1456_v60 = vadd.f32 %v16403_v30, %v1353_v42  ;;  %v1129_v11 = vpop.f32.mrb[1].mxu0  ;;  %v1355_v56 = vpop.f32.mrb[1].mxu1  ;;  %v2292_v42 = vld [vmem:[#allocation3 + $0x50] sm:$0xff] }
 0x1f6   :  { %v1455_v4 = vadd.f32 %v16406_v59, %v1129_v11  ;;  %v1457_v12 = vadd.f32 %v16410_v55, %v1355_v56  ;;  %v1131_v5 = vpop.f32.mrb[2].mxu0  ;;  %v1357_v17 = vpop.f32.mrb[2].mxu1 }
 0x1f7   :  { %v1458_v13 = vadd.f32 %v16399_v51, %v1131_v5  ;;  %v1460_v57 = vadd.f32 %v16403_v30, %v1357_v17  ;;  %v1133_v22 = vpop.f32.mrb[3].mxu0  ;;  %v1359_v40 = vpop.f32.mrb[3].mxu1  ;;  %v1518_v62 = vmax.f32 %v1454_v47, 0.0  ;;  %v1520_v29 = vmax.f32 %v1456_v60, 0.0  ;;  %v2065_v60 = vld [vmem:[#allocation3 + $0x8] sm:$0xff] }
 0x1f8   :  { %v1459_v63 = vadd.f32 %v16406_v59, %v1133_v22  ;;  %v1461_v1 = vadd.f32 %v16410_v55, %v1359_v40  ;;  %v1519_v43 = vmax.f32 %v1455_v4, 0.0  ;;  %v1521_v7 = vmax.f32 %v1457_v12, 0.0  ;;  %v2071_v22 = vld [vmem:[#allocation3 + $0x18] sm:$0xff] }
 0x1f9   :  { %v1522_v18 = vmax.f32 %v1458_v13, 0.0  ;;  %v1524_v23 = vmax.f32 %v1460_v57, 0.0  ;;  %v2289_v57 = vld [vmem:[#allocation3 + $0x48] sm:$0xff]  ;;  %v2295_v40 = vld [vmem:[#allocation3 + $0x58] sm:$0xff] }
 0x1fa   :  { %v1523_v8 = vmax.f32 %v1459_v63, 0.0  ;;  %v1525_v54 = vmax.f32 %v1461_v1, 0.0 }
 0x1fb   :  { %v1582_v9 = vpack.c.bf16 %v1522_v18, %v1518_v62  ;;  %v1584_v10 = vpack.c.bf16 %v1524_v23, %v1520_v29 }
 0x1fc   :  { %v1583_v14 = vpack.c.bf16 %v1523_v8, %v1519_v43  ;;  %v1585_v15 = vpack.c.bf16 %v1525_v54, %v1521_v7  ;;  %v16420_v41 = vpop.f32.mrb[4].mxu0  ;;  %v16422_v19 = vpop.f32.mrb[4].mxu1  ;;  %v14297_v8 = vld [vmem:[#allocation12 + $0x200] ss:$16 sps:$4 sm:$0xff]  }
 0x1fd   :  { %v1807_v20 = vshrl.u32 %v1582_v9, 16  ;;  %v1810_v0 = vshll.u32 %v1582_v9, 16  ;;  %2158 = vst [vmem:[#allocation3 + $0x20] sm:$0xff] %v1582_v9  ;;  %v1821_v52 = vshrl.u32 %v1584_v10, 16  ;;  %v1824_v58 = vshll.u32 %v1584_v10, 16  ;;  %2160 = vst [vmem:[#allocation3 + $0x30] sm:$0xff] %v1584_v10 }
 0x1fe   :  { %v1139_v2 = vpop.f32.mrb[5].mxu0  ;;  %v1365_v16 = vpop.f32.mrb[5].mxu1  ;;  %v1814_v45 = vshrl.u32 %v1583_v14, 16  ;;  %v1817_v24 = vshll.u32 %v1583_v14, 16  ;;  %2159 = vst [vmem:[#allocation3 + $0x28] sm:$0xff] %v1583_v14  ;;  %v1828_v25 = vshrl.u32 %v1585_v15, 16 }
 0x1ff   :  { %v1831_v27 = vshll.u32 %v1585_v15, 16  ;;  %2161 = vst [vmem:[#allocation3 + $0x38] sm:$0xff] %v1585_v15  ;;  %v1141_v32 = vpop.f32.mrb[6].mxu0  ;;  %v1367_v33 = vpop.f32.mrb[6].mxu1  ;;  %v1809_v34 = vrot.slane %v1807_v20, 7  ;;  %v2190_v35 = vrot.slane %v1810_v0, 1 }
 0x200   :  { %v1823_v36 = vrot.slane %v1821_v52, 7  ;;  %v2194_v37 = vrot.slane %v1824_v58, 1  ;;  %v1143_v48 = vpop.f32.mrb[7].mxu0  ;;  %v1369_v3 = vpop.f32.mrb[7].mxu1  ;;  %v1816_v47 = vrot.slane %v1814_v45, 7  ;;  %v2192_v11 = vrot.slane %v1817_v24, 1 }
 0x201   :  { %v1830_v56 = vrot.slane %v1828_v25, 7  ;;  %v2196_v4 = vrot.slane %v1831_v27, 1  ;;  %v1812_v12 = vor.u32 %v1810_v0, %v1809_v34  ;;  %v2191_v5 = vor.u32 %v2190_v35, %v1807_v20  ;;  %v14300_v0 = vld [vmem:[#allocation12 + $0x208] ss:$16 sps:$4 sm:$0xff]  }
 0x202   :  { %v1826_v17 = vor.u32 %v1824_v58, %v1823_v36  ;;  %v2195_v13 = vor.u32 %v2194_v37, %v1821_v52  ;;  %v1819_v62 = vor.u32 %v1817_v24, %v1816_v47  ;;  %v2193_v63 = vor.u32 %v2192_v11, %v1814_v45  ;;  %v14305_v24 = vld [vmem:[#allocation12 + $0x224] ss:$16 sps:$4 sm:$0xff]  }
 0x203   :  { %v1833_v1 = vor.u32 %v1831_v27, %v1830_v56  ;;  %v2197_v29 = vor.u32 %v2196_v4, %v1828_v25  ;;  %v2063_v18 = vsel %vm15992_vm5, %v1812_v12, %v2062_v28  ;;  %v2287_v23 = vsel %vm16143_vm10, %v2191_v5, %v2286_v61  ;;  %v14314_v12 = vld [vmem:[#allocation12 + $0x24c] ss:$16 sps:$4 sm:$0xff]  }
 0x204   :  { %v2069_v43 = vsel %vm15992_vm5, %v1826_v17, %v2068_v21  ;;  %v2293_v7 = vsel %vm16143_vm10, %v2195_v13, %v2292_v42  ;;  %2064 = vst [vmem:[#allocation3] sm:$0xff] %v2063_v18  ;;  %2288 = vst [vmem:[#allocation3 + $0x40] sm:$0xff] %v2287_v23  ;;  %v2066_v54 = vsel %vm15992_vm5, %v1819_v62, %v2065_v60  ;;  %v1147_v15 = vpop.f32.mrb[8].mxu0  ;;  %v1373_v20 = vpop.f32.mrb[8].mxu1 }
 0x205   :  { %2070 = vst [vmem:[#allocation3 + $0x10] sm:$0xff] %v2069_v43  ;;  %2294 = vst [vmem:[#allocation3 + $0x50] sm:$0xff] %v2293_v7  ;;  %v2290_v9 = vsel %vm16143_vm10, %v2193_v63, %v2289_v57  ;;  %v2072_v10 = vsel %vm15992_vm5, %v1833_v1, %v2071_v22  ;;  %v2296_v14 = vsel %vm16143_vm10, %v2197_v29, %v2295_v40  ;;  %v1149_v21 = vpop.f32.mrb[9].mxu0  ;;  %v1375_v45 = vpop.f32.mrb[9].mxu1  ;;  %4814 = vmatprep.mubr.bf16.mxu0 %v2066_v54  ;;  %v14309_v1 = vld [vmem:[#allocation12 + $0x240] ss:$16 sps:$4 sm:$0xff]  }
 0x206   :  { %2067 = vst [vmem:[#allocation3 + $0x8] sm:$0xff] %v2066_v54  ;;  %2291 = vst [vmem:[#allocation3 + $0x48] sm:$0xff] %v2290_v9  ;;  %v1462_v52 = vadd.f32 %v16399_v51, %v16420_v41  ;;  %v1464_v58 = vadd.f32 %v16403_v30, %v16422_v19  ;;  %v1463_v28 = vadd.f32 %v16406_v59, %v1139_v2  ;;  %v16450_v41 = vpop.f32.mrb[10].mxu0  ;;  %v16452_v36 = vpop.f32.mrb[10].mxu1  ;;  %5492 = vmatprep.mubr.bf16.mxu1 %v2066_v54  ;;  %v14303_v19 = vld [vmem:[#allocation12 + $0x220] ss:$16 sps:$4 sm:$0xff]  }
 0x207   :  { %2073 = vst [vmem:[#allocation3 + $0x18] sm:$0xff] %v2072_v10  ;;  %2297 = vst [vmem:[#allocation3 + $0x58] sm:$0xff] %v2296_v14  ;;  %v1465_v61 = vadd.f32 %v16410_v55, %v1365_v16  ;;  %v1466_v25 = vadd.f32 %v16399_v51, %v1141_v32  ;;  %v1468_v27 = vadd.f32 %v16403_v30, %v1367_v33  ;;  %v14306_v2 = vld [vmem:[#allocation12 + $0x228] ss:$16 sps:$4 sm:$0xff]   ;;  %v14308_v16 = vld [vmem:[#allocation12 + $0x22c] ss:$16 sps:$4 sm:$0xff]   ;;  %4815 = vmatmul.mubr.bf16.vlgmr.msra.gmra.mrb[32].mxu0 %v2063_v18 }
 0x208   :  { %v1467_v34 = vadd.f32 %v16406_v59, %v1143_v48  ;;  %v1469_v35 = vadd.f32 %v16410_v55, %v1369_v3  ;;  %v1526_v37 = vmax.f32 %v1462_v52, 0.0  ;;  %v1528_v42 = vmax.f32 %v1464_v58, 0.0  ;;  %v16454_v11 = vpop.f32.mrb[11].mxu0  ;;  %v16456_v32 = vpop.f32.mrb[11].mxu1  ;;  %5493 = vmatmul.mubr.bf16.vlgmr.msra.gmra.mrb[32].mxu1 %v2063_v18  ;;  %v14311_v33 = vld [vmem:[#allocation12 + $0x244] ss:$16 sps:$4 sm:$0xff]   ;;  %4896 = vmatpush1.bf16.msra.mxu0 %v14297_v8 }
 0x209   :  { %v1527_v47 = vmax.f32 %v1463_v28, 0.0  ;;  %v1529_v60 = vmax.f32 %v1465_v61, 0.0  ;;  %v1530_v48 = vmax.f32 %v1466_v25, 0.0  ;;  %v1532_v3 = vmax.f32 %v1468_v27, 0.0  ;;  %5574 = vmatpush1.bf16.msra.mxu1 %v14300_v0  ;;  %4897 = vmatprep.subr.bf16.mxu0 %v14305_v24  ;;  %v14312_v7 = vld [vmem:[#allocation12 + $0x248] ss:$16 sps:$4 sm:$0xff]  }
 0x20a   :  { %v1531_v56 = vmax.f32 %v1467_v34, 0.0  ;;  %v1533_v4 = vmax.f32 %v1469_v35, 0.0  ;;  %v16459_v5 = vadd.f32 %v16399_v51, %v1147_v15  ;;  %v16462_v17 = vadd.f32 %v16403_v30, %v1373_v20  ;;  %5575 = vmatprep.subr.bf16.mxu1 %v14308_v16  ;;  %v14317_v20 = vld [vmem:[#allocation12 + $0x264] ss:$16 sps:$4 sm:$0xff]   ;;  %v2074_v0 = vld [vmem:[#allocation3 + $0x60] sm:$0xff]  ;;  %v2080_v58 = vld [vmem:[#allocation3 + $0x70] sm:$0xff] }
 0x20b   :  { %v16465_v13 = vadd.f32 %v16406_v59, %v1149_v21  ;;  %v16468_v57 = vadd.f32 %v16410_v55, %v1375_v45  ;;  %v1586_v22 = vpack.c.bf16 %v1530_v48, %v1526_v37  ;;  %v1588_v40 = vpack.c.bf16 %v1532_v3, %v1528_v42  ;;  %v2298_v52 = vld [vmem:[#allocation3 + $0xa0] sm:$0xff]  ;;  %v2304_v28 = vld [vmem:[#allocation3 + $0xb0] sm:$0xff] }
 0x20c   :  { %v1587_v62 = vpack.c.bf16 %v1531_v56, %v1527_v47  ;;  %v1589_v63 = vpack.c.bf16 %v1533_v4, %v1529_v60  ;;  %v16474_v14 = vpop.f32.mrb[12].mxu0  ;;  %v16476_v15 = vpop.f32.mrb[12].mxu1  ;;  %4898 = vmatpush1.bf16.msra.mxu0 %v14303_v19  ;;  %v14320_v34 = vld [vmem:[#allocation12 + $0x26c] ss:$16 sps:$4 sm:$0xff]   ;;  %v2077_v19 = vld [vmem:[#allocation3 + $0x68] sm:$0xff] }
 0x20d   :  { %v1835_v8 = vshrl.u32 %v1586_v22, 16  ;;  %v1838_v54 = vshll.u32 %v1586_v22, 16  ;;  %2162 = vst [vmem:[#allocation3 + $0x80] sm:$0xff] %v1586_v22  ;;  %v1849_v9 = vshrl.u32 %v1588_v40, 16  ;;  %v1852_v10 = vshll.u32 %v1588_v40, 16  ;;  %2164 = vst [vmem:[#allocation3 + $0x90] sm:$0xff] %v1588_v40  ;;  %5576 = vmatpush1.bf16.msra.mxu1 %v14306_v2  ;;  %4899 = vmatprep.subr.bf16.mxu0 %v14311_v33 }
 0x20e   :  { %2163 = vst [vmem:[#allocation3 + $0x88] sm:$0xff] %v1587_v62  ;;  %2165 = vst [vmem:[#allocation3 + $0x98] sm:$0xff] %v1589_v63  ;;  %v1842_v61 = vshrl.u32 %v1587_v62, 16  ;;  %v1845_v21 = vshll.u32 %v1587_v62, 16  ;;  %v1856_v45 = vshrl.u32 %v1589_v63, 16  ;;  %v1859_v24 = vshll.u32 %v1589_v63, 16  ;;  %5577 = vmatprep.subr.bf16.mxu1 %v14314_v12 }
 0x20f   :  { %v1159_v25 = vpop.f32.mrb[13].mxu0  ;;  %v1385_v27 = vpop.f32.mrb[13].mxu1  ;;  %v1837_v35 = vrot.slane %v1835_v8, 7  ;;  %v2198_v16 = vrot.slane %v1838_v54, 1  ;;  %v1851_v37 = vrot.slane %v1849_v9, 7  ;;  %v2202_v42 = vrot.slane %v1852_v10, 1 }
 0x210   :  { %v16478_v2 = vpop.f32.mrb[14].mxu0  ;;  %v16480_v47 = vpop.f32.mrb[14].mxu1  ;;  %v1844_v60 = vrot.slane %v1842_v61, 7  ;;  %v2200_v48 = vrot.slane %v1845_v21, 1  ;;  %v1858_v3 = vrot.slane %v1856_v45, 7  ;;  %v2204_v56 = vrot.slane %v1859_v24, 1  ;;  %4900 = vmatpush1.bf16.msra.mxu0 %v14309_v1 }
 0x211   :  { %v16482_v4 = vpop.f32.mrb[15].mxu0  ;;  %v16484_v22 = vpop.f32.mrb[15].mxu1  ;;  %v1840_v33 = vor.u32 %v1838_v54, %v1837_v35  ;;  %v2199_v12 = vor.u32 %v2198_v16, %v1835_v8  ;;  %v1854_v40 = vor.u32 %v1852_v10, %v1851_v37  ;;  %v2203_v62 = vor.u32 %v2202_v42, %v1849_v9  ;;  %v2301_v63 = vld [vmem:[#allocation3 + $0xa8] sm:$0xff]  ;;  %5578 = vmatpush1.bf16.msra.mxu1 %v14312_v7  ;;  %v2095_v16 = vld [vmem:[#allocation3 + $0xd8] sm:$0xff] }
 0x212   :  { %v1847_v46 = vor.u32 %v1845_v21, %v1844_v60  ;;  %v2201_v43 = vor.u32 %v2200_v48, %v1842_v61  ;;  %v1861_v23 = vor.u32 %v1859_v24, %v1858_v3  ;;  %v2205_v18 = vor.u32 %v2204_v56, %v1856_v45  ;;  %4901 = vmatprep.subr.bf16.mxu0 %v14317_v20  ;;  %v14326_v20 = vld [vmem:[#allocation12 + $0x28c] ss:$16 sps:$4 sm:$0xff]   ;;  %v14321_v61 = vld [vmem:[#allocation12 + $0x280] ss:$16 sps:$4 sm:$0xff]   ;;  %v14324_v21 = vld [vmem:[#allocation12 + $0x288] ss:$16 sps:$4 sm:$0xff]  }
 0x213   :  { %v2075_v29 = vsel %vm15992_vm5, %v1840_v33, %v2074_v0  ;;  %v2299_v49 = vsel %vm16143_vm10, %v2199_v12, %v2298_v52  ;;  %v2081_v8 = vsel %vm15992_vm5, %v1854_v40, %v2080_v58  ;;  %v2305_v54 = vsel %vm16143_vm10, %v2203_v62, %v2304_v28  ;;  %v14315_v0 = vld [vmem:[#allocation12 + $0x260] ss:$16 sps:$4 sm:$0xff]   ;;  %v14318_v52 = vld [vmem:[#allocation12 + $0x268] ss:$16 sps:$4 sm:$0xff]   ;;  %5579 = vmatprep.subr.bf16.mxu1 %v14320_v34  ;;  %v14329_v62 = vld [vmem:[#allocation12 + $0x2a4] ss:$16 sps:$4 sm:$0xff]  }
 0x214   :  { %2076 = vst [vmem:[#allocation3 + $0x60] sm:$0xff] %v2075_v29  ;;  %2300 = vst [vmem:[#allocation3 + $0xa0] sm:$0xff] %v2299_v49  ;;  %v2078_v1 = vsel %vm15992_vm5, %v1847_v46, %v2077_v19  ;;  %v2302_v7 = vsel %vm16143_vm10, %v2201_v43, %v2301_v63  ;;  %v2084_v9 = vsel %vm15992_vm5, %v1861_v23, %v2083_v31  ;;  %v14323_v23 = vld [vmem:[#allocation12 + $0x284] ss:$16 sps:$4 sm:$0xff]   ;;  %4902 = vmatpush1.bf16.msra.mxu0 %v14315_v0  ;;  %v14332_v63 = vld [vmem:[#allocation12 + $0x2ac] ss:$16 sps:$4 sm:$0xff]  }
 0x215   :  { %2082 = vst [vmem:[#allocation3 + $0x70] sm:$0xff] %v2081_v8  ;;  %2306 = vst [vmem:[#allocation3 + $0xb0] sm:$0xff] %v2305_v54  ;;  %v2308_v10 = vsel %vm16143_vm10, %v2205_v18, %v2307_v50  ;;  %v1474_v49 = vadd.f32 %v16399_v51, %v16450_v41  ;;  %v1476_v46 = vadd.f32 %v16403_v30, %v16452_v36  ;;  %v16510_v50 = vpop.f32.mrb[16].mxu0  ;;  %v16512_v18 = vpop.f32.mrb[16].mxu1  ;;  %4824 = vmatprep.mubr.bf16.mxu0 %v2078_v1  ;;  %v2092_v0 = vld [vmem:[#allocation3 + $0xd0] sm:$0xff]  ;;  %v2313_v37 = vld [vmem:[#allocation3 + $0x108] sm:$0xff] }
 0x216   :  { %2079 = vst [vmem:[#allocation3 + $0x68] sm:$0xff] %v2078_v1  ;;  %2303 = vst [vmem:[#allocation3 + $0xa8] sm:$0xff] %v2302_v7  ;;  %v1475_v43 = vadd.f32 %v16406_v59, %v16454_v11  ;;  %v1477_v31 = vadd.f32 %v16410_v55, %v16456_v32  ;;  %v16516_v58 = vadd.f32 %v16399_v51, %v16474_v14  ;;  %v16528_v32 = vpop.f32.mrb[17].mxu0  ;;  %v16530_v28 = vpop.f32.mrb[17].mxu1  ;;  %5502 = vmatprep.mubr.bf16.mxu1 %v2078_v1 }
 0x217   :  { %2085 = vst [vmem:[#allocation3 + $0x78] sm:$0xff] %v2084_v9  ;;  %2309 = vst [vmem:[#allocation3 + $0xb8] sm:$0xff] %v2308_v10  ;;  %v16520_v41 = vadd.f32 %v16403_v30, %v16476_v15  ;;  %v16523_v36 = vadd.f32 %v16406_v59, %v1159_v25  ;;  %v16526_v11 = vadd.f32 %v16410_v55, %v1385_v27  ;;  %v1538_v45 = vmax.f32 %v1474_v49, 0.0  ;;  %v16532_v35 = vpop.f32.mrb[18].mxu0  ;;  %v16534_v15 = vpop.f32.mrb[18].mxu1  ;;  %v2086_v9 = vld [vmem:[#allocation3 + $0xc0] sm:$0xff] }
 0x218   :  { %v1540_v14 = vmax.f32 %v1476_v46, 0.0  ;;  %v1539_v24 = vmax.f32 %v1475_v43, 0.0  ;;  %v1541_v34 = vmax.f32 %v1477_v31, 0.0  ;;  %4825 = vmatmul.mubr.bf16.gmra.mrb[36].mxu0 %v2075_v29  ;;  %5503 = vmatmul.mubr.bf16.gmra.mrb[36].mxu1 %v2075_v29  ;;  %v16540_v42 = vpop.f32.mrb[19].mxu0  ;;  %v16542_v19 = vpop.f32.mrb[19].mxu1  ;;  %v18350_v60 = vmax.f32 %v16459_v5, 0.0 }
 0x219   :  { %5580 = vmatpush1.bf16.msra.mxu1 %v14318_v52  ;;  %v18351_v3 = vmax.f32 %v16462_v17, 0.0  ;;  %v18352_v56 = vmax.f32 %v16465_v13, 0.0  ;;  %v18353_v12 = vmax.f32 %v16468_v57, 0.0  ;;  %4903 = vmatprep.subr.bf16.mxu0 %v14323_v23  ;;  %v16554_v8 = vadd.f32 %v16399_v51, %v16478_v2  ;;  %v14327_v57 = vld [vmem:[#allocation12 + $0x2a0] ss:$16 sps:$4 sm:$0xff]   ;;  %v2319_v27 = vld [vmem:[#allocation3 + $0x118] sm:$0xff] }
 0x21a   :  { %v1590_v48 = vpack.c.bf16 %v1538_v45, %v18350_v60  ;;  %v16558_v5 = vadd.f32 %v16403_v30, %v16480_v47  ;;  %v16562_v17 = vadd.f32 %v16406_v59, %v16482_v4  ;;  %v16566_v13 = vadd.f32 %v16410_v55, %v16484_v22  ;;  %5581 = vmatprep.subr.bf16.mxu1 %v14326_v20  ;;  %v14330_v47 = vld [vmem:[#allocation12 + $0x2a8] ss:$16 sps:$4 sm:$0xff]   ;;  %v2310_v10 = vld [vmem:[#allocation3 + $0x100] sm:$0xff]  ;;  %v2316_v4 = vld [vmem:[#allocation3 + $0x110] sm:$0xff] }
 0x21b   :  { %v1592_v29 = vpack.c.bf16 %v1540_v14, %v18351_v3  ;;  %v1591_v33 = vpack.c.bf16 %v1539_v24, %v18352_v56  ;;  %v1593_v40 = vpack.c.bf16 %v1541_v34, %v18353_v12  ;;  %4904 = vmatpush1.bf16.msra.mxu0 %v14321_v61  ;;  %v14335_v43 = vld [vmem:[#allocation12 + $0x2c4] ss:$16 sps:$4 sm:$0xff]  }
 0x21c   :  { %v1863_v54 = vshrl.u32 %v1590_v48, 16  ;;  %v1866_v1 = vshll.u32 %v1590_v48, 16  ;;  %2166 = vst [vmem:[#allocation3 + $0xe0] sm:$0xff] %v1590_v48  ;;  %v2089_v14 = vld [vmem:[#allocation3 + $0xc8] sm:$0xff]  ;;  %v16568_v24 = vpop.f32.mrb[20].mxu0  ;;  %v16570_v34 = vpop.f32.mrb[20].mxu1  ;;  %4905 = vmatprep.subr.bf16.mxu0 %v14329_v62 }
 0x21d   :  { %v1877_v7 = vshrl.u32 %v1592_v29, 16  ;;  %v1880_v2 = vshll.u32 %v1592_v29, 16  ;;  %2168 = vst [vmem:[#allocation3 + $0xf0] sm:$0xff] %v1592_v29  ;;  %2167 = vst [vmem:[#allocation3 + $0xe8] sm:$0xff] %v1591_v33  ;;  %v1870_v52 = vshrl.u32 %v1591_v33, 16  ;;  %v1873_v49 = vshll.u32 %v1591_v33, 16  ;;  %5582 = vmatpush1.bf16.msra.mxu1 %v14324_v21 }
 0x21e   :  { %2169 = vst [vmem:[#allocation3 + $0xf8] sm:$0xff] %v1593_v40  ;;  %v1884_v46 = vshrl.u32 %v1593_v40, 16  ;;  %v1887_v22 = vshll.u32 %v1593_v40, 16  ;;  %v1865_v31 = vrot.slane %v1863_v54, 7  ;;  %v2206_v23 = vrot.slane %v1866_v1, 1  ;;  %5583 = vmatprep.subr.bf16.mxu1 %v14332_v63  ;;  %v16572_v56 = vpop.f32.mrb[21].mxu0 }
 0x21f   :  { %v1879_v20 = vrot.slane %v1877_v7, 7  ;;  %v2210_v45 = vrot.slane %v1880_v2, 1  ;;  %v1872_v60 = vrot.slane %v1870_v52, 7  ;;  %v2208_v48 = vrot.slane %v1873_v49, 1  ;;  %18354 = vst [vmem:[#allocation33_spill] sm:$0xff] %v16572_v56  ;;  %v16574_v61 = vpop.f32.mrb[21].mxu1  ;;  %4906 = vmatpush1.bf16.msra.mxu0 %v14327_v57 }
 0x220   :  { %v1886_v3 = vrot.slane %v1884_v46, 7  ;;  %v2212_v29 = vrot.slane %v1887_v22, 1  ;;  %v1868_v21 = vor.u32 %v1866_v1, %v1865_v31  ;;  %v2207_v33 = vor.u32 %v2206_v23, %v1863_v54  ;;  %v16576_v25 = vpop.f32.mrb[22].mxu0  ;;  %v16578_v38 = vpop.f32.mrb[22].mxu1  ;;  %4907 = vmatprep.subr.bf16.mxu0 %v14335_v43 }
 0x221   :  { %v1882_v12 = vor.u32 %v1880_v2, %v1879_v20  ;;  %v2211_v40 = vor.u32 %v2210_v45, %v1877_v7  ;;  %v1875_v62 = vor.u32 %v1873_v49, %v1872_v60  ;;  %v2209_v63 = vor.u32 %v2208_v48, %v1870_v52  ;;  %v16580_v44 = vpop.f32.mrb[23].mxu0  ;;  %v16582_v56 = vpop.f32.mrb[23].mxu1  ;;  %5584 = vmatpush1.bf16.msra.mxu1 %v14330_v47  ;;  %v14333_v52 = vld [vmem:[#allocation12 + $0x2c0] ss:$16 sps:$4 sm:$0xff]   ;;  %v14338_v47 = vld [vmem:[#allocation12 + $0x2cc] ss:$16 sps:$4 sm:$0xff]  }
 0x222   :  { %v1889_v39 = vor.u32 %v1887_v22, %v1886_v3  ;;  %v2213_v6 = vor.u32 %v2212_v29, %v1884_v46  ;;  %v2087_v54 = vsel %vm15992_vm5, %v1868_v21, %v2086_v9  ;;  %v2311_v1 = vsel %vm16143_vm10, %v2207_v33, %v2310_v10  ;;  %5585 = vmatprep.subr.bf16.mxu1 %v14338_v47  ;;  %v2325_v48 = vld [vmem:[#allocation3 + $0x168] sm:$0xff] }
 0x223   :  { %v2093_v7 = vsel %vm15992_vm5, %v1882_v12, %v2092_v0  ;;  %v2317_v2 = vsel %vm16143_vm10, %v2211_v40, %v2316_v4  ;;  %2088 = vst [vmem:[#allocation3 + $0xc0] sm:$0xff] %v2087_v54  ;;  %2312 = vst [vmem:[#allocation3 + $0x100] sm:$0xff] %v2311_v1  ;;  %v2090_v57 = vsel %vm15992_vm5, %v1875_v62, %v2089_v14  ;;  %v14336_v4 = vld [vmem:[#allocation12 + $0x2c8] ss:$16 sps:$4 sm:$0xff]   ;;  %v1546_v49 = vmax.f32 %v16554_v8, 0.0  ;;  %v2104_v1 = vld [vmem:[#allocation3 + $0x130] sm:$0xff] }
 0x224   :  { %2094 = vst [vmem:[#allocation3 + $0xd0] sm:$0xff] %v2093_v7  ;;  %2318 = vst [vmem:[#allocation3 + $0x110] sm:$0xff] %v2317_v2  ;;  %v2314_v9 = vsel %vm16143_vm10, %v2209_v63, %v2313_v37  ;;  %v2096_v10 = vsel %vm15992_vm5, %v1889_v39, %v2095_v16  ;;  %v2320_v0 = vsel %vm16143_vm10, %v2213_v6, %v2319_v27  ;;  %v1548_v46 = vmax.f32 %v16558_v5, 0.0  ;;  %v14341_v39 = vld [vmem:[#allocation12 + $0x2e4] ss:$16 sps:$4 sm:$0xff]   ;;  %v16630_v45 = vpop.f32.mrb[24].mxu1 }
 0x225   :  { %2091 = vst [vmem:[#allocation3 + $0xc8] sm:$0xff] %v2090_v57  ;;  %2315 = vst [vmem:[#allocation3 + $0x108] sm:$0xff] %v2314_v9  ;;  %v1547_v37 = vmax.f32 %v16562_v17, 0.0  ;;  %v1549_v22 = vmax.f32 %v16566_v13, 0.0  ;;  %4834 = vmatprep.mubr.bf16.mxu0 %v2090_v57  ;;  %5512 = vmatprep.mubr.bf16.mxu1 %v2090_v57  ;;  %v16606_v6 = vadd.f32 %v16399_v51, %v16510_v50  ;;  %v14344_v5 = vld [vmem:[#allocation12 + $0x2ec] ss:$16 sps:$4 sm:$0xff]  }
 0x226   :  { %2097 = vst [vmem:[#allocation3 + $0xd8] sm:$0xff] %v2096_v10  ;;  %2321 = vst [vmem:[#allocation3 + $0x118] sm:$0xff] %v2320_v0  ;;  %v16610_v27 = vadd.f32 %v16403_v30, %v16512_v18  ;;  %v16614_v16 = vadd.f32 %v16406_v59, %v16528_v32  ;;  %v16618_v8 = vadd.f32 %v16410_v55, %v16530_v28  ;;  %4835 = vmatmul.mubr.bf16.gmra.mrb[40].mxu0 %v2087_v54  ;;  %v16628_v32 = vpop.f32.mrb[24].mxu0  ;;  %v14339_v28 = vld [vmem:[#allocation12 + $0x2e0] ss:$16 sps:$4 sm:$0xff]   ;;  %v16638_v3 = vpop.f32.mrb[25].mxu1 }
 0x227   :  { %v18355_v17 = vmax.f32 %v16516_v58, 0.0  ;;  %v18356_v50 = vmax.f32 %v16520_v41, 0.0  ;;  %v18357_v31 = vmax.f32 %v16523_v36, 0.0  ;;  %v18358_v23 = vmax.f32 %v16526_v11, 0.0  ;;  %5513 = vmatmul.mubr.bf16.gmra.mrb[40].mxu1 %v2087_v54  ;;  %v14342_v14 = vld [vmem:[#allocation12 + $0x2e8] ss:$16 sps:$4 sm:$0xff]   ;;  %4908 = vmatpush1.bf16.msra.mxu0 %v14333_v52 }
 0x228   :  { %v16636_v36 = vpop.f32.mrb[25].mxu0  ;;  %v14347_v11 = vld [vmem:[#allocation12 + $0x304] ss:$16 sps:$4 sm:$0xff]   ;;  %v16642_v62 = vpop.f32.mrb[26].mxu1  ;;  %5586 = vmatpush1.bf16.msra.mxu1 %v14336_v4  ;;  %4909 = vmatprep.subr.bf16.mxu0 %v14341_v39  ;;  %v2098_v63 = vld [vmem:[#allocation3 + $0x120] sm:$0xff]  ;;  %v2328_v7 = vld [vmem:[#allocation3 + $0x170] sm:$0xff] }
 0x229   :  { %v1594_v13 = vpack.c.bf16 %v1546_v49, %v18355_v17  ;;  %v1596_v43 = vpack.c.bf16 %v1548_v46, %v18356_v50  ;;  %v1595_v18 = vpack.c.bf16 %v1547_v37, %v18357_v31  ;;  %v1597_v20 = vpack.c.bf16 %v1549_v22, %v18358_v23  ;;  %v16640_v40 = vpop.f32.mrb[26].mxu0  ;;  %18359 = vst [vmem:[#allocation34_spill] sm:$0xff] %v16642_v62  ;;  %v2322_v54 = vld [vmem:[#allocation3 + $0x160] sm:$0xff]  ;;  %v16646_v52 = vpop.f32.mrb[27].mxu1  ;;  %v2101_v22 = vld [vmem:[#allocation3 + $0x128] sm:$0xff]  ;;  %v2107_v41 = vld [vmem:[#allocation3 + $0x138] sm:$0xff] }
 0x22a   :  { %v16644_v0 = vpop.f32.mrb[27].mxu0  ;;  %18361 = vst [vmem:[#allocation36_spill] sm:$0xff] %v16646_v52  ;;  %5587 = vmatprep.subr.bf16.mxu1 %v14344_v5  ;;  %v14350_v4 = vld [vmem:[#allocation12 + $0x30c] ss:$16 sps:$4 sm:$0xff]   ;;  %v2331_v58 = vld [vmem:[#allocation3 + $0x178] sm:$0xff] }
 0x22b   :  { %v1891_v29 = vshrl.u32 %v1594_v13, 16  ;;  %v1894_v21 = vshll.u32 %v1594_v13, 16  ;;  %2170 = vst [vmem:[#allocation3 + $0x140] sm:$0xff] %v1594_v13  ;;  %v1905_v33 = vshrl.u32 %v1596_v43, 16  ;;  %v1908_v12 = vshll.u32 %v1596_v43, 16  ;;  %2172 = vst [vmem:[#allocation3 + $0x150] sm:$0xff] %v1596_v43  ;;  %4910 = vmatpush1.bf16.msra.mxu0 %v14339_v28 }
 0x22c   :  { %2171 = vst [vmem:[#allocation3 + $0x148] sm:$0xff] %v1595_v18  ;;  %2173 = vst [vmem:[#allocation3 + $0x158] sm:$0xff] %v1597_v20  ;;  %v1898_v2 = vshrl.u32 %v1595_v18, 16  ;;  %v1901_v57 = vshll.u32 %v1595_v18, 16  ;;  %v1912_v9 = vshrl.u32 %v1597_v20, 16  ;;  %v1915_v10 = vshll.u32 %v1597_v20, 16  ;;  %5588 = vmatpush1.bf16.msra.mxu1 %v14342_v14  ;;  %4911 = vmatprep.subr.bf16.mxu0 %v14347_v11 }
 0x22d   :  { %18360 = vst [vmem:[#allocation35_spill] sm:$0xff] %v16644_v0  ;;  %v1893_v47 = vrot.slane %v1891_v29, 7  ;;  %v2214_v49 = vrot.slane %v1894_v21, 1  ;;  %v1907_v46 = vrot.slane %v1905_v33, 7  ;;  %v2218_v37 = vrot.slane %v1908_v12, 1  ;;  %v16658_v14 = vpop.f32.mrb[28].mxu1  ;;  %5589 = vmatprep.subr.bf16.mxu1 %v14350_v4 }
 0x22e   :  { %v1900_v39 = vrot.slane %v1898_v2, 7  ;;  %v2216_v17 = vrot.slane %v1901_v57, 1  ;;  %v1914_v13 = vrot.slane %v1912_v9, 7  ;;  %v2220_v50 = vrot.slane %v1915_v10, 1  ;;  %v14345_v43 = vld [vmem:[#allocation12 + $0x300] ss:$16 sps:$4 sm:$0xff]  }
 0x22f   :  { %v1896_v31 = vor.u32 %v1894_v21, %v1893_v47  ;;  %v2215_v18 = vor.u32 %v2214_v49, %v1891_v29  ;;  %v1910_v23 = vor.u32 %v1908_v12, %v1907_v46  ;;  %v2219_v20 = vor.u32 %v2218_v37, %v1905_v33  ;;  %v16656_v33 = vpop.f32.mrb[28].mxu0  ;;  %4912 = vmatpush1.bf16.msra.mxu0 %v14345_v43  ;;  %v14351_v46 = vld [vmem:[#allocation12 + $0x320] ss:$16 sps:$4 sm:$0xff]   ;;  %v14362_v43 = vld [vmem:[#allocation12 + $0x34c] ss:$16 sps:$4 sm:$0xff]  }
 0x230   :  { %v1903_v5 = vor.u32 %v1901_v57, %v1900_v39  ;;  %v2217_v60 = vor.u32 %v2216_v17, %v1898_v2  ;;  %v1917_v52 = vor.u32 %v1915_v10, %v1914_v13  ;;  %v2221_v0 = vor.u32 %v2220_v50, %v1912_v9  ;;  %v14348_v2 = vld [vmem:[#allocation12 + $0x308] ss:$16 sps:$4 sm:$0xff]   ;;  %v14353_v57 = vld [vmem:[#allocation12 + $0x324] ss:$16 sps:$4 sm:$0xff]  }
 0x231   :  { %v2099_v62 = vsel %vm15992_vm5, %v1896_v31, %v2098_v63  ;;  %v2323_v28 = vsel %vm16143_vm10, %v2215_v18, %v2322_v54  ;;  %v2105_v29 = vsel %vm15992_vm5, %v1910_v23, %v2104_v1  ;;  %v2329_v21 = vsel %vm16143_vm10, %v2219_v20, %v2328_v7  ;;  %v16668_v1 = vpop.f32.mrb[29].mxu0  ;;  %v16670_v7 = vpop.f32.mrb[29].mxu1  ;;  %v14359_v39 = vld [vmem:[#allocation12 + $0x344] ss:$16 sps:$4 sm:$0xff]   ;;  %5590 = vmatpush1.bf16.msra.mxu1 %v14348_v2  ;;  %v2334_v2 = vld [vmem:[#allocation3 + $0x1c0] sm:$0xff] }
 0x232   :  { %2100 = vst [vmem:[#allocation3 + $0x120] sm:$0xff] %v2099_v62  ;;  %2324 = vst [vmem:[#allocation3 + $0x160] sm:$0xff] %v2323_v28  ;;  %v2102_v11 = vsel %vm15992_vm5, %v1903_v5, %v2101_v22  ;;  %v2326_v12 = vsel %vm16143_vm10, %v2217_v60, %v2325_v48  ;;  %v2108_v63 = vsel %vm15992_vm5, %v1917_v52, %v2107_v41  ;;  %v16680_v9 = vpop.f32.mrb[30].mxu0  ;;  %v16682_v10 = vpop.f32.mrb[30].mxu1  ;;  %4913 = vmatprep.subr.bf16.mxu0 %v14353_v57  ;;  %v2340_v57 = vld [vmem:[#allocation3 + $0x1d0] sm:$0xff]  ;;  %v2343_v50 = vld [vmem:[#allocation3 + $0x1d8] sm:$0xff] }
 0x233   :  { %2106 = vst [vmem:[#allocation3 + $0x130] sm:$0xff] %v2105_v29  ;;  %2330 = vst [vmem:[#allocation3 + $0x170] sm:$0xff] %v2329_v21  ;;  %v2332_v54 = vsel %vm16143_vm10, %v2221_v0, %v2331_v58  ;;  %v1490_v60 = vadd.f32 %v16399_v51, %v16532_v35  ;;  %v1492_v41 = vadd.f32 %v16403_v30, %v16534_v15  ;;  %4844 = vmatprep.mubr.bf16.mxu0 %v2102_v11  ;;  %v14356_v0 = vld [vmem:[#allocation12 + $0x32c] ss:$16 sps:$4 sm:$0xff]   ;;  %v16700_v47 = vpop.f32.mrb[31].mxu0  ;;  %v16702_v49 = vpop.f32.mrb[31].mxu1 }
 0x234   :  { %2103 = vst [vmem:[#allocation3 + $0x128] sm:$0xff] %v2102_v11  ;;  %2327 = vst [vmem:[#allocation3 + $0x168] sm:$0xff] %v2326_v12  ;;  %v1491_v58 = vadd.f32 %v16406_v59, %v16540_v42  ;;  %v1493_v48 = vadd.f32 %v16410_v55, %v16542_v19  ;;  %v16686_v52 = vadd.f32 %v16399_v51, %v16568_v24  ;;  %v18362_v15 = vld [vmem:[#allocation33_spill] sm:$0xff]  ;;  %5522 = vmatprep.mubr.bf16.mxu1 %v2102_v11  ;;  %v14354_v24 = vld [vmem:[#allocation12 + $0x328] ss:$16 sps:$4 sm:$0xff]  }
 0x235   :  { %2109 = vst [vmem:[#allocation3 + $0x138] sm:$0xff] %v2108_v63  ;;  %2333 = vst [vmem:[#allocation3 + $0x178] sm:$0xff] %v2332_v54  ;;  %v16690_v35 = vadd.f32 %v16403_v30, %v16570_v34  ;;  %v16694_v42 = vadd.f32 %v16406_v59, %v18362_v15  ;;  %v16698_v19 = vadd.f32 %v16410_v55, %v16574_v61  ;;  %v1554_v37 = vmax.f32 %v1490_v60, 0.0  ;;  %v2110_v54 = vld [vmem:[#allocation3 + $0x180] sm:$0xff] }
 0x236   :  { %18363 = vst [vmem:[#allocation33_spill] sm:$0xff] %v16702_v49  ;;  %v1556_v22 = vmax.f32 %v1492_v41, 0.0  ;;  %v1555_v4 = vmax.f32 %v1491_v58, 0.0  ;;  %v1557_v34 = vmax.f32 %v1493_v48, 0.0  ;;  %4845 = vmatmul.mubr.bf16.gmra.mrb[44].mxu0 %v2099_v62  ;;  %5523 = vmatmul.mubr.bf16.gmra.mrb[44].mxu1 %v2099_v62  ;;  %v18364_v31 = vmax.f32 %v16606_v6, 0.0 }
 0x237   :  { %v18365_v23 = vmax.f32 %v16610_v27, 0.0  ;;  %v18366_v62 = vmax.f32 %v16614_v16, 0.0  ;;  %v18367_v28 = vmax.f32 %v16618_v8, 0.0  ;;  %5591 = vmatprep.subr.bf16.mxu1 %v14356_v0  ;;  %v16718_v21 = vadd.f32 %v16399_v51, %v16576_v25  ;;  %4914 = vmatpush1.bf16.msra.mxu0 %v14351_v46  ;;  %v14357_v16 = vld [vmem:[#allocation12 + $0x340] ss:$16 sps:$4 sm:$0xff]  }
 0x238   :  { %v1598_v18 = vpack.c.bf16 %v1554_v37, %v18364_v31  ;;  %v16722_v11 = vadd.f32 %v16403_v30, %v16578_v38  ;;  %v16726_v6 = vadd.f32 %v16406_v59, %v16580_v44  ;;  %v16730_v27 = vadd.f32 %v16410_v55, %v16582_v56  ;;  %4915 = vmatprep.subr.bf16.mxu0 %v14359_v39  ;;  %v14365_v38 = vld [vmem:[#allocation12 + $0x364] ss:$16 sps:$4 sm:$0xff]   ;;  %v2116_v44 = vld [vmem:[#allocation3 + $0x190] sm:$0xff]  ;;  %v14360_v48 = vld [vmem:[#allocation12 + $0x348] ss:$16 sps:$4 sm:$0xff]  }
 0x239   :  { %v1600_v20 = vpack.c.bf16 %v1556_v22, %v18365_v23  ;;  %v1599_v5 = vpack.c.bf16 %v1555_v4, %v18366_v62  ;;  %v1601_v29 = vpack.c.bf16 %v1557_v34, %v18367_v28  ;;  %5592 = vmatpush1.bf16.msra.mxu1 %v14354_v24  ;;  %v2113_v22 = vld [vmem:[#allocation3 + $0x188] sm:$0xff]  ;;  %v14368_v4 = vld [vmem:[#allocation12 + $0x36c] ss:$16 sps:$4 sm:$0xff]   ;;  %v14363_v23 = vld [vmem:[#allocation12 + $0x360] ss:$16 sps:$4 sm:$0xff]  }
 0x23a   :  { %v1919_v8 = vshrl.u32 %v1598_v18, 16  ;;  %v1922_v12 = vshll.u32 %v1598_v18, 16  ;;  %2174 = vst [vmem:[#allocation3 + $0x1a0] sm:$0xff] %v1598_v18  ;;  %5593 = vmatprep.subr.bf16.mxu1 %v14362_v43  ;;  %v2119_v24 = vld [vmem:[#allocation3 + $0x198] sm:$0xff] }
 0x23b   :  { %v1933_v63 = vshrl.u32 %v1600_v20, 16  ;;  %v1936_v25 = vshll.u32 %v1600_v20, 16  ;;  %2176 = vst [vmem:[#allocation3 + $0x1b0] sm:$0xff] %v1600_v20  ;;  %2175 = vst [vmem:[#allocation3 + $0x1a8] sm:$0xff] %v1599_v5  ;;  %v1926_v60 = vshrl.u32 %v1599_v5, 16  ;;  %v1929_v41 = vshll.u32 %v1599_v5, 16  ;;  %4916 = vmatpush1.bf16.msra.mxu0 %v14357_v16 }
 0x23c   :  { %2177 = vst [vmem:[#allocation3 + $0x1b8] sm:$0xff] %v1601_v29  ;;  %v1940_v56 = vshrl.u32 %v1601_v29, 16  ;;  %v1943_v58 = vshll.u32 %v1601_v29, 16  ;;  %v1921_v0 = vrot.slane %v1919_v8, 7  ;;  %v2222_v15 = vrot.slane %v1922_v12, 1  ;;  %v2337_v29 = vld [vmem:[#allocation3 + $0x1c8] sm:$0xff]  ;;  %4917 = vmatprep.subr.bf16.mxu0 %v14365_v38 }
 0x23d   :  { %v1935_v46 = vrot.slane %v1933_v63, 7  ;;  %v2226_v37 = vrot.slane %v1936_v25, 1  ;;  %v1928_v34 = vrot.slane %v1926_v60, 7  ;;  %v2224_v39 = vrot.slane %v1929_v41, 1  ;;  %5594 = vmatpush1.bf16.msra.mxu1 %v14360_v48 }
 0x23e   :  { %v1942_v31 = vrot.slane %v1940_v56, 7  ;;  %v2228_v18 = vrot.slane %v1943_v58, 1  ;;  %v1924_v20 = vor.u32 %v1922_v12, %v1921_v0  ;;  %v2223_v62 = vor.u32 %v2222_v15, %v1919_v8  ;;  %5595 = vmatprep.subr.bf16.mxu1 %v14368_v4 }
 0x23f   :  { %v1938_v5 = vor.u32 %v1936_v25, %v1935_v46  ;;  %v2227_v28 = vor.u32 %v2226_v37, %v1933_v63  ;;  %v1931_v61 = vor.u32 %v1929_v41, %v1928_v34  ;;  %v2225_v13 = vor.u32 %v2224_v39, %v1926_v60  ;;  %4918 = vmatpush1.bf16.msra.mxu0 %v14363_v23  ;;  %v14380_v46 = vld [vmem:[#allocation12 + $0x3ac] ss:$16 sps:$4 sm:$0xff]  }
 0x240   :  { %v1945_v17 = vor.u32 %v1943_v58, %v1942_v31  ;;  %v2229_v49 = vor.u32 %v2228_v18, %v1940_v56  ;;  %v2111_v43 = vsel %vm15992_vm5, %v1924_v20, %v2110_v54  ;;  %v2335_v16 = vsel %vm16143_vm10, %v2223_v62, %v2334_v2  ;;  %v14366_v2 = vld [vmem:[#allocation12 + $0x368] ss:$16 sps:$4 sm:$0xff]   ;;  %v2122_v39 = vld [vmem:[#allocation3 + $0x1e0] sm:$0xff]  ;;  %v2128_v18 = vld [vmem:[#allocation3 + $0x1f0] sm:$0xff] }
 0x241   :  { %v2117_v8 = vsel %vm15992_vm5, %v1938_v5, %v2116_v44  ;;  %v2341_v12 = vsel %vm16143_vm10, %v2227_v28, %v2340_v57  ;;  %2112 = vst [vmem:[#allocation3 + $0x180] sm:$0xff] %v2111_v43  ;;  %2336 = vst [vmem:[#allocation3 + $0x1c0] sm:$0xff] %v2335_v16  ;;  %v2114_v63 = vsel %vm15992_vm5, %v1931_v61, %v2113_v22  ;;  %v14369_v44 = vld [vmem:[#allocation12 + $0x380] ss:$16 sps:$4 sm:$0xff]   ;;  %v14371_v57 = vld [vmem:[#allocation12 + $0x384] ss:$16 sps:$4 sm:$0xff]   ;;  %5596 = vmatpush1.bf16.msra.mxu1 %v14366_v2 }
 0x242   :  { %2118 = vst [vmem:[#allocation3 + $0x190] sm:$0xff] %v2117_v8  ;;  %2342 = vst [vmem:[#allocation3 + $0x1d0] sm:$0xff] %v2341_v12  ;;  %v2338_v25 = vsel %vm16143_vm10, %v2225_v13, %v2337_v29  ;;  %v2120_v38 = vsel %vm15992_vm5, %v1945_v17, %v2119_v24  ;;  %v2344_v54 = vsel %vm16143_vm10, %v2229_v49, %v2343_v50  ;;  %v1562_v60 = vmax.f32 %v16718_v21, 0.0  ;;  %v14374_v17 = vld [vmem:[#allocation12 + $0x38c] ss:$16 sps:$4 sm:$0xff]   ;;  %v2125_v8 = vld [vmem:[#allocation3 + $0x1e8] sm:$0xff] }
 0x243   :  { %2115 = vst [vmem:[#allocation3 + $0x188] sm:$0xff] %v2114_v63  ;;  %2339 = vst [vmem:[#allocation3 + $0x1c8] sm:$0xff] %v2338_v25  ;;  %v1564_v61 = vmax.f32 %v16722_v11, 0.0  ;;  %v1563_v13 = vmax.f32 %v16726_v6, 0.0  ;;  %v1565_v41 = vmax.f32 %v16730_v27, 0.0  ;;  %4854 = vmatprep.mubr.bf16.mxu0 %v2114_v63  ;;  %5532 = vmatprep.mubr.bf16.mxu1 %v2114_v63  ;;  %v16754_v49 = vadd.f32 %v16399_v51, %v16628_v32  ;;  %v2346_v31 = vld [vmem:[#allocation3 + $0x220] sm:$0xff] }
 0x244   :  { %2121 = vst [vmem:[#allocation3 + $0x198] sm:$0xff] %v2120_v38  ;;  %2345 = vst [vmem:[#allocation3 + $0x1d8] sm:$0xff] %v2344_v54  ;;  %v16758_v50 = vadd.f32 %v16403_v30, %v16630_v45  ;;  %v16762_v21 = vadd.f32 %v16406_v59, %v16636_v36  ;;  %v16766_v11 = vadd.f32 %v16410_v55, %v16638_v3  ;;  %4855 = vmatmul.mubr.bf16.gmra.mrb[48].mxu0 %v2111_v43  ;;  %v14377_v6 = vld [vmem:[#allocation12 + $0x3a4] ss:$16 sps:$4 sm:$0xff]   ;;  %v14372_v36 = vld [vmem:[#allocation12 + $0x388] ss:$16 sps:$4 sm:$0xff]  }
 0x245   :  { %v18368_v27 = vmax.f32 %v16686_v52, 0.0  ;;  %v18369_v32 = vmax.f32 %v16690_v35, 0.0  ;;  %v18370_v48 = vmax.f32 %v16694_v42, 0.0  ;;  %v18371_v0 = vmax.f32 %v16698_v19, 0.0  ;;  %5533 = vmatmul.mubr.bf16.gmra.mrb[48].mxu1 %v2111_v43  ;;  %4919 = vmatprep.subr.bf16.mxu0 %v14371_v57  ;;  %v14375_v35 = vld [vmem:[#allocation12 + $0x3a0] ss:$16 sps:$4 sm:$0xff]  }
 0x246   :  { %v1566_v3 = vmax.f32 %v16754_v49, 0.0  ;;  %v1568_v37 = vmax.f32 %v16758_v50, 0.0  ;;  %v1567_v22 = vmax.f32 %v16762_v21, 0.0  ;;  %v1569_v52 = vmax.f32 %v16766_v11, 0.0  ;;  %5597 = vmatprep.subr.bf16.mxu1 %v14374_v17  ;;  %4920 = vmatpush1.bf16.msra.mxu0 %v14369_v44  ;;  %v2352_v23 = vld [vmem:[#allocation3 + $0x230] sm:$0xff]  ;;  %v2355_v17 = vld [vmem:[#allocation3 + $0x238] sm:$0xff] }
 0x247   :  { %v1602_v56 = vpack.c.bf16 %v1562_v60, %v18368_v27  ;;  %v1604_v58 = vpack.c.bf16 %v1564_v61, %v18369_v32  ;;  %v1603_v45 = vpack.c.bf16 %v1563_v13, %v18370_v48  ;;  %v1605_v15 = vpack.c.bf16 %v1565_v41, %v18371_v0  ;;  %4921 = vmatprep.subr.bf16.mxu0 %v14377_v6  ;;  %v14383_v12 = vld [vmem:[#allocation12 + $0x3c4] ss:$16 sps:$4 sm:$0xff]   ;;  %v14378_v2 = vld [vmem:[#allocation12 + $0x3a8] ss:$16 sps:$4 sm:$0xff]  }
 0x248   :  { %5598 = vmatpush1.bf16.msra.mxu1 %v14372_v36  ;;  %v2349_v13 = vld [vmem:[#allocation3 + $0x228] sm:$0xff]  ;;  %v2131_v41 = vld [vmem:[#allocation3 + $0x1f8] sm:$0xff]  ;;  %v16838_v49 = vadd.f32 %v16403_v30, %v16682_v10  ;;  %v16842_v50 = vadd.f32 %v16406_v59, %v16700_v47 }
 0x249   :  { %v1947_v4 = vshrl.u32 %v1602_v56, 16  ;;  %v1950_v42 = vshll.u32 %v1602_v56, 16  ;;  %2178 = vst [vmem:[#allocation3 + $0x200] sm:$0xff] %v1602_v56  ;;  %v1961_v34 = vshrl.u32 %v1604_v58, 16  ;;  %v1964_v19 = vshll.u32 %v1604_v58, 16  ;;  %2180 = vst [vmem:[#allocation3 + $0x210] sm:$0xff] %v1604_v58  ;;  %5599 = vmatprep.subr.bf16.mxu1 %v14380_v46 }
 0x24a   :  { %2179 = vst [vmem:[#allocation3 + $0x208] sm:$0xff] %v1603_v45  ;;  %2181 = vst [vmem:[#allocation3 + $0x218] sm:$0xff] %v1605_v15  ;;  %v1954_v20 = vshrl.u32 %v1603_v45, 16  ;;  %v1957_v62 = vshll.u32 %v1603_v45, 16  ;;  %v1968_v5 = vshrl.u32 %v1605_v15, 16  ;;  %v1971_v28 = vshll.u32 %v1605_v15, 16  ;;  %4922 = vmatpush1.bf16.msra.mxu0 %v14375_v35 }
 0x24b   :  { %v1949_v29 = vrot.slane %v1947_v4, 7  ;;  %v2230_v24 = vrot.slane %v1950_v42, 1  ;;  %v1963_v43 = vrot.slane %v1961_v34, 7  ;;  %v2234_v16 = vrot.slane %v1964_v19, 1  ;;  %4923 = vmatprep.subr.bf16.mxu0 %v14383_v12  ;;  %v18375_v21 = vld [vmem:[#allocation33_spill] sm:$0xff] }
 0x24c   :  { %v1956_v63 = vrot.slane %v1954_v20, 7  ;;  %v2232_v25 = vrot.slane %v1957_v62, 1  ;;  %v1970_v38 = vrot.slane %v1968_v5, 7  ;;  %v2236_v54 = vrot.slane %v1971_v28, 1  ;;  %5600 = vmatpush1.bf16.msra.mxu1 %v14378_v2 }
 0x24d   :  { %v1952_v44 = vor.u32 %v1950_v42, %v1949_v29  ;;  %v2231_v57 = vor.u32 %v2230_v24, %v1947_v4  ;;  %v1966_v60 = vor.u32 %v1964_v19, %v1963_v43  ;;  %v2235_v61 = vor.u32 %v2234_v16, %v1961_v34  ;;  %v14381_v4 = vld [vmem:[#allocation12 + $0x3c0] ss:$16 sps:$4 sm:$0xff]   ;;  %v14384_v42 = vld [vmem:[#allocation12 + $0x3c8] ss:$16 sps:$4 sm:$0xff]   ;;  %v14386_v34 = vld [vmem:[#allocation12 + $0x3cc] ss:$16 sps:$4 sm:$0xff]  }
 0x24e   :  { %v1959_v6 = vor.u32 %v1957_v62, %v1956_v63  ;;  %v2233_v27 = vor.u32 %v2232_v25, %v1954_v20  ;;  %v1973_v56 = vor.u32 %v1971_v28, %v1970_v38  ;;  %v2237_v32 = vor.u32 %v2236_v54, %v1968_v5  ;;  %v18374_v20 = vld [vmem:[#allocation36_spill] sm:$0xff]  ;;  %5601 = vmatprep.subr.bf16.mxu1 %v14386_v34  ;;  %v14387_v38 = vld [vmem:[#allocation12 + $0x3e0] ss:$16 sps:$4 sm:$0xff]   ;;  %v2367_v34 = vld [vmem:[#allocation3 + $0x298] sm:$0xff] }
 0x24f   :  { %v2123_v58 = vsel %vm15992_vm5, %v1952_v44, %v2122_v39  ;;  %v2347_v48 = vsel %vm16143_vm10, %v2231_v57, %v2346_v31  ;;  %v2129_v45 = vsel %vm15992_vm5, %v1966_v60, %v2128_v18  ;;  %v2353_v0 = vsel %vm16143_vm10, %v2235_v61, %v2352_v23  ;;  %v18372_v39 = vld [vmem:[#allocation34_spill] sm:$0xff]  ;;  %v18373_v18 = vld [vmem:[#allocation35_spill] sm:$0xff]  ;;  %4924 = vmatpush1.bf16.msra.mxu0 %v14381_v4 }
 0x250   :  { %2124 = vst [vmem:[#allocation3 + $0x1e0] sm:$0xff] %v2123_v58  ;;  %2348 = vst [vmem:[#allocation3 + $0x220] sm:$0xff] %v2347_v48  ;;  %v2126_v15 = vsel %vm15992_vm5, %v1959_v6, %v2125_v8  ;;  %v2350_v36 = vsel %vm16143_vm10, %v2233_v27, %v2349_v13  ;;  %v2132_v46 = vsel %vm15992_vm5, %v1973_v56, %v2131_v41  ;;  %v14389_v5 = vld [vmem:[#allocation12 + $0x3e4] ss:$16 sps:$4 sm:$0xff]   ;;  %v14392_v28 = vld [vmem:[#allocation12 + $0x3ec] ss:$16 sps:$4 sm:$0xff]   ;;  %5602 = vmatpush1.bf16.msra.mxu1 %v14384_v42 }
 0x251   :  { %2130 = vst [vmem:[#allocation3 + $0x1f0] sm:$0xff] %v2129_v45  ;;  %2354 = vst [vmem:[#allocation3 + $0x230] sm:$0xff] %v2353_v0  ;;  %v2356_v35 = vsel %vm16143_vm10, %v2237_v32, %v2355_v17  ;;  %v1506_v19 = vadd.f32 %v16399_v51, %v16640_v40  ;;  %v1508_v31 = vadd.f32 %v16403_v30, %v18372_v39  ;;  %4864 = vmatprep.mubr.bf16.mxu0 %v2126_v15  ;;  %v14390_v57 = vld [vmem:[#allocation12 + $0x3e8] ss:$16 sps:$4 sm:$0xff]   ;;  %v14395_v60 = vld [vmem:[#allocation12 + $0x404] ss:$16 sps:$4 sm:$0xff]  }
 0x252   :  { %2127 = vst [vmem:[#allocation3 + $0x1e8] sm:$0xff] %v2126_v15  ;;  %2351 = vst [vmem:[#allocation3 + $0x228] sm:$0xff] %v2350_v36  ;;  %v1507_v23 = vadd.f32 %v16406_v59, %v18373_v18  ;;  %v1509_v62 = vadd.f32 %v16410_v55, %v18374_v20  ;;  %v16806_v29 = vadd.f32 %v16399_v51, %v16656_v33  ;;  %5542 = vmatprep.mubr.bf16.mxu1 %v2126_v15  ;;  %v14398_v61 = vld [vmem:[#allocation12 + $0x40c] ss:$16 sps:$4 sm:$0xff]   ;;  %v2361_v4 = vld [vmem:[#allocation3 + $0x288] sm:$0xff] }
 0x253   :  { %2133 = vst [vmem:[#allocation3 + $0x1f8] sm:$0xff] %v2132_v46  ;;  %2357 = vst [vmem:[#allocation3 + $0x238] sm:$0xff] %v2356_v35  ;;  %v16810_v24 = vadd.f32 %v16403_v30, %v16658_v14  ;;  %v16814_v40 = vadd.f32 %v16406_v59, %v16668_v1  ;;  %v16818_v43 = vadd.f32 %v16410_v55, %v16670_v7  ;;  %v1570_v16 = vmax.f32 %v1506_v19, 0.0  ;;  %v2140_v6 = vld [vmem:[#allocation3 + $0x250] sm:$0xff]  ;;  %v2143_v42 = vld [vmem:[#allocation3 + $0x258] sm:$0xff] }
 0x254   :  { %v1572_v8 = vmax.f32 %v1508_v31, 0.0  ;;  %v1571_v12 = vmax.f32 %v1507_v23, 0.0  ;;  %v1573_v63 = vmax.f32 %v1509_v62, 0.0  ;;  %4865 = vmatmul.mubr.bf16.gmra.mrb[52].mxu0 %v2123_v58  ;;  %5543 = vmatmul.mubr.bf16.gmra.mrb[52].mxu1 %v2123_v58  ;;  %v1574_v33 = vmax.f32 %v16806_v29, 0.0  ;;  %v2364_v56 = vld [vmem:[#allocation3 + $0x290] sm:$0xff]  ;;  %v2137_v58 = vld [vmem:[#allocation3 + $0x248] sm:$0xff] }
 0x255   :  { %v1576_v14 = vmax.f32 %v16810_v24, 0.0  ;;  %v1575_v25 = vmax.f32 %v16814_v40, 0.0  ;;  %v1577_v1 = vmax.f32 %v16818_v43, 0.0  ;;  %v1606_v7 = vpack.c.bf16 %v1570_v16, %v1566_v3  ;;  %4925 = vmatprep.subr.bf16.mxu0 %v14389_v5  ;;  %5603 = vmatprep.subr.bf16.mxu1 %v14392_v28  ;;  %v2370_v40 = vld [vmem:[#allocation3 + $0x2e0] sm:$0xff] }
 0x256   :  { %v1608_v54 = vpack.c.bf16 %v1572_v8, %v1568_v37  ;;  %v1607_v2 = vpack.c.bf16 %v1571_v12, %v1567_v22  ;;  %v1609_v44 = vpack.c.bf16 %v1573_v63, %v1569_v52  ;;  %v16834_v13 = vadd.f32 %v16399_v51, %v16680_v9  ;;  %v2134_v51 = vld [vmem:[#allocation3 + $0x240] sm:$0xff]  ;;  %4926 = vmatpush1.bf16.msra.mxu0 %v14387_v38 }
 0x257   :  { %v16846_v11 = vadd.f32 %v16410_v55, %v18375_v21  ;;  %v1975_v3 = vshrl.u32 %v1606_v7, 16  ;;  %v1978_v37 = vshll.u32 %v1606_v7, 16  ;;  %2182 = vst [vmem:[#allocation3 + $0x260] sm:$0xff] %v1606_v7  ;;  %v2358_v55 = vld [vmem:[#allocation3 + $0x280] sm:$0xff]  ;;  %5604 = vmatpush1.bf16.msra.mxu1 %v14390_v57  ;;  %5008 = vmatprep.subr.bf16.mxu0 %v14395_v60  ;;  %v1580_v38 = vmax.f32 %v16838_v49, 0.0 }
 0x258   :  { %v1989_v22 = vshrl.u32 %v1608_v54, 16  ;;  %v1992_v52 = vshll.u32 %v1608_v54, 16  ;;  %2184 = vst [vmem:[#allocation3 + $0x270] sm:$0xff] %v1608_v54  ;;  %2183 = vst [vmem:[#allocation3 + $0x268] sm:$0xff] %v1607_v2  ;;  %v1982_v30 = vshrl.u32 %v1607_v2, 16  ;;  %v1985_v9 = vshll.u32 %v1607_v2, 16  ;;  %5686 = vmatprep.subr.bf16.mxu1 %v14398_v61 }
 0x259   :  { %2185 = vst [vmem:[#allocation3 + $0x278] sm:$0xff] %v1609_v44  ;;  %v1996_v10 = vshrl.u32 %v1609_v44, 16  ;;  %v1999_v59 = vshll.u32 %v1609_v44, 16  ;;  %v1977_v47 = vrot.slane %v1975_v3, 7  ;;  %v2238_v41 = vrot.slane %v1978_v37, 1  ;;  %v2146_v21 = vld [vmem:[#allocation3 + $0x2a0] sm:$0xff] }
 0x25a   :  { %v1991_v17 = vrot.slane %v1989_v22, 7  ;;  %v2242_v27 = vrot.slane %v1992_v52, 1  ;;  %v1984_v32 = vrot.slane %v1982_v30, 7  ;;  %v2240_v48 = vrot.slane %v1985_v9, 1 }
 0x25b   :  { %v1998_v45 = vrot.slane %v1996_v10, 7  ;;  %v2244_v0 = vrot.slane %v1999_v59, 1  ;;  %v1980_v15 = vor.u32 %v1978_v37, %v1977_v47  ;;  %v2239_v36 = vor.u32 %v2238_v41, %v1975_v3  ;;  %v2152_v37 = vld [vmem:[#allocation3 + $0x2b0] sm:$0xff] }
 0x25c   :  { %v1994_v46 = vor.u32 %v1992_v52, %v1991_v17  ;;  %v2243_v35 = vor.u32 %v2242_v27, %v1989_v22  ;;  %v1987_v19 = vor.u32 %v1985_v9, %v1984_v32  ;;  %v2241_v39 = vor.u32 %v2240_v48, %v1982_v30  ;;  %v2149_v52 = vld [vmem:[#allocation3 + $0x2a8] sm:$0xff]  ;;  %v2155_v17 = vld [vmem:[#allocation3 + $0x2b8] sm:$0xff] }
 0x25d   :  { %v2001_v31 = vor.u32 %v1999_v59, %v1998_v45  ;;  %v2245_v18 = vor.u32 %v2244_v0, %v1996_v10  ;;  %v2135_v23 = vsel %vm15992_vm5, %v1980_v15, %v2134_v51  ;;  %v2359_v20 = vsel %vm16143_vm10, %v2239_v36, %v2358_v55  ;;  %v2373_v55 = vld [vmem:[#allocation3 + $0x2e8] sm:$0xff] }
 0x25e   :  { %v16854_v62 = vsel %vm15992_vm5, %v1994_v46, %v2140_v6  ;;  %v2365_v5 = vsel %vm16143_vm10, %v2243_v35, %v2364_v56  ;;  %2136 = vst [vmem:[#allocation3 + $0x240] sm:$0xff] %v2135_v23  ;;  %2360 = vst [vmem:[#allocation3 + $0x280] sm:$0xff] %v2359_v20  ;;  %v2138_v28 = vsel %vm15992_vm5, %v1987_v19, %v2137_v58  ;;  %v1578_v63 = vmax.f32 %v16834_v13, 0.0  ;;  %v2379_v6 = vld [vmem:[#allocation3 + $0x2f8] sm:$0xff] }
 0x25f   :  { %2142 = vst [vmem:[#allocation3 + $0x250] sm:$0xff] %v16854_v62  ;;  %2366 = vst [vmem:[#allocation3 + $0x290] sm:$0xff] %v2365_v5  ;;  %v2362_v16 = vsel %vm16143_vm10, %v2241_v39, %v2361_v4  ;;  %v16865_v8 = vsel %vm15992_vm5, %v2001_v31, %v2143_v42  ;;  %v2368_v12 = vsel %vm16143_vm10, %v2245_v18, %v2367_v34  ;;  %v1579_v7 = vmax.f32 %v16842_v50, 0.0  ;;  %v2385_v42 = vld [vmem:[#allocation3 + $0x18] sm:$0xff]  ;;  %v14393_v34 = vld [vmem:[#allocation12 + $0x400] ss:$16 sps:$4 sm:$0xff]  }
 0x260   :  { %2139 = vst [vmem:[#allocation3 + $0x248] sm:$0xff] %v2138_v28  ;;  %2363 = vst [vmem:[#allocation3 + $0x288] sm:$0xff] %v2362_v16  ;;  %v1581_v54 = vmax.f32 %v16846_v11, 0.0  ;;  %4874 = vmatprep.mubr.bf16.mxu0 %v2138_v28  ;;  %5552 = vmatprep.mubr.bf16.mxu1 %v2138_v28  ;;  %v1610_v2 = vpack.c.bf16 %v1578_v63, %v1574_v33  ;;  %v1612_v44 = vpack.c.bf16 %v1580_v38, %v1576_v14  ;;  %v14396_v19 = vld [vmem:[#allocation12 + $0x408] ss:$16 sps:$4 sm:$0xff]   ;;  %v2384_v31 = vld [vmem:[#allocation3 + $0x10] sm:$0xff] }
 0x261   :  { %2145 = vst [vmem:[#allocation3 + $0x258] sm:$0xff] %v16865_v8  ;;  %2369 = vst [vmem:[#allocation3 + $0x298] sm:$0xff] %v2368_v12  ;;  %4875 = vmatmul.mubr.bf16.gmra.mrb[56].mxu0 %v2135_v23  ;;  %5553 = vmatmul.mubr.bf16.gmra.mrb[56].mxu1 %v2135_v23  ;;  %v1611_v57 = vpack.c.bf16 %v1579_v7, %v1575_v25  ;;  %v14401_v39 = vld [vmem:[#allocation12 + $0x424] ss:$16 sps:$4 sm:$0xff]   ;;  %v14404_v18 = vld [vmem:[#allocation12 + $0x42c] ss:$16 sps:$4 sm:$0xff]  }
 0x262   :  { %v1613_v60 = vpack.c.bf16 %v1581_v54, %v1577_v1  ;;  %v2003_v61 = vshrl.u32 %v1610_v2, 16  ;;  %v2006_v13 = vshll.u32 %v1610_v2, 16  ;;  %2186 = vst [vmem:[#allocation3 + $0x2c0] sm:$0xff] %v1610_v2  ;;  %v2017_v49 = vshrl.u32 %v1612_v44, 16  ;;  %2188 = vst [vmem:[#allocation3 + $0x2d0] sm:$0xff] %v1612_v44  ;;  %v2376_v1 = vld [vmem:[#allocation3 + $0x2f0] sm:$0xff] }
 0x263   :  { %v2020_v50 = vshll.u32 %v1612_v44, 16  ;;  %2187 = vst [vmem:[#allocation3 + $0x2c8] sm:$0xff] %v1611_v57  ;;  %v2010_v29 = vshrl.u32 %v1611_v57, 16  ;;  %v2013_v33 = vshll.u32 %v1611_v57, 16  ;;  %v14399_v23 = vld [vmem:[#allocation12 + $0x420] ss:$16 sps:$4 sm:$0xff]  }
 0x264   :  { %2189 = vst [vmem:[#allocation3 + $0x2d8] sm:$0xff] %v1613_v60  ;;  %v2024_v11 = vshrl.u32 %v1613_v60, 16  ;;  %v2027_v24 = vshll.u32 %v1613_v60, 16  ;;  %v2005_v14 = vrot.slane %v2003_v61, 7  ;;  %v2246_v3 = vrot.slane %v2006_v13, 1  ;;  %v2397_v20 = vld [vmem:[#allocation3 + $0x78] sm:$0xff] }
 0x265   :  { %v2019_v25 = vrot.slane %v2017_v49, 7  ;;  %v2250_v43 = vrot.slane %v2020_v50, 1  ;;  %v2012_v22 = vrot.slane %v2010_v29, 7  ;;  %v2248_v51 = vrot.slane %v2013_v33, 1  ;;  %v14402_v5 = vld [vmem:[#allocation12 + $0x428] ss:$16 sps:$4 sm:$0xff]  }
 0x266   :  { %v2026_v30 = vrot.slane %v2024_v11, 7  ;;  %v2252_v9 = vrot.slane %v2027_v24, 1  ;;  %v2008_v10 = vor.u32 %v2006_v13, %v2005_v14  ;;  %v2247_v59 = vor.u32 %v2246_v3, %v2003_v61  ;;  %v14407_v28 = vld [vmem:[#allocation12 + $0x444] ss:$16 sps:$4 sm:$0xff]   ;;  %v14410_v16 = vld [vmem:[#allocation12 + $0x44c] ss:$16 sps:$4 sm:$0xff]  }
 0x267   :  { %v2022_v47 = vor.u32 %v2020_v50, %v2019_v25  ;;  %v2251_v41 = vor.u32 %v2250_v43, %v2017_v49  ;;  %v2015_v27 = vor.u32 %v2013_v33, %v2012_v22  ;;  %v2249_v56 = vor.u32 %v2248_v51, %v2010_v29  ;;  %v14405_v12 = vld [vmem:[#allocation12 + $0x440] ss:$16 sps:$4 sm:$0xff]   ;;  %v14408_v63 = vld [vmem:[#allocation12 + $0x448] ss:$16 sps:$4 sm:$0xff]   ;;  %v14413_v7 = vld [vmem:[#allocation12 + $0x464] ss:$16 sps:$4 sm:$0xff]  }
 0x268   :  { %v2029_v32 = vor.u32 %v2027_v24, %v2026_v30  ;;  %v2253_v58 = vor.u32 %v2252_v9, %v2024_v11  ;;  %v2147_v48 = vsel %vm15992_vm5, %v2008_v10, %v2146_v21  ;;  %v2371_v45 = vsel %vm16143_vm10, %v2247_v59, %v2370_v40  ;;  %v2396_v38 = vld [vmem:[#allocation3 + $0x70] sm:$0xff]  ;;  %v2409_v2 = vld [vmem:[#allocation3 + $0xd8] sm:$0xff] }
 0x269   :  { %v16888_v0 = vsel %vm15992_vm5, %v2022_v47, %v2152_v37  ;;  %v2377_v15 = vsel %vm16143_vm10, %v2251_v41, %v2376_v1  ;;  %2148 = vst [vmem:[#allocation3 + $0x2a0] sm:$0xff] %v2147_v48  ;;  %2372 = vst [vmem:[#allocation3 + $0x2e0] sm:$0xff] %v2371_v45  ;;  %v2150_v36 = vsel %vm15992_vm5, %v2015_v27, %v2149_v52  ;;  %v14416_v54 = vld [vmem:[#allocation12 + $0x46c] ss:$16 sps:$4 sm:$0xff]   ;;  %v14411_v44 = vld [vmem:[#allocation12 + $0x460] ss:$16 sps:$4 sm:$0xff]  }
 0x26a   :  { %2154 = vst [vmem:[#allocation3 + $0x2b0] sm:$0xff] %v16888_v0  ;;  %2378 = vst [vmem:[#allocation3 + $0x2f0] sm:$0xff] %v2377_v15  ;;  %v2374_v46 = vsel %vm16143_vm10, %v2249_v56, %v2373_v55  ;;  %v16899_v35 = vsel %vm15992_vm5, %v2029_v32, %v2155_v17  ;;  %v2380_v4 = vsel %vm16143_vm10, %v2253_v58, %v2379_v6  ;;  %4884 = vmatprep.mubr.bf16.mxu0 %v2150_v36  ;;  %v14414_v57 = vld [vmem:[#allocation12 + $0x468] ss:$16 sps:$4 sm:$0xff]   ;;  %v14419_v60 = vld [vmem:[#allocation12 + $0x484] ss:$16 sps:$4 sm:$0xff]  }
 0x26b   :  { %2151 = vst [vmem:[#allocation3 + $0x2a8] sm:$0xff] %v2150_v36  ;;  %2375 = vst [vmem:[#allocation3 + $0x2e8] sm:$0xff] %v2374_v46  ;;  %5562 = vmatprep.mubr.bf16.mxu1 %v2150_v36  ;;  %4885 = vmatmul.mubr.bf16.gmra.mrb[60].mxu0 %v2147_v48  ;;  %v14422_v61 = vld [vmem:[#allocation12 + $0x48c] ss:$16 sps:$4 sm:$0xff]   ;;  %v14417_v13 = vld [vmem:[#allocation12 + $0x480] ss:$16 sps:$4 sm:$0xff]  }
 0x26c   :  { %2157 = vst [vmem:[#allocation3 + $0x2b8] sm:$0xff] %v16899_v35  ;;  %2381 = vst [vmem:[#allocation3 + $0x2f8] sm:$0xff] %v2380_v4  ;;  %5563 = vmatmul.mubr.bf16.gmra.mrb[60].mxu1 %v2147_v48  ;;  %4927 = vmatprep.mubr.bf16.mxu0 %v2385_v42  ;;  %v14420_v49 = vld [vmem:[#allocation12 + $0x488] ss:$16 sps:$4 sm:$0xff]   ;;  %v2408_v50 = vld [vmem:[#allocation3 + $0xd0] sm:$0xff] }
 0x26d   :  { %5605 = vmatprep.mubr.bf16.mxu1 %v2385_v42  ;;  %v14425_v21 = vld [vmem:[#allocation12 + $0x4a4] ss:$16 sps:$4 sm:$0xff]   ;;  %v14428_v29 = vld [vmem:[#allocation12 + $0x4ac] ss:$16 sps:$4 sm:$0xff]   ;;  %v14423_v11 = vld [vmem:[#allocation12 + $0x4a0] ss:$16 sps:$4 sm:$0xff]  }
 0x26e   :  { %v2421_v33 = vld [vmem:[#allocation3 + $0x138] sm:$0xff]  ;;  %v14434_v3 = vld [vmem:[#allocation12 + $0x4cc] ss:$16 sps:$4 sm:$0xff]   ;;  %v14429_v40 = vld [vmem:[#allocation12 + $0x4c0] ss:$16 sps:$4 sm:$0xff]  }
 0x26f   :  { %v14426_v24 = vld [vmem:[#allocation12 + $0x4a8] ss:$16 sps:$4 sm:$0xff]   ;;  %v14431_v14 = vld [vmem:[#allocation12 + $0x4c4] ss:$16 sps:$4 sm:$0xff]   ;;  %v2420_v37 = vld [vmem:[#allocation3 + $0x130] sm:$0xff] }
 0x270   :  { %v14432_v25 = vld [vmem:[#allocation12 + $0x4c8] ss:$16 sps:$4 sm:$0xff]   ;;  %v14437_v43 = vld [vmem:[#allocation12 + $0x4e4] ss:$16 sps:$4 sm:$0xff]   ;;  %v14440_v1 = vld [vmem:[#allocation12 + $0x4ec] ss:$16 sps:$4 sm:$0xff]  }
 0x271   :  { %v2433_v22 = vld [vmem:[#allocation3 + $0x198] sm:$0xff]  ;;  %v14435_v52 = vld [vmem:[#allocation12 + $0x4e0] ss:$16 sps:$4 sm:$0xff]   ;;  %v14446_v9 = vld [vmem:[#allocation12 + $0x50c] ss:$16 sps:$4 sm:$0xff]  }
 0x272   :  { %v14438_v51 = vld [vmem:[#allocation12 + $0x4e8] ss:$16 sps:$4 sm:$0xff]   ;;  %v14443_v30 = vld [vmem:[#allocation12 + $0x504] ss:$16 sps:$4 sm:$0xff]   ;;  %v14441_v10 = vld [vmem:[#allocation12 + $0x500] ss:$16 sps:$4 sm:$0xff]  }
 0x273   :  { %4928 = vmatmul.mubr.bf16.vlgmr.msra.gmra.mrb[32].mxu0 %v2384_v31  ;;  %v14444_v59 = vld [vmem:[#allocation12 + $0x508] ss:$16 sps:$4 sm:$0xff]   ;;  %v2432_v47 = vld [vmem:[#allocation3 + $0x190] sm:$0xff]  ;;  %v14449_v41 = vld [vmem:[#allocation12 + $0x524] ss:$16 sps:$4 sm:$0xff]  }
 0x274   :  { %5606 = vmatmul.mubr.bf16.vlgmr.msra.gmra.mrb[32].mxu1 %v2384_v31  ;;  %4937 = vmatprep.mubr.bf16.mxu0 %v2397_v20  ;;  %v14452_v55 = vld [vmem:[#allocation12 + $0x52c] ss:$16 sps:$4 sm:$0xff]   ;;  %v2445_v17 = vld [vmem:[#allocation3 + $0x1f8] sm:$0xff]  ;;  %v14447_v6 = vld [vmem:[#allocation12 + $0x520] ss:$16 sps:$4 sm:$0xff]  }
 0x275   :  { %5009 = vmatpush1.bf16.msra.mxu0 %v14393_v34  ;;  %5615 = vmatprep.mubr.bf16.mxu1 %v2397_v20  ;;  %v14450_v27 = vld [vmem:[#allocation12 + $0x528] ss:$16 sps:$4 sm:$0xff]   ;;  %v14455_v56 = vld [vmem:[#allocation12 + $0x544] ss:$16 sps:$4 sm:$0xff]   ;;  %v14458_v32 = vld [vmem:[#allocation12 + $0x54c] ss:$16 sps:$4 sm:$0xff]  }
 0x276   :  { %5687 = vmatpush1.bf16.msra.mxu1 %v14396_v19  ;;  %5010 = vmatprep.subr.bf16.mxu0 %v14401_v39  ;;  %v14453_v58 = vld [vmem:[#allocation12 + $0x540] ss:$16 sps:$4 sm:$0xff]   ;;  %v14456_v48 = vld [vmem:[#allocation12 + $0x548] ss:$16 sps:$4 sm:$0xff]   ;;  %v14461_v15 = vld [vmem:[#allocation12 + $0x564] ss:$16 sps:$4 sm:$0xff]  }
 0x277   :  { %5688 = vmatprep.subr.bf16.mxu1 %v14404_v18  ;;  %v2444_v45 = vld [vmem:[#allocation3 + $0x1f0] sm:$0xff]  ;;  %v14462_v4 = vld [vmem:[#allocation12 + $0x568] ss:$16 sps:$4 sm:$0xff]   ;;  %v14467_v42 = vld [vmem:[#allocation12 + $0x584] ss:$16 sps:$4 sm:$0xff]  }
 0x278   :  { %v14464_v36 = vld [vmem:[#allocation12 + $0x56c] ss:$16 sps:$4 sm:$0xff]   ;;  %v14459_v46 = vld [vmem:[#allocation12 + $0x560] ss:$16 sps:$4 sm:$0xff]   ;;  %v14468_v39 = vld [vmem:[#allocation12 + $0x588] ss:$16 sps:$4 sm:$0xff]  }
 0x279   :  { %5011 = vmatpush1.bf16.msra.mxu0 %v14399_v23  ;;  %v14470_v34 = vld [vmem:[#allocation12 + $0x58c] ss:$16 sps:$4 sm:$0xff]   ;;  %v14465_v19 = vld [vmem:[#allocation12 + $0x580] ss:$16 sps:$4 sm:$0xff]   ;;  %v14473_v31 = vld [vmem:[#allocation12 + $0x5a4] ss:$16 sps:$4 sm:$0xff]  }
 0x27a   :  { %5689 = vmatpush1.bf16.msra.mxu1 %v14402_v5  ;;  %5012 = vmatprep.subr.bf16.mxu0 %v14407_v28  ;;  %v14476_v18 = vld [vmem:[#allocation12 + $0x5ac] ss:$16 sps:$4 sm:$0xff]   ;;  %v14474_v23 = vld [vmem:[#allocation12 + $0x5a8] ss:$16 sps:$4 sm:$0xff]   ;;  %v14479_v20 = vld [vmem:[#allocation12 + $0x5c4] ss:$16 sps:$4 sm:$0xff]  }
 0x27b   :  { %5690 = vmatprep.subr.bf16.mxu1 %v14410_v16  ;;  %4938 = vmatmul.mubr.bf16.gmra.mrb[36].mxu0 %v2396_v38  ;;  %v14482_v5 = vld [vmem:[#allocation12 + $0x5cc] ss:$16 sps:$4 sm:$0xff]   ;;  %v14477_v28 = vld [vmem:[#allocation12 + $0x5c0] ss:$16 sps:$4 sm:$0xff]   ;;  %v14480_v16 = vld [vmem:[#allocation12 + $0x5c8] ss:$16 sps:$4 sm:$0xff]  }
 0x27c   :  { %5616 = vmatmul.mubr.bf16.gmra.mrb[36].mxu1 %v2396_v38  ;;  %4947 = vmatprep.mubr.bf16.mxu0 %v2409_v2  ;;  %v14486_v38 = vld [vmem:[#allocation12 + $0x5e8] ss:$16 sps:$4 sm:$0xff]  }
 0x27d   :  { %5013 = vmatpush1.bf16.msra.mxu0 %v14405_v12  ;;  %5625 = vmatprep.mubr.bf16.mxu1 %v2409_v2  ;;  %v14485_v12 = vld [vmem:[#allocation12 + $0x5e4] ss:$16 sps:$4 sm:$0xff]   ;;  %v14489_v2 = vld [vmem:[#allocation12 + $0x600] ss:$16 sps:$4 sm:$0xff]  }
 0x27e   :  { %5691 = vmatpush1.bf16.msra.mxu1 %v14408_v63  ;;  %5014 = vmatprep.subr.bf16.mxu0 %v14413_v7  ;;  %v14488_v63 = vld [vmem:[#allocation12 + $0x5ec] ss:$16 sps:$4 sm:$0xff]   ;;  %v14491_v7 = vld [vmem:[#allocation12 + $0x604] ss:$16 sps:$4 sm:$0xff]  }
 0x27f   :  { %5692 = vmatprep.subr.bf16.mxu1 %v14416_v54  ;;  %v14494_v54 = vld [vmem:[#allocation12 + $0x60c] ss:$16 sps:$4 sm:$0xff]  }
 0x281   :  { %5015 = vmatpush1.bf16.msra.mxu0 %v14411_v44  ;;  %v2386_v44 = vld [vmem:[#allocation3 + $0x20] sm:$0xff] }
 0x282   :  { %5693 = vmatpush1.bf16.msra.mxu1 %v14414_v57  ;;  %5016 = vmatprep.subr.bf16.mxu0 %v14419_v60  ;;  %v14492_v57 = vld [vmem:[#allocation12 + $0x608] ss:$16 sps:$4 sm:$0xff]   ;;  %v14497_v60 = vld [vmem:[#allocation12 + $0x624] ss:$16 sps:$4 sm:$0xff]  }
 0x283   :  { %5694 = vmatprep.subr.bf16.mxu1 %v14422_v61  ;;  %4948 = vmatmul.mubr.bf16.gmra.mrb[40].mxu0 %v2408_v50  ;;  %v2399_v61 = vld [vmem:[#allocation3 + $0x88] sm:$0xff] }
 0x284   :  { %5626 = vmatmul.mubr.bf16.gmra.mrb[40].mxu1 %v2408_v50  ;;  %4957 = vmatprep.mubr.bf16.mxu0 %v2421_v33  ;;  %v14503_v50 = vld [vmem:[#allocation12 + $0x644] ss:$16 sps:$4 sm:$0xff]  }
 0x285   :  { %5017 = vmatpush1.bf16.msra.mxu0 %v14417_v13  ;;  %5635 = vmatprep.mubr.bf16.mxu1 %v2421_v33  ;;  %v14500_v13 = vld [vmem:[#allocation12 + $0x62c] ss:$16 sps:$4 sm:$0xff]   ;;  %v14501_v33 = vld [vmem:[#allocation12 + $0x640] ss:$16 sps:$4 sm:$0xff]  }
 0x286   :  { %5695 = vmatpush1.bf16.msra.mxu1 %v14420_v49  ;;  %5018 = vmatprep.subr.bf16.mxu0 %v14425_v21  ;;  %v14498_v49 = vld [vmem:[#allocation12 + $0x628] ss:$16 sps:$4 sm:$0xff]   ;;  %v14506_v21 = vld [vmem:[#allocation12 + $0x64c] ss:$16 sps:$4 sm:$0xff]  }
 0x287   :  { %5696 = vmatprep.subr.bf16.mxu1 %v14428_v29  ;;  %v2398_v29 = vld [vmem:[#allocation3 + $0x80] sm:$0xff] }
 0x289   :  { %5019 = vmatpush1.bf16.msra.mxu0 %v14423_v11  ;;  %v14504_v11 = vld [vmem:[#allocation12 + $0x648] ss:$16 sps:$4 sm:$0xff]  }
 0x28a   :  { %5697 = vmatpush1.bf16.msra.mxu1 %v14426_v24  ;;  %5020 = vmatprep.subr.bf16.mxu0 %v14431_v14  ;;  %v14509_v24 = vld [vmem:[#allocation12 + $0x664] ss:$16 sps:$4 sm:$0xff]  }
 0x28b   :  { %5698 = vmatprep.subr.bf16.mxu1 %v14434_v3  ;;  %4958 = vmatmul.mubr.bf16.gmra.mrb[44].mxu0 %v2420_v37  ;;  %v2411_v14 = vld [vmem:[#allocation3 + $0xe8] sm:$0xff]  ;;  %v14512_v3 = vld [vmem:[#allocation12 + $0x66c] ss:$16 sps:$4 sm:$0xff]  }
 0x28c   :  { %5636 = vmatmul.mubr.bf16.gmra.mrb[44].mxu1 %v2420_v37  ;;  %4967 = vmatprep.mubr.bf16.mxu0 %v2433_v22  ;;  %v14515_v37 = vld [vmem:[#allocation12 + $0x684] ss:$16 sps:$4 sm:$0xff]  }
 0x28d   :  { %5021 = vmatpush1.bf16.msra.mxu0 %v14429_v40  ;;  %5645 = vmatprep.mubr.bf16.mxu1 %v2433_v22  ;;  %v14507_v40 = vld [vmem:[#allocation12 + $0x660] ss:$16 sps:$4 sm:$0xff]  }
 0x28e   :  { %5699 = vmatpush1.bf16.msra.mxu1 %v14432_v25  ;;  %5022 = vmatprep.subr.bf16.mxu0 %v14437_v43  ;;  %v14510_v25 = vld [vmem:[#allocation12 + $0x668] ss:$16 sps:$4 sm:$0xff]   ;;  %v14518_v43 = vld [vmem:[#allocation12 + $0x68c] ss:$16 sps:$4 sm:$0xff]   ;;  %v14513_v22 = vld [vmem:[#allocation12 + $0x680] ss:$16 sps:$4 sm:$0xff]  }
 0x28f   :  { %5700 = vmatprep.subr.bf16.mxu1 %v14440_v1  ;;  %v2410_v1 = vld [vmem:[#allocation3 + $0xe0] sm:$0xff] }
 0x291   :  { %5023 = vmatpush1.bf16.msra.mxu0 %v14435_v52  ;;  %v14516_v52 = vld [vmem:[#allocation12 + $0x688] ss:$16 sps:$4 sm:$0xff]  }
 0x292   :  { %5701 = vmatpush1.bf16.msra.mxu1 %v14438_v51  ;;  %5024 = vmatprep.subr.bf16.mxu0 %v14443_v30  ;;  %v14521_v51 = vld [vmem:[#allocation12 + $0x6a4] ss:$16 sps:$4 sm:$0xff]  }
 0x293   :  { %5702 = vmatprep.subr.bf16.mxu1 %v14446_v9  ;;  %4968 = vmatmul.mubr.bf16.gmra.mrb[48].mxu0 %v2432_v47  ;;  %v2423_v30 = vld [vmem:[#allocation3 + $0x148] sm:$0xff]  ;;  %v14524_v9 = vld [vmem:[#allocation12 + $0x6ac] ss:$16 sps:$4 sm:$0xff]  }
 0x294   :  { %5646 = vmatmul.mubr.bf16.gmra.mrb[48].mxu1 %v2432_v47  ;;  %4977 = vmatprep.mubr.bf16.mxu0 %v2445_v17  ;;  %v14527_v47 = vld [vmem:[#allocation12 + $0x6c4] ss:$16 sps:$4 sm:$0xff]  }
 0x295   :  { %5025 = vmatpush1.bf16.msra.mxu0 %v14441_v10  ;;  %5655 = vmatprep.mubr.bf16.mxu1 %v2445_v17  ;;  %v14519_v10 = vld [vmem:[#allocation12 + $0x6a0] ss:$16 sps:$4 sm:$0xff]  }
 0x296   :  { %5703 = vmatpush1.bf16.msra.mxu1 %v14444_v59  ;;  %5026 = vmatprep.subr.bf16.mxu0 %v14449_v41  ;;  %v14522_v59 = vld [vmem:[#allocation12 + $0x6a8] ss:$16 sps:$4 sm:$0xff]   ;;  %v14530_v41 = vld [vmem:[#allocation12 + $0x6cc] ss:$16 sps:$4 sm:$0xff]  }
 0x297   :  { %5704 = vmatprep.subr.bf16.mxu1 %v14452_v55  ;;  %v14525_v55 = vld [vmem:[#allocation12 + $0x6c0] ss:$16 sps:$4 sm:$0xff]  }
 0x298   :  { %v2422_v17 = vld [vmem:[#allocation3 + $0x140] sm:$0xff] }
 0x299   :  { %5027 = vmatpush1.bf16.msra.mxu0 %v14447_v6  ;;  %v14528_v6 = vld [vmem:[#allocation12 + $0x6c8] ss:$16 sps:$4 sm:$0xff]  }
 0x29a   :  { %5705 = vmatpush1.bf16.msra.mxu1 %v14450_v27  ;;  %5028 = vmatprep.subr.bf16.mxu0 %v14455_v56  ;;  %v14533_v27 = vld [vmem:[#allocation12 + $0x6e4] ss:$16 sps:$4 sm:$0xff]  }
 0x29b   :  { %5706 = vmatprep.subr.bf16.mxu1 %v14458_v32  ;;  %4978 = vmatmul.mubr.bf16.gmra.mrb[52].mxu0 %v2444_v45  ;;  %v2435_v56 = vld [vmem:[#allocation3 + $0x1a8] sm:$0xff]  ;;  %v14536_v32 = vld [vmem:[#allocation12 + $0x6ec] ss:$16 sps:$4 sm:$0xff]  }
 0x29c   :  { %5656 = vmatmul.mubr.bf16.gmra.mrb[52].mxu1 %v2444_v45  ;;  %4987 = vmatprep.mubr.bf16.mxu0 %v16865_v8  ;;  %v14539_v45 = vld [vmem:[#allocation12 + $0x704] ss:$16 sps:$4 sm:$0xff]  }
 0x29d   :  { %5029 = vmatpush1.bf16.msra.mxu0 %v14453_v58  ;;  %5665 = vmatprep.mubr.bf16.mxu1 %v16865_v8  ;;  %v14471_v8 = vld [vmem:[#allocation12 + $0x5a0] ss:$16 sps:$4 sm:$0xff]  }
 0x29e   :  { %5707 = vmatpush1.bf16.msra.mxu1 %v14456_v48  ;;  %5030 = vmatprep.subr.bf16.mxu0 %v14461_v15  ;;  %v14531_v58 = vld [vmem:[#allocation12 + $0x6e0] ss:$16 sps:$4 sm:$0xff]   ;;  %v14534_v48 = vld [vmem:[#allocation12 + $0x6e8] ss:$16 sps:$4 sm:$0xff]   ;;  %v14542_v15 = vld [vmem:[#allocation12 + $0x70c] ss:$16 sps:$4 sm:$0xff]  }
 0x29f   :  { %5708 = vmatprep.subr.bf16.mxu1 %v14464_v36  ;;  %v14537_v36 = vld [vmem:[#allocation12 + $0x700] ss:$16 sps:$4 sm:$0xff]  }
 0x2a1   :  { %5031 = vmatpush1.bf16.msra.mxu0 %v14459_v46  ;;  %v2434_v46 = vld [vmem:[#allocation3 + $0x1a0] sm:$0xff] }
 0x2a2   :  { %5709 = vmatpush1.bf16.msra.mxu1 %v14462_v4  ;;  %5032 = vmatprep.subr.bf16.mxu0 %v14467_v42  ;;  %v14540_v4 = vld [vmem:[#allocation12 + $0x708] ss:$16 sps:$4 sm:$0xff]   ;;  %v14545_v42 = vld [vmem:[#allocation12 + $0x724] ss:$16 sps:$4 sm:$0xff]  }
 0x2a3   :  { %5710 = vmatprep.subr.bf16.mxu1 %v14470_v34  ;;  %4988 = vmatmul.mubr.bf16.gmra.mrb[56].mxu0 %v16854_v62  ;;  %v2447_v34 = vld [vmem:[#allocation3 + $0x208] sm:$0xff] }
 0x2a4   :  { %5666 = vmatmul.mubr.bf16.gmra.mrb[56].mxu1 %v16854_v62  ;;  %4997 = vmatprep.mubr.bf16.mxu0 %v16899_v35  ;;  %v2387_v62 = vld [vmem:[#allocation3 + $0x28] sm:$0xff] }
 0x2a5   :  { %5033 = vmatpush1.bf16.msra.mxu0 %v14465_v19  ;;  %5675 = vmatprep.mubr.bf16.mxu1 %v16899_v35  ;;  %v14483_v35 = vld [vmem:[#allocation12 + $0x5e0] ss:$16 sps:$4 sm:$0xff]   ;;  %v14548_v19 = vld [vmem:[#allocation12 + $0x72c] ss:$16 sps:$4 sm:$0xff]  }
 0x2a6   :  { %5711 = vmatpush1.bf16.msra.mxu1 %v14468_v39  ;;  %5034 = vmatprep.subr.bf16.mxu0 %v14473_v31  ;;  %v14543_v39 = vld [vmem:[#allocation12 + $0x720] ss:$16 sps:$4 sm:$0xff]   ;;  %v14546_v31 = vld [vmem:[#allocation12 + $0x728] ss:$16 sps:$4 sm:$0xff]  }
 0x2a7   :  { %5712 = vmatprep.subr.bf16.mxu1 %v14476_v18  ;;  %v14551_v18 = vld [vmem:[#allocation12 + $0x744] ss:$16 sps:$4 sm:$0xff]  }
 0x2a9   :  { %5035 = vmatpush1.bf16.msra.mxu0 %v14471_v8  ;;  %v14554_v8 = vld [vmem:[#allocation12 + $0x74c] ss:$16 sps:$4 sm:$0xff]  }
 0x2aa   :  { %5713 = vmatpush1.bf16.msra.mxu1 %v14474_v23  ;;  %5036 = vmatprep.subr.bf16.mxu0 %v14479_v20  ;;  %v14549_v23 = vld [vmem:[#allocation12 + $0x740] ss:$16 sps:$4 sm:$0xff]  }
 0x2ab   :  { %5714 = vmatprep.subr.bf16.mxu1 %v14482_v5  ;;  %4998 = vmatmul.mubr.bf16.gmra.mrb[60].mxu0 %v16888_v0  ;;  %v2446_v20 = vld [vmem:[#allocation3 + $0x200] sm:$0xff]  ;;  %v14552_v5 = vld [vmem:[#allocation12 + $0x748] ss:$16 sps:$4 sm:$0xff]  }
 0x2ac   :  { %5676 = vmatmul.mubr.bf16.gmra.mrb[60].mxu1 %v16888_v0  ;;  %5040 = vmatprep.mubr.bf16.mxu0 %v2387_v62  ;;  %v14495_v0 = vld [vmem:[#allocation12 + $0x620] ss:$16 sps:$4 sm:$0xff]  }
 0x2ad   :  { %5037 = vmatpush1.bf16.msra.mxu0 %v14477_v28  ;;  %5718 = vmatprep.mubr.bf16.mxu1 %v2387_v62  ;;  %v14557_v28 = vld [vmem:[#allocation12 + $0x764] ss:$16 sps:$4 sm:$0xff]   ;;  %v14558_v62 = vld [vmem:[#allocation12 + $0x768] ss:$16 sps:$4 sm:$0xff]  }
 0x2ae   :  { %5715 = vmatpush1.bf16.msra.mxu1 %v14480_v16  ;;  %5038 = vmatprep.subr.bf16.mxu0 %v14485_v12  ;;  %v2459_v16 = vld [vmem:[#allocation3 + $0x268] sm:$0xff]  ;;  %v14560_v12 = vld [vmem:[#allocation12 + $0x76c] ss:$16 sps:$4 sm:$0xff]  }
 0x2af   :  { %5716 = vmatprep.subr.bf16.mxu1 %v14488_v63  ;;  %v14555_v63 = vld [vmem:[#allocation12 + $0x760] ss:$16 sps:$4 sm:$0xff]  }
 0x2b1   :  { %5039 = vmatpush1.bf16.msra.mxu0 %v14483_v35  ;;  %v14563_v35 = vld [vmem:[#allocation12 + $0x784] ss:$16 sps:$4 sm:$0xff]  }
 0x2b2   :  { %5717 = vmatpush1.bf16.msra.mxu1 %v14486_v38  ;;  %5121 = vmatprep.subr.bf16.mxu0 %v14491_v7  ;;  %v14566_v38 = vld [vmem:[#allocation12 + $0x78c] ss:$16 sps:$4 sm:$0xff]   ;;  %v14561_v7 = vld [vmem:[#allocation12 + $0x780] ss:$16 sps:$4 sm:$0xff]  }
 0x2b3   :  { %5799 = vmatprep.subr.bf16.mxu1 %v14494_v54  ;;  %v2458_v54 = vld [vmem:[#allocation3 + $0x260] sm:$0xff] }
 0x2b4   :  { %5041 = vmatmul.mubr.bf16.vlgmr.msra.gmra.mrb[32].mxu0 %v2386_v44 }
 0x2b5   :  { %5719 = vmatmul.mubr.bf16.vlgmr.msra.gmra.mrb[32].mxu1 %v2386_v44  ;;  %5050 = vmatprep.mubr.bf16.mxu0 %v2399_v61  ;;  %v14569_v44 = vld [vmem:[#allocation12 + $0x7a4] ss:$16 sps:$4 sm:$0xff]  }
 0x2b6   :  { %5122 = vmatpush1.bf16.msra.mxu0 %v14489_v2  ;;  %5728 = vmatprep.mubr.bf16.mxu1 %v2399_v61  ;;  %v14564_v2 = vld [vmem:[#allocation12 + $0x788] ss:$16 sps:$4 sm:$0xff]   ;;  %v14567_v61 = vld [vmem:[#allocation12 + $0x7a0] ss:$16 sps:$4 sm:$0xff]  }
 0x2b7   :  { %5800 = vmatpush1.bf16.msra.mxu1 %v14492_v57  ;;  %5123 = vmatprep.subr.bf16.mxu0 %v14497_v60  ;;  %v2471_v57 = vld [vmem:[#allocation3 + $0x2c8] sm:$0xff]  ;;  %v14572_v60 = vld [vmem:[#allocation12 + $0x7ac] ss:$16 sps:$4 sm:$0xff]  }
 0x2b8   :  { %5801 = vmatprep.subr.bf16.mxu1 %v14500_v13  ;;  %v14570_v13 = vld [vmem:[#allocation12 + $0x7a8] ss:$16 sps:$4 sm:$0xff]  }
 0x2ba   :  { %5124 = vmatpush1.bf16.msra.mxu0 %v14495_v0  ;;  %v14575_v0 = vld [vmem:[#allocation12 + $0x7c4] ss:$16 sps:$4 sm:$0xff]  }
 0x2bb   :  { %5802 = vmatpush1.bf16.msra.mxu1 %v14498_v49  ;;  %5125 = vmatprep.subr.bf16.mxu0 %v14503_v50  ;;  %v14578_v49 = vld [vmem:[#allocation12 + $0x7cc] ss:$16 sps:$4 sm:$0xff]   ;;  %v14573_v50 = vld [vmem:[#allocation12 + $0x7c0] ss:$16 sps:$4 sm:$0xff]  }
 0x2bc   :  { %5051 = vmatmul.mubr.bf16.gmra.mrb[36].mxu0 %v2398_v29  ;;  %5803 = vmatprep.subr.bf16.mxu1 %v14506_v21  ;;  %v2470_v21 = vld [vmem:[#allocation3 + $0x2c0] sm:$0xff] }
 0x2bd   :  { %5729 = vmatmul.mubr.bf16.gmra.mrb[36].mxu1 %v2398_v29  ;;  %5060 = vmatprep.mubr.bf16.mxu0 %v2411_v14  ;;  %v14576_v29 = vld [vmem:[#allocation12 + $0x7c8] ss:$16 sps:$4 sm:$0xff]  }
 0x2be   :  { %5126 = vmatpush1.bf16.msra.mxu0 %v14501_v33  ;;  %5738 = vmatprep.mubr.bf16.mxu1 %v2411_v14  ;;  %v14581_v33 = vld [vmem:[#allocation12 + $0x7e4] ss:$16 sps:$4 sm:$0xff]   ;;  %v14579_v14 = vld [vmem:[#allocation12 + $0x7e0] ss:$16 sps:$4 sm:$0xff]  }
 0x2bf   :  { %5804 = vmatpush1.bf16.msra.mxu1 %v14504_v11  ;;  %5127 = vmatprep.subr.bf16.mxu0 %v14509_v24  ;;  %v2389_v11 = vld [vmem:[#allocation3 + $0x38] sm:$0xff]  ;;  %v14584_v24 = vld [vmem:[#allocation12 + $0x7ec] ss:$16 sps:$4 sm:$0xff]  }
 0x2c0   :  { %5805 = vmatprep.subr.bf16.mxu1 %v14512_v3  ;;  %v14582_v3 = vld [vmem:[#allocation12 + $0x7e8] ss:$16 sps:$4 sm:$0xff]  }
 0x2c2   :  { %5128 = vmatpush1.bf16.msra.mxu0 %v14507_v40  ;;  %v14587_v40 = vld [vmem:[#allocation12 + $0x804] ss:$16 sps:$4 sm:$0xff]  }
 0x2c3   :  { %5806 = vmatpush1.bf16.msra.mxu1 %v14510_v25  ;;  %5129 = vmatprep.subr.bf16.mxu0 %v14515_v37  ;;  %v14590_v25 = vld [vmem:[#allocation12 + $0x80c] ss:$16 sps:$4 sm:$0xff]   ;;  %v14585_v37 = vld [vmem:[#allocation12 + $0x800] ss:$16 sps:$4 sm:$0xff]  }
 0x2c4   :  { %5061 = vmatmul.mubr.bf16.gmra.mrb[40].mxu0 %v2410_v1  ;;  %5807 = vmatprep.subr.bf16.mxu1 %v14518_v43  ;;  %v2388_v43 = vld [vmem:[#allocation3 + $0x30] sm:$0xff] }
 0x2c5   :  { %5739 = vmatmul.mubr.bf16.gmra.mrb[40].mxu1 %v2410_v1  ;;  %5070 = vmatprep.mubr.bf16.mxu0 %v2423_v30  ;;  %v14588_v1 = vld [vmem:[#allocation12 + $0x808] ss:$16 sps:$4 sm:$0xff]  }
 0x2c6   :  { %5130 = vmatpush1.bf16.msra.mxu0 %v14513_v22  ;;  %5748 = vmatprep.mubr.bf16.mxu1 %v2423_v30  ;;  %v14593_v22 = vld [vmem:[#allocation12 + $0x824] ss:$16 sps:$4 sm:$0xff]   ;;  %v14591_v30 = vld [vmem:[#allocation12 + $0x820] ss:$16 sps:$4 sm:$0xff]  }
 0x2c7   :  { %5808 = vmatpush1.bf16.msra.mxu1 %v14516_v52  ;;  %5131 = vmatprep.subr.bf16.mxu0 %v14521_v51  ;;  %v2401_v52 = vld [vmem:[#allocation3 + $0x98] sm:$0xff]  ;;  %v14596_v51 = vld [vmem:[#allocation12 + $0x82c] ss:$16 sps:$4 sm:$0xff]  }
 0x2c8   :  { %5809 = vmatprep.subr.bf16.mxu1 %v14524_v9  ;;  %v14594_v9 = vld [vmem:[#allocation12 + $0x828] ss:$16 sps:$4 sm:$0xff]  }
 0x2ca   :  { %5132 = vmatpush1.bf16.msra.mxu0 %v14519_v10  ;;  %v14599_v10 = vld [vmem:[#allocation12 + $0x844] ss:$16 sps:$4 sm:$0xff]  }
 0x2cb   :  { %5810 = vmatpush1.bf16.msra.mxu1 %v14522_v59  ;;  %5133 = vmatprep.subr.bf16.mxu0 %v14527_v47  ;;  %v14602_v59 = vld [vmem:[#allocation12 + $0x84c] ss:$16 sps:$4 sm:$0xff]   ;;  %v14597_v47 = vld [vmem:[#allocation12 + $0x840] ss:$16 sps:$4 sm:$0xff]  }
 0x2cc   :  { %5071 = vmatmul.mubr.bf16.gmra.mrb[44].mxu0 %v2422_v17  ;;  %5811 = vmatprep.subr.bf16.mxu1 %v14530_v41  ;;  %v2400_v41 = vld [vmem:[#allocation3 + $0x90] sm:$0xff] }
 0x2cd   :  { %5749 = vmatmul.mubr.bf16.gmra.mrb[44].mxu1 %v2422_v17  ;;  %5080 = vmatprep.mubr.bf16.mxu0 %v2435_v56  ;;  %v14605_v17 = vld [vmem:[#allocation12 + $0x864] ss:$16 sps:$4 sm:$0xff]  }
 0x2ce   :  { %5134 = vmatpush1.bf16.msra.mxu0 %v14525_v55  ;;  %5758 = vmatprep.mubr.bf16.mxu1 %v2435_v56  ;;  %v14600_v55 = vld [vmem:[#allocation12 + $0x848] ss:$16 sps:$4 sm:$0xff]   ;;  %v14603_v56 = vld [vmem:[#allocation12 + $0x860] ss:$16 sps:$4 sm:$0xff]  }
 0x2cf   :  { %5812 = vmatpush1.bf16.msra.mxu1 %v14528_v6  ;;  %5135 = vmatprep.subr.bf16.mxu0 %v14533_v27  ;;  %v2413_v6 = vld [vmem:[#allocation3 + $0xf8] sm:$0xff]  ;;  %v14608_v27 = vld [vmem:[#allocation12 + $0x86c] ss:$16 sps:$4 sm:$0xff]  }
 0x2d0   :  { %5813 = vmatprep.subr.bf16.mxu1 %v14536_v32  ;;  %v14606_v32 = vld [vmem:[#allocation12 + $0x868] ss:$16 sps:$4 sm:$0xff]  }
 0x2d2   :  { %5136 = vmatpush1.bf16.msra.mxu0 %v14531_v58  ;;  %v14611_v58 = vld [vmem:[#allocation12 + $0x884] ss:$16 sps:$4 sm:$0xff]  }
 0x2d3   :  { %5814 = vmatpush1.bf16.msra.mxu1 %v14534_v48  ;;  %5137 = vmatprep.subr.bf16.mxu0 %v14539_v45  ;;  %v14614_v48 = vld [vmem:[#allocation12 + $0x88c] ss:$16 sps:$4 sm:$0xff]   ;;  %v14609_v45 = vld [vmem:[#allocation12 + $0x880] ss:$16 sps:$4 sm:$0xff]  }
 0x2d4   :  { %5081 = vmatmul.mubr.bf16.gmra.mrb[48].mxu0 %v2434_v46  ;;  %5815 = vmatprep.subr.bf16.mxu1 %v14542_v15  ;;  %v2412_v15 = vld [vmem:[#allocation3 + $0xf0] sm:$0xff] }
 0x2d5   :  { %5759 = vmatmul.mubr.bf16.gmra.mrb[48].mxu1 %v2434_v46  ;;  %5090 = vmatprep.mubr.bf16.mxu0 %v2447_v34  ;;  %v14617_v46 = vld [vmem:[#allocation12 + $0x8a4] ss:$16 sps:$4 sm:$0xff]  }
 0x2d6   :  { %5138 = vmatpush1.bf16.msra.mxu0 %v14537_v36  ;;  %5768 = vmatprep.mubr.bf16.mxu1 %v2447_v34  ;;  %v14612_v36 = vld [vmem:[#allocation12 + $0x888] ss:$16 sps:$4 sm:$0xff]   ;;  %v14615_v34 = vld [vmem:[#allocation12 + $0x8a0] ss:$16 sps:$4 sm:$0xff]  }
 0x2d7   :  { %5816 = vmatpush1.bf16.msra.mxu1 %v14540_v4  ;;  %5139 = vmatprep.subr.bf16.mxu0 %v14545_v42  ;;  %v2425_v4 = vld [vmem:[#allocation3 + $0x158] sm:$0xff]  ;;  %v14620_v42 = vld [vmem:[#allocation12 + $0x8ac] ss:$16 sps:$4 sm:$0xff]  }
 0x2d8   :  { %5817 = vmatprep.subr.bf16.mxu1 %v14548_v19  ;;  %v14618_v19 = vld [vmem:[#allocation12 + $0x8a8] ss:$16 sps:$4 sm:$0xff]  }
 0x2da   :  { %5140 = vmatpush1.bf16.msra.mxu0 %v14543_v39  ;;  %v14623_v39 = vld [vmem:[#allocation12 + $0x8c4] ss:$16 sps:$4 sm:$0xff]  }
 0x2db   :  { %5818 = vmatpush1.bf16.msra.mxu1 %v14546_v31  ;;  %5141 = vmatprep.subr.bf16.mxu0 %v14551_v18  ;;  %v14626_v31 = vld [vmem:[#allocation12 + $0x8cc] ss:$16 sps:$4 sm:$0xff]   ;;  %v14621_v18 = vld [vmem:[#allocation12 + $0x8c0] ss:$16 sps:$4 sm:$0xff]  }
 0x2dc   :  { %5091 = vmatmul.mubr.bf16.gmra.mrb[52].mxu0 %v2446_v20  ;;  %5819 = vmatprep.subr.bf16.mxu1 %v14554_v8  ;;  %v2424_v8 = vld [vmem:[#allocation3 + $0x150] sm:$0xff] }
 0x2dd   :  { %5769 = vmatmul.mubr.bf16.gmra.mrb[52].mxu1 %v2446_v20  ;;  %5100 = vmatprep.mubr.bf16.mxu0 %v2459_v16  ;;  %v14629_v20 = vld [vmem:[#allocation12 + $0x8e4] ss:$16 sps:$4 sm:$0xff]  }
 0x2de   :  { %5142 = vmatpush1.bf16.msra.mxu0 %v14549_v23  ;;  %5778 = vmatprep.mubr.bf16.mxu1 %v2459_v16  ;;  %v14624_v23 = vld [vmem:[#allocation12 + $0x8c8] ss:$16 sps:$4 sm:$0xff]   ;;  %v14627_v16 = vld [vmem:[#allocation12 + $0x8e0] ss:$16 sps:$4 sm:$0xff]  }
 0x2df   :  { %5820 = vmatpush1.bf16.msra.mxu1 %v14552_v5  ;;  %5143 = vmatprep.subr.bf16.mxu0 %v14557_v28  ;;  %v2437_v5 = vld [vmem:[#allocation3 + $0x1b8] sm:$0xff]  ;;  %v14632_v28 = vld [vmem:[#allocation12 + $0x8ec] ss:$16 sps:$4 sm:$0xff]  }
 0x2e0   :  { %5821 = vmatprep.subr.bf16.mxu1 %v14560_v12  ;;  %v14630_v12 = vld [vmem:[#allocation12 + $0x8e8] ss:$16 sps:$4 sm:$0xff]  }
 0x2e2   :  { %5144 = vmatpush1.bf16.msra.mxu0 %v14555_v63  ;;  %v14635_v63 = vld [vmem:[#allocation12 + $0x904] ss:$16 sps:$4 sm:$0xff]  }
 0x2e3   :  { %5822 = vmatpush1.bf16.msra.mxu1 %v14558_v62  ;;  %5145 = vmatprep.subr.bf16.mxu0 %v14563_v35  ;;  %v14638_v62 = vld [vmem:[#allocation12 + $0x90c] ss:$16 sps:$4 sm:$0xff]   ;;  %v14633_v35 = vld [vmem:[#allocation12 + $0x900] ss:$16 sps:$4 sm:$0xff]  }
 0x2e4   :  { %5101 = vmatmul.mubr.bf16.gmra.mrb[56].mxu0 %v2458_v54  ;;  %5823 = vmatprep.subr.bf16.mxu1 %v14566_v38  ;;  %v2436_v38 = vld [vmem:[#allocation3 + $0x1b0] sm:$0xff] }
 0x2e5   :  { %5779 = vmatmul.mubr.bf16.gmra.mrb[56].mxu1 %v2458_v54  ;;  %5110 = vmatprep.mubr.bf16.mxu0 %v2471_v57  ;;  %v14641_v54 = vld [vmem:[#allocation12 + $0x924] ss:$16 sps:$4 sm:$0xff]  }
 0x2e6   :  { %5146 = vmatpush1.bf16.msra.mxu0 %v14561_v7  ;;  %5788 = vmatprep.mubr.bf16.mxu1 %v2471_v57  ;;  %v14636_v7 = vld [vmem:[#allocation12 + $0x908] ss:$16 sps:$4 sm:$0xff]   ;;  %v14639_v57 = vld [vmem:[#allocation12 + $0x920] ss:$16 sps:$4 sm:$0xff]  }
 0x2e7   :  { %5824 = vmatpush1.bf16.msra.mxu1 %v14564_v2  ;;  %5147 = vmatprep.subr.bf16.mxu0 %v14569_v44  ;;  %v2449_v2 = vld [vmem:[#allocation3 + $0x218] sm:$0xff]  ;;  %v14644_v44 = vld [vmem:[#allocation12 + $0x92c] ss:$16 sps:$4 sm:$0xff]  }
 0x2e8   :  { %5825 = vmatprep.subr.bf16.mxu1 %v14572_v60  ;;  %v14642_v60 = vld [vmem:[#allocation12 + $0x928] ss:$16 sps:$4 sm:$0xff]  }
 0x2ea   :  { %5148 = vmatpush1.bf16.msra.mxu0 %v14567_v61  ;;  %v14647_v61 = vld [vmem:[#allocation12 + $0x944] ss:$16 sps:$4 sm:$0xff]  }
 0x2eb   :  { %5826 = vmatpush1.bf16.msra.mxu1 %v14570_v13  ;;  %5149 = vmatprep.subr.bf16.mxu0 %v14575_v0  ;;  %v14650_v13 = vld [vmem:[#allocation12 + $0x94c] ss:$16 sps:$4 sm:$0xff]   ;;  %v14645_v0 = vld [vmem:[#allocation12 + $0x940] ss:$16 sps:$4 sm:$0xff]  }
 0x2ec   :  { %5111 = vmatmul.mubr.bf16.gmra.mrb[60].mxu0 %v2470_v21  ;;  %5827 = vmatprep.subr.bf16.mxu1 %v14578_v49  ;;  %v2448_v49 = vld [vmem:[#allocation3 + $0x210] sm:$0xff] }
 0x2ed   :  { %5789 = vmatmul.mubr.bf16.gmra.mrb[60].mxu1 %v2470_v21  ;;  %5153 = vmatprep.mubr.bf16.mxu0 %v2389_v11  ;;  %v14653_v21 = vld [vmem:[#allocation12 + $0x964] ss:$16 sps:$4 sm:$0xff]  }
 0x2ee   :  { %5150 = vmatpush1.bf16.msra.mxu0 %v14573_v50  ;;  %5831 = vmatprep.mubr.bf16.mxu1 %v2389_v11  ;;  %v14648_v50 = vld [vmem:[#allocation12 + $0x948] ss:$16 sps:$4 sm:$0xff]   ;;  %v14651_v11 = vld [vmem:[#allocation12 + $0x960] ss:$16 sps:$4 sm:$0xff]  }
 0x2ef   :  { %5828 = vmatpush1.bf16.msra.mxu1 %v14576_v29  ;;  %5151 = vmatprep.subr.bf16.mxu0 %v14581_v33  ;;  %v2461_v29 = vld [vmem:[#allocation3 + $0x278] sm:$0xff]  ;;  %v14656_v33 = vld [vmem:[#allocation12 + $0x96c] ss:$16 sps:$4 sm:$0xff]  }
 0x2f0   :  { %5829 = vmatprep.subr.bf16.mxu1 %v14584_v24  ;;  %v14654_v24 = vld [vmem:[#allocation12 + $0x968] ss:$16 sps:$4 sm:$0xff]  }
 0x2f2   :  { %5152 = vmatpush1.bf16.msra.mxu0 %v14579_v14  ;;  %v14659_v14 = vld [vmem:[#allocation12 + $0x984] ss:$16 sps:$4 sm:$0xff]  }
 0x2f3   :  { %5830 = vmatpush1.bf16.msra.mxu1 %v14582_v3  ;;  %5234 = vmatprep.subr.bf16.mxu0 %v14587_v40  ;;  %v14662_v3 = vld [vmem:[#allocation12 + $0x98c] ss:$16 sps:$4 sm:$0xff]   ;;  %v14657_v40 = vld [vmem:[#allocation12 + $0x980] ss:$16 sps:$4 sm:$0xff]  }
 0x2f4   :  { %5912 = vmatprep.subr.bf16.mxu1 %v14590_v25  ;;  %v2460_v25 = vld [vmem:[#allocation3 + $0x270] sm:$0xff] }
 0x2f5   :  { %5154 = vmatmul.mubr.bf16.vlgmr.msra.gmra.mrb[32].mxu0 %v2388_v43 }
 0x2f6   :  { %5832 = vmatmul.mubr.bf16.vlgmr.msra.gmra.mrb[32].mxu1 %v2388_v43  ;;  %5163 = vmatprep.mubr.bf16.mxu0 %v2401_v52  ;;  %v14665_v43 = vld [vmem:[#allocation12 + $0x9a4] ss:$16 sps:$4 sm:$0xff]  }
 0x2f7   :  { %5235 = vmatpush1.bf16.msra.mxu0 %v14585_v37  ;;  %5841 = vmatprep.mubr.bf16.mxu1 %v2401_v52  ;;  %v14660_v37 = vld [vmem:[#allocation12 + $0x988] ss:$16 sps:$4 sm:$0xff]   ;;  %v14663_v52 = vld [vmem:[#allocation12 + $0x9a0] ss:$16 sps:$4 sm:$0xff]  }
 0x2f8   :  { %5913 = vmatpush1.bf16.msra.mxu1 %v14588_v1  ;;  %5236 = vmatprep.subr.bf16.mxu0 %v14593_v22  ;;  %v2473_v1 = vld [vmem:[#allocation3 + $0x2d8] sm:$0xff]  ;;  %v14668_v22 = vld [vmem:[#allocation12 + $0x9ac] ss:$16 sps:$4 sm:$0xff]  }
 0x2f9   :  { %5914 = vmatprep.subr.bf16.mxu1 %v14596_v51  ;;  %v14666_v51 = vld [vmem:[#allocation12 + $0x9a8] ss:$16 sps:$4 sm:$0xff]  }
 0x2fb   :  { %5237 = vmatpush1.bf16.msra.mxu0 %v14591_v30  ;;  %v14671_v30 = vld [vmem:[#allocation12 + $0x9c4] ss:$16 sps:$4 sm:$0xff]  }
 0x2fc   :  { %5915 = vmatpush1.bf16.msra.mxu1 %v14594_v9  ;;  %5238 = vmatprep.subr.bf16.mxu0 %v14599_v10  ;;  %v14674_v9 = vld [vmem:[#allocation12 + $0x9cc] ss:$16 sps:$4 sm:$0xff]   ;;  %v14669_v10 = vld [vmem:[#allocation12 + $0x9c0] ss:$16 sps:$4 sm:$0xff]  }
 0x2fd   :  { %5164 = vmatmul.mubr.bf16.gmra.mrb[36].mxu0 %v2400_v41  ;;  %5916 = vmatprep.subr.bf16.mxu1 %v14602_v59  ;;  %v2472_v59 = vld [vmem:[#allocation3 + $0x2d0] sm:$0xff] }
 0x2fe   :  { %5842 = vmatmul.mubr.bf16.gmra.mrb[36].mxu1 %v2400_v41  ;;  %5173 = vmatprep.mubr.bf16.mxu0 %v2413_v6  ;;  %v14677_v41 = vld [vmem:[#allocation12 + $0x9e4] ss:$16 sps:$4 sm:$0xff]  }
 0x2ff   :  { %5239 = vmatpush1.bf16.msra.mxu0 %v14597_v47  ;;  %5851 = vmatprep.mubr.bf16.mxu1 %v2413_v6  ;;  %v14672_v47 = vld [vmem:[#allocation12 + $0x9c8] ss:$16 sps:$4 sm:$0xff]   ;;  %v14675_v6 = vld [vmem:[#allocation12 + $0x9e0] ss:$16 sps:$4 sm:$0xff]  }
 0x300   :  { %5917 = vmatpush1.bf16.msra.mxu1 %v14600_v55  ;;  %5240 = vmatprep.subr.bf16.mxu0 %v14605_v17  ;;  %v2391_v55 = vld [vmem:[#allocation3 + $0x48] sm:$0xff]  ;;  %v14680_v17 = vld [vmem:[#allocation12 + $0x9ec] ss:$16 sps:$4 sm:$0xff]  }
 0x301   :  { %5918 = vmatprep.subr.bf16.mxu1 %v14608_v27  ;;  %v14678_v27 = vld [vmem:[#allocation12 + $0x9e8] ss:$16 sps:$4 sm:$0xff]  }
 0x303   :  { %5241 = vmatpush1.bf16.msra.mxu0 %v14603_v56  ;;  %v14683_v56 = vld [vmem:[#allocation12 + $0xa04] ss:$16 sps:$4 sm:$0xff]  }
 0x304   :  { %5919 = vmatpush1.bf16.msra.mxu1 %v14606_v32  ;;  %5242 = vmatprep.subr.bf16.mxu0 %v14611_v58  ;;  %v14686_v32 = vld [vmem:[#allocation12 + $0xa0c] ss:$16 sps:$4 sm:$0xff]   ;;  %v14681_v58 = vld [vmem:[#allocation12 + $0xa00] ss:$16 sps:$4 sm:$0xff]  }
 0x305   :  { %5174 = vmatmul.mubr.bf16.gmra.mrb[40].mxu0 %v2412_v15  ;;  %5920 = vmatprep.subr.bf16.mxu1 %v14614_v48  ;;  %v2390_v48 = vld [vmem:[#allocation3 + $0x40] sm:$0xff] }
 0x306   :  { %5852 = vmatmul.mubr.bf16.gmra.mrb[40].mxu1 %v2412_v15  ;;  %5183 = vmatprep.mubr.bf16.mxu0 %v2425_v4  ;;  %v14689_v15 = vld [vmem:[#allocation12 + $0xa24] ss:$16 sps:$4 sm:$0xff]  }
 0x307   :  { %5243 = vmatpush1.bf16.msra.mxu0 %v14609_v45  ;;  %5861 = vmatprep.mubr.bf16.mxu1 %v2425_v4  ;;  %v14684_v45 = vld [vmem:[#allocation12 + $0xa08] ss:$16 sps:$4 sm:$0xff]   ;;  %v14687_v4 = vld [vmem:[#allocation12 + $0xa20] ss:$16 sps:$4 sm:$0xff]  }
 0x308   :  { %5921 = vmatpush1.bf16.msra.mxu1 %v14612_v36  ;;  %5244 = vmatprep.subr.bf16.mxu0 %v14617_v46  ;;  %v2403_v36 = vld [vmem:[#allocation3 + $0xa8] sm:$0xff]  ;;  %v14692_v46 = vld [vmem:[#allocation12 + $0xa2c] ss:$16 sps:$4 sm:$0xff]  }
 0x309   :  { %5922 = vmatprep.subr.bf16.mxu1 %v14620_v42  ;;  %v14690_v42 = vld [vmem:[#allocation12 + $0xa28] ss:$16 sps:$4 sm:$0xff]  }
 0x30b   :  { %5245 = vmatpush1.bf16.msra.mxu0 %v14615_v34  ;;  %v14695_v34 = vld [vmem:[#allocation12 + $0xa44] ss:$16 sps:$4 sm:$0xff]  }
 0x30c   :  { %5923 = vmatpush1.bf16.msra.mxu1 %v14618_v19  ;;  %5246 = vmatprep.subr.bf16.mxu0 %v14623_v39  ;;  %v14698_v19 = vld [vmem:[#allocation12 + $0xa4c] ss:$16 sps:$4 sm:$0xff]   ;;  %v14693_v39 = vld [vmem:[#allocation12 + $0xa40] ss:$16 sps:$4 sm:$0xff]  }
 0x30d   :  { %5184 = vmatmul.mubr.bf16.gmra.mrb[44].mxu0 %v2424_v8  ;;  %5924 = vmatprep.subr.bf16.mxu1 %v14626_v31  ;;  %v2402_v31 = vld [vmem:[#allocation3 + $0xa0] sm:$0xff] }
 0x30e   :  { %5862 = vmatmul.mubr.bf16.gmra.mrb[44].mxu1 %v2424_v8  ;;  %5193 = vmatprep.mubr.bf16.mxu0 %v2437_v5  ;;  %v14701_v8 = vld [vmem:[#allocation12 + $0xa64] ss:$16 sps:$4 sm:$0xff]  }
 0x30f   :  { %5247 = vmatpush1.bf16.msra.mxu0 %v14621_v18  ;;  %5871 = vmatprep.mubr.bf16.mxu1 %v2437_v5  ;;  %v14696_v18 = vld [vmem:[#allocation12 + $0xa48] ss:$16 sps:$4 sm:$0xff]   ;;  %v14699_v5 = vld [vmem:[#allocation12 + $0xa60] ss:$16 sps:$4 sm:$0xff]  }
 0x310   :  { %5925 = vmatpush1.bf16.msra.mxu1 %v14624_v23  ;;  %5248 = vmatprep.subr.bf16.mxu0 %v14629_v20  ;;  %v2415_v23 = vld [vmem:[#allocation3 + $0x108] sm:$0xff]  ;;  %v14704_v20 = vld [vmem:[#allocation12 + $0xa6c] ss:$16 sps:$4 sm:$0xff]  }
 0x311   :  { %5926 = vmatprep.subr.bf16.mxu1 %v14632_v28  ;;  %v14702_v28 = vld [vmem:[#allocation12 + $0xa68] ss:$16 sps:$4 sm:$0xff]  }
 0x313   :  { %5249 = vmatpush1.bf16.msra.mxu0 %v14627_v16  ;;  %v14707_v16 = vld [vmem:[#allocation12 + $0xa84] ss:$16 sps:$4 sm:$0xff]  }
 0x314   :  { %5927 = vmatpush1.bf16.msra.mxu1 %v14630_v12  ;;  %5250 = vmatprep.subr.bf16.mxu0 %v14635_v63  ;;  %v14710_v12 = vld [vmem:[#allocation12 + $0xa8c] ss:$16 sps:$4 sm:$0xff]   ;;  %v14705_v63 = vld [vmem:[#allocation12 + $0xa80] ss:$16 sps:$4 sm:$0xff]  }
 0x315   :  { %5194 = vmatmul.mubr.bf16.gmra.mrb[48].mxu0 %v2436_v38  ;;  %5928 = vmatprep.subr.bf16.mxu1 %v14638_v62  ;;  %v2414_v62 = vld [vmem:[#allocation3 + $0x100] sm:$0xff] }
 0x316   :  { %5872 = vmatmul.mubr.bf16.gmra.mrb[48].mxu1 %v2436_v38  ;;  %5203 = vmatprep.mubr.bf16.mxu0 %v2449_v2  ;;  %v14713_v38 = vld [vmem:[#allocation12 + $0xaa4] ss:$16 sps:$4 sm:$0xff]  }
 0x317   :  { %5251 = vmatpush1.bf16.msra.mxu0 %v14633_v35  ;;  %5881 = vmatprep.mubr.bf16.mxu1 %v2449_v2  ;;  %v14708_v35 = vld [vmem:[#allocation12 + $0xa88] ss:$16 sps:$4 sm:$0xff]   ;;  %v14711_v2 = vld [vmem:[#allocation12 + $0xaa0] ss:$16 sps:$4 sm:$0xff]  }
 0x318   :  { %5929 = vmatpush1.bf16.msra.mxu1 %v14636_v7  ;;  %5252 = vmatprep.subr.bf16.mxu0 %v14641_v54  ;;  %v2427_v7 = vld [vmem:[#allocation3 + $0x168] sm:$0xff]  ;;  %v14716_v54 = vld [vmem:[#allocation12 + $0xaac] ss:$16 sps:$4 sm:$0xff]  }
 0x319   :  { %5930 = vmatprep.subr.bf16.mxu1 %v14644_v44  ;;  %v14714_v44 = vld [vmem:[#allocation12 + $0xaa8] ss:$16 sps:$4 sm:$0xff]  }
 0x31b   :  { %5253 = vmatpush1.bf16.msra.mxu0 %v14639_v57  ;;  %v14719_v57 = vld [vmem:[#allocation12 + $0xac4] ss:$16 sps:$4 sm:$0xff]  }
 0x31c   :  { %5931 = vmatpush1.bf16.msra.mxu1 %v14642_v60  ;;  %5254 = vmatprep.subr.bf16.mxu0 %v14647_v61  ;;  %v14722_v60 = vld [vmem:[#allocation12 + $0xacc] ss:$16 sps:$4 sm:$0xff]   ;;  %v14717_v61 = vld [vmem:[#allocation12 + $0xac0] ss:$16 sps:$4 sm:$0xff]  }
 0x31d   :  { %5204 = vmatmul.mubr.bf16.gmra.mrb[52].mxu0 %v2448_v49  ;;  %5932 = vmatprep.subr.bf16.mxu1 %v14650_v13  ;;  %v2426_v13 = vld [vmem:[#allocation3 + $0x160] sm:$0xff] }
 0x31e   :  { %5882 = vmatmul.mubr.bf16.gmra.mrb[52].mxu1 %v2448_v49  ;;  %5213 = vmatprep.mubr.bf16.mxu0 %v2461_v29  ;;  %v14725_v49 = vld [vmem:[#allocation12 + $0xae4] ss:$16 sps:$4 sm:$0xff]  }
 0x31f   :  { %5255 = vmatpush1.bf16.msra.mxu0 %v14645_v0  ;;  %5891 = vmatprep.mubr.bf16.mxu1 %v2461_v29  ;;  %v14720_v0 = vld [vmem:[#allocation12 + $0xac8] ss:$16 sps:$4 sm:$0xff]   ;;  %v14723_v29 = vld [vmem:[#allocation12 + $0xae0] ss:$16 sps:$4 sm:$0xff]  }
 0x320   :  { %5933 = vmatpush1.bf16.msra.mxu1 %v14648_v50  ;;  %5256 = vmatprep.subr.bf16.mxu0 %v14653_v21  ;;  %v2439_v50 = vld [vmem:[#allocation3 + $0x1c8] sm:$0xff]  ;;  %v14728_v21 = vld [vmem:[#allocation12 + $0xaec] ss:$16 sps:$4 sm:$0xff]  }
 0x321   :  { %5934 = vmatprep.subr.bf16.mxu1 %v14656_v33  ;;  %v14726_v33 = vld [vmem:[#allocation12 + $0xae8] ss:$16 sps:$4 sm:$0xff]  }
 0x323   :  { %5257 = vmatpush1.bf16.msra.mxu0 %v14651_v11  ;;  %v14731_v11 = vld [vmem:[#allocation12 + $0xb04] ss:$16 sps:$4 sm:$0xff]  }
 0x324   :  { %5935 = vmatpush1.bf16.msra.mxu1 %v14654_v24  ;;  %5258 = vmatprep.subr.bf16.mxu0 %v14659_v14  ;;  %v14734_v24 = vld [vmem:[#allocation12 + $0xb0c] ss:$16 sps:$4 sm:$0xff]   ;;  %v14729_v14 = vld [vmem:[#allocation12 + $0xb00] ss:$16 sps:$4 sm:$0xff]  }
 0x325   :  { %5214 = vmatmul.mubr.bf16.gmra.mrb[56].mxu0 %v2460_v25  ;;  %5936 = vmatprep.subr.bf16.mxu1 %v14662_v3  ;;  %v2438_v3 = vld [vmem:[#allocation3 + $0x1c0] sm:$0xff] }
 0x326   :  { %5892 = vmatmul.mubr.bf16.gmra.mrb[56].mxu1 %v2460_v25  ;;  %5223 = vmatprep.mubr.bf16.mxu0 %v2473_v1  ;;  %v14737_v25 = vld [vmem:[#allocation12 + $0xb24] ss:$16 sps:$4 sm:$0xff]  }
 0x327   :  { %5259 = vmatpush1.bf16.msra.mxu0 %v14657_v40  ;;  %5901 = vmatprep.mubr.bf16.mxu1 %v2473_v1  ;;  %v14732_v40 = vld [vmem:[#allocation12 + $0xb08] ss:$16 sps:$4 sm:$0xff]   ;;  %v14735_v1 = vld [vmem:[#allocation12 + $0xb20] ss:$16 sps:$4 sm:$0xff]  }
 0x328   :  { %5937 = vmatpush1.bf16.msra.mxu1 %v14660_v37  ;;  %5260 = vmatprep.subr.bf16.mxu0 %v14665_v43  ;;  %v2451_v37 = vld [vmem:[#allocation3 + $0x228] sm:$0xff]  ;;  %v14740_v43 = vld [vmem:[#allocation12 + $0xb2c] ss:$16 sps:$4 sm:$0xff]  }
 0x329   :  { %5938 = vmatprep.subr.bf16.mxu1 %v14668_v22  ;;  %v14738_v22 = vld [vmem:[#allocation12 + $0xb28] ss:$16 sps:$4 sm:$0xff]  }
 0x32b   :  { %5261 = vmatpush1.bf16.msra.mxu0 %v14663_v52  ;;  %v14743_v52 = vld [vmem:[#allocation12 + $0xb44] ss:$16 sps:$4 sm:$0xff]  }
 0x32c   :  { %5939 = vmatpush1.bf16.msra.mxu1 %v14666_v51  ;;  %5262 = vmatprep.subr.bf16.mxu0 %v14671_v30  ;;  %v14746_v51 = vld [vmem:[#allocation12 + $0xb4c] ss:$16 sps:$4 sm:$0xff]   ;;  %v14741_v30 = vld [vmem:[#allocation12 + $0xb40] ss:$16 sps:$4 sm:$0xff]  }
 0x32d   :  { %5224 = vmatmul.mubr.bf16.gmra.mrb[60].mxu0 %v2472_v59  ;;  %5940 = vmatprep.subr.bf16.mxu1 %v14674_v9  ;;  %v2450_v9 = vld [vmem:[#allocation3 + $0x220] sm:$0xff] }
 0x32e   :  { %5902 = vmatmul.mubr.bf16.gmra.mrb[60].mxu1 %v2472_v59  ;;  %5266 = vmatprep.mubr.bf16.mxu0 %v2391_v55  ;;  %v14749_v59 = vld [vmem:[#allocation12 + $0xb64] ss:$16 sps:$4 sm:$0xff]  }
 0x32f   :  { %5263 = vmatpush1.bf16.msra.mxu0 %v14669_v10  ;;  %5944 = vmatprep.mubr.bf16.mxu1 %v2391_v55  ;;  %v14744_v10 = vld [vmem:[#allocation12 + $0xb48] ss:$16 sps:$4 sm:$0xff]   ;;  %v14747_v55 = vld [vmem:[#allocation12 + $0xb60] ss:$16 sps:$4 sm:$0xff]  }
 0x330   :  { %5941 = vmatpush1.bf16.msra.mxu1 %v14672_v47  ;;  %5264 = vmatprep.subr.bf16.mxu0 %v14677_v41  ;;  %v2463_v47 = vld [vmem:[#allocation3 + $0x288] sm:$0xff]  ;;  %v14752_v41 = vld [vmem:[#allocation12 + $0xb6c] ss:$16 sps:$4 sm:$0xff]  }
 0x331   :  { %5942 = vmatprep.subr.bf16.mxu1 %v14680_v17  ;;  %v14750_v17 = vld [vmem:[#allocation12 + $0xb68] ss:$16 sps:$4 sm:$0xff]  }
 0x333   :  { %5265 = vmatpush1.bf16.msra.mxu0 %v14675_v6  ;;  %v14755_v6 = vld [vmem:[#allocation12 + $0xb84] ss:$16 sps:$4 sm:$0xff]  }
 0x334   :  { %5943 = vmatpush1.bf16.msra.mxu1 %v14678_v27  ;;  %5347 = vmatprep.subr.bf16.mxu0 %v14683_v56  ;;  %v14758_v27 = vld [vmem:[#allocation12 + $0xb8c] ss:$16 sps:$4 sm:$0xff]   ;;  %v14753_v56 = vld [vmem:[#allocation12 + $0xb80] ss:$16 sps:$4 sm:$0xff]  }
 0x335   :  { %6025 = vmatprep.subr.bf16.mxu1 %v14686_v32  ;;  %v2462_v32 = vld [vmem:[#allocation3 + $0x280] sm:$0xff] }
 0x336   :  { %5267 = vmatmul.mubr.bf16.vlgmr.msra.gmra.mrb[32].mxu0 %v2390_v48 }
 0x337   :  { %5945 = vmatmul.mubr.bf16.vlgmr.msra.gmra.mrb[32].mxu1 %v2390_v48  ;;  %5276 = vmatprep.mubr.bf16.mxu0 %v2403_v36  ;;  %v14761_v48 = vld [vmem:[#allocation12 + $0xba4] ss:$16 sps:$4 sm:$0xff]  }
 0x338   :  { %5348 = vmatpush1.bf16.msra.mxu0 %v14681_v58  ;;  %5954 = vmatprep.mubr.bf16.mxu1 %v2403_v36  ;;  %v14756_v58 = vld [vmem:[#allocation12 + $0xb88] ss:$16 sps:$4 sm:$0xff]   ;;  %v14759_v36 = vld [vmem:[#allocation12 + $0xba0] ss:$16 sps:$4 sm:$0xff]  }
 0x339   :  { %6026 = vmatpush1.bf16.msra.mxu1 %v14684_v45  ;;  %5349 = vmatprep.subr.bf16.mxu0 %v14689_v15  ;;  %v2475_v45 = vld [vmem:[#allocation3 + $0x2e8] sm:$0xff]  ;;  %v14764_v15 = vld [vmem:[#allocation12 + $0xbac] ss:$16 sps:$4 sm:$0xff]  }
 0x33a   :  { %6027 = vmatprep.subr.bf16.mxu1 %v14692_v46  ;;  %v14762_v46 = vld [vmem:[#allocation12 + $0xba8] ss:$16 sps:$4 sm:$0xff]  }
 0x33c   :  { %5350 = vmatpush1.bf16.msra.mxu0 %v14687_v4  ;;  %v14767_v4 = vld [vmem:[#allocation12 + $0xbc4] ss:$16 sps:$4 sm:$0xff]  }
 0x33d   :  { %6028 = vmatpush1.bf16.msra.mxu1 %v14690_v42  ;;  %5351 = vmatprep.subr.bf16.mxu0 %v14695_v34  ;;  %v14770_v42 = vld [vmem:[#allocation12 + $0xbcc] ss:$16 sps:$4 sm:$0xff]   ;;  %v14765_v34 = vld [vmem:[#allocation12 + $0xbc0] ss:$16 sps:$4 sm:$0xff]  }
 0x33e   :  { %5277 = vmatmul.mubr.bf16.gmra.mrb[36].mxu0 %v2402_v31  ;;  %6029 = vmatprep.subr.bf16.mxu1 %v14698_v19  ;;  %v2474_v19 = vld [vmem:[#allocation3 + $0x2e0] sm:$0xff] }
 0x33f   :  { %5955 = vmatmul.mubr.bf16.gmra.mrb[36].mxu1 %v2402_v31  ;;  %5286 = vmatprep.mubr.bf16.mxu0 %v2415_v23  ;;  %v14773_v31 = vld [vmem:[#allocation12 + $0xbe4] ss:$16 sps:$4 sm:$0xff]  }
 0x340   :  { %5352 = vmatpush1.bf16.msra.mxu0 %v14693_v39  ;;  %5964 = vmatprep.mubr.bf16.mxu1 %v2415_v23  ;;  %v14768_v39 = vld [vmem:[#allocation12 + $0xbc8] ss:$16 sps:$4 sm:$0xff]   ;;  %v14771_v23 = vld [vmem:[#allocation12 + $0xbe0] ss:$16 sps:$4 sm:$0xff]  }
 0x341   :  { %6030 = vmatpush1.bf16.msra.mxu1 %v14696_v18  ;;  %5353 = vmatprep.subr.bf16.mxu0 %v14701_v8  ;;  %v2393_v18 = vld [vmem:[#allocation3 + $0x58] sm:$0xff]  ;;  %v14776_v8 = vld [vmem:[#allocation12 + $0xbec] ss:$16 sps:$4 sm:$0xff]  }
 0x342   :  { %6031 = vmatprep.subr.bf16.mxu1 %v14704_v20  ;;  %v14774_v20 = vld [vmem:[#allocation12 + $0xbe8] ss:$16 sps:$4 sm:$0xff]  }
 0x344   :  { %5354 = vmatpush1.bf16.msra.mxu0 %v14699_v5  ;;  %v14785_v5 = vld [vmem:[#allocation15 + $0x4] ss:$8 sps:$4 sm:$0xff]  }
 0x345   :  { %6032 = vmatpush1.bf16.msra.mxu1 %v14702_v28  ;;  %5355 = vmatprep.subr.bf16.mxu0 %v14707_v16  ;;  %v14779_v28 = vld [vmem:[#allocation17 + $0x4] ss:$8 sps:$4 sm:$0xff]   ;;  %v14777_v16 = vld [vmem:[#allocation17] ss:$8 sps:$4 sm:$0xff]  }
 0x346   :  { %5287 = vmatmul.mubr.bf16.gmra.mrb[40].mxu0 %v2414_v62  ;;  %6033 = vmatprep.subr.bf16.mxu1 %v14710_v12  ;;  %v2392_v12 = vld [vmem:[#allocation3 + $0x50] sm:$0xff] }
 0x347   :  { %5965 = vmatmul.mubr.bf16.gmra.mrb[40].mxu1 %v2414_v62  ;;  %5296 = vmatprep.mubr.bf16.mxu0 %v2427_v7  ;;  %v14783_v62 = vld [vmem:[#allocation15] ss:$8 sps:$4 sm:$0xff]  }
 0x348   :  { %5356 = vmatpush1.bf16.msra.mxu0 %v14705_v63  ;;  %5974 = vmatprep.mubr.bf16.mxu1 %v2427_v7  ;;  %v14782_v63 = vld [vmem:[#allocation17 + $0x14] ss:$8 sps:$4 sm:$0xff]   ;;  %v14780_v7 = vld [vmem:[#allocation17 + $0x10] ss:$8 sps:$4 sm:$0xff]  }
 0x349   :  { %6034 = vmatpush1.bf16.msra.mxu1 %v14708_v35  ;;  %5357 = vmatprep.subr.bf16.mxu0 %v14713_v38  ;;  %v2405_v35 = vld [vmem:[#allocation3 + $0xb8] sm:$0xff] }
 0x34a   :  { %6035 = vmatprep.subr.bf16.mxu1 %v14716_v54  ;;  %v14791_v38 = vld [vmem:[#allocation15 + $0x14] ss:$8 sps:$4 sm:$0xff]   ;;  %v14788_v54 = vld [vmem:[#allocation17 + $0x24] ss:$8 sps:$4 sm:$0xff]  }
 0x34c   :  { %5358 = vmatpush1.bf16.msra.mxu0 %v14711_v2  ;;  %v14789_v2 = vld [vmem:[#allocation15 + $0x10] ss:$8 sps:$4 sm:$0xff]  }
 0x34d   :  { %6036 = vmatpush1.bf16.msra.mxu1 %v14714_v44  ;;  %5359 = vmatprep.subr.bf16.mxu0 %v14719_v57  ;;  %v14797_v44 = vld [vmem:[#allocation15 + $0x24] ss:$8 sps:$4 sm:$0xff]   ;;  %v14786_v57 = vld [vmem:[#allocation17 + $0x20] ss:$8 sps:$4 sm:$0xff]  }
 0x34e   :  { %5297 = vmatmul.mubr.bf16.gmra.mrb[44].mxu0 %v2426_v13  ;;  %6037 = vmatprep.subr.bf16.mxu1 %v14722_v60  ;;  %v2404_v60 = vld [vmem:[#allocation3 + $0xb0] sm:$0xff] }
 0x34f   :  { %5975 = vmatmul.mubr.bf16.gmra.mrb[44].mxu1 %v2426_v13  ;;  %5306 = vmatprep.mubr.bf16.mxu0 %v2439_v50  ;;  %v14795_v13 = vld [vmem:[#allocation15 + $0x20] ss:$8 sps:$4 sm:$0xff]  }
 0x350   :  { %5360 = vmatpush1.bf16.msra.mxu0 %v14717_v61  ;;  %5984 = vmatprep.mubr.bf16.mxu1 %v2439_v50  ;;  %v14794_v61 = vld [vmem:[#allocation17 + $0x34] ss:$8 sps:$4 sm:$0xff]   ;;  %v14792_v50 = vld [vmem:[#allocation17 + $0x30] ss:$8 sps:$4 sm:$0xff]  }
 0x351   :  { %6038 = vmatpush1.bf16.msra.mxu1 %v14720_v0  ;;  %5361 = vmatprep.subr.bf16.mxu0 %v14725_v49  ;;  %v2417_v0 = vld [vmem:[#allocation3 + $0x118] sm:$0xff] }
 0x352   :  { %6039 = vmatprep.subr.bf16.mxu1 %v14728_v21  ;;  %v14803_v49 = vld [vmem:[#allocation15 + $0x34] ss:$8 sps:$4 sm:$0xff]   ;;  %v14800_v21 = vld [vmem:[#allocation17 + $0x44] ss:$8 sps:$4 sm:$0xff]  }
 0x354   :  { %5362 = vmatpush1.bf16.msra.mxu0 %v14723_v29  ;;  %v14801_v29 = vld [vmem:[#allocation15 + $0x30] ss:$8 sps:$4 sm:$0xff]  }
 0x355   :  { %6040 = vmatpush1.bf16.msra.mxu1 %v14726_v33  ;;  %5363 = vmatprep.subr.bf16.mxu0 %v14731_v11  ;;  %v14809_v33 = vld [vmem:[#allocation15 + $0x44] ss:$8 sps:$4 sm:$0xff]   ;;  %v14798_v11 = vld [vmem:[#allocation17 + $0x40] ss:$8 sps:$4 sm:$0xff]  }
 0x356   :  { %5307 = vmatmul.mubr.bf16.gmra.mrb[48].mxu0 %v2438_v3  ;;  %6041 = vmatprep.subr.bf16.mxu1 %v14734_v24  ;;  %v2416_v24 = vld [vmem:[#allocation3 + $0x110] sm:$0xff] }
 0x357   :  { %5985 = vmatmul.mubr.bf16.gmra.mrb[48].mxu1 %v2438_v3  ;;  %5316 = vmatprep.mubr.bf16.mxu0 %v2451_v37  ;;  %v14807_v3 = vld [vmem:[#allocation15 + $0x40] ss:$8 sps:$4 sm:$0xff]  }
 0x358   :  { %5364 = vmatpush1.bf16.msra.mxu0 %v14729_v14  ;;  %5994 = vmatprep.mubr.bf16.mxu1 %v2451_v37  ;;  %v14806_v14 = vld [vmem:[#allocation17 + $0x54] ss:$8 sps:$4 sm:$0xff]   ;;  %v14804_v37 = vld [vmem:[#allocation17 + $0x50] ss:$8 sps:$4 sm:$0xff]  }
 0x359   :  { %6042 = vmatpush1.bf16.msra.mxu1 %v14732_v40  ;;  %5365 = vmatprep.subr.bf16.mxu0 %v14737_v25  ;;  %v2429_v40 = vld [vmem:[#allocation3 + $0x178] sm:$0xff] }
 0x35a   :  { %6043 = vmatprep.subr.bf16.mxu1 %v14740_v43  ;;  %v14815_v25 = vld [vmem:[#allocation15 + $0x54] ss:$8 sps:$4 sm:$0xff]   ;;  %v14812_v43 = vld [vmem:[#allocation17 + $0x64] ss:$8 sps:$4 sm:$0xff]  }
 0x35c   :  { %5366 = vmatpush1.bf16.msra.mxu0 %v14735_v1  ;;  %v14813_v1 = vld [vmem:[#allocation15 + $0x50] ss:$8 sps:$4 sm:$0xff]  }
 0x35d   :  { %6044 = vmatpush1.bf16.msra.mxu1 %v14738_v22  ;;  %5367 = vmatprep.subr.bf16.mxu0 %v14743_v52  ;;  %v14821_v22 = vld [vmem:[#allocation15 + $0x64] ss:$8 sps:$4 sm:$0xff]   ;;  %v14810_v52 = vld [vmem:[#allocation17 + $0x60] ss:$8 sps:$4 sm:$0xff]  }
 0x35e   :  { %5317 = vmatmul.mubr.bf16.gmra.mrb[52].mxu0 %v2450_v9  ;;  %6045 = vmatprep.subr.bf16.mxu1 %v14746_v51  ;;  %v2428_v51 = vld [vmem:[#allocation3 + $0x170] sm:$0xff] }
 0x35f   :  { %5995 = vmatmul.mubr.bf16.gmra.mrb[52].mxu1 %v2450_v9  ;;  %5326 = vmatprep.mubr.bf16.mxu0 %v2463_v47  ;;  %v14819_v9 = vld [vmem:[#allocation15 + $0x60] ss:$8 sps:$4 sm:$0xff]  }
 0x360   :  { %5368 = vmatpush1.bf16.msra.mxu0 %v14741_v30  ;;  %6004 = vmatprep.mubr.bf16.mxu1 %v2463_v47  ;;  %v14818_v30 = vld [vmem:[#allocation17 + $0x74] ss:$8 sps:$4 sm:$0xff]   ;;  %v14816_v47 = vld [vmem:[#allocation17 + $0x70] ss:$8 sps:$4 sm:$0xff]  }
 0x361   :  { %6046 = vmatpush1.bf16.msra.mxu1 %v14744_v10  ;;  %5369 = vmatprep.subr.bf16.mxu0 %v14749_v59  ;;  %v2441_v10 = vld [vmem:[#allocation3 + $0x1d8] sm:$0xff] }
 0x362   :  { %6047 = vmatprep.subr.bf16.mxu1 %v14752_v41  ;;  %v14827_v59 = vld [vmem:[#allocation15 + $0x74] ss:$8 sps:$4 sm:$0xff]   ;;  %v14824_v41 = vld [vmem:[#allocation17 + $0x84] ss:$8 sps:$4 sm:$0xff]  }
 0x364   :  { %5370 = vmatpush1.bf16.msra.mxu0 %v14747_v55  ;;  %v14825_v55 = vld [vmem:[#allocation15 + $0x70] ss:$8 sps:$4 sm:$0xff]  }
 0x365   :  { %6048 = vmatpush1.bf16.msra.mxu1 %v14750_v17  ;;  %5371 = vmatprep.subr.bf16.mxu0 %v14755_v6  ;;  %v14833_v17 = vld [vmem:[#allocation15 + $0x84] ss:$8 sps:$4 sm:$0xff]   ;;  %v14822_v6 = vld [vmem:[#allocation17 + $0x80] ss:$8 sps:$4 sm:$0xff]  }
 0x366   :  { %5327 = vmatmul.mubr.bf16.gmra.mrb[56].mxu0 %v2462_v32  ;;  %6049 = vmatprep.subr.bf16.mxu1 %v14758_v27  ;;  %v2440_v27 = vld [vmem:[#allocation3 + $0x1d0] sm:$0xff] }
 0x367   :  { %6005 = vmatmul.mubr.bf16.gmra.mrb[56].mxu1 %v2462_v32  ;;  %5336 = vmatprep.mubr.bf16.mxu0 %v2475_v45  ;;  %v14831_v32 = vld [vmem:[#allocation15 + $0x80] ss:$8 sps:$4 sm:$0xff]  }
 0x368   :  { %5372 = vmatpush1.bf16.msra.mxu0 %v14753_v56  ;;  %6014 = vmatprep.mubr.bf16.mxu1 %v2475_v45  ;;  %v14830_v56 = vld [vmem:[#allocation17 + $0x94] ss:$8 sps:$4 sm:$0xff]   ;;  %v14828_v45 = vld [vmem:[#allocation17 + $0x90] ss:$8 sps:$4 sm:$0xff]  }
 0x369   :  { %6050 = vmatpush1.bf16.msra.mxu1 %v14756_v58  ;;  %5373 = vmatprep.subr.bf16.mxu0 %v14761_v48  ;;  %v2453_v58 = vld [vmem:[#allocation3 + $0x238] sm:$0xff] }
 0x36a   :  { %6051 = vmatprep.subr.bf16.mxu1 %v14764_v15  ;;  %v14839_v48 = vld [vmem:[#allocation15 + $0x94] ss:$8 sps:$4 sm:$0xff]   ;;  %v14836_v15 = vld [vmem:[#allocation17 + $0xa4] ss:$8 sps:$4 sm:$0xff]  }
 0x36c   :  { %5374 = vmatpush1.bf16.msra.mxu0 %v14759_v36  ;;  %v14837_v36 = vld [vmem:[#allocation15 + $0x90] ss:$8 sps:$4 sm:$0xff]  }
 0x36d   :  { %6052 = vmatpush1.bf16.msra.mxu1 %v14762_v46  ;;  %5375 = vmatprep.subr.bf16.mxu0 %v14767_v4  ;;  %v14834_v46 = vld [vmem:[#allocation17 + $0xa0] ss:$8 sps:$4 sm:$0xff]  }
 0x36e   :  { %5337 = vmatmul.mubr.bf16.gmra.mrb[60].mxu0 %v2474_v19  ;;  %6053 = vmatprep.subr.bf16.mxu1 %v14770_v42  ;;  %v2452_v4 = vld [vmem:[#allocation3 + $0x230] sm:$0xff]  ;;  %v14842_v42 = vld [vmem:[#allocation17 + $0xb4] ss:$8 sps:$4 sm:$0xff]  }
 0x36f   :  { %6015 = vmatmul.mubr.bf16.gmra.mrb[60].mxu1 %v2474_v19  ;;  %5379 = vmatprep.mubr.bf16.mxu0 %v2393_v18  ;;  %v14840_v19 = vld [vmem:[#allocation17 + $0xb0] ss:$8 sps:$4 sm:$0xff]  }
 0x370   :  { %5376 = vmatpush1.bf16.msra.mxu0 %v14765_v34  ;;  %6057 = vmatprep.mubr.bf16.mxu1 %v2393_v18  ;;  %v2465_v34 = vld [vmem:[#allocation3 + $0x298] sm:$0xff]  ;;  %v2476_v18 = vld [vmem:[#allocation3 + $0x2f0] sm:$0xff] }
 0x371   :  { %6054 = vmatpush1.bf16.msra.mxu1 %v14768_v39  ;;  %5377 = vmatprep.subr.bf16.mxu0 %v14773_v31  ;;  %v2464_v39 = vld [vmem:[#allocation3 + $0x290] sm:$0xff]  ;;  %v2477_v31 = vld [vmem:[#allocation3 + $0x2f8] sm:$0xff] }
 0x372   :  { %6055 = vmatprep.subr.bf16.mxu1 %v14776_v8  ;;  %v14845_v8 = vld [vmem:[#allocation15 + $0xa4] ss:$8 sps:$4 sm:$0xff]  }
 0x374   :  { %5378 = vmatpush1.bf16.msra.mxu0 %v14771_v23  ;;  %v14843_v23 = vld [vmem:[#allocation15 + $0xa0] ss:$8 sps:$4 sm:$0xff]  }
 0x375   :  { %6056 = vmatpush1.bf16.msra.mxu1 %v14774_v20  ;;  %7921 = vmatprep.subr.bf16.mxu0 %v14785_v5  ;;  %v14848_v20 = vld [vmem:[#allocation17 + $0xc4] ss:$8 sps:$4 sm:$0xff]   ;;  %v14846_v5 = vld [vmem:[#allocation17 + $0xc0] ss:$8 sps:$4 sm:$0xff]  }
 0x376   :  { %9205 = vmatprep.subr.bf16.mxu1 %v14779_v28  ;;  %v14851_v28 = vld [vmem:[#allocation15 + $0xb4] ss:$8 sps:$4 sm:$0xff]  }
 0x377   :  { %5380 = vmatmul.mubr.bf16.vlgmr.msra.gmra.mrb[32].mxu0 %v2392_v12 }
 0x378   :  { %6058 = vmatmul.mubr.bf16.vlgmr.msra.gmra.mrb[32].mxu1 %v2392_v12  ;;  %5389 = vmatprep.mubr.bf16.mxu0 %v2405_v35  ;;  %v14854_v12 = vld [vmem:[#allocation17 + $0xd4] ss:$8 sps:$4 sm:$0xff]  }
 0x379   :  { %6067 = vmatprep.mubr.bf16.mxu1 %v2405_v35  ;;  %9206 = vmatpush1.bf16.msra.mxu1 %v14777_v16  ;;  %v14849_v16 = vld [vmem:[#allocation15 + $0xb0] ss:$8 sps:$4 sm:$0xff]   ;;  %v6416_v35 = vld [vmem:[#allocation4 + $0x40] sm:$0x80] }
 0x37a   :  { %9207 = vmatprep.subr.bf16.mxu1 %v14782_v63  ;;  %7922 = vmatpush1.bf16.msra.mxu0 %v14783_v62  ;;  %v14852_v63 = vld [vmem:[#allocation17 + $0xd0] ss:$8 sps:$4 sm:$0xff]  }
 0x37b   :  { %7923 = vmatprep.subr.bf16.mxu0 %v14791_v38  ;;  %v6320_v62 = vld [vmem:[#allocation4] sm:$0x1]  ;;  %v6326_v38 = vld [vmem:[#allocation4 + $0x10] sm:$0x1] }
 0x37d   :  { %9208 = vmatpush1.bf16.msra.mxu1 %v14780_v7 }
 0x37e   :  { %9209 = vmatprep.subr.bf16.mxu1 %v14788_v54  ;;  %7924 = vmatpush1.bf16.msra.mxu0 %v14789_v2  ;;  %v6321_v54 = vsel %vm15954_vm2, 0, %v6320_v62 }
 0x37f   :  { %5390 = vmatmul.mubr.bf16.gmra.mrb[36].mxu0 %v2404_v60  ;;  %7925 = vmatprep.subr.bf16.mxu0 %v14797_v44  ;;  %v6417_v44 = vsel %vm16103_vm9, 0, %v6416_v35  ;;  %6322 = vst [vmem:[#allocation4] sm:$0x1] %v6321_v54  ;;  %v14881_v35 = vld [vmem:[#allocation15 + $0x104] ss:$8 sps:$4 sm:$0xff]  }
 0x380   :  { %6068 = vmatmul.mubr.bf16.gmra.mrb[36].mxu1 %v2404_v60  ;;  %5399 = vmatprep.mubr.bf16.mxu0 %v2417_v0  ;;  %v6422_v60 = vld [vmem:[#allocation4 + $0x50] sm:$0x80]  ;;  %6418 = vst [vmem:[#allocation4 + $0x40] sm:$0x80] %v6417_v44  ;;  %v6452_v44 = vld [vmem:[#allocation4 + $0x160] sm:$0x80] }
 0x381   :  { %6077 = vmatprep.mubr.bf16.mxu1 %v2417_v0  ;;  %9210 = vmatpush1.bf16.msra.mxu1 %v14786_v57  ;;  %v6327_v57 = vsel %vm15954_vm2, 0, %v6326_v38  ;;  %v6419_v0 = vld [vmem:[#allocation4 + $0x48] sm:$0x80]  ;;  %v6356_v38 = vld [vmem:[#allocation4 + $0x120] sm:$0x1] }
 0x382   :  { %9211 = vmatprep.subr.bf16.mxu1 %v14794_v61  ;;  %7926 = vmatpush1.bf16.msra.mxu0 %v14795_v13  ;;  %6328 = vst [vmem:[#allocation4 + $0x10] sm:$0x1] %v6327_v57  ;;  %v6423_v61 = vsel %vm16103_vm9, 0, %v6422_v60  ;;  %v6323_v13 = vld [vmem:[#allocation4 + $0x8] sm:$0x1]  ;;  %v6357_v54 = vsel %vm15954_vm2, 0, %v6356_v38 }
 0x383   :  { %7927 = vmatprep.subr.bf16.mxu0 %v14803_v49  ;;  %6424 = vst [vmem:[#allocation4 + $0x50] sm:$0x80] %v6423_v61  ;;  %v6324_v49 = vsel %vm15954_vm2, 0, %v6323_v13  ;;  %6358 = vst [vmem:[#allocation4 + $0x120] sm:$0x1] %v6357_v54  ;;  %v6453_v57 = vsel %vm16103_vm9, 0, %v6452_v44 }
 0x384   :  { %6325 = vst [vmem:[#allocation4 + $0x8] sm:$0x1] %v6324_v49  ;;  %v6362_v60 = vld [vmem:[#allocation4 + $0x130] sm:$0x1]  ;;  %v6458_v61 = vld [vmem:[#allocation4 + $0x170] sm:$0x80] }
 0x385   :  { %9212 = vmatpush1.bf16.msra.mxu1 %v14792_v50  ;;  %v6420_v50 = vsel %vm16103_vm9, 0, %v6419_v0  ;;  %6454 = vst [vmem:[#allocation4 + $0x160] sm:$0x80] %v6453_v57  ;;  %v6363_v13 = vsel %vm15954_vm2, 0, %v6362_v60  ;;  %v6459_v0 = vsel %vm16103_vm9, 0, %v6458_v61 }
 0x386   :  { %9213 = vmatprep.subr.bf16.mxu1 %v14800_v21  ;;  %7928 = vmatpush1.bf16.msra.mxu0 %v14801_v29  ;;  %v6329_v21 = vld [vmem:[#allocation4 + $0x18] sm:$0x1]  ;;  %v6425_v29 = vld [vmem:[#allocation4 + $0x58] sm:$0x80]  ;;  %6421 = vst [vmem:[#allocation4 + $0x48] sm:$0x80] %v6420_v50 }
 0x387   :  { %5400 = vmatmul.mubr.bf16.gmra.mrb[40].mxu0 %v2416_v24  ;;  %7929 = vmatprep.subr.bf16.mxu0 %v14809_v33  ;;  %v6330_v33 = vsel %vm15954_vm2, 0, %v6329_v21  ;;  %6364 = vst [vmem:[#allocation4 + $0x130] sm:$0x1] %v6363_v13  ;;  %6460 = vst [vmem:[#allocation4 + $0x170] sm:$0x80] %v6459_v0 }
 0x388   :  { %6078 = vmatmul.mubr.bf16.gmra.mrb[40].mxu1 %v2416_v24  ;;  %5409 = vmatprep.mubr.bf16.mxu0 %v2429_v40  ;;  %v14855_v24 = vld [vmem:[#allocation15 + $0xc0] ss:$8 sps:$4 sm:$0xff]   ;;  %6331 = vst [vmem:[#allocation4 + $0x18] sm:$0x1] %v6330_v33  ;;  %v6455_v50 = vld [vmem:[#allocation4 + $0x168] sm:$0x80] }
 0x389   :  { %6087 = vmatprep.mubr.bf16.mxu1 %v2429_v40  ;;  %9214 = vmatpush1.bf16.msra.mxu1 %v14798_v11  ;;  %v6426_v11 = vsel %vm16103_vm9, 0, %v6425_v29  ;;  %v14860_v40 = vld [vmem:[#allocation17 + $0xe4] ss:$8 sps:$4 sm:$0xff]   ;;  %v6359_v49 = vld [vmem:[#allocation4 + $0x128] sm:$0x1]  ;;  %v6456_v33 = vsel %vm16103_vm9, 0, %v6455_v50 }
 0x38a   :  { %9215 = vmatprep.subr.bf16.mxu1 %v14806_v14  ;;  %7930 = vmatpush1.bf16.msra.mxu0 %v14807_v3  ;;  %v14857_v14 = vld [vmem:[#allocation15 + $0xc4] ss:$8 sps:$4 sm:$0xff]   ;;  %6427 = vst [vmem:[#allocation4 + $0x58] sm:$0x80] %v6426_v11  ;;  %v14858_v3 = vld [vmem:[#allocation17 + $0xe0] ss:$8 sps:$4 sm:$0xff]  }
 0x38b   :  { %7931 = vmatprep.subr.bf16.mxu0 %v14815_v25  ;;  %v14863_v25 = vld [vmem:[#allocation15 + $0xd4] ss:$8 sps:$4 sm:$0xff]   ;;  %v6365_v21 = vld [vmem:[#allocation4 + $0x138] sm:$0x1]  ;;  %v6360_v29 = vsel %vm15954_vm2, 0, %v6359_v49 }
 0x38c   :  { %v6366_v11 = vsel %vm15954_vm2, 0, %v6365_v21  ;;  %6361 = vst [vmem:[#allocation4 + $0x128] sm:$0x1] %v6360_v29  ;;  %6457 = vst [vmem:[#allocation4 + $0x168] sm:$0x80] %v6456_v33 }
 0x38d   :  { %9216 = vmatpush1.bf16.msra.mxu1 %v14804_v37  ;;  %v14861_v37 = vld [vmem:[#allocation15 + $0xd0] ss:$8 sps:$4 sm:$0xff]   ;;  %6367 = vst [vmem:[#allocation4 + $0x138] sm:$0x1] %v6366_v11  ;;  %v6497_v54 = vld [vmem:[#allocation4 + $0x298] sm:$0x80] }
 0x38e   :  { %9217 = vmatprep.subr.bf16.mxu1 %v14812_v43  ;;  %7932 = vmatpush1.bf16.msra.mxu0 %v14813_v1  ;;  %v14866_v43 = vld [vmem:[#allocation17 + $0xf4] ss:$8 sps:$4 sm:$0xff]   ;;  %v14864_v1 = vld [vmem:[#allocation17 + $0xf0] ss:$8 sps:$4 sm:$0xff]   ;;  %v6498_v57 = vsel %vm16103_vm9, 0, %v6497_v54 }
 0x38f   :  { %5410 = vmatmul.mubr.bf16.gmra.mrb[44].mxu0 %v2428_v51  ;;  %7933 = vmatprep.subr.bf16.mxu0 %v14821_v22  ;;  %v6332_v22 = vld [vmem:[#allocation4 + $0x60] sm:$0x1]  ;;  %v6401_v38 = vld [vmem:[#allocation4 + $0x258] sm:$0x1]  ;;  %6499 = vst [vmem:[#allocation4 + $0x298] sm:$0x80] %v6498_v57 }
 0x390   :  { %6088 = vmatmul.mubr.bf16.gmra.mrb[44].mxu1 %v2428_v51  ;;  %5419 = vmatprep.mubr.bf16.mxu0 %v2441_v10  ;;  %v6338_v51 = vld [vmem:[#allocation4 + $0x70] sm:$0x1]  ;;  %v6402_v44 = vsel %vm15954_vm2, 0, %v6401_v38  ;;  %v6404_v60 = vld [vmem:[#allocation4 + $0x2a0] sm:$0x1] }
 0x391   :  { %6097 = vmatprep.mubr.bf16.mxu1 %v2441_v10  ;;  %9218 = vmatpush1.bf16.msra.mxu1 %v14810_v52  ;;  %v6428_v52 = vld [vmem:[#allocation4 + $0xa0] sm:$0x80]  ;;  %v6339_v10 = vsel %vm15954_vm2, 0, %v6338_v51  ;;  %v6371_v51 = vld [vmem:[#allocation4 + $0x188] sm:$0x1]  ;;  %v6405_v61 = vsel %vm15954_vm2, 0, %v6404_v60 }
 0x392   :  { %9219 = vmatprep.subr.bf16.mxu1 %v14818_v30  ;;  %7934 = vmatpush1.bf16.msra.mxu0 %v14819_v9  ;;  %v6333_v30 = vsel %vm15954_vm2, 0, %v6332_v22  ;;  %v6429_v9 = vsel %vm16103_vm9, 0, %v6428_v52  ;;  %6340 = vst [vmem:[#allocation4 + $0x70] sm:$0x1] %v6339_v10  ;;  %v6372_v10 = vsel %vm15954_vm2, 0, %v6371_v51  ;;  %v6768_v60 = vld [vmem:[#allocation4] sm:$0xff] }
 0x393   :  { %7935 = vmatprep.subr.bf16.mxu0 %v14827_v59  ;;  %v6434_v59 = vld [vmem:[#allocation4 + $0xb0] sm:$0x80]  ;;  %6334 = vst [vmem:[#allocation4 + $0x60] sm:$0x1] %v6333_v30  ;;  %6430 = vst [vmem:[#allocation4 + $0xa0] sm:$0x80] %v6429_v9 }
 0x394   :  { %v6467_v30 = vld [vmem:[#allocation4 + $0x1c8] sm:$0x80]  ;;  %v6377_v9 = vld [vmem:[#allocation4 + $0x198] sm:$0x1]  ;;  %6373 = vst [vmem:[#allocation4 + $0x188] sm:$0x1] %v6372_v10 }
 0x395   :  { %9220 = vmatpush1.bf16.msra.mxu1 %v14816_v47  ;;  %v6435_v47 = vsel %vm16103_vm9, 0, %v6434_v59  ;;  %v6468_v59 = vsel %vm16103_vm9, 0, %v6467_v30  ;;  %6403 = vst [vmem:[#allocation4 + $0x258] sm:$0x1] %v6402_v44  ;;  %v6500_v13 = vld [vmem:[#allocation4 + $0x2e0] sm:$0x80] }
 0x396   :  { %9221 = vmatprep.subr.bf16.mxu1 %v14824_v41  ;;  %7936 = vmatpush1.bf16.msra.mxu0 %v14825_v55  ;;  %v6335_v41 = vld [vmem:[#allocation4 + $0x68] sm:$0x1]  ;;  %v6431_v55 = vld [vmem:[#allocation4 + $0xa8] sm:$0x80]  ;;  %6436 = vst [vmem:[#allocation4 + $0xb0] sm:$0x80] %v6435_v47 }
 0x397   :  { %5420 = vmatmul.mubr.bf16.gmra.mrb[48].mxu0 %v2440_v27  ;;  %7937 = vmatprep.subr.bf16.mxu0 %v14833_v17  ;;  %v6336_v17 = vsel %vm15954_vm2, 0, %v6335_v41  ;;  %v6378_v47 = vsel %vm15954_vm2, 0, %v6377_v9  ;;  %v6473_v41 = vld [vmem:[#allocation4 + $0x1d8] sm:$0x80]  ;;  %6469 = vst [vmem:[#allocation4 + $0x1c8] sm:$0x80] %v6468_v59 }
 0x398   :  { %6098 = vmatmul.mubr.bf16.gmra.mrb[48].mxu1 %v2440_v27  ;;  %5429 = vmatprep.mubr.bf16.mxu0 %v2453_v58  ;;  %v6341_v27 = vld [vmem:[#allocation4 + $0x78] sm:$0x1]  ;;  %6337 = vst [vmem:[#allocation4 + $0x68] sm:$0x1] %v6336_v17  ;;  %6379 = vst [vmem:[#allocation4 + $0x198] sm:$0x1] %v6378_v47 }
 0x399   :  { %6107 = vmatprep.mubr.bf16.mxu1 %v2453_v58  ;;  %9222 = vmatpush1.bf16.msra.mxu1 %v14822_v6  ;;  %v6432_v6 = vsel %vm16103_vm9, 0, %v6431_v55  ;;  %v6474_v55 = vsel %vm16103_vm9, 0, %v6473_v41  ;;  %v6380_v17 = vld [vmem:[#allocation4 + $0x1e0] sm:$0x1]  ;;  %6406 = vst [vmem:[#allocation4 + $0x2a0] sm:$0x1] %v6405_v61 }
 0x39a   :  { %9223 = vmatprep.subr.bf16.mxu1 %v14830_v56  ;;  %7938 = vmatpush1.bf16.msra.mxu0 %v14831_v32  ;;  %v6437_v56 = vld [vmem:[#allocation4 + $0xb8] sm:$0x80]  ;;  %6433 = vst [vmem:[#allocation4 + $0xa8] sm:$0x80] %v6432_v6  ;;  %v6342_v32 = vsel %vm15954_vm2, 0, %v6341_v27  ;;  %v6501_v0 = vsel %vm16103_vm9, 0, %v6500_v13 }
 0x39b   :  { %7939 = vmatprep.subr.bf16.mxu0 %v14839_v48  ;;  %v6438_v58 = vsel %vm16103_vm9, 0, %v6437_v56  ;;  %v14867_v48 = vld [vmem:[#allocation15 + $0xe0] ss:$8 sps:$4 sm:$0xff]   ;;  %6343 = vst [vmem:[#allocation4 + $0x78] sm:$0x1] %v6342_v32  ;;  %v6381_v56 = vsel %vm15954_vm2, 0, %v6380_v17 }
 0x39c   :  { %6439 = vst [vmem:[#allocation4 + $0xb8] sm:$0x80] %v6438_v58  ;;  %6475 = vst [vmem:[#allocation4 + $0x1d8] sm:$0x80] %v6474_v55  ;;  %v6476_v6 = vld [vmem:[#allocation4 + $0x220] sm:$0x80] }
 0x39d   :  { %9224 = vmatpush1.bf16.msra.mxu1 %v14828_v45  ;;  %v14869_v45 = vld [vmem:[#allocation15 + $0xe4] ss:$8 sps:$4 sm:$0xff]   ;;  %v6386_v27 = vld [vmem:[#allocation4 + $0x1f0] sm:$0x1]  ;;  %v6477_v32 = vsel %vm16103_vm9, 0, %v6476_v6  ;;  %v6992_v61 = vld [vmem:[#allocation4 + $0x40] sm:$0xff] }
 0x39e   :  { %9225 = vmatprep.subr.bf16.mxu1 %v14836_v15  ;;  %7940 = vmatpush1.bf16.msra.mxu0 %v14837_v36  ;;  %v14872_v15 = vld [vmem:[#allocation17 + $0x104] ss:$8 sps:$4 sm:$0xff]   ;;  %v14875_v36 = vld [vmem:[#allocation15 + $0xf4] ss:$8 sps:$4 sm:$0xff]   ;;  %v6387_v58 = vsel %vm15954_vm2, 0, %v6386_v27 }
 0x39f   :  { %5430 = vmatmul.mubr.bf16.gmra.mrb[52].mxu0 %v2452_v4  ;;  %7941 = vmatprep.subr.bf16.mxu0 %v14845_v8  ;;  %v6347_v8 = vld [vmem:[#allocation4 + $0xc8] sm:$0x1]  ;;  %6382 = vst [vmem:[#allocation4 + $0x1e0] sm:$0x1] %v6381_v56  ;;  %6478 = vst [vmem:[#allocation4 + $0x220] sm:$0x80] %v6477_v32 }
 0x3a0   :  { %6108 = vmatmul.mubr.bf16.gmra.mrb[52].mxu1 %v2452_v4  ;;  %5439 = vmatprep.mubr.bf16.mxu0 %v2465_v34  ;;  %v6344_v4 = vld [vmem:[#allocation4 + $0xc0] sm:$0x1]  ;;  %6388 = vst [vmem:[#allocation4 + $0x1f0] sm:$0x1] %v6387_v58  ;;  %v6410_v49 = vld [vmem:[#allocation4 + $0x2b0] sm:$0x1] }
 0x3a1   :  { %6117 = vmatprep.mubr.bf16.mxu1 %v2465_v34  ;;  %9226 = vmatpush1.bf16.msra.mxu1 %v14834_v46  ;;  %v14873_v46 = vld [vmem:[#allocation15 + $0xf0] ss:$8 sps:$4 sm:$0xff]   ;;  %v6440_v34 = vld [vmem:[#allocation4 + $0x100] sm:$0x80]  ;;  %v6506_v50 = vld [vmem:[#allocation4 + $0x2f0] sm:$0x80] }
 0x3a2   :  { %9227 = vmatprep.subr.bf16.mxu1 %v14842_v42  ;;  %7942 = vmatpush1.bf16.msra.mxu0 %v14843_v23  ;;  %v6345_v42 = vsel %vm15954_vm2, 0, %v6344_v4  ;;  %6502 = vst [vmem:[#allocation4 + $0x2e0] sm:$0x80] %v6501_v0  ;;  %v6411_v21 = vsel %vm15954_vm2, 0, %v6410_v49  ;;  %v6507_v29 = vsel %vm16103_vm9, 0, %v6506_v50  ;;  %v18381_v9 = vld [vmem:[#allocation32_spill] sm:$0xff] }
 0x3a3   :  { %7943 = vmatprep.subr.bf16.mxu0 %v14851_v28  ;;  %6346 = vst [vmem:[#allocation4 + $0xc0] sm:$0x1] %v6345_v42  ;;  %v6353_v28 = vld [vmem:[#allocation4 + $0xd8] sm:$0x1]  ;;  %6412 = vst [vmem:[#allocation4 + $0x2b0] sm:$0x1] %v6411_v21 }
 0x3a4   :  { %v6389_v42 = vld [vmem:[#allocation4 + $0x1f8] sm:$0x1]  ;;  %6508 = vst [vmem:[#allocation4 + $0x2f0] sm:$0x80] %v6507_v29  ;;  %v6407_v33 = vld [vmem:[#allocation4 + $0x2a8] sm:$0x1] }
 0x3a5   :  { %9228 = vmatpush1.bf16.msra.mxu1 %v14840_v19  ;;  %v6350_v19 = vld [vmem:[#allocation4 + $0xd0] sm:$0x1]  ;;  %v6503_v11 = vld [vmem:[#allocation4 + $0x2e8] sm:$0x80]  ;;  %v14878_v57 = vld [vmem:[#allocation17 + $0x114] ss:$8 sps:$4 sm:$0xff]  }
 0x3a6   :  { %9229 = vmatprep.subr.bf16.mxu1 %v14848_v20  ;;  %7944 = vmatpush1.bf16.msra.mxu0 %v14849_v16  ;;  %v6348_v20 = vsel %vm15954_vm2, 0, %v6347_v8  ;;  %v6488_v8 = vld [vmem:[#allocation4 + $0x280] sm:$0x80] }
 0x3a7   :  { %5440 = vmatmul.mubr.bf16.gmra.mrb[56].mxu0 %v2464_v39  ;;  %7945 = vmatprep.subr.bf16.mxu0 %v14857_v14  ;;  %6349 = vst [vmem:[#allocation4 + $0xc8] sm:$0x1] %v6348_v20  ;;  %v6398_v20 = vld [vmem:[#allocation4 + $0x250] sm:$0x1] }
 0x3a8   :  { %6118 = vmatmul.mubr.bf16.gmra.mrb[56].mxu1 %v2464_v39  ;;  %5449 = vmatprep.mubr.bf16.mxu0 %v2477_v31  ;;  %v6441_v39 = vsel %vm16103_vm9, 0, %v6440_v34  ;;  %v6485_v34 = vld [vmem:[#allocation4 + $0x238] sm:$0x80] }
 0x3a9   :  { %6127 = vmatprep.mubr.bf16.mxu1 %v2477_v31  ;;  %9230 = vmatpush1.bf16.msra.mxu1 %v14846_v5  ;;  %v6351_v31 = vsel %vm15954_vm2, 0, %v6350_v19  ;;  %6442 = vst [vmem:[#allocation4 + $0x100] sm:$0x80] %v6441_v39  ;;  %v6443_v5 = vld [vmem:[#allocation4 + $0x108] sm:$0x80]  ;;  %v6390_v19 = vsel %vm15954_vm2, 0, %v6389_v42 }
 0x3aa   :  { %9231 = vmatprep.subr.bf16.mxu1 %v14854_v12  ;;  %7946 = vmatpush1.bf16.msra.mxu0 %v14855_v24  ;;  %6352 = vst [vmem:[#allocation4 + $0xd0] sm:$0x1] %v6351_v31  ;;  %v6444_v16 = vsel %vm16103_vm9, 0, %v6443_v5  ;;  %v6354_v12 = vsel %vm15954_vm2, 0, %v6353_v28  ;;  %v6461_v24 = vld [vmem:[#allocation4 + $0x178] sm:$0x80] }
 0x3ab   :  { %7947 = vmatprep.subr.bf16.mxu0 %v14863_v25  ;;  %6445 = vst [vmem:[#allocation4 + $0x108] sm:$0x80] %v6444_v16  ;;  %6355 = vst [vmem:[#allocation4 + $0xd8] sm:$0x1] %v6354_v12  ;;  %v6462_v14 = vsel %vm16103_vm9, 0, %v6461_v24  ;;  %v6486_v39 = vsel %vm16103_vm9, 0, %v6485_v34 }
 0x3ac   :  { %6463 = vst [vmem:[#allocation4 + $0x178] sm:$0x80] %v6462_v14  ;;  %6391 = vst [vmem:[#allocation4 + $0x1f8] sm:$0x1] %v6390_v19  ;;  %v6392_v31 = vld [vmem:[#allocation4 + $0x240] sm:$0x1] }
 0x3ad   :  { %9232 = vmatpush1.bf16.msra.mxu1 %v14852_v63  ;;  %v6449_v63 = vld [vmem:[#allocation4 + $0x118] sm:$0x80]  ;;  %6487 = vst [vmem:[#allocation4 + $0x238] sm:$0x80] %v6486_v39  ;;  %v6494_v5 = vld [vmem:[#allocation4 + $0x290] sm:$0x80] }
 0x3ae   :  { %9233 = vmatprep.subr.bf16.mxu1 %v14860_v40  ;;  %7948 = vmatpush1.bf16.msra.mxu0 %v14861_v37  ;;  %v6450_v62 = vsel %vm16103_vm9, 0, %v6449_v63  ;;  %v6464_v40 = vld [vmem:[#allocation4 + $0x1c0] sm:$0x80]  ;;  %v6399_v28 = vsel %vm15954_vm2, 0, %v6398_v20  ;;  %v6495_v16 = vsel %vm16103_vm9, 0, %v6494_v5  ;;  %v6408_v14 = vsel %vm15954_vm2, 0, %v6407_v33 }
 0x3af   :  { %5450 = vmatmul.mubr.bf16.gmra.mrb[60].mxu0 %v2476_v18  ;;  %7949 = vmatprep.subr.bf16.mxu0 %v14869_v45  ;;  %6451 = vst [vmem:[#allocation4 + $0x118] sm:$0x80] %v6450_v62  ;;  %v6465_v37 = vsel %vm16103_vm9, 0, %v6464_v40  ;;  %v6395_v12 = vld [vmem:[#allocation4 + $0x248] sm:$0x1] }
 0x3b0   :  { %6128 = vmatmul.mubr.bf16.gmra.mrb[60].mxu1 %v2476_v18  ;;  %v6446_v18 = vld [vmem:[#allocation4 + $0x110] sm:$0x80]  ;;  %6466 = vst [vmem:[#allocation4 + $0x1c0] sm:$0x80] %v6465_v37  ;;  %v6491_v63 = vld [vmem:[#allocation4 + $0x288] sm:$0x80] }
 0x3b1   :  { %9234 = vmatpush1.bf16.msra.mxu1 %v14858_v3  ;;  %v6447_v23 = vsel %vm16103_vm9, 0, %v6446_v18  ;;  %v6368_v3 = vld [vmem:[#allocation4 + $0x180] sm:$0x1]  ;;  %v6393_v18 = vsel %vm15954_vm2, 0, %v6392_v31  ;;  %6400 = vst [vmem:[#allocation4 + $0x250] sm:$0x1] %v6399_v28 }
 0x3b2   :  { %9235 = vmatprep.subr.bf16.mxu1 %v14866_v43  ;;  %7950 = vmatpush1.bf16.msra.mxu0 %v14867_v48  ;;  %6448 = vst [vmem:[#allocation4 + $0x110] sm:$0x80] %v6447_v23  ;;  %v6369_v25 = vsel %vm15954_vm2, 0, %v6368_v3  ;;  %v6374_v43 = vld [vmem:[#allocation4 + $0x190] sm:$0x1]  ;;  %v6489_v23 = vsel %vm16103_vm9, 0, %v6488_v8 }
 0x3b3   :  { %7951 = vmatprep.subr.bf16.mxu0 %v14875_v36  ;;  %6370 = vst [vmem:[#allocation4 + $0x180] sm:$0x1] %v6369_v25  ;;  %v6375_v22 = vsel %vm15954_vm2, 0, %v6374_v43  ;;  %v6482_v48 = vld [vmem:[#allocation4 + $0x230] sm:$0x80]  ;;  %v6396_v62 = vsel %vm15954_vm2, 0, %v6395_v12 }
 0x3b4   :  { %6376 = vst [vmem:[#allocation4 + $0x190] sm:$0x1] %v6375_v22  ;;  %v6483_v45 = vsel %vm16103_vm9, 0, %v6482_v48  ;;  %v6479_v36 = vld [vmem:[#allocation4 + $0x228] sm:$0x80]  ;;  %v6504_v3 = vsel %vm16103_vm9, 0, %v6503_v11 }
 0x3b5   :  { %9236 = vmatpush1.bf16.msra.mxu1 %v14864_v1  ;;  %v6470_v1 = vld [vmem:[#allocation4 + $0x1d0] sm:$0x80]  ;;  %6484 = vst [vmem:[#allocation4 + $0x230] sm:$0x80] %v6483_v45  ;;  %v6480_v4 = vsel %vm16103_vm9, 0, %v6479_v36 }
 0x3b6   :  { %9318 = vmatprep.subr.bf16.mxu1 %v14872_v15  ;;  %7952 = vmatpush1.bf16.msra.mxu0 %v14873_v46  ;;  %v6471_v52 = vsel %vm16103_vm9, 0, %v6470_v1  ;;  %v6383_v15 = vld [vmem:[#allocation4 + $0x1e8] sm:$0x1]  ;;  %6481 = vst [vmem:[#allocation4 + $0x228] sm:$0x80] %v6480_v4 }
 0x3b7   :  { %8034 = vmatprep.subr.bf16.mxu0 %v14881_v35  ;;  %6472 = vst [vmem:[#allocation4 + $0x1d0] sm:$0x80] %v6471_v52  ;;  %v6384_v46 = vsel %vm15954_vm2, 0, %v6383_v15  ;;  %6394 = vst [vmem:[#allocation4 + $0x240] sm:$0x1] %v6393_v18  ;;  %v6492_v35 = vsel %vm16103_vm9, 0, %v6491_v63 }
 0x3b8   :  { %6385 = vst [vmem:[#allocation4 + $0x1e8] sm:$0x1] %v6384_v46  ;;  %6490 = vst [vmem:[#allocation4 + $0x280] sm:$0x80] %v6489_v23  ;;  %v6413_v24 = vld [vmem:[#allocation4 + $0x2b8] sm:$0x1] }
 0x3b9   :  { %6496 = vst [vmem:[#allocation4 + $0x290] sm:$0x80] %v6495_v16  ;;  %6397 = vst [vmem:[#allocation4 + $0x248] sm:$0x1] %v6396_v62  ;;  %v6414_v40 = vsel %vm15954_vm2, 0, %v6413_v24  ;;  %v18378_v1 = vld [vmem:[#allocation31_spill] sm:$0xff] }
 0x3ba   :  { %6493 = vst [vmem:[#allocation4 + $0x288] sm:$0x80] %v6492_v35  ;;  %v6509_v25 = vld [vmem:[#allocation4 + $0x2f8] sm:$0x80]  ;;  %6409 = vst [vmem:[#allocation4 + $0x2a8] sm:$0x1] %v6408_v14 }
 0x3bb   :  { %6505 = vst [vmem:[#allocation4 + $0x2e8] sm:$0x80] %v6504_v3  ;;  %6415 = vst [vmem:[#allocation4 + $0x2b8] sm:$0x1] %v6414_v40  ;;  %v6510_v37 = vsel %vm16103_vm9, 0, %v6509_v25  ;;  %v18379_v52 = vld [vmem:[#allocation30_spill] sm:$0xff] }
 0x3bc   :  { %6511 = vst [vmem:[#allocation4 + $0x2f8] sm:$0x80] %v6510_v37  ;;  %v6138_v43 = vld [vmem:[#allocation14] sm:$0xf]  ;;  %v18380_v51 = vsub.s32 2, %v18379_v52  ;;  %v18382_v7 = vsub.s32 3, %v18379_v52 }
 0x3bd   :  { %v17041_v22 = vrot.slane %v6138_v43, %v18378_v1  ;;  %v17048_v10 = vrot.slane %v6138_v43, %v18381_v9  ;;  %v14870_v12 = vld [vmem:[#allocation17 + $0x100] ss:$8 sps:$4 sm:$0xff]   ;;  %v14876_v33 = vld [vmem:[#allocation17 + $0x110] ss:$8 sps:$4 sm:$0xff]  }
 0x3be   :  { %v17045_v30 = vrot.slane %v6138_v43, %v18380_v51  ;;  %v17052_v59 = vrot.slane %v6138_v43, %v18382_v7  ;;  %v6774_v14 = vld [vmem:[#allocation4 + $0x10] sm:$0xff] }
 0x3bf   :  { %v6998_v51 = vld [vmem:[#allocation4 + $0x50] sm:$0xff] }
 0x44a   :  { %v5381_v47 = vpop.f32.mrb[32].mxu0 }
 0x44b   :  { %v6160_v2 = vadd.f32 %v17041_v22, %v5381_v47  ;;  %v6059_v41 = vpop.f32.mrb[32].mxu1  ;;  %v5383_v55 = vpop.f32.mrb[33].mxu0 }
 0x44c   :  { %v6162_v17 = vadd.f32 %v17045_v30, %v6059_v41  ;;  %v6161_v6 = vadd.f32 %v17048_v10, %v5383_v55  ;;  %v6061_v27 = vpop.f32.mrb[33].mxu1  ;;  %v5385_v56 = vpop.f32.mrb[34].mxu0 }
 0x44d   :  { %v6163_v32 = vadd.f32 %v17052_v59, %v6061_v27  ;;  %v6164_v58 = vadd.f32 %v17041_v22, %v5385_v56  ;;  %v6063_v48 = vpop.f32.mrb[34].mxu1  ;;  %v5387_v45 = vpop.f32.mrb[35].mxu0  ;;  %v6224_v4 = vmax.f32 %v6160_v2, 0.0 }
 0x44e   :  { %v6166_v15 = vadd.f32 %v17045_v30, %v6063_v48  ;;  %v6165_v36 = vadd.f32 %v17048_v10, %v5387_v45  ;;  %v6065_v46 = vpop.f32.mrb[35].mxu1  ;;  %v6226_v19 = vmax.f32 %v6162_v17, 0.0  ;;  %v6225_v39 = vmax.f32 %v6161_v6, 0.0  ;;  %v6771_v17 = vld [vmem:[#allocation4 + $0x8] sm:$0xff] }
 0x44f   :  { %v6228_v42 = vmax.f32 %v6164_v58, 0.0  ;;  %v6167_v34 = vadd.f32 %v17052_v59, %v6065_v46  ;;  %v6227_v8 = vmax.f32 %v6163_v32, 0.0  ;;  %v6995_v6 = vld [vmem:[#allocation4 + $0x48] sm:$0xff]  ;;  %v7001_v46 = vld [vmem:[#allocation4 + $0x58] sm:$0xff] }
 0x450   :  { %v6230_v31 = vmax.f32 %v6166_v15, 0.0  ;;  %v6229_v18 = vmax.f32 %v6165_v36, 0.0  ;;  %v14884_v32 = vld [vmem:[#allocation17 + $0x124] ss:$8 sps:$4 sm:$0xff]   ;;  %v6777_v36 = vld [vmem:[#allocation4 + $0x18] sm:$0xff] }
 0x451   :  { %v6288_v23 = vpack.c.bf16 %v6228_v42, %v6224_v4  ;;  %v6231_v20 = vmax.f32 %v6167_v34, 0.0 }
 0x452   :  { %v6290_v5 = vpack.c.bf16 %v6230_v31, %v6226_v19  ;;  %v6289_v28 = vpack.c.bf16 %v6229_v18, %v6225_v39  ;;  %v5391_v16 = vpop.f32.mrb[36].mxu0  ;;  %v14879_v39 = vld [vmem:[#allocation15 + $0x100] ss:$8 sps:$4 sm:$0xff]  }
 0x453   :  { %v6513_v63 = vshrl.u32 %v6288_v23, 16  ;;  %v6516_v62 = vshll.u32 %v6288_v23, 16  ;;  %6864 = vst [vmem:[#allocation4 + $0x20] sm:$0xff] %v6288_v23  ;;  %v6291_v35 = vpack.c.bf16 %v6231_v20, %v6227_v8  ;;  %v17063_v38 = vadd.f32 %v17041_v22, %v5391_v16  ;;  %v17065_v54 = vpop.f32.mrb[36].mxu1  ;;  %v17067_v44 = vpop.f32.mrb[37].mxu0 }
 0x454   :  { %v6527_v13 = vshrl.u32 %v6290_v5, 16  ;;  %v6530_v0 = vshll.u32 %v6290_v5, 16  ;;  %6866 = vst [vmem:[#allocation4 + $0x30] sm:$0xff] %v6290_v5  ;;  %v6520_v49 = vshrl.u32 %v6289_v28, 16  ;;  %v6523_v50 = vshll.u32 %v6289_v28, 16  ;;  %6865 = vst [vmem:[#allocation4 + $0x28] sm:$0xff] %v6289_v28  ;;  %9237 = vmatprep.mubr.bf16.mxu1 %v6289_v28 }
 0x455   :  { %v17069_v21 = vpop.f32.mrb[37].mxu1  ;;  %v17071_v29 = vpop.f32.mrb[38].mxu0  ;;  %v6515_v11 = vrot.slane %v6513_v63, 7  ;;  %v6896_v24 = vrot.slane %v6516_v62, 1  ;;  %v6534_v3 = vshrl.u32 %v6291_v35, 16  ;;  %v6537_v40 = vshll.u32 %v6291_v35, 16  ;;  %9238 = vmatmul.mubr.bf16.vlgmr.msra.gmra.mrb[64].mxu1 %v6288_v23 }
 0x456   :  { %6867 = vst [vmem:[#allocation4 + $0x38] sm:$0xff] %v6291_v35  ;;  %v6073_v25 = vpop.f32.mrb[38].mxu1  ;;  %v5397_v37 = vpop.f32.mrb[39].mxu0  ;;  %v6529_v43 = vrot.slane %v6527_v13, 7  ;;  %v6900_v52 = vrot.slane %v6530_v0, 1  ;;  %v6522_v7 = vrot.slane %v6520_v49, 7  ;;  %9319 = vmatpush1.bf16.msra.mxu1 %v14870_v12 }
 0x457   :  { %v6898_v47 = vrot.slane %v6523_v50, 1  ;;  %v6075_v2 = vpop.f32.mrb[39].mxu1  ;;  %v6518_v41 = vor.u32 %v6516_v62, %v6515_v11  ;;  %v6897_v55 = vor.u32 %v6896_v24, %v6513_v63  ;;  %v6536_v27 = vrot.slane %v6534_v3, 7  ;;  %9320 = vmatprep.subr.bf16.mxu1 %v14878_v57  ;;  %v14882_v5 = vld [vmem:[#allocation17 + $0x120] ss:$8 sps:$4 sm:$0xff]  }
 0x458   :  { %v6902_v56 = vrot.slane %v6537_v40, 1  ;;  %v6532_v58 = vor.u32 %v6530_v0, %v6529_v43  ;;  %v6901_v48 = vor.u32 %v6900_v52, %v6527_v13  ;;  %v6525_v45 = vor.u32 %v6523_v50, %v6522_v7  ;;  %v14887_v28 = vld [vmem:[#allocation15 + $0x114] ss:$8 sps:$4 sm:$0xff]   ;;  %v14885_v50 = vld [vmem:[#allocation15 + $0x110] ss:$8 sps:$4 sm:$0xff]  }
 0x459   :  { %v6899_v15 = vor.u32 %v6898_v47, %v6520_v49  ;;  %v6769_v4 = vsel %vm15992_vm5, %v6518_v41, %v6768_v60  ;;  %v6993_v42 = vsel %vm16143_vm10, %v6897_v55, %v6992_v61  ;;  %v6539_v34 = vor.u32 %v6537_v40, %v6536_v27  ;;  %v14890_v57 = vld [vmem:[#allocation17 + $0x134] ss:$8 sps:$4 sm:$0xff]  }
 0x45a   :  { %v6903_v19 = vor.u32 %v6902_v56, %v6534_v3  ;;  %6770 = vst [vmem:[#allocation4] sm:$0xff] %v6769_v4  ;;  %6994 = vst [vmem:[#allocation4 + $0x40] sm:$0xff] %v6993_v42  ;;  %v6775_v31 = vsel %vm15992_vm5, %v6532_v58, %v6774_v14  ;;  %v6999_v18 = vsel %vm16143_vm10, %v6901_v48, %v6998_v51  ;;  %v5401_v20 = vpop.f32.mrb[40].mxu0  ;;  %9321 = vmatpush1.bf16.msra.mxu1 %v14876_v33  ;;  %v14888_v33 = vld [vmem:[#allocation17 + $0x130] ss:$8 sps:$4 sm:$0xff]  }
 0x45b   :  { %v6772_v8 = vsel %vm15992_vm5, %v6525_v45, %v6771_v17  ;;  %v6996_v23 = vsel %vm16143_vm10, %v6899_v15, %v6995_v6  ;;  %6776 = vst [vmem:[#allocation4 + $0x10] sm:$0xff] %v6775_v31  ;;  %7000 = vst [vmem:[#allocation4 + $0x50] sm:$0xff] %v6999_v18  ;;  %v6778_v16 = vsel %vm15992_vm5, %v6539_v34, %v6777_v36  ;;  %v6079_v62 = vpop.f32.mrb[40].mxu1  ;;  %v5403_v35 = vpop.f32.mrb[41].mxu0  ;;  %9322 = vmatprep.subr.bf16.mxu1 %v14884_v32  ;;  %v14891_v48 = vld [vmem:[#allocation15 + $0x120] ss:$8 sps:$4 sm:$0xff]  }
 0x45c   :  { %6773 = vst [vmem:[#allocation4 + $0x8] sm:$0xff] %v6772_v8  ;;  %6997 = vst [vmem:[#allocation4 + $0x48] sm:$0xff] %v6996_v23  ;;  %v7002_v12 = vsel %vm16143_vm10, %v6903_v19, %v7001_v46  ;;  %v6170_v63 = vadd.f32 %v17045_v30, %v17065_v54  ;;  %7953 = vmatprep.mubr.bf16.mxu0 %v6772_v8  ;;  %v6169_v60 = vadd.f32 %v17048_v10, %v17067_v44  ;;  %v6081_v49 = vpop.f32.mrb[41].mxu1  ;;  %v5405_v54 = vpop.f32.mrb[42].mxu0  ;;  %v14894_v45 = vld [vmem:[#allocation17 + $0x140] ss:$8 sps:$4 sm:$0xff]  }
 0x45d   :  { %6779 = vst [vmem:[#allocation4 + $0x18] sm:$0xff] %v6778_v16  ;;  %7003 = vst [vmem:[#allocation4 + $0x58] sm:$0xff] %v7002_v12  ;;  %v6171_v61 = vadd.f32 %v17052_v59, %v17069_v21  ;;  %v6172_v13 = vadd.f32 %v17041_v22, %v17071_v29  ;;  %v6174_v0 = vadd.f32 %v17045_v30, %v6073_v25  ;;  %7954 = vmatmul.mubr.bf16.vlgmr.msra.gmra.mrb[64].mxu0 %v6769_v4  ;;  %v17104_v21 = vpop.f32.mrb[42].mxu1  ;;  %v17106_v3 = vpop.f32.mrb[43].mxu0  ;;  %v14893_v29 = vld [vmem:[#allocation15 + $0x124] ss:$8 sps:$4 sm:$0xff]  }
 0x45e   :  { %v6232_v11 = vmax.f32 %v17063_v38, 0.0  ;;  %v6173_v24 = vadd.f32 %v17048_v10, %v5397_v37  ;;  %v6175_v14 = vadd.f32 %v17052_v59, %v6075_v2  ;;  %v17102_v44 = vadd.f32 %v17041_v22, %v5401_v20  ;;  %8035 = vmatpush1.bf16.msra.mxu0 %v14879_v39  ;;  %v17108_v51 = vpop.f32.mrb[43].mxu1  ;;  %9323 = vmatpush1.bf16.msra.mxu1 %v14882_v5  ;;  %v14896_v2 = vld [vmem:[#allocation17 + $0x144] ss:$8 sps:$4 sm:$0xff]   ;;  %v14899_v15 = vld [vmem:[#allocation15 + $0x134] ss:$8 sps:$4 sm:$0xff]  }
 0x45f   :  { %v6234_v40 = vmax.f32 %v6170_v63, 0.0  ;;  %v6233_v25 = vmax.f32 %v6169_v60, 0.0  ;;  %v6236_v43 = vmax.f32 %v6172_v13, 0.0  ;;  %v6238_v52 = vmax.f32 %v6174_v0, 0.0  ;;  %8036 = vmatprep.subr.bf16.mxu0 %v14887_v28  ;;  %9324 = vmatprep.subr.bf16.mxu1 %v14890_v57  ;;  %v14902_v19 = vld [vmem:[#allocation17 + $0x154] ss:$8 sps:$4 sm:$0xff]  }
 0x460   :  { %v6235_v38 = vmax.f32 %v6171_v61, 0.0  ;;  %v6237_v37 = vmax.f32 %v6173_v24, 0.0  ;;  %v6239_v7 = vmax.f32 %v6175_v14, 0.0  ;;  %v6240_v47 = vmax.f32 %v17102_v44, 0.0  ;;  %v6780_v39 = vld [vmem:[#allocation4 + $0x60] sm:$0xff]  ;;  %v6786_v18 = vld [vmem:[#allocation4 + $0x70] sm:$0xff] }
 0x461   :  { %v6292_v41 = vpack.c.bf16 %v6236_v43, %v6232_v11  ;;  %v6294_v55 = vpack.c.bf16 %v6238_v52, %v6234_v40  ;;  %v17112_v17 = vadd.f32 %v17045_v30, %v6079_v62  ;;  %v17115_v6 = vadd.f32 %v17048_v10, %v5403_v35  ;;  %v7004_v31 = vld [vmem:[#allocation4 + $0xa0] sm:$0xff]  ;;  %v7010_v8 = vld [vmem:[#allocation4 + $0xb0] sm:$0xff]  ;;  %v6783_v61 = vld [vmem:[#allocation4 + $0x68] sm:$0xff] }
 0x462   :  { %v6293_v27 = vpack.c.bf16 %v6237_v37, %v6233_v25  ;;  %v6295_v56 = vpack.c.bf16 %v6239_v7, %v6235_v38  ;;  %v17118_v32 = vadd.f32 %v17052_v59, %v6081_v49  ;;  %v17121_v58 = vadd.f32 %v17041_v22, %v5405_v54  ;;  %8037 = vmatpush1.bf16.msra.mxu0 %v14885_v50  ;;  %v17123_v34 = vpop.f32.mrb[44].mxu0  ;;  %v14897_v63 = vld [vmem:[#allocation15 + $0x130] ss:$8 sps:$4 sm:$0xff]   ;;  %v7007_v13 = vld [vmem:[#allocation4 + $0xa8] sm:$0xff] }
 0x463   :  { %v6541_v36 = vshrl.u32 %v6292_v41, 16  ;;  %v6544_v46 = vshll.u32 %v6292_v41, 16  ;;  %6868 = vst [vmem:[#allocation4 + $0x80] sm:$0xff] %v6292_v41  ;;  %v6555_v4 = vshrl.u32 %v6294_v55, 16  ;;  %v6558_v42 = vshll.u32 %v6294_v55, 16  ;;  %6870 = vst [vmem:[#allocation4 + $0x90] sm:$0xff] %v6294_v55  ;;  %9325 = vmatpush1.bf16.msra.mxu1 %v14888_v33  ;;  %8038 = vmatprep.subr.bf16.mxu0 %v14893_v29 }
 0x464   :  { %v6548_v23 = vshrl.u32 %v6293_v27, 16  ;;  %v6551_v20 = vshll.u32 %v6293_v27, 16  ;;  %6869 = vst [vmem:[#allocation4 + $0x88] sm:$0xff] %v6293_v27  ;;  %v6562_v5 = vshrl.u32 %v6295_v56, 16  ;;  %v6565_v28 = vshll.u32 %v6295_v56, 16  ;;  %6871 = vst [vmem:[#allocation4 + $0x98] sm:$0xff] %v6295_v56  ;;  %9247 = vmatprep.mubr.bf16.mxu1 %v6293_v27  ;;  %9326 = vmatprep.subr.bf16.mxu1 %v14896_v2 }
 0x465   :  { %v17125_v16 = vpop.f32.mrb[44].mxu1  ;;  %v17127_v12 = vpop.f32.mrb[45].mxu0  ;;  %v6543_v62 = vrot.slane %v6541_v36, 7  ;;  %v6904_v35 = vrot.slane %v6544_v46, 1  ;;  %v6557_v57 = vrot.slane %v6555_v4, 7  ;;  %v6908_v60 = vrot.slane %v6558_v42, 1  ;;  %9248 = vmatmul.mubr.bf16.gmra.mrb[68].mxu1 %v6292_v41 }
 0x466   :  { %v17129_v0 = vpop.f32.mrb[45].mxu1  ;;  %v17131_v49 = vpop.f32.mrb[46].mxu0  ;;  %v6550_v54 = vrot.slane %v6548_v23, 7  ;;  %v6906_v50 = vrot.slane %v6551_v20, 1  ;;  %v6564_v33 = vrot.slane %v6562_v5, 7  ;;  %v6910_v11 = vrot.slane %v6565_v28, 1  ;;  %8039 = vmatpush1.bf16.msra.mxu0 %v14891_v48 }
 0x467   :  { %v17133_v24 = vpop.f32.mrb[46].mxu1  ;;  %v17135_v14 = vpop.f32.mrb[47].mxu0  ;;  %v6546_v29 = vor.u32 %v6544_v46, %v6543_v62  ;;  %v6905_v40 = vor.u32 %v6904_v35, %v6541_v36  ;;  %v6560_v25 = vor.u32 %v6558_v42, %v6557_v57  ;;  %v6909_v43 = vor.u32 %v6908_v60, %v6555_v4  ;;  %v6789_v52 = vld [vmem:[#allocation4 + $0x78] sm:$0xff]  ;;  %9327 = vmatpush1.bf16.msra.mxu1 %v14894_v45  ;;  %v14905_v45 = vld [vmem:[#allocation15 + $0x144] ss:$8 sps:$4 sm:$0xff]  }
 0x468   :  { %v7013_v38 = vld [vmem:[#allocation4 + $0xb8] sm:$0xff]  ;;  %v17137_v37 = vpop.f32.mrb[47].mxu1  ;;  %v6553_v2 = vor.u32 %v6551_v20, %v6550_v54  ;;  %v6907_v41 = vor.u32 %v6906_v50, %v6548_v23  ;;  %v6567_v55 = vor.u32 %v6565_v28, %v6564_v33  ;;  %v6911_v27 = vor.u32 %v6910_v11, %v6562_v5  ;;  %8040 = vmatprep.subr.bf16.mxu0 %v14899_v15  ;;  %v14908_v4 = vld [vmem:[#allocation17 + $0x164] ss:$8 sps:$4 sm:$0xff]  }
 0x469   :  { %v14900_v7 = vld [vmem:[#allocation17 + $0x150] ss:$8 sps:$4 sm:$0xff]   ;;  %v6781_v56 = vsel %vm15992_vm5, %v6546_v29, %v6780_v39  ;;  %v7005_v48 = vsel %vm16143_vm10, %v6905_v40, %v7004_v31  ;;  %v6787_v36 = vsel %vm15992_vm5, %v6560_v25, %v6786_v18  ;;  %v7011_v46 = vsel %vm16143_vm10, %v6909_v43, %v7010_v8  ;;  %9328 = vmatprep.subr.bf16.mxu1 %v14902_v19  ;;  %v14903_v19 = vld [vmem:[#allocation15 + $0x140] ss:$8 sps:$4 sm:$0xff]   ;;  %v14914_v57 = vld [vmem:[#allocation17 + $0x174] ss:$8 sps:$4 sm:$0xff]  }
 0x46a   :  { %6782 = vst [vmem:[#allocation4 + $0x60] sm:$0xff] %v6781_v56  ;;  %7006 = vst [vmem:[#allocation4 + $0xa0] sm:$0xff] %v7005_v48  ;;  %v6784_v15 = vsel %vm15992_vm5, %v6553_v2, %v6783_v61  ;;  %v7008_v42 = vsel %vm16143_vm10, %v6907_v41, %v7007_v13  ;;  %v6790_v39 = vsel %vm15992_vm5, %v6567_v55, %v6789_v52  ;;  %8041 = vmatpush1.bf16.msra.mxu0 %v14897_v63  ;;  %v14906_v18 = vld [vmem:[#allocation17 + $0x160] ss:$8 sps:$4 sm:$0xff]   ;;  %v17160_v28 = vpop.f32.mrb[48].mxu0  ;;  %v6792_v52 = vld [vmem:[#allocation4 + $0xc0] sm:$0xff] }
 0x46b   :  { %6788 = vst [vmem:[#allocation4 + $0x70] sm:$0xff] %v6787_v36  ;;  %7012 = vst [vmem:[#allocation4 + $0xb0] sm:$0xff] %v7011_v46  ;;  %v7014_v31 = vsel %vm16143_vm10, %v6911_v27, %v7013_v38  ;;  %v6242_v8 = vmax.f32 %v17112_v17, 0.0  ;;  %v6241_v23 = vmax.f32 %v17115_v6, 0.0  ;;  %v6244_v20 = vmax.f32 %v17121_v58, 0.0  ;;  %7963 = vmatprep.mubr.bf16.mxu0 %v6784_v15  ;;  %9329 = vmatpush1.bf16.msra.mxu1 %v14900_v7  ;;  %v17176_v58 = vpop.f32.mrb[49].mxu0 }
 0x46c   :  { %6785 = vst [vmem:[#allocation4 + $0x68] sm:$0xff] %v6784_v15  ;;  %7009 = vst [vmem:[#allocation4 + $0xa8] sm:$0xff] %v7008_v42  ;;  %v6182_v5 = vadd.f32 %v17045_v30, %v17104_v21  ;;  %v14911_v63 = vld [vmem:[#allocation15 + $0x154] ss:$8 sps:$4 sm:$0xff]   ;;  %v6181_v62 = vadd.f32 %v17048_v10, %v17106_v3  ;;  %v6183_v35 = vadd.f32 %v17052_v59, %v17108_v51  ;;  %v17174_v21 = vpop.f32.mrb[48].mxu1  ;;  %7964 = vmatmul.mubr.bf16.gmra.mrb[68].mxu0 %v6781_v56  ;;  %v7022_v15 = vld [vmem:[#allocation4 + $0x110] sm:$0xff] }
 0x46d   :  { %6791 = vst [vmem:[#allocation4 + $0x78] sm:$0xff] %v6790_v39  ;;  %7015 = vst [vmem:[#allocation4 + $0xb8] sm:$0xff] %v7014_v31  ;;  %v17168_v17 = vadd.f32 %v17041_v22, %v17123_v34  ;;  %v17172_v6 = vadd.f32 %v17045_v30, %v17125_v16  ;;  %v6243_v60 = vmax.f32 %v17118_v32, 0.0  ;;  %v6296_v3 = vpack.c.bf16 %v6244_v20, %v6240_v47  ;;  %v17185_v61 = vpop.f32.mrb[49].mxu1  ;;  %v17187_v16 = vpop.f32.mrb[50].mxu0  ;;  %v7016_v38 = vld [vmem:[#allocation4 + $0x100] sm:$0xff] }
 0x46e   :  { %v6246_v51 = vmax.f32 %v6182_v5, 0.0  ;;  %v17183_v34 = vadd.f32 %v17048_v10, %v17127_v12  ;;  %8042 = vmatprep.subr.bf16.mxu0 %v14905_v45  ;;  %9330 = vmatprep.subr.bf16.mxu1 %v14908_v4  ;;  %v14909_v13 = vld [vmem:[#allocation15 + $0x150] ss:$8 sps:$4 sm:$0xff]   ;;  %v6245_v54 = vmax.f32 %v6181_v62, 0.0  ;;  %v6247_v50 = vmax.f32 %v6183_v35, 0.0  ;;  %v17194_v47 = vpop.f32.mrb[50].mxu1 }
 0x46f   :  { %v17192_v44 = vadd.f32 %v17052_v59, %v17129_v0  ;;  %v17196_v32 = vpop.f32.mrb[51].mxu0  ;;  %8043 = vmatpush1.bf16.msra.mxu0 %v14903_v19  ;;  %v6569_v12 = vshrl.u32 %v6296_v3, 16  ;;  %v6572_v11 = vshll.u32 %v6296_v3, 16  ;;  %6872 = vst [vmem:[#allocation4 + $0xe0] sm:$0xff] %v6296_v3  ;;  %v17199_v25 = vpop.f32.mrb[51].mxu1  ;;  %9331 = vmatpush1.bf16.msra.mxu1 %v14906_v18  ;;  %v17204_v41 = vadd.f32 %v17041_v22, %v17131_v49  ;;  %v6798_v4 = vld [vmem:[#allocation4 + $0xd0] sm:$0xff] }
 0x470   :  { %v6298_v29 = vpack.c.bf16 %v6246_v51, %v6242_v8  ;;  %8044 = vmatprep.subr.bf16.mxu0 %v14911_v63  ;;  %v14917_v43 = vld [vmem:[#allocation15 + $0x164] ss:$8 sps:$4 sm:$0xff]   ;;  %v6297_v0 = vpack.c.bf16 %v6245_v54, %v6241_v23  ;;  %v6299_v7 = vpack.c.bf16 %v6247_v50, %v6243_v60  ;;  %v14912_v55 = vld [vmem:[#allocation17 + $0x170] ss:$8 sps:$4 sm:$0xff]   ;;  %9332 = vmatprep.subr.bf16.mxu1 %v14914_v57  ;;  %v14915_v27 = vld [vmem:[#allocation15 + $0x160] ss:$8 sps:$4 sm:$0xff]  }
 0x471   :  { %v6571_v56 = vrot.slane %v6569_v12, 7  ;;  %v6912_v48 = vrot.slane %v6572_v11, 1  ;;  %v14920_v45 = vld [vmem:[#allocation17 + $0x184] ss:$8 sps:$4 sm:$0xff]   ;;  %v14918_v49 = vld [vmem:[#allocation17 + $0x180] ss:$8 sps:$4 sm:$0xff]  }
 0x472   :  { %v6583_v36 = vshrl.u32 %v6298_v29, 16  ;;  %v6586_v46 = vshll.u32 %v6298_v29, 16  ;;  %6874 = vst [vmem:[#allocation4 + $0xf0] sm:$0xff] %v6298_v29  ;;  %v6576_v42 = vshrl.u32 %v6297_v0, 16  ;;  %v6579_v39 = vshll.u32 %v6297_v0, 16  ;;  %6873 = vst [vmem:[#allocation4 + $0xe8] sm:$0xff] %v6297_v0  ;;  %9257 = vmatprep.mubr.bf16.mxu1 %v6297_v0 }
 0x473   :  { %v6590_v31 = vshrl.u32 %v6299_v7, 16  ;;  %v6593_v19 = vshll.u32 %v6299_v7, 16  ;;  %6875 = vst [vmem:[#allocation4 + $0xf8] sm:$0xff] %v6299_v7  ;;  %8045 = vmatpush1.bf16.msra.mxu0 %v14909_v13  ;;  %v6574_v18 = vor.u32 %v6572_v11, %v6571_v56  ;;  %v6913_v8 = vor.u32 %v6912_v48, %v6569_v12  ;;  %v6795_v5 = vld [vmem:[#allocation4 + $0xc8] sm:$0xff]  ;;  %9258 = vmatmul.mubr.bf16.gmra.mrb[72].mxu1 %v6296_v3  ;;  %v17206_v62 = vpop.f32.mrb[52].mxu0  ;;  %v17208_v50 = vpop.f32.mrb[52].mxu1 }
 0x474   :  { %v6585_v23 = vrot.slane %v6583_v36, 7  ;;  %v6916_v20 = vrot.slane %v6586_v46, 1  ;;  %v7019_v63 = vld [vmem:[#allocation4 + $0x108] sm:$0xff]  ;;  %8046 = vmatprep.subr.bf16.mxu0 %v14917_v43  ;;  %v14923_v35 = vld [vmem:[#allocation15 + $0x174] ss:$8 sps:$4 sm:$0xff]   ;;  %v6578_v57 = vrot.slane %v6576_v42, 7  ;;  %9333 = vmatpush1.bf16.msra.mxu1 %v14912_v55 }
 0x475   :  { %v6914_v60 = vrot.slane %v6579_v39, 1  ;;  %v6592_v51 = vrot.slane %v6590_v31, 7  ;;  %v6918_v54 = vrot.slane %v6593_v19, 1  ;;  %v17210_v29 = vpop.f32.mrb[53].mxu0  ;;  %v6793_v13 = vsel %vm15992_vm5, %v6574_v18, %v6792_v52  ;;  %v6801_v0 = vld [vmem:[#allocation4 + $0xd8] sm:$0xff]  ;;  %v17216_v7 = vpop.f32.mrb[53].mxu1  ;;  %9334 = vmatprep.subr.bf16.mxu1 %v14920_v45 }
 0x476   :  { %v7017_v12 = vsel %vm16143_vm10, %v6913_v8, %v7016_v38  ;;  %v6588_v3 = vor.u32 %v6586_v46, %v6585_v23  ;;  %v6917_v11 = vor.u32 %v6916_v20, %v6583_v36  ;;  %v7025_v43 = vld [vmem:[#allocation4 + $0x118] sm:$0xff]  ;;  %v17218_v56 = vpop.f32.mrb[54].mxu0  ;;  %6794 = vst [vmem:[#allocation4 + $0xc0] sm:$0xff] %v6793_v13  ;;  %v6581_v2 = vor.u32 %v6579_v39, %v6578_v57  ;;  %v17220_v52 = vpop.f32.mrb[54].mxu1 }
 0x477   :  { %v14926_v48 = vld [vmem:[#allocation17 + $0x194] ss:$8 sps:$4 sm:$0xff]   ;;  %7018 = vst [vmem:[#allocation4 + $0x100] sm:$0xff] %v7017_v12  ;;  %v6915_v55 = vor.u32 %v6914_v60, %v6576_v42  ;;  %v6595_v40 = vor.u32 %v6593_v19, %v6592_v51  ;;  %v6919_v33 = vor.u32 %v6918_v54, %v6590_v31  ;;  %v17222_v18 = vpop.f32.mrb[55].mxu0  ;;  %8047 = vmatpush1.bf16.msra.mxu0 %v14915_v27  ;;  %v6252_v46 = vmax.f32 %v17204_v41, 0.0  ;;  %v17231_v39 = vpop.f32.mrb[55].mxu1 }
 0x478   :  { %v6799_v38 = vsel %vm15992_vm5, %v6588_v3, %v6798_v4  ;;  %v7023_v36 = vsel %vm16143_vm10, %v6917_v11, %v7022_v15  ;;  %v6190_v45 = vadd.f32 %v17045_v30, %v17133_v24  ;;  %v14921_v42 = vld [vmem:[#allocation15 + $0x170] ss:$8 sps:$4 sm:$0xff]   ;;  %8048 = vmatprep.subr.bf16.mxu0 %v14923_v35  ;;  %v6796_v27 = vsel %vm15992_vm5, %v6581_v2, %v6795_v5  ;;  %v14929_v31 = vld [vmem:[#allocation15 + $0x184] ss:$8 sps:$4 sm:$0xff]   ;;  %v14935_v11 = vld [vmem:[#allocation15 + $0x194] ss:$8 sps:$4 sm:$0xff]  }
 0x479   :  { %6800 = vst [vmem:[#allocation4 + $0xd0] sm:$0xff] %v6799_v38  ;;  %7024 = vst [vmem:[#allocation4 + $0x110] sm:$0xff] %v7023_v36  ;;  %v7020_v4 = vsel %vm16143_vm10, %v6915_v55, %v7019_v63  ;;  %v6802_v15 = vsel %vm15992_vm5, %v6595_v40, %v6801_v0  ;;  %v7026_v41 = vsel %vm16143_vm10, %v6919_v33, %v7025_v43  ;;  %9335 = vmatpush1.bf16.msra.mxu1 %v14918_v49  ;;  %v14924_v24 = vld [vmem:[#allocation17 + $0x190] ss:$8 sps:$4 sm:$0xff]   ;;  %v14932_v33 = vld [vmem:[#allocation17 + $0x1a4] ss:$8 sps:$4 sm:$0xff]  }
 0x47a   :  { %6797 = vst [vmem:[#allocation4 + $0xc8] sm:$0xff] %v6796_v27  ;;  %7021 = vst [vmem:[#allocation4 + $0x108] sm:$0xff] %v7020_v4  ;;  %v18383_v19 = vmax.f32 %v17168_v17, 0.0  ;;  %v6254_v2 = vmax.f32 %v6190_v45, 0.0  ;;  %v6189_v23 = vadd.f32 %v17048_v10, %v17135_v14  ;;  %v6191_v40 = vadd.f32 %v17052_v59, %v17137_v37  ;;  %7973 = vmatprep.mubr.bf16.mxu0 %v6796_v27  ;;  %v14927_v14 = vld [vmem:[#allocation15 + $0x180] ss:$8 sps:$4 sm:$0xff]  }
 0x47b   :  { %6803 = vst [vmem:[#allocation4 + $0xd8] sm:$0xff] %v6802_v15  ;;  %7027 = vst [vmem:[#allocation4 + $0x118] sm:$0xff] %v7026_v41  ;;  %9336 = vmatprep.subr.bf16.mxu1 %v14926_v48  ;;  %v6251_v49 = vmax.f32 %v17192_v44, 0.0  ;;  %v17252_v20 = vadd.f32 %v17041_v22, %v17160_v28  ;;  %v17256_v17 = vadd.f32 %v17045_v30, %v17174_v21  ;;  %7974 = vmatmul.mubr.bf16.gmra.mrb[72].mxu0 %v6793_v13  ;;  %v17267_v57 = vpop.f32.mrb[56].mxu0  ;;  %v14930_v21 = vld [vmem:[#allocation17 + $0x1a0] ss:$8 sps:$4 sm:$0xff]  }
 0x47c   :  { %v17243_v8 = vpack.c.bf16 %v6252_v46, %v18383_v19  ;;  %v17260_v5 = vadd.f32 %v17048_v10, %v17176_v58  ;;  %v18384_v44 = vmax.f32 %v17172_v6, 0.0  ;;  %v6253_v35 = vmax.f32 %v6189_v23, 0.0  ;;  %8049 = vmatpush1.bf16.msra.mxu0 %v14921_v42  ;;  %v6804_v60 = vld [vmem:[#allocation4 + $0x120] sm:$0xff]  ;;  %v17275_v3 = vpop.f32.mrb[56].mxu1  ;;  %v17277_v6 = vpop.f32.mrb[57].mxu0  ;;  %v6810_v46 = vld [vmem:[#allocation4 + $0x130] sm:$0xff] }
 0x47d   :  { %v7028_v51 = vld [vmem:[#allocation4 + $0x160] sm:$0xff]  ;;  %v6255_v58 = vmax.f32 %v6191_v40, 0.0  ;;  %v6256_v54 = vmax.f32 %v17252_v20, 0.0  ;;  %v17273_v12 = vadd.f32 %v17052_v59, %v17185_v61  ;;  %9337 = vmatpush1.bf16.msra.mxu1 %v14924_v24  ;;  %8050 = vmatprep.subr.bf16.mxu0 %v14929_v31  ;;  %v17279_v38 = vpop.f32.mrb[57].mxu1  ;;  %v17281_v36 = vpop.f32.mrb[58].mxu0  ;;  %v18385_v61 = vmax.f32 %v17183_v34, 0.0 }
 0x47e   :  { %v6597_v37 = vshrl.u32 %v17243_v8, 16  ;;  %v6600_v63 = vshll.u32 %v17243_v8, 16  ;;  %6876 = vst [vmem:[#allocation4 + $0x140] sm:$0xff] %v17243_v8  ;;  %v6302_v28 = vpack.c.bf16 %v6254_v2, %v18384_v44  ;;  %9338 = vmatprep.subr.bf16.mxu1 %v14932_v33  ;;  %v6196_v4 = vadd.f32 %v17041_v22, %v17187_v16  ;;  %v17288_v15 = vpop.f32.mrb[58].mxu1  ;;  %v17290_v41 = vpop.f32.mrb[59].mxu0  ;;  %v7034_v40 = vld [vmem:[#allocation4 + $0x170] sm:$0xff] }
 0x47f   :  { %v6301_v45 = vpack.c.bf16 %v6253_v35, %v18385_v61  ;;  %v6303_v42 = vpack.c.bf16 %v6255_v58, %v6251_v49  ;;  %v14938_v24 = vld [vmem:[#allocation17 + $0x1b4] ss:$8 sps:$4 sm:$0xff]   ;;  %v17292_v33 = vpop.f32.mrb[59].mxu1  ;;  %v14933_v34 = vld [vmem:[#allocation15 + $0x190] ss:$8 sps:$4 sm:$0xff]  }
 0x480   :  { %v6599_v0 = vrot.slane %v6597_v37, 7  ;;  %v6920_v43 = vrot.slane %v6600_v63, 1  ;;  %v6611_v48 = vshrl.u32 %v6302_v28, 16  ;;  %v6614_v55 = vshll.u32 %v6302_v28, 16  ;;  %6878 = vst [vmem:[#allocation4 + $0x150] sm:$0xff] %v6302_v28  ;;  %8051 = vmatpush1.bf16.msra.mxu0 %v14927_v14 }
 0x481   :  { %v6604_v49 = vshrl.u32 %v6301_v45, 16  ;;  %v6607_v44 = vshll.u32 %v6301_v45, 16  ;;  %6877 = vst [vmem:[#allocation4 + $0x148] sm:$0xff] %v6301_v45  ;;  %v6618_v28 = vshrl.u32 %v6303_v42, 16  ;;  %v6621_v35 = vshll.u32 %v6303_v42, 16  ;;  %6879 = vst [vmem:[#allocation4 + $0x158] sm:$0xff] %v6303_v42  ;;  %9267 = vmatprep.mubr.bf16.mxu1 %v6301_v45  ;;  %9339 = vmatpush1.bf16.msra.mxu1 %v14930_v21 }
 0x482   :  { %v6602_v31 = vor.u32 %v6600_v63, %v6599_v0  ;;  %v6921_v19 = vor.u32 %v6920_v43, %v6597_v37  ;;  %v6613_v2 = vrot.slane %v6611_v48, 7  ;;  %v6924_v23 = vrot.slane %v6614_v55, 1  ;;  %v14936_v16 = vld [vmem:[#allocation17 + $0x1b0] ss:$8 sps:$4 sm:$0xff]   ;;  %9268 = vmatmul.mubr.bf16.gmra.mrb[76].mxu1 %v17243_v8  ;;  %v14941_v14 = vld [vmem:[#allocation15 + $0x1a4] ss:$8 sps:$4 sm:$0xff]   ;;  %8052 = vmatprep.subr.bf16.mxu0 %v14935_v11 }
 0x483   :  { %v14944_v43 = vld [vmem:[#allocation17 + $0x1c4] ss:$8 sps:$4 sm:$0xff]   ;;  %v6606_v61 = vrot.slane %v6604_v49, 7  ;;  %v6922_v21 = vrot.slane %v6607_v44, 1  ;;  %v6620_v27 = vrot.slane %v6618_v28, 7  ;;  %v6926_v13 = vrot.slane %v6621_v35, 1  ;;  %9340 = vmatprep.subr.bf16.mxu1 %v14938_v24 }
 0x484   :  { %v17296_v63 = vsel %vm15992_vm5, %v6602_v31, %v6804_v60  ;;  %v7029_v37 = vsel %vm16143_vm10, %v6921_v19, %v7028_v51  ;;  %v6616_v58 = vor.u32 %v6614_v55, %v6613_v2  ;;  %v6925_v0 = vor.u32 %v6924_v23, %v6611_v48  ;;  %v6807_v45 = vld [vmem:[#allocation4 + $0x128] sm:$0xff]  ;;  %v6813_v8 = vld [vmem:[#allocation4 + $0x138] sm:$0xff]  ;;  %v17308_v19 = vpop.f32.mrb[60].mxu0  ;;  %8053 = vmatpush1.bf16.msra.mxu0 %v14933_v34 }
 0x485   :  { %6806 = vst [vmem:[#allocation4 + $0x120] sm:$0xff] %v17296_v63  ;;  %7030 = vst [vmem:[#allocation4 + $0x160] sm:$0xff] %v7029_v37  ;;  %v7031_v42 = vld [vmem:[#allocation4 + $0x168] sm:$0xff]  ;;  %v7037_v48 = vld [vmem:[#allocation4 + $0x178] sm:$0xff]  ;;  %v6260_v55 = vmax.f32 %v6196_v4, 0.0  ;;  %v6198_v31 = vadd.f32 %v17045_v30, %v17194_v47  ;;  %v6609_v11 = vor.u32 %v6607_v44, %v6606_v61  ;;  %v6923_v24 = vor.u32 %v6922_v21, %v6604_v49 }
 0x486   :  { %v6811_v60 = vsel %vm15992_vm5, %v6616_v58, %v6810_v46  ;;  %v7035_v51 = vsel %vm16143_vm10, %v6925_v0, %v7034_v40  ;;  %v14939_v2 = vld [vmem:[#allocation15 + $0x1a0] ss:$8 sps:$4 sm:$0xff]   ;;  %v6623_v23 = vor.u32 %v6621_v35, %v6620_v27  ;;  %v6927_v37 = vor.u32 %v6926_v13, %v6618_v28  ;;  %v17310_v46 = vpop.f32.mrb[60].mxu1  ;;  %v17312_v58 = vpop.f32.mrb[61].mxu0  ;;  %9341 = vmatpush1.bf16.msra.mxu1 %v14936_v16  ;;  %v14947_v4 = vld [vmem:[#allocation15 + $0x1b4] ss:$8 sps:$4 sm:$0xff]  }
 0x487   :  { %6812 = vst [vmem:[#allocation4 + $0x130] sm:$0xff] %v6811_v60  ;;  %7036 = vst [vmem:[#allocation4 + $0x170] sm:$0xff] %v7035_v51  ;;  %v14942_v40 = vld [vmem:[#allocation17 + $0x1c0] ss:$8 sps:$4 sm:$0xff]   ;;  %v17316_v47 = vpack.c.bf16 %v6260_v55, %v6256_v54  ;;  %v6262_v0 = vmax.f32 %v6198_v31, 0.0  ;;  %v6197_v34 = vadd.f32 %v17048_v10, %v17196_v32  ;;  %v6199_v49 = vadd.f32 %v17052_v59, %v17199_v25  ;;  %v17322_v27 = vpop.f32.mrb[61].mxu1 }
 0x488   :  { %v17324_v13 = vpop.f32.mrb[62].mxu0  ;;  %8054 = vmatprep.subr.bf16.mxu0 %v14941_v14  ;;  %9342 = vmatprep.subr.bf16.mxu1 %v14944_v43  ;;  %v14950_v44 = vld [vmem:[#allocation17 + $0x1d4] ss:$8 sps:$4 sm:$0xff]   ;;  %v6808_v28 = vsel %vm15992_vm5, %v6609_v11, %v6807_v45  ;;  %v7032_v20 = vsel %vm16143_vm10, %v6923_v24, %v7031_v42  ;;  %v6814_v54 = vsel %vm15992_vm5, %v6623_v23, %v6813_v8  ;;  %v17334_v25 = vpop.f32.mrb[62].mxu1  ;;  %v18386_v43 = vmax.f32 %v17256_v17, 0.0 }
 0x489   :  { %v7038_v32 = vsel %vm16143_vm10, %v6927_v37, %v7037_v48  ;;  %v17336_v35 = vpop.f32.mrb[63].mxu0  ;;  %6809 = vst [vmem:[#allocation4 + $0x128] sm:$0xff] %v6808_v28  ;;  %7033 = vst [vmem:[#allocation4 + $0x168] sm:$0xff] %v7032_v20  ;;  %v6625_v16 = vshrl.u32 %v17316_v47, 16  ;;  %v6628_v14 = vshll.u32 %v17316_v47, 16  ;;  %v6261_v45 = vmax.f32 %v6197_v34, 0.0  ;;  %7983 = vmatprep.mubr.bf16.mxu0 %v6808_v28  ;;  %8055 = vmatpush1.bf16.msra.mxu0 %v14939_v2 }
 0x48a   :  { %6815 = vst [vmem:[#allocation4 + $0x138] sm:$0xff] %v6814_v54  ;;  %7039 = vst [vmem:[#allocation4 + $0x178] sm:$0xff] %v7038_v32  ;;  %v6306_v61 = vpack.c.bf16 %v6262_v0, %v18386_v43  ;;  %v17343_v21 = vpop.f32.mrb[63].mxu1  ;;  %v14945_v42 = vld [vmem:[#allocation15 + $0x1b0] ss:$8 sps:$4 sm:$0xff]   ;;  %v6259_v60 = vmax.f32 %v17273_v12, 0.0  ;;  %v17348_v8 = vadd.f32 %v17041_v22, %v17206_v62  ;;  %v17352_v48 = vadd.f32 %v17045_v30, %v17208_v50 }
 0x48b   :  { %6880 = vst [vmem:[#allocation4 + $0x1a0] sm:$0xff] %v17316_v47  ;;  %v6263_v51 = vmax.f32 %v6199_v49, 0.0  ;;  %7984 = vmatmul.mubr.bf16.gmra.mrb[76].mxu0 %v17296_v63  ;;  %9343 = vmatpush1.bf16.msra.mxu1 %v14942_v40  ;;  %v14948_v17 = vld [vmem:[#allocation17 + $0x1d0] ss:$8 sps:$4 sm:$0xff]   ;;  %v6627_v55 = vrot.slane %v6625_v16, 7  ;;  %v6928_v11 = vrot.slane %v6628_v14, 1  ;;  %v17360_v63 = vadd.f32 %v17048_v10, %v17210_v29 }
 0x48c   :  { %v6816_v31 = vld [vmem:[#allocation4 + $0x180] sm:$0xff]  ;;  %v6639_v2 = vshrl.u32 %v6306_v61, 16  ;;  %v6642_v24 = vshll.u32 %v6306_v61, 16  ;;  %6882 = vst [vmem:[#allocation4 + $0x1b0] sm:$0xff] %v6306_v61  ;;  %8056 = vmatprep.subr.bf16.mxu0 %v14947_v4  ;;  %9344 = vmatprep.subr.bf16.mxu1 %v14950_v44  ;;  %v18387_v62 = vmax.f32 %v17260_v5, 0.0  ;;  %v6264_v50 = vmax.f32 %v17348_v8, 0.0 }
 0x48d   :  { %v7040_v12 = vld [vmem:[#allocation4 + $0x1c0] sm:$0xff]  ;;  %v6307_v37 = vpack.c.bf16 %v6263_v51, %v6259_v60  ;;  %v14953_v40 = vld [vmem:[#allocation15 + $0x1c4] ss:$8 sps:$4 sm:$0xff]   ;;  %v6630_v34 = vor.u32 %v6628_v14, %v6627_v55  ;;  %v6929_v49 = vor.u32 %v6928_v11, %v6625_v16  ;;  %8057 = vmatpush1.bf16.msra.mxu0 %v14945_v42  ;;  %v14951_v44 = vld [vmem:[#allocation15 + $0x1c0] ss:$8 sps:$4 sm:$0xff]  }
 0x48e   :  { %v6305_v23 = vpack.c.bf16 %v6261_v45, %v18387_v62  ;;  %v14956_v0 = vld [vmem:[#allocation17 + $0x1e4] ss:$8 sps:$4 sm:$0xff]   ;;  %v6641_v28 = vrot.slane %v6639_v2, 7  ;;  %v6932_v54 = vrot.slane %v6642_v24, 1  ;;  %v14954_v29 = vld [vmem:[#allocation17 + $0x1e0] ss:$8 sps:$4 sm:$0xff]   ;;  %8058 = vmatprep.subr.bf16.mxu0 %v14953_v40 }
 0x48f   :  { %v6822_v20 = vld [vmem:[#allocation4 + $0x190] sm:$0xff]  ;;  %v6646_v43 = vshrl.u32 %v6307_v37, 16  ;;  %v6649_v61 = vshll.u32 %v6307_v37, 16  ;;  %6883 = vst [vmem:[#allocation4 + $0x1b8] sm:$0xff] %v6307_v37  ;;  %9345 = vmatpush1.bf16.msra.mxu1 %v14948_v17  ;;  %v6817_v45 = vsel %vm15992_vm5, %v6630_v34, %v6816_v31  ;;  %v7041_v16 = vsel %vm16143_vm10, %v6929_v49, %v7040_v12  ;;  %v14959_v42 = vld [vmem:[#allocation15 + $0x1d4] ss:$8 sps:$4 sm:$0xff]  }
 0x490   :  { %v7046_v4 = vld [vmem:[#allocation4 + $0x1d0] sm:$0xff]  ;;  %v6632_v32 = vshrl.u32 %v6305_v23, 16  ;;  %v6635_v5 = vshll.u32 %v6305_v23, 16  ;;  %6881 = vst [vmem:[#allocation4 + $0x1a8] sm:$0xff] %v6305_v23  ;;  %9277 = vmatprep.mubr.bf16.mxu1 %v6305_v23  ;;  %v6644_v14 = vor.u32 %v6642_v24, %v6641_v28  ;;  %v6933_v60 = vor.u32 %v6932_v54, %v6639_v2  ;;  %v14962_v51 = vld [vmem:[#allocation17 + $0x1f4] ss:$8 sps:$4 sm:$0xff]   ;;  %9346 = vmatprep.subr.bf16.mxu1 %v14956_v0 }
 0x491   :  { %9278 = vmatmul.mubr.bf16.gmra.mrb[80].mxu1 %v17316_v47  ;;  %6818 = vst [vmem:[#allocation4 + $0x180] sm:$0xff] %v6817_v45  ;;  %7042 = vst [vmem:[#allocation4 + $0x1c0] sm:$0xff] %v7041_v16  ;;  %v6819_v11 = vld [vmem:[#allocation4 + $0x188] sm:$0xff]  ;;  %v6648_v17 = vrot.slane %v6646_v43, 7  ;;  %v6934_v37 = vrot.slane %v6649_v61, 1  ;;  %v6825_v24 = vld [vmem:[#allocation4 + $0x198] sm:$0xff]  ;;  %v17374_v34 = vadd.f32 %v17052_v59, %v17216_v7  ;;  %8059 = vmatpush1.bf16.msra.mxu0 %v14951_v44 }
 0x492   :  { %v6634_v55 = vrot.slane %v6632_v32, 7  ;;  %v6930_v62 = vrot.slane %v6635_v5, 1  ;;  %v7043_v23 = vld [vmem:[#allocation4 + $0x1c8] sm:$0xff]  ;;  %v6823_v31 = vsel %vm15992_vm5, %v6644_v14, %v6822_v20  ;;  %v7047_v2 = vsel %vm16143_vm10, %v6933_v60, %v7046_v4  ;;  %v7049_v47 = vld [vmem:[#allocation4 + $0x1d8] sm:$0xff]  ;;  %8060 = vmatprep.subr.bf16.mxu0 %v14959_v42 }
 0x493   :  { %v6266_v12 = vmax.f32 %v17352_v48, 0.0  ;;  %v14957_v49 = vld [vmem:[#allocation15 + $0x1d0] ss:$8 sps:$4 sm:$0xff]   ;;  %6824 = vst [vmem:[#allocation4 + $0x190] sm:$0xff] %v6823_v31  ;;  %7048 = vst [vmem:[#allocation4 + $0x1d0] sm:$0xff] %v7047_v2  ;;  %v6651_v28 = vor.u32 %v6649_v61, %v6648_v17  ;;  %v6935_v54 = vor.u32 %v6934_v37, %v6646_v43  ;;  %9347 = vmatpush1.bf16.msra.mxu1 %v14954_v29  ;;  %v6265_v20 = vmax.f32 %v17360_v63, 0.0 }
 0x494   :  { %v6637_v40 = vor.u32 %v6635_v5, %v6634_v55  ;;  %v6931_v0 = vor.u32 %v6930_v62, %v6632_v32  ;;  %v6204_v4 = vadd.f32 %v17041_v22, %v17218_v56  ;;  %v6206_v48 = vadd.f32 %v17045_v30, %v17220_v52  ;;  %v14960_v44 = vld [vmem:[#allocation17 + $0x1f0] ss:$8 sps:$4 sm:$0xff]   ;;  %9348 = vmatprep.subr.bf16.mxu1 %v14962_v51  ;;  %v14965_v16 = vld [vmem:[#allocation15 + $0x1e4] ss:$8 sps:$4 sm:$0xff]   ;;  %v14963_v14 = vld [vmem:[#allocation15 + $0x1e0] ss:$8 sps:$4 sm:$0xff]  }
 0x495   :  { %v6205_v7 = vadd.f32 %v17048_v10, %v17222_v18  ;;  %v6826_v63 = vsel %vm15992_vm5, %v6651_v28, %v6825_v24  ;;  %v7050_v56 = vsel %vm16143_vm10, %v6935_v54, %v7049_v47  ;;  %v14968_v52 = vld [vmem:[#allocation17 + $0x204] ss:$8 sps:$4 sm:$0xff]   ;;  %v6207_v29 = vadd.f32 %v17052_v59, %v17231_v39  ;;  %8061 = vmatpush1.bf16.msra.mxu0 %v14957_v49  ;;  %v14969_v2 = vld [vmem:[#allocation15 + $0x1f0] ss:$8 sps:$4 sm:$0xff]  }
 0x496   :  { %v6820_v32 = vsel %vm15992_vm5, %v6637_v40, %v6819_v11  ;;  %v7044_v5 = vsel %vm16143_vm10, %v6931_v0, %v7043_v23  ;;  %6827 = vst [vmem:[#allocation4 + $0x198] sm:$0xff] %v6826_v63  ;;  %7051 = vst [vmem:[#allocation4 + $0x1d8] sm:$0xff] %v7050_v56  ;;  %v6268_v18 = vmax.f32 %v6204_v4, 0.0  ;;  %v6270_v43 = vmax.f32 %v6206_v48, 0.0  ;;  %v14971_v11 = vld [vmem:[#allocation15 + $0x1f4] ss:$8 sps:$4 sm:$0xff]   ;;  %8062 = vmatprep.subr.bf16.mxu0 %v14965_v16 }
 0x497   :  { %6821 = vst [vmem:[#allocation4 + $0x188] sm:$0xff] %v6820_v32  ;;  %7045 = vst [vmem:[#allocation4 + $0x1c8] sm:$0xff] %v7044_v5  ;;  %v6269_v61 = vmax.f32 %v6205_v7, 0.0  ;;  %7993 = vmatprep.mubr.bf16.mxu0 %v6820_v32  ;;  %v6267_v60 = vmax.f32 %v17374_v34, 0.0  ;;  %v17396_v42 = vadd.f32 %v17041_v22, %v17267_v57  ;;  %v17400_v51 = vadd.f32 %v17045_v30, %v17275_v3  ;;  %v6828_v40 = vld [vmem:[#allocation4 + $0x1e0] sm:$0xff]  ;;  %v6834_v4 = vld [vmem:[#allocation4 + $0x1f0] sm:$0xff] }
 0x498   :  { %v17404_v55 = vadd.f32 %v17048_v10, %v17277_v6  ;;  %7994 = vmatmul.mubr.bf16.gmra.mrb[80].mxu0 %v6817_v45  ;;  %v6308_v39 = vpack.c.bf16 %v6268_v18, %v6264_v50  ;;  %v6310_v62 = vpack.c.bf16 %v6270_v43, %v6266_v12  ;;  %v6271_v17 = vmax.f32 %v6207_v29, 0.0  ;;  %9349 = vmatpush1.bf16.msra.mxu1 %v14960_v44  ;;  %v7052_v28 = vld [vmem:[#allocation4 + $0x220] sm:$0xff]  ;;  %v7058_v48 = vld [vmem:[#allocation4 + $0x230] sm:$0xff]  ;;  %v7055_v18 = vld [vmem:[#allocation4 + $0x228] sm:$0xff] }
 0x499   :  { %v6309_v23 = vpack.c.bf16 %v6269_v61, %v6265_v20  ;;  %v6272_v57 = vmax.f32 %v17396_v42, 0.0  ;;  %v6274_v37 = vmax.f32 %v17400_v51, 0.0  ;;  %v17413_v6 = vadd.f32 %v17052_v59, %v17279_v38  ;;  %9431 = vmatprep.subr.bf16.mxu1 %v14968_v52  ;;  %8063 = vmatpush1.bf16.msra.mxu0 %v14963_v14  ;;  %v14977_v38 = vld [vmem:[#allocation15 + $0x204] ss:$8 sps:$4 sm:$0xff]  }
 0x49a   :  { %v6273_v3 = vmax.f32 %v17404_v55, 0.0  ;;  %v6653_v45 = vshrl.u32 %v6308_v39, 16  ;;  %v6656_v31 = vshll.u32 %v6308_v39, 16  ;;  %6884 = vst [vmem:[#allocation4 + $0x200] sm:$0xff] %v6308_v39  ;;  %v6667_v8 = vshrl.u32 %v6310_v62, 16  ;;  %6886 = vst [vmem:[#allocation4 + $0x210] sm:$0xff] %v6310_v62  ;;  %8064 = vmatprep.subr.bf16.mxu0 %v14971_v11 }
 0x49b   :  { %v6670_v50 = vshll.u32 %v6310_v62, 16  ;;  %6885 = vst [vmem:[#allocation4 + $0x208] sm:$0xff] %v6309_v23  ;;  %9287 = vmatprep.mubr.bf16.mxu1 %v6309_v23  ;;  %v6660_v24 = vshrl.u32 %v6309_v23, 16  ;;  %v6663_v47 = vshll.u32 %v6309_v23, 16  ;;  %v17415_v12 = vpack.c.bf16 %v6271_v17, %v6267_v60  ;;  %v6831_v52 = vld [vmem:[#allocation4 + $0x1e8] sm:$0xff]  ;;  %v6837_v23 = vld [vmem:[#allocation4 + $0x1f8] sm:$0xff] }
 0x49c   :  { %v6212_v34 = vadd.f32 %v17041_v22, %v17281_v36  ;;  %9288 = vmatmul.mubr.bf16.gmra.mrb[84].mxu1 %v6308_v39  ;;  %v6655_v49 = vrot.slane %v6653_v45, 7  ;;  %v6936_v0 = vrot.slane %v6656_v31, 1  ;;  %v6669_v54 = vrot.slane %v6667_v8, 7  ;;  %v7061_v17 = vld [vmem:[#allocation4 + $0x238] sm:$0xff] }
 0x49d   :  { %v6940_v20 = vrot.slane %v6670_v50, 1  ;;  %v6662_v7 = vrot.slane %v6660_v24, 7  ;;  %v6938_v44 = vrot.slane %v6663_v47, 1  ;;  %v6674_v16 = vshrl.u32 %v17415_v12, 16  ;;  %6887 = vst [vmem:[#allocation4 + $0x218] sm:$0xff] %v17415_v12  ;;  %8065 = vmatpush1.bf16.msra.mxu0 %v14969_v2 }
 0x49e   :  { %v6677_v32 = vshll.u32 %v17415_v12, 16  ;;  %v6658_v36 = vor.u32 %v6656_v31, %v6655_v49  ;;  %v6937_v5 = vor.u32 %v6936_v0, %v6653_v45  ;;  %v6672_v63 = vor.u32 %v6670_v50, %v6669_v54  ;;  %8147 = vmatprep.subr.bf16.mxu0 %v14977_v38 }
 0x49f   :  { %v6941_v56 = vor.u32 %v6940_v20, %v6667_v8  ;;  %v6665_v43 = vor.u32 %v6663_v47, %v6662_v7  ;;  %v6939_v61 = vor.u32 %v6938_v44, %v6660_v24  ;;  %v6676_v29 = vrot.slane %v6674_v16, 7 }
 0x4a0   :  { %v6942_v14 = vrot.slane %v6677_v32, 1  ;;  %v6829_v60 = vsel %vm15992_vm5, %v6658_v36, %v6828_v40  ;;  %v7053_v11 = vsel %vm16143_vm10, %v6937_v5, %v7052_v28  ;;  %v6835_v39 = vsel %vm15992_vm5, %v6672_v63, %v6834_v4 }
 0x4a1   :  { %v7059_v62 = vsel %vm16143_vm10, %v6941_v56, %v7058_v48  ;;  %6830 = vst [vmem:[#allocation4 + $0x1e0] sm:$0xff] %v6829_v60  ;;  %7054 = vst [vmem:[#allocation4 + $0x220] sm:$0xff] %v7053_v11  ;;  %v6832_v45 = vsel %vm15992_vm5, %v6665_v43, %v6831_v52  ;;  %v7056_v31 = vsel %vm16143_vm10, %v6939_v61, %v7055_v18  ;;  %v6276_v2 = vmax.f32 %v6212_v34, 0.0  ;;  %v6846_v56 = vld [vmem:[#allocation4 + $0x250] sm:$0xff]  ;;  %v6843_v61 = vld [vmem:[#allocation4 + $0x248] sm:$0xff] }
 0x4a2   :  { %6836 = vst [vmem:[#allocation4 + $0x1f0] sm:$0xff] %v6835_v39  ;;  %7060 = vst [vmem:[#allocation4 + $0x230] sm:$0xff] %v7059_v62  ;;  %v6679_v8 = vor.u32 %v6677_v32, %v6676_v29  ;;  %v6943_v50 = vor.u32 %v6942_v14, %v6674_v16  ;;  %v6214_v24 = vadd.f32 %v17045_v30, %v17288_v15  ;;  %8003 = vmatprep.mubr.bf16.mxu0 %v6832_v45  ;;  %v7070_v18 = vld [vmem:[#allocation4 + $0x290] sm:$0xff] }
 0x4a3   :  { %6833 = vst [vmem:[#allocation4 + $0x1e8] sm:$0xff] %v6832_v45  ;;  %7057 = vst [vmem:[#allocation4 + $0x228] sm:$0xff] %v7056_v31  ;;  %v6213_v47 = vadd.f32 %v17048_v10, %v17290_v41  ;;  %v6215_v38 = vadd.f32 %v17052_v59, %v17292_v33  ;;  %v17446_v0 = vadd.f32 %v17041_v22, %v17308_v19  ;;  %8004 = vmatmul.mubr.bf16.gmra.mrb[84].mxu0 %v6829_v60  ;;  %v6849_v45 = vld [vmem:[#allocation4 + $0x258] sm:$0xff] }
 0x4a4   :  { %v6838_v49 = vsel %vm15992_vm5, %v6679_v8, %v6837_v23  ;;  %v7062_v40 = vsel %vm16143_vm10, %v6943_v50, %v7061_v17  ;;  %v17450_v15 = vadd.f32 %v17045_v30, %v17310_v46  ;;  %v6312_v41 = vpack.c.bf16 %v6276_v2, %v6272_v57  ;;  %v7067_v17 = vld [vmem:[#allocation4 + $0x288] sm:$0xff]  ;;  %v7073_v31 = vld [vmem:[#allocation4 + $0x298] sm:$0xff] }
 0x4a5   :  { %6839 = vst [vmem:[#allocation4 + $0x1f8] sm:$0xff] %v6838_v49  ;;  %7063 = vst [vmem:[#allocation4 + $0x238] sm:$0xff] %v7062_v40  ;;  %v6278_v33 = vmax.f32 %v6214_v24, 0.0  ;;  %v6277_v34 = vmax.f32 %v6213_v47, 0.0  ;;  %v6279_v28 = vmax.f32 %v6215_v38, 0.0  ;;  %v6275_v54 = vmax.f32 %v17413_v6, 0.0 }
 0x4a6   :  { %v6280_v20 = vmax.f32 %v17446_v0, 0.0  ;;  %v6282_v19 = vmax.f32 %v17450_v15, 0.0  ;;  %v6681_v4 = vshrl.u32 %v6312_v41, 16  ;;  %v6684_v48 = vshll.u32 %v6312_v41, 16  ;;  %6888 = vst [vmem:[#allocation4 + $0x260] sm:$0xff] %v6312_v41 }
 0x4a7   :  { %v17459_v46 = vpack.c.bf16 %v6278_v33, %v6274_v37  ;;  %v6313_v42 = vpack.c.bf16 %v6277_v34, %v6273_v3  ;;  %v17463_v57 = vpack.c.bf16 %v6279_v28, %v6275_v54  ;;  %v17467_v7 = vadd.f32 %v17048_v10, %v17312_v58  ;;  %v6840_v3 = vld [vmem:[#allocation4 + $0x240] sm:$0xff] }
 0x4a8   :  { %v17471_v6 = vadd.f32 %v17052_v59, %v17322_v27  ;;  %v6220_v44 = vadd.f32 %v17041_v22, %v17324_v13  ;;  %v6683_v16 = vrot.slane %v6681_v4, 7  ;;  %v6944_v51 = vrot.slane %v6684_v48, 1  ;;  %v7064_v58 = vld [vmem:[#allocation4 + $0x280] sm:$0xff] }
 0x4a9   :  { %v6695_v37 = vshrl.u32 %v17459_v46, 16  ;;  %v6698_v55 = vshll.u32 %v17459_v46, 16  ;;  %6890 = vst [vmem:[#allocation4 + $0x270] sm:$0xff] %v17459_v46  ;;  %6889 = vst [vmem:[#allocation4 + $0x268] sm:$0xff] %v6313_v42  ;;  %9297 = vmatprep.mubr.bf16.mxu1 %v6313_v42  ;;  %v6688_v32 = vshrl.u32 %v6313_v42, 16  ;;  %v6691_v36 = vshll.u32 %v6313_v42, 16 }
 0x4aa   :  { %v6702_v27 = vshrl.u32 %v17463_v57, 16  ;;  %v6705_v5 = vshll.u32 %v17463_v57, 16  ;;  %6891 = vst [vmem:[#allocation4 + $0x278] sm:$0xff] %v17463_v57  ;;  %9298 = vmatmul.mubr.bf16.gmra.mrb[88].mxu1 %v6312_v41  ;;  %v6686_v22 = vor.u32 %v6684_v48, %v6683_v16  ;;  %v6945_v13 = vor.u32 %v6944_v51, %v6681_v4 }
 0x4ab   :  { %v6697_v63 = vrot.slane %v6695_v37, 7  ;;  %v6948_v52 = vrot.slane %v6698_v55, 1  ;;  %v6690_v43 = vrot.slane %v6688_v32, 7  ;;  %v6946_v29 = vrot.slane %v6691_v36, 1 }
 0x4ac   :  { %v6704_v14 = vrot.slane %v6702_v27, 7  ;;  %v6950_v60 = vrot.slane %v6705_v5, 1  ;;  %v6841_v11 = vsel %vm15992_vm5, %v6686_v22, %v6840_v3  ;;  %v7065_v39 = vsel %vm16143_vm10, %v6945_v13, %v7064_v58 }
 0x4ad   :  { %v6700_v62 = vor.u32 %v6698_v55, %v6697_v63  ;;  %v6949_v23 = vor.u32 %v6948_v52, %v6695_v37  ;;  %6842 = vst [vmem:[#allocation4 + $0x240] sm:$0xff] %v6841_v11  ;;  %7066 = vst [vmem:[#allocation4 + $0x280] sm:$0xff] %v7065_v39  ;;  %v6693_v8 = vor.u32 %v6691_v36, %v6690_v43  ;;  %v6284_v49 = vmax.f32 %v6220_v44, 0.0  ;;  %v7076_v55 = vld [vmem:[#allocation4 + $0x2e0] sm:$0xff]  ;;  %v6858_v36 = vld [vmem:[#allocation4 + $0x2b0] sm:$0xff] }
 0x4ae   :  { %v6947_v50 = vor.u32 %v6946_v29, %v6688_v32  ;;  %v6707_v2 = vor.u32 %v6705_v5, %v6704_v14  ;;  %v6951_v24 = vor.u32 %v6950_v60, %v6702_v27  ;;  %v6222_v40 = vadd.f32 %v17045_v30, %v17334_v25  ;;  %v8376_v43 = vld [vmem:[#allocation4 + $0x38] sm:$0xff]  ;;  %v6855_v29 = vld [vmem:[#allocation4 + $0x2a8] sm:$0xff] }
 0x4af   :  { %v17487_v47 = vsel %vm15992_vm5, %v6700_v62, %v6846_v56  ;;  %v7071_v38 = vsel %vm16143_vm10, %v6949_v23, %v7070_v18  ;;  %v6844_v41 = vsel %vm15992_vm5, %v6693_v8, %v6843_v61  ;;  %v6316_v30 = vpack.c.bf16 %v6284_v49, %v6280_v20  ;;  %v7079_v23 = vld [vmem:[#allocation4 + $0x2e8] sm:$0xff] }
 0x4b0   :  { %6848 = vst [vmem:[#allocation4 + $0x250] sm:$0xff] %v17487_v47  ;;  %7072 = vst [vmem:[#allocation4 + $0x290] sm:$0xff] %v7071_v38  ;;  %v7068_v33 = vsel %vm16143_vm10, %v6947_v50, %v7067_v17  ;;  %v17500_v34 = vsel %vm15992_vm5, %v6707_v2, %v6849_v45  ;;  %v7074_v28 = vsel %vm16143_vm10, %v6951_v24, %v7073_v31  ;;  %v6286_v25 = vmax.f32 %v6222_v40, 0.0  ;;  %v6861_v17 = vld [vmem:[#allocation4 + $0x2b8] sm:$0xff] }
 0x4b1   :  { %6845 = vst [vmem:[#allocation4 + $0x248] sm:$0xff] %v6844_v41  ;;  %7069 = vst [vmem:[#allocation4 + $0x288] sm:$0xff] %v7068_v33  ;;  %v6221_v54 = vadd.f32 %v17048_v10, %v17336_v35  ;;  %v6223_v4 = vadd.f32 %v17052_v59, %v17343_v21  ;;  %8013 = vmatprep.mubr.bf16.mxu0 %v6844_v41  ;;  %v6709_v48 = vshrl.u32 %v6316_v30, 16  ;;  %v6712_v42 = vshll.u32 %v6316_v30, 16  ;;  %v6852_v21 = vld [vmem:[#allocation4 + $0x2a0] sm:$0xff]  ;;  %v7085_v45 = vld [vmem:[#allocation4 + $0x2f8] sm:$0xff] }
 0x4b2   :  { %6851 = vst [vmem:[#allocation4 + $0x258] sm:$0xff] %v17500_v34  ;;  %7075 = vst [vmem:[#allocation4 + $0x298] sm:$0xff] %v7074_v28  ;;  %8014 = vmatmul.mubr.bf16.gmra.mrb[88].mxu0 %v6841_v11  ;;  %v17513_v44 = vpack.c.bf16 %v6286_v25, %v6282_v19  ;;  %v6281_v0 = vmax.f32 %v17467_v7, 0.0  ;;  %v6283_v20 = vmax.f32 %v17471_v6, 0.0  ;;  %v7082_v6 = vld [vmem:[#allocation4 + $0x2f0] sm:$0xff]  ;;  %v7092_v28 = vld [vmem:[#allocation4 + $0x18] sm:$0xff] }
 0x4b3   :  { %6892 = vst [vmem:[#allocation4 + $0x2c0] sm:$0xff] %v6316_v30  ;;  %v6285_v16 = vmax.f32 %v6221_v54, 0.0  ;;  %v6287_v51 = vmax.f32 %v6223_v4, 0.0  ;;  %v6711_v37 = vrot.slane %v6709_v48, 7  ;;  %v6952_v10 = vrot.slane %v6712_v42, 1  ;;  %v8384_v25 = vld [vmem:[#allocation4 + $0x98] sm:$0xff] }
 0x4b4   :  { %v6723_v35 = vshrl.u32 %v17513_v44, 16  ;;  %v6726_v59 = vshll.u32 %v17513_v44, 16  ;;  %6894 = vst [vmem:[#allocation4 + $0x2d0] sm:$0xff] %v17513_v44  ;;  %v14966_v41 = vld [vmem:[#allocation17 + $0x200] ss:$8 sps:$4 sm:$0xff]  }
 0x4b5   :  { %v6317_v3 = vpack.c.bf16 %v6285_v16, %v6281_v0  ;;  %v17520_v15 = vpack.c.bf16 %v6287_v51, %v6283_v20  ;;  %v6714_v19 = vor.u32 %v6712_v42, %v6711_v37  ;;  %v6953_v58 = vor.u32 %v6952_v10, %v6709_v48  ;;  %v14974_v33 = vld [vmem:[#allocation17 + $0x214] ss:$8 sps:$4 sm:$0xff]   ;;  %v14975_v54 = vld [vmem:[#allocation15 + $0x200] ss:$8 sps:$4 sm:$0xff]   ;;  %v14981_v51 = vld [vmem:[#allocation15 + $0x210] ss:$8 sps:$4 sm:$0xff]  }
 0x4b6   :  { %v6725_v32 = vrot.slane %v6723_v35, 7  ;;  %v6956_v7 = vrot.slane %v6726_v59, 1  ;;  %v14983_v4 = vld [vmem:[#allocation15 + $0x214] ss:$8 sps:$4 sm:$0xff]   ;;  %v7091_v48 = vld [vmem:[#allocation4 + $0x10] sm:$0xff] }
 0x4b7   :  { %v6716_v27 = vshrl.u32 %v6317_v3, 16  ;;  %v6719_v5 = vshll.u32 %v6317_v3, 16  ;;  %6893 = vst [vmem:[#allocation4 + $0x2c8] sm:$0xff] %v6317_v3  ;;  %v6730_v22 = vshrl.u32 %v17520_v15, 16  ;;  %v6733_v13 = vshll.u32 %v17520_v15, 16  ;;  %6895 = vst [vmem:[#allocation4 + $0x2d8] sm:$0xff] %v17520_v15  ;;  %9307 = vmatprep.mubr.bf16.mxu1 %v6317_v3 }
 0x4b8   :  { %v6853_v63 = vsel %vm15992_vm5, %v6714_v19, %v6852_v21  ;;  %v7077_v56 = vsel %vm16143_vm10, %v6953_v58, %v7076_v55  ;;  %v6728_v52 = vor.u32 %v6726_v59, %v6725_v32  ;;  %v6957_v18 = vor.u32 %v6956_v7, %v6723_v35  ;;  %9308 = vmatmul.mubr.bf16.gmra.mrb[92].mxu1 %v6316_v30  ;;  %v8375_v30 = vld [vmem:[#allocation4 + $0x30] sm:$0xff]  ;;  %v7100_v16 = vld [vmem:[#allocation4 + $0x78] sm:$0xff] }
 0x4b9   :  { %6854 = vst [vmem:[#allocation4 + $0x2a0] sm:$0xff] %v6853_v63  ;;  %7078 = vst [vmem:[#allocation4 + $0x2e0] sm:$0xff] %v7077_v56  ;;  %v6718_v61 = vrot.slane %v6716_v27, 7  ;;  %v6954_v14 = vrot.slane %v6719_v5, 1  ;;  %v6732_v60 = vrot.slane %v6730_v22, 7  ;;  %v6958_v11 = vrot.slane %v6733_v13, 1  ;;  %9350 = vmatprep.mubr.bf16.mxu1 %v8376_v43 }
 0x4ba   :  { %v17531_v39 = vsel %vm15992_vm5, %v6728_v52, %v6858_v36  ;;  %v7083_v62 = vsel %vm16143_vm10, %v6957_v18, %v7082_v6  ;;  %v14978_v42 = vld [vmem:[#allocation17 + $0x220] ss:$8 sps:$4 sm:$0xff]   ;;  %v14986_v0 = vld [vmem:[#allocation17 + $0x234] ss:$8 sps:$4 sm:$0xff]   ;;  %v14989_v10 = vld [vmem:[#allocation15 + $0x224] ss:$8 sps:$4 sm:$0xff]  }
 0x4bb   :  { %6860 = vst [vmem:[#allocation4 + $0x2b0] sm:$0xff] %v17531_v39  ;;  %7084 = vst [vmem:[#allocation4 + $0x2f0] sm:$0xff] %v7083_v62  ;;  %v6721_v31 = vor.u32 %v6719_v5, %v6718_v61  ;;  %v6955_v8 = vor.u32 %v6954_v14, %v6716_v27  ;;  %v6735_v50 = vor.u32 %v6733_v13, %v6732_v60  ;;  %v17547_v20 = vld [vmem:[#allocation4 + $0x90] sm:$0xff]  ;;  %v17550_v37 = vld [vmem:[#allocation4 + $0xf8] sm:$0xff] }
 0x4bc   :  { %v6959_v2 = vor.u32 %v6958_v11, %v6730_v22  ;;  %v14984_v35 = vld [vmem:[#allocation17 + $0x230] ss:$8 sps:$4 sm:$0xff]   ;;  %v14992_v59 = vld [vmem:[#allocation17 + $0x244] ss:$8 sps:$4 sm:$0xff]   ;;  %v14987_v21 = vld [vmem:[#allocation15 + $0x220] ss:$8 sps:$4 sm:$0xff]  }
 0x4bd   :  { %v6856_v24 = vsel %vm15992_vm5, %v6721_v31, %v6855_v29  ;;  %v7080_v38 = vsel %vm16143_vm10, %v6955_v8, %v7079_v23  ;;  %v17542_v49 = vsel %vm15992_vm5, %v6735_v50, %v6861_v17  ;;  %v14995_v55 = vld [vmem:[#allocation15 + $0x234] ss:$8 sps:$4 sm:$0xff]   ;;  %v7099_v3 = vld [vmem:[#allocation4 + $0x70] sm:$0xff]  ;;  %v14993_v36 = vld [vmem:[#allocation15 + $0x230] ss:$8 sps:$4 sm:$0xff]  }
 0x4be   :  { %v7086_v40 = vsel %vm16143_vm10, %v6959_v2, %v7085_v45  ;;  %6857 = vst [vmem:[#allocation4 + $0x2a8] sm:$0xff] %v6856_v24  ;;  %7081 = vst [vmem:[#allocation4 + $0x2e8] sm:$0xff] %v7080_v38  ;;  %8023 = vmatprep.mubr.bf16.mxu0 %v6856_v24  ;;  %v14990_v19 = vld [vmem:[#allocation17 + $0x240] ss:$8 sps:$4 sm:$0xff]   ;;  %v7108_v58 = vld [vmem:[#allocation4 + $0xd8] sm:$0xff] }
 0x4bf   :  { %6863 = vst [vmem:[#allocation4 + $0x2b8] sm:$0xff] %v17542_v49  ;;  %7087 = vst [vmem:[#allocation4 + $0x2f8] sm:$0xff] %v7086_v40  ;;  %8024 = vmatmul.mubr.bf16.gmra.mrb[92].mxu0 %v6853_v63  ;;  %v14998_v32 = vld [vmem:[#allocation17 + $0x254] ss:$8 sps:$4 sm:$0xff]   ;;  %v17553_v7 = vld [vmem:[#allocation4 + $0xf0] sm:$0xff] }
 0x4c0   :  { %8066 = vmatprep.mubr.bf16.mxu0 %v7092_v28  ;;  %9351 = vmatmul.mubr.bf16.vlgmr.msra.gmra.mrb[64].mxu1 %v8375_v30  ;;  %v17556_v6 = vld [vmem:[#allocation4 + $0x158] sm:$0xff]  ;;  %v15001_v27 = vld [vmem:[#allocation15 + $0x244] ss:$8 sps:$4 sm:$0xff]   ;;  %v14999_v13 = vld [vmem:[#allocation15 + $0x240] ss:$8 sps:$4 sm:$0xff]  }
 0x4c1   :  { %9360 = vmatprep.mubr.bf16.mxu1 %v8384_v25  ;;  %9432 = vmatpush1.bf16.msra.mxu1 %v14966_v41  ;;  %v14996_v5 = vld [vmem:[#allocation17 + $0x250] ss:$8 sps:$4 sm:$0xff]   ;;  %v15004_v22 = vld [vmem:[#allocation17 + $0x264] ss:$8 sps:$4 sm:$0xff]   ;;  %v15007_v63 = vld [vmem:[#allocation15 + $0x254] ss:$8 sps:$4 sm:$0xff]  }
 0x4c2   :  { %9433 = vmatprep.subr.bf16.mxu1 %v14974_v33  ;;  %v7107_v56 = vld [vmem:[#allocation4 + $0xd0] sm:$0xff]  ;;  %v7116_v18 = vld [vmem:[#allocation4 + $0x138] sm:$0xff] }
 0x4c3   :  { %v15002_v52 = vld [vmem:[#allocation17 + $0x260] ss:$8 sps:$4 sm:$0xff]   ;;  %v15010_v43 = vld [vmem:[#allocation17 + $0x274] ss:$8 sps:$4 sm:$0xff]   ;;  %v15005_v29 = vld [vmem:[#allocation15 + $0x250] ss:$8 sps:$4 sm:$0xff]  }
 0x4c4   :  { %v17559_v61 = vld [vmem:[#allocation4 + $0x150] sm:$0xff]  ;;  %v17562_v14 = vld [vmem:[#allocation4 + $0x1b8] sm:$0xff] }
 0x4c5   :  { %9434 = vmatpush1.bf16.msra.mxu1 %v14972_v26  ;;  %v15013_v60 = vld [vmem:[#allocation15 + $0x264] ss:$8 sps:$4 sm:$0xff]   ;;  %v15008_v11 = vld [vmem:[#allocation17 + $0x270] ss:$8 sps:$4 sm:$0xff]   ;;  %v15011_v23 = vld [vmem:[#allocation15 + $0x260] ss:$8 sps:$4 sm:$0xff]  }
 0x4c6   :  { %9435 = vmatprep.subr.bf16.mxu1 %v14980_v53  ;;  %v15016_v62 = vld [vmem:[#allocation17 + $0x284] ss:$8 sps:$4 sm:$0xff]   ;;  %v15019_v17 = vld [vmem:[#allocation15 + $0x274] ss:$8 sps:$4 sm:$0xff]   ;;  %v15014_v31 = vld [vmem:[#allocation17 + $0x280] ss:$8 sps:$4 sm:$0xff]  }
 0x4c7   :  { %8067 = vmatmul.mubr.bf16.vlgmr.msra.gmra.mrb[64].mxu0 %v7091_v48  ;;  %v7115_v45 = vld [vmem:[#allocation4 + $0x130] sm:$0xff]  ;;  %v7124_v8 = vld [vmem:[#allocation4 + $0x198] sm:$0xff] }
 0x4c8   :  { %8076 = vmatprep.mubr.bf16.mxu0 %v7100_v16  ;;  %8148 = vmatpush1.bf16.msra.mxu0 %v14975_v54  ;;  %v15022_v50 = vld [vmem:[#allocation17 + $0x294] ss:$8 sps:$4 sm:$0xff]   ;;  %v17565_v2 = vld [vmem:[#allocation4 + $0x1b0] sm:$0xff]  ;;  %v15017_v24 = vld [vmem:[#allocation15 + $0x270] ss:$8 sps:$4 sm:$0xff]  }
 0x4c9   :  { %9361 = vmatmul.mubr.bf16.gmra.mrb[68].mxu1 %v17547_v20  ;;  %8149 = vmatprep.subr.bf16.mxu0 %v14983_v4  ;;  %v15025_v38 = vld [vmem:[#allocation15 + $0x284] ss:$8 sps:$4 sm:$0xff]   ;;  %v15020_v40 = vld [vmem:[#allocation17 + $0x290] ss:$8 sps:$4 sm:$0xff]   ;;  %v15023_v33 = vld [vmem:[#allocation15 + $0x280] ss:$8 sps:$4 sm:$0xff]  }
 0x4ca   :  { %9370 = vmatprep.mubr.bf16.mxu1 %v17550_v37  ;;  %9436 = vmatpush1.bf16.msra.mxu1 %v14978_v42  ;;  %v15028_v41 = vld [vmem:[#allocation17 + $0x2a4] ss:$8 sps:$4 sm:$0xff]   ;;  %v15031_v28 = vld [vmem:[#allocation15 + $0x294] ss:$8 sps:$4 sm:$0xff]   ;;  %v15026_v25 = vld [vmem:[#allocation17 + $0x2a0] ss:$8 sps:$4 sm:$0xff]  }
 0x4cb   :  { %9437 = vmatprep.subr.bf16.mxu1 %v14986_v0  ;;  %v7123_v30 = vld [vmem:[#allocation4 + $0x190] sm:$0xff]  ;;  %v7132_v26 = vld [vmem:[#allocation4 + $0x1f8] sm:$0xff] }
 0x4cc   :  { %8150 = vmatpush1.bf16.msra.mxu0 %v14981_v51  ;;  %v15034_v53 = vld [vmem:[#allocation17 + $0x2b4] ss:$8 sps:$4 sm:$0xff]   ;;  %v17569_v54 = vld [vmem:[#allocation4 + $0x210] sm:$0xff]  ;;  %v15032_v48 = vld [vmem:[#allocation17 + $0x2b0] ss:$8 sps:$4 sm:$0xff]  }
 0x4cd   :  { %8151 = vmatprep.subr.bf16.mxu0 %v14989_v10  ;;  %v15037_v4 = vld [vmem:[#allocation15 + $0x2a4] ss:$8 sps:$4 sm:$0xff]   ;;  %v15035_v16 = vld [vmem:[#allocation15 + $0x2a0] ss:$8 sps:$4 sm:$0xff]   ;;  %v15043_v0 = vld [vmem:[#allocation15 + $0x2b4] ss:$8 sps:$4 sm:$0xff]  }
 0x4ce   :  { %9438 = vmatpush1.bf16.msra.mxu1 %v14984_v35  ;;  %v15040_v42 = vld [vmem:[#allocation17 + $0x2c4] ss:$8 sps:$4 sm:$0xff]   ;;  %v15038_v10 = vld [vmem:[#allocation17 + $0x2c0] ss:$8 sps:$4 sm:$0xff]   ;;  %v15046_v35 = vld [vmem:[#allocation17 + $0x2d4] ss:$8 sps:$4 sm:$0xff]  }
 0x4cf   :  { %8077 = vmatmul.mubr.bf16.gmra.mrb[68].mxu0 %v7099_v3  ;;  %9439 = vmatprep.subr.bf16.mxu1 %v14992_v59  ;;  %v7131_v51 = vld [vmem:[#allocation4 + $0x1f0] sm:$0xff]  ;;  %v15041_v59 = vld [vmem:[#allocation15 + $0x2b0] ss:$8 sps:$4 sm:$0xff]  }
 0x4d0   :  { %8086 = vmatprep.mubr.bf16.mxu0 %v7108_v58  ;;  %8152 = vmatpush1.bf16.msra.mxu0 %v14987_v21  ;;  %v15044_v21 = vld [vmem:[#allocation17 + $0x2d0] ss:$8 sps:$4 sm:$0xff]   ;;  %v15047_v3 = vld [vmem:[#allocation15 + $0x2c0] ss:$8 sps:$4 sm:$0xff]  }
 0x4d1   :  { %9371 = vmatmul.mubr.bf16.gmra.mrb[72].mxu1 %v17553_v7  ;;  %8153 = vmatprep.subr.bf16.mxu0 %v14995_v55  ;;  %v15052_v55 = vld [vmem:[#allocation17 + $0x2e4] ss:$8 sps:$4 sm:$0xff]   ;;  %v15050_v58 = vld [vmem:[#allocation17 + $0x2e0] ss:$8 sps:$4 sm:$0xff]  }
 0x4d2   :  { %9380 = vmatprep.mubr.bf16.mxu1 %v17556_v6  ;;  %9440 = vmatpush1.bf16.msra.mxu1 %v14990_v19  ;;  %v15055_v19 = vld [vmem:[#allocation15 + $0x2d4] ss:$8 sps:$4 sm:$0xff]  }
 0x4d3   :  { %9441 = vmatprep.subr.bf16.mxu1 %v14998_v32  ;;  %v15061_v32 = vld [vmem:[#allocation15 + $0x2e4] ss:$8 sps:$4 sm:$0xff]  }
 0x4d4   :  { %8154 = vmatpush1.bf16.msra.mxu0 %v14993_v36  ;;  %v15056_v36 = vld [vmem:[#allocation17 + $0x2f0] ss:$8 sps:$4 sm:$0xff]  }
 0x4d5   :  { %8155 = vmatprep.subr.bf16.mxu0 %v15001_v27  ;;  %v15064_v27 = vld [vmem:[#allocation17 + $0x304] ss:$8 sps:$4 sm:$0xff]  }
 0x4d6   :  { %9442 = vmatpush1.bf16.msra.mxu1 %v14996_v5  ;;  %v15059_v5 = vld [vmem:[#allocation15 + $0x2e0] ss:$8 sps:$4 sm:$0xff]  }
 0x4d7   :  { %8087 = vmatmul.mubr.bf16.gmra.mrb[72].mxu0 %v7107_v56  ;;  %9443 = vmatprep.subr.bf16.mxu1 %v15004_v22  ;;  %v15062_v22 = vld [vmem:[#allocation17 + $0x300] ss:$8 sps:$4 sm:$0xff]  }
 0x4d8   :  { %8096 = vmatprep.mubr.bf16.mxu0 %v7116_v18  ;;  %8156 = vmatpush1.bf16.msra.mxu0 %v14999_v13  ;;  %v15070_v13 = vld [vmem:[#allocation17 + $0x314] ss:$8 sps:$4 sm:$0xff]   ;;  %v8386_v56 = vld [vmem:[#allocation4 + $0xa8] sm:$0xff]  ;;  %v15068_v18 = vld [vmem:[#allocation17 + $0x310] ss:$8 sps:$4 sm:$0xff]  }
 0x4d9   :  { %9381 = vmatmul.mubr.bf16.gmra.mrb[76].mxu1 %v17559_v61  ;;  %8157 = vmatprep.subr.bf16.mxu0 %v15007_v63  ;;  %v15065_v63 = vld [vmem:[#allocation15 + $0x2f0] ss:$8 sps:$4 sm:$0xff]  }
 0x4da   :  { %9390 = vmatprep.mubr.bf16.mxu1 %v17562_v14  ;;  %9444 = vmatpush1.bf16.msra.mxu1 %v15002_v52  ;;  %v15073_v52 = vld [vmem:[#allocation15 + $0x304] ss:$8 sps:$4 sm:$0xff]  }
 0x4db   :  { %9445 = vmatprep.subr.bf16.mxu1 %v15010_v43  ;;  %v15076_v43 = vld [vmem:[#allocation17 + $0x324] ss:$8 sps:$4 sm:$0xff]  }
 0x4dc   :  { %8158 = vmatpush1.bf16.msra.mxu0 %v15005_v29  ;;  %v15071_v29 = vld [vmem:[#allocation15 + $0x300] ss:$8 sps:$4 sm:$0xff]  }
 0x4dd   :  { %8159 = vmatprep.subr.bf16.mxu0 %v15013_v60  ;;  %v7093_v60 = vld [vmem:[#allocation4 + $0x20] sm:$0xff] }
 0x4de   :  { %9446 = vmatpush1.bf16.msra.mxu1 %v15008_v11  ;;  %v15074_v11 = vld [vmem:[#allocation17 + $0x320] ss:$8 sps:$4 sm:$0xff]  }
 0x4df   :  { %8097 = vmatmul.mubr.bf16.gmra.mrb[76].mxu0 %v7115_v45  ;;  %9447 = vmatprep.subr.bf16.mxu1 %v15016_v62  ;;  %v7102_v62 = vld [vmem:[#allocation4 + $0x88] sm:$0xff]  ;;  %v15077_v45 = vld [vmem:[#allocation15 + $0x310] ss:$8 sps:$4 sm:$0xff]  }
 0x4e0   :  { %8106 = vmatprep.mubr.bf16.mxu0 %v7124_v8  ;;  %8160 = vmatpush1.bf16.msra.mxu0 %v15011_v23  ;;  %v15082_v23 = vld [vmem:[#allocation17 + $0x334] ss:$8 sps:$4 sm:$0xff]   ;;  %v15085_v8 = vld [vmem:[#allocation15 + $0x324] ss:$8 sps:$4 sm:$0xff]  }
 0x4e1   :  { %9391 = vmatmul.mubr.bf16.gmra.mrb[80].mxu1 %v17565_v2  ;;  %8161 = vmatprep.subr.bf16.mxu0 %v15019_v17  ;;  %v8385_v17 = vld [vmem:[#allocation4 + $0xa0] sm:$0xff] }
 0x4e2   :  { %9400 = vmatprep.mubr.bf16.mxu1 %v17415_v12  ;;  %9448 = vmatpush1.bf16.msra.mxu1 %v15014_v31  ;;  %v15029_v12 = vld [vmem:[#allocation15 + $0x290] ss:$8 sps:$4 sm:$0xff]   ;;  %v8394_v31 = vld [vmem:[#allocation4 + $0x108] sm:$0xff] }
 0x4e3   :  { %9449 = vmatprep.subr.bf16.mxu1 %v15022_v50  ;;  %v15080_v50 = vld [vmem:[#allocation17 + $0x330] ss:$8 sps:$4 sm:$0xff]  }
 0x4e4   :  { %8162 = vmatpush1.bf16.msra.mxu0 %v15017_v24  ;;  %v15088_v24 = vld [vmem:[#allocation17 + $0x344] ss:$8 sps:$4 sm:$0xff]  }
 0x4e5   :  { %8163 = vmatprep.subr.bf16.mxu0 %v15025_v38  ;;  %v15083_v38 = vld [vmem:[#allocation15 + $0x320] ss:$8 sps:$4 sm:$0xff]  }
 0x4e6   :  { %9450 = vmatpush1.bf16.msra.mxu1 %v15020_v40  ;;  %v15091_v40 = vld [vmem:[#allocation15 + $0x334] ss:$8 sps:$4 sm:$0xff]  }
 0x4e7   :  { %8107 = vmatmul.mubr.bf16.gmra.mrb[80].mxu0 %v7123_v30  ;;  %9451 = vmatprep.subr.bf16.mxu1 %v15028_v41  ;;  %v7101_v41 = vld [vmem:[#allocation4 + $0x80] sm:$0xff] }
 0x4e8   :  { %8116 = vmatprep.mubr.bf16.mxu0 %v7132_v26  ;;  %8164 = vmatpush1.bf16.msra.mxu0 %v15023_v33  ;;  %v15086_v33 = vld [vmem:[#allocation17 + $0x340] ss:$8 sps:$4 sm:$0xff]   ;;  %v15094_v30 = vld [vmem:[#allocation17 + $0x354] ss:$8 sps:$4 sm:$0xff]   ;;  %v15089_v26 = vld [vmem:[#allocation15 + $0x330] ss:$8 sps:$4 sm:$0xff]  }
 0x4e9   :  { %9401 = vmatmul.mubr.bf16.gmra.mrb[84].mxu1 %v17569_v54  ;;  %8165 = vmatprep.subr.bf16.mxu0 %v15031_v28  ;;  %v7110_v28 = vld [vmem:[#allocation4 + $0xe8] sm:$0xff] }
 0x4ea   :  { %9410 = vmatprep.mubr.bf16.mxu1 %v17463_v57  ;;  %9452 = vmatpush1.bf16.msra.mxu1 %v15026_v25  ;;  %v15049_v57 = vld [vmem:[#allocation15 + $0x2c4] ss:$8 sps:$4 sm:$0xff]   ;;  %v8393_v25 = vld [vmem:[#allocation4 + $0x100] sm:$0xff] }
 0x4eb   :  { %9453 = vmatprep.subr.bf16.mxu1 %v15034_v53  ;;  %v8402_v53 = vld [vmem:[#allocation4 + $0x168] sm:$0xff] }
 0x4ec   :  { %8166 = vmatpush1.bf16.msra.mxu0 %v15029_v12  ;;  %v15097_v12 = vld [vmem:[#allocation15 + $0x344] ss:$8 sps:$4 sm:$0xff]  }
 0x4ed   :  { %8167 = vmatprep.subr.bf16.mxu0 %v15037_v4  ;;  %v15092_v4 = vld [vmem:[#allocation17 + $0x350] ss:$8 sps:$4 sm:$0xff]  }
 0x4ee   :  { %9454 = vmatpush1.bf16.msra.mxu1 %v15032_v48  ;;  %v15100_v48 = vld [vmem:[#allocation17 + $0x364] ss:$8 sps:$4 sm:$0xff]  }
 0x4ef   :  { %8117 = vmatmul.mubr.bf16.gmra.mrb[84].mxu0 %v7131_v51  ;;  %9455 = vmatprep.subr.bf16.mxu1 %v15040_v42  ;;  %v15095_v42 = vld [vmem:[#allocation15 + $0x340] ss:$8 sps:$4 sm:$0xff]  }
 0x4f0   :  { %8126 = vmatprep.mubr.bf16.mxu0 %v17500_v34  ;;  %8168 = vmatpush1.bf16.msra.mxu0 %v15035_v16  ;;  %v15058_v34 = vld [vmem:[#allocation17 + $0x2f4] ss:$8 sps:$4 sm:$0xff]   ;;  %v15098_v51 = vld [vmem:[#allocation17 + $0x360] ss:$8 sps:$4 sm:$0xff]  }
 0x4f1   :  { %9411 = vmatmul.mubr.bf16.gmra.mrb[88].mxu1 %v17459_v46  ;;  %8169 = vmatprep.subr.bf16.mxu0 %v15043_v0  ;;  %v15053_v46 = vld [vmem:[#allocation15 + $0x2d0] ss:$8 sps:$4 sm:$0xff]   ;;  %v15103_v16 = vld [vmem:[#allocation15 + $0x354] ss:$8 sps:$4 sm:$0xff]  }
 0x4f2   :  { %9420 = vmatprep.mubr.bf16.mxu1 %v17520_v15  ;;  %9456 = vmatpush1.bf16.msra.mxu1 %v15038_v10  ;;  %v8378_v15 = vld [vmem:[#allocation4 + $0x48] sm:$0xff]  ;;  %v7109_v0 = vld [vmem:[#allocation4 + $0xe0] sm:$0xff] }
 0x4f3   :  { %9457 = vmatprep.subr.bf16.mxu1 %v15046_v35  ;;  %v7118_v10 = vld [vmem:[#allocation4 + $0x148] sm:$0xff]  ;;  %v15106_v35 = vld [vmem:[#allocation17 + $0x374] ss:$8 sps:$4 sm:$0xff]  }
 0x4f4   :  { %8170 = vmatpush1.bf16.msra.mxu0 %v15041_v59  ;;  %v8401_v59 = vld [vmem:[#allocation4 + $0x160] sm:$0xff] }
 0x4f5   :  { %8171 = vmatprep.subr.bf16.mxu0 %v15049_v57  ;;  %v15101_v57 = vld [vmem:[#allocation15 + $0x350] ss:$8 sps:$4 sm:$0xff]  }
 0x4f6   :  { %9458 = vmatpush1.bf16.msra.mxu1 %v15044_v21  ;;  %v8410_v21 = vld [vmem:[#allocation4 + $0x1c8] sm:$0xff] }
 0x4f7   :  { %8127 = vmatmul.mubr.bf16.gmra.mrb[88].mxu0 %v17487_v47  ;;  %9459 = vmatprep.subr.bf16.mxu1 %v15052_v55  ;;  %v15067_v47 = vld [vmem:[#allocation15 + $0x2f4] ss:$8 sps:$4 sm:$0xff]   ;;  %v15109_v55 = vld [vmem:[#allocation15 + $0x364] ss:$8 sps:$4 sm:$0xff]  }
 0x4f8   :  { %8136 = vmatprep.mubr.bf16.mxu0 %v17542_v49  ;;  %8172 = vmatpush1.bf16.msra.mxu0 %v15047_v3  ;;  %v7094_v49 = vld [vmem:[#allocation4 + $0x28] sm:$0xff]  ;;  %v15104_v3 = vld [vmem:[#allocation17 + $0x370] ss:$8 sps:$4 sm:$0xff]  }
 0x4f9   :  { %9421 = vmatmul.mubr.bf16.gmra.mrb[92].mxu1 %v17513_v44  ;;  %8173 = vmatprep.subr.bf16.mxu0 %v15055_v19  ;;  %v8377_v44 = vld [vmem:[#allocation4 + $0x40] sm:$0xff]  ;;  %v15112_v19 = vld [vmem:[#allocation17 + $0x384] ss:$8 sps:$4 sm:$0xff]  }
 0x4fa   :  { %9460 = vmatpush1.bf16.msra.mxu1 %v15050_v58  ;;  %9463 = vmatprep.mubr.bf16.mxu1 %v8378_v15  ;;  %v15107_v58 = vld [vmem:[#allocation15 + $0x360] ss:$8 sps:$4 sm:$0xff]  }
 0x4fb   :  { %9461 = vmatprep.subr.bf16.mxu1 %v15058_v34  ;;  %v15115_v34 = vld [vmem:[#allocation15 + $0x374] ss:$8 sps:$4 sm:$0xff]   ;;  %v15110_v15 = vld [vmem:[#allocation17 + $0x380] ss:$8 sps:$4 sm:$0xff]  }
 0x4fc   :  { %8174 = vmatpush1.bf16.msra.mxu0 %v15053_v46  ;;  %v7117_v46 = vld [vmem:[#allocation4 + $0x140] sm:$0xff] }
 0x4fd   :  { %8175 = vmatprep.subr.bf16.mxu0 %v15061_v32  ;;  %v7126_v32 = vld [vmem:[#allocation4 + $0x1a8] sm:$0xff] }
 0x4fe   :  { %9462 = vmatpush1.bf16.msra.mxu1 %v15056_v36  ;;  %v15118_v36 = vld [vmem:[#allocation17 + $0x394] ss:$8 sps:$4 sm:$0xff]  }
 0x4ff   :  { %8137 = vmatmul.mubr.bf16.gmra.mrb[92].mxu0 %v17531_v39  ;;  %9544 = vmatprep.subr.bf16.mxu1 %v15064_v27  ;;  %v15079_v39 = vld [vmem:[#allocation15 + $0x314] ss:$8 sps:$4 sm:$0xff]  }
 0x500   :  { %8176 = vmatpush1.bf16.msra.mxu0 %v15059_v5  ;;  %8179 = vmatprep.mubr.bf16.mxu0 %v7094_v49  ;;  %v8409_v27 = vld [vmem:[#allocation4 + $0x1c0] sm:$0xff] }
 0x501   :  { %9464 = vmatmul.mubr.bf16.vlgmr.msra.gmra.mrb[64].mxu1 %v8377_v44  ;;  %8177 = vmatprep.subr.bf16.mxu0 %v15067_v47  ;;  %v15113_v5 = vld [vmem:[#allocation15 + $0x370] ss:$8 sps:$4 sm:$0xff]   ;;  %v8418_v47 = vld [vmem:[#allocation4 + $0x228] sm:$0xff] }
 0x502   :  { %9473 = vmatprep.mubr.bf16.mxu1 %v8386_v56  ;;  %9545 = vmatpush1.bf16.msra.mxu1 %v15062_v22  ;;  %v15121_v22 = vld [vmem:[#allocation15 + $0x384] ss:$8 sps:$4 sm:$0xff]   ;;  %v15116_v49 = vld [vmem:[#allocation17 + $0x390] ss:$8 sps:$4 sm:$0xff]   ;;  %v15119_v44 = vld [vmem:[#allocation15 + $0x380] ss:$8 sps:$4 sm:$0xff]  }
 0x503   :  { %9546 = vmatprep.subr.bf16.mxu1 %v15070_v13  ;;  %v15124_v13 = vld [vmem:[#allocation17 + $0x3a4] ss:$8 sps:$4 sm:$0xff]   ;;  %v7125_v56 = vld [vmem:[#allocation4 + $0x1a0] sm:$0xff] }
 0x504   :  { %8178 = vmatpush1.bf16.msra.mxu0 %v15065_v63  ;;  %v15127_v63 = vld [vmem:[#allocation15 + $0x394] ss:$8 sps:$4 sm:$0xff]  }
 0x505   :  { %8260 = vmatprep.subr.bf16.mxu0 %v15073_v52  ;;  %v15122_v52 = vld [vmem:[#allocation17 + $0x3a0] ss:$8 sps:$4 sm:$0xff]  }
 0x506   :  { %9547 = vmatpush1.bf16.msra.mxu1 %v15068_v18  ;;  %v7134_v18 = vld [vmem:[#allocation4 + $0x208] sm:$0xff] }
 0x507   :  { %8180 = vmatmul.mubr.bf16.vlgmr.msra.gmra.mrb[64].mxu0 %v7093_v60  ;;  %9548 = vmatprep.subr.bf16.mxu1 %v15076_v43  ;;  %v15130_v43 = vld [vmem:[#allocation17 + $0x3b4] ss:$8 sps:$4 sm:$0xff]   ;;  %v8426_v60 = vld [vmem:[#allocation4 + $0x288] sm:$0xff] }
 0x508   :  { %8189 = vmatprep.mubr.bf16.mxu0 %v7102_v62  ;;  %8261 = vmatpush1.bf16.msra.mxu0 %v15071_v29  ;;  %v8417_v29 = vld [vmem:[#allocation4 + $0x220] sm:$0xff] }
 0x509   :  { %9474 = vmatmul.mubr.bf16.gmra.mrb[68].mxu1 %v8385_v17  ;;  %8262 = vmatprep.subr.bf16.mxu0 %v15079_v39  ;;  %v15125_v39 = vld [vmem:[#allocation15 + $0x390] ss:$8 sps:$4 sm:$0xff]   ;;  %v15131_v17 = vld [vmem:[#allocation15 + $0x3a0] ss:$8 sps:$4 sm:$0xff]  }
 0x50a   :  { %9483 = vmatprep.mubr.bf16.mxu1 %v8394_v31  ;;  %9549 = vmatpush1.bf16.msra.mxu1 %v15074_v11  ;;  %v15133_v11 = vld [vmem:[#allocation15 + $0x3a4] ss:$8 sps:$4 sm:$0xff]   ;;  %v15128_v62 = vld [vmem:[#allocation17 + $0x3b0] ss:$8 sps:$4 sm:$0xff]  }
 0x50b   :  { %9550 = vmatprep.subr.bf16.mxu1 %v15082_v23  ;;  %v15136_v23 = vld [vmem:[#allocation17 + $0x3c4] ss:$8 sps:$4 sm:$0xff]   ;;  %v7133_v31 = vld [vmem:[#allocation4 + $0x200] sm:$0xff] }
 0x50c   :  { %8263 = vmatpush1.bf16.msra.mxu0 %v15077_v45  ;;  %v15139_v45 = vld [vmem:[#allocation15 + $0x3b4] ss:$8 sps:$4 sm:$0xff]  }
 0x50d   :  { %8264 = vmatprep.subr.bf16.mxu0 %v15085_v8  ;;  %v15134_v8 = vld [vmem:[#allocation17 + $0x3c0] ss:$8 sps:$4 sm:$0xff]  }
 0x50e   :  { %9551 = vmatpush1.bf16.msra.mxu1 %v15080_v50  ;;  %v7142_v50 = vld [vmem:[#allocation4 + $0x268] sm:$0xff] }
 0x50f   :  { %8190 = vmatmul.mubr.bf16.gmra.mrb[68].mxu0 %v7101_v41  ;;  %9552 = vmatprep.subr.bf16.mxu1 %v15088_v24  ;;  %v15142_v24 = vld [vmem:[#allocation17 + $0x3d4] ss:$8 sps:$4 sm:$0xff]   ;;  %v8434_v41 = vld [vmem:[#allocation4 + $0x2e8] sm:$0xff] }
 0x510   :  { %8199 = vmatprep.mubr.bf16.mxu0 %v7110_v28  ;;  %8265 = vmatpush1.bf16.msra.mxu0 %v15083_v38  ;;  %v8425_v38 = vld [vmem:[#allocation4 + $0x280] sm:$0xff] }
 0x511   :  { %9484 = vmatmul.mubr.bf16.gmra.mrb[72].mxu1 %v8393_v25  ;;  %8266 = vmatprep.subr.bf16.mxu0 %v15091_v40  ;;  %v15137_v40 = vld [vmem:[#allocation15 + $0x3b0] ss:$8 sps:$4 sm:$0xff]   ;;  %v15143_v25 = vld [vmem:[#allocation15 + $0x3c0] ss:$8 sps:$4 sm:$0xff]  }
 0x512   :  { %9493 = vmatprep.mubr.bf16.mxu1 %v8402_v53  ;;  %9553 = vmatpush1.bf16.msra.mxu1 %v15086_v33  ;;  %v15145_v33 = vld [vmem:[#allocation15 + $0x3c4] ss:$8 sps:$4 sm:$0xff]   ;;  %v15140_v28 = vld [vmem:[#allocation17 + $0x3d0] ss:$8 sps:$4 sm:$0xff]  }
 0x513   :  { %9554 = vmatprep.subr.bf16.mxu1 %v15094_v30  ;;  %v15148_v30 = vld [vmem:[#allocation17 + $0x3e4] ss:$8 sps:$4 sm:$0xff]   ;;  %v7141_v53 = vld [vmem:[#allocation4 + $0x260] sm:$0xff] }
 0x514   :  { %8267 = vmatpush1.bf16.msra.mxu0 %v15089_v26  ;;  %v15151_v26 = vld [vmem:[#allocation15 + $0x3d4] ss:$8 sps:$4 sm:$0xff]  }
 0x515   :  { %8268 = vmatprep.subr.bf16.mxu0 %v15097_v12  ;;  %v15146_v12 = vld [vmem:[#allocation17 + $0x3e0] ss:$8 sps:$4 sm:$0xff]  }
 0x516   :  { %9555 = vmatpush1.bf16.msra.mxu1 %v15092_v4  ;;  %v7150_v4 = vld [vmem:[#allocation4 + $0x2c8] sm:$0xff] }
 0x517   :  { %8200 = vmatmul.mubr.bf16.gmra.mrb[72].mxu0 %v7109_v0  ;;  %9556 = vmatprep.subr.bf16.mxu1 %v15100_v48  ;;  %v15154_v48 = vld [vmem:[#allocation17 + $0x3f4] ss:$8 sps:$4 sm:$0xff]  }
 0x518   :  { %8209 = vmatprep.mubr.bf16.mxu0 %v7118_v10  ;;  %8269 = vmatpush1.bf16.msra.mxu0 %v15095_v42  ;;  %v8433_v42 = vld [vmem:[#allocation4 + $0x2e0] sm:$0xff]  ;;  %v8380_v0 = vld [vmem:[#allocation4 + $0x58] sm:$0xff] }
 0x519   :  { %9494 = vmatmul.mubr.bf16.gmra.mrb[76].mxu1 %v8401_v59  ;;  %8270 = vmatprep.subr.bf16.mxu0 %v15103_v16  ;;  %v15149_v16 = vld [vmem:[#allocation15 + $0x3d0] ss:$8 sps:$4 sm:$0xff]   ;;  %v15155_v59 = vld [vmem:[#allocation15 + $0x3e0] ss:$8 sps:$4 sm:$0xff]  }
 0x51a   :  { %9503 = vmatprep.mubr.bf16.mxu1 %v8410_v21  ;;  %9557 = vmatpush1.bf16.msra.mxu1 %v15098_v51  ;;  %v15157_v51 = vld [vmem:[#allocation15 + $0x3e4] ss:$8 sps:$4 sm:$0xff]   ;;  %v15152_v10 = vld [vmem:[#allocation17 + $0x3f0] ss:$8 sps:$4 sm:$0xff]  }
 0x51b   :  { %9558 = vmatprep.subr.bf16.mxu1 %v15106_v35  ;;  %v15166_v35 = vld [vmem:[#allocation20 + $0xc] ss:$16 sps:$4 sm:$0xff]  }
 0x51c   :  { %8271 = vmatpush1.bf16.msra.mxu0 %v15101_v57  ;;  %v15160_v57 = vld [vmem:[#allocation15 + $0x3f4] ss:$8 sps:$4 sm:$0xff]  }
 0x51d   :  { %8272 = vmatprep.subr.bf16.mxu0 %v15109_v55  ;;  %v7149_v21 = vld [vmem:[#allocation4 + $0x2c0] sm:$0xff] }
 0x51e   :  { %9559 = vmatpush1.bf16.msra.mxu1 %v15104_v3  ;;  %v15164_v55 = vld [vmem:[#allocation20 + $0x8] ss:$16 sps:$4 sm:$0xff]   ;;  %v7096_v3 = vld [vmem:[#allocation4 + $0x38] sm:$0xff] }
 0x51f   :  { %8210 = vmatmul.mubr.bf16.gmra.mrb[76].mxu0 %v7117_v46  ;;  %9560 = vmatprep.subr.bf16.mxu1 %v15112_v19  ;;  %v15172_v19 = vld [vmem:[#allocation20 + $0x2c] ss:$16 sps:$4 sm:$0xff]  }
 0x520   :  { %8219 = vmatprep.mubr.bf16.mxu0 %v7126_v32  ;;  %8273 = vmatpush1.bf16.msra.mxu0 %v15107_v58  ;;  %v8379_v58 = vld [vmem:[#allocation4 + $0x50] sm:$0xff]  ;;  %v8388_v46 = vld [vmem:[#allocation4 + $0xb8] sm:$0xff] }
 0x521   :  { %9504 = vmatmul.mubr.bf16.gmra.mrb[80].mxu1 %v8409_v27  ;;  %8274 = vmatprep.subr.bf16.mxu0 %v15115_v34  ;;  %v15158_v34 = vld [vmem:[#allocation15 + $0x3f0] ss:$8 sps:$4 sm:$0xff]  }
 0x522   :  { %9513 = vmatprep.mubr.bf16.mxu1 %v8418_v47  ;;  %9561 = vmatpush1.bf16.msra.mxu1 %v15110_v15  ;;  %v15163_v15 = vld [vmem:[#allocation20 + $0x4] ss:$16 sps:$4 sm:$0xff]   ;;  %v15170_v32 = vld [vmem:[#allocation20 + $0x28] ss:$16 sps:$4 sm:$0xff]   ;;  %v15161_v27 = vld [vmem:[#allocation20] ss:$16 sps:$4 sm:$0xff]  }
 0x523   :  { %9562 = vmatprep.subr.bf16.mxu1 %v15118_v36  ;;  %v15178_v36 = vld [vmem:[#allocation20 + $0x4c] ss:$16 sps:$4 sm:$0xff]  }
 0x524   :  { %8275 = vmatpush1.bf16.msra.mxu0 %v15113_v5  ;;  %v15169_v5 = vld [vmem:[#allocation20 + $0x24] ss:$16 sps:$4 sm:$0xff]  }
 0x525   :  { %8276 = vmatprep.subr.bf16.mxu0 %v15121_v22  ;;  %v7095_v47 = vld [vmem:[#allocation4 + $0x30] sm:$0xff] }
 0x526   :  { %9563 = vmatpush1.bf16.msra.mxu1 %v15116_v49  ;;  %v15176_v22 = vld [vmem:[#allocation20 + $0x48] ss:$16 sps:$4 sm:$0xff]   ;;  %v7104_v49 = vld [vmem:[#allocation4 + $0x98] sm:$0xff] }
 0x527   :  { %8220 = vmatmul.mubr.bf16.gmra.mrb[80].mxu0 %v7125_v56  ;;  %9564 = vmatprep.subr.bf16.mxu1 %v15124_v13  ;;  %v15184_v13 = vld [vmem:[#allocation20 + $0x6c] ss:$16 sps:$4 sm:$0xff]  }
 0x528   :  { %8229 = vmatprep.mubr.bf16.mxu0 %v7134_v18  ;;  %8277 = vmatpush1.bf16.msra.mxu0 %v15119_v44  ;;  %v8387_v44 = vld [vmem:[#allocation4 + $0xb0] sm:$0xff]  ;;  %v8396_v56 = vld [vmem:[#allocation4 + $0x118] sm:$0xff] }
 0x529   :  { %9514 = vmatmul.mubr.bf16.gmra.mrb[84].mxu1 %v8417_v29  ;;  %8278 = vmatprep.subr.bf16.mxu0 %v15127_v63  ;;  %v15167_v63 = vld [vmem:[#allocation20 + $0x20] ss:$16 sps:$4 sm:$0xff]   ;;  %v15182_v18 = vld [vmem:[#allocation20 + $0x68] ss:$16 sps:$4 sm:$0xff]  }
 0x52a   :  { %9523 = vmatprep.mubr.bf16.mxu1 %v8426_v60  ;;  %9565 = vmatpush1.bf16.msra.mxu1 %v15122_v52  ;;  %v15175_v52 = vld [vmem:[#allocation20 + $0x44] ss:$16 sps:$4 sm:$0xff]   ;;  %v15173_v29 = vld [vmem:[#allocation20 + $0x40] ss:$16 sps:$4 sm:$0xff]   ;;  %v15188_v60 = vld [vmem:[#allocation20 + $0x88] ss:$16 sps:$4 sm:$0xff]  }
 0x52b   :  { %9566 = vmatprep.subr.bf16.mxu1 %v15130_v43  ;;  %v15190_v43 = vld [vmem:[#allocation20 + $0x8c] ss:$16 sps:$4 sm:$0xff]  }
 0x52c   :  { %8279 = vmatpush1.bf16.msra.mxu0 %v15125_v39  ;;  %v15181_v39 = vld [vmem:[#allocation20 + $0x64] ss:$16 sps:$4 sm:$0xff]  }
 0x52d   :  { %8280 = vmatprep.subr.bf16.mxu0 %v15133_v11  ;;  %v15196_v11 = vld [vmem:[#allocation20 + $0xac] ss:$16 sps:$4 sm:$0xff]  }
 0x52e   :  { %9567 = vmatpush1.bf16.msra.mxu1 %v15128_v62  ;;  %v8395_v62 = vld [vmem:[#allocation4 + $0x110] sm:$0xff] }
 0x52f   :  { %8230 = vmatmul.mubr.bf16.gmra.mrb[84].mxu0 %v7133_v31  ;;  %9568 = vmatprep.subr.bf16.mxu1 %v15136_v23  ;;  %v15179_v23 = vld [vmem:[#allocation20 + $0x60] ss:$16 sps:$4 sm:$0xff]   ;;  %v15194_v31 = vld [vmem:[#allocation20 + $0xa8] ss:$16 sps:$4 sm:$0xff]  }
 0x530   :  { %8239 = vmatprep.mubr.bf16.mxu0 %v7142_v50  ;;  %8281 = vmatpush1.bf16.msra.mxu0 %v15131_v17  ;;  %v8404_v17 = vld [vmem:[#allocation4 + $0x178] sm:$0xff] }
 0x531   :  { %9524 = vmatmul.mubr.bf16.gmra.mrb[88].mxu1 %v8425_v38  ;;  %8282 = vmatprep.subr.bf16.mxu0 %v15139_v45  ;;  %v15187_v45 = vld [vmem:[#allocation20 + $0x84] ss:$16 sps:$4 sm:$0xff]  }
 0x532   :  { %9533 = vmatprep.mubr.bf16.mxu1 %v8434_v41  ;;  %9569 = vmatpush1.bf16.msra.mxu1 %v15134_v8  ;;  %v15185_v8 = vld [vmem:[#allocation20 + $0x80] ss:$16 sps:$4 sm:$0xff]   ;;  %v15193_v50 = vld [vmem:[#allocation20 + $0xa4] ss:$16 sps:$4 sm:$0xff]  }
 0x533   :  { %9570 = vmatprep.subr.bf16.mxu1 %v15142_v24  ;;  %v8412_v24 = vld [vmem:[#allocation4 + $0x1d8] sm:$0xff]  ;;  %v8411_v38 = vld [vmem:[#allocation4 + $0x1d0] sm:$0xff] }
 0x534   :  { %8283 = vmatpush1.bf16.msra.mxu0 %v15137_v40  ;;  %v8420_v40 = vld [vmem:[#allocation4 + $0x238] sm:$0xff] }
 0x535   :  { %8284 = vmatprep.subr.bf16.mxu0 %v15145_v33  ;;  %v8428_v41 = vld [vmem:[#allocation4 + $0x298] sm:$0xff] }
 0x536   :  { %9571 = vmatpush1.bf16.msra.mxu1 %v15140_v28  ;;  %v7144_v33 = vld [vmem:[#allocation4 + $0x278] sm:$0xff]  ;;  %v8427_v28 = vld [vmem:[#allocation4 + $0x290] sm:$0xff] }
 0x537   :  { %8240 = vmatmul.mubr.bf16.gmra.mrb[88].mxu0 %v7141_v53  ;;  %9572 = vmatprep.subr.bf16.mxu1 %v15148_v30  ;;  %v7152_v30 = vld [vmem:[#allocation4 + $0x2d8] sm:$0xff] }
 0x538   :  { %8249 = vmatprep.mubr.bf16.mxu0 %v7150_v4  ;;  %8285 = vmatpush1.bf16.msra.mxu0 %v15143_v25  ;;  %v8435_v25 = vld [vmem:[#allocation4 + $0x2f0] sm:$0xff] }
 0x539   :  { %9534 = vmatmul.mubr.bf16.gmra.mrb[92].mxu1 %v8433_v42  ;;  %8286 = vmatprep.subr.bf16.mxu0 %v15151_v26  ;;  %v15199_v26 = vld [vmem:[#allocation20 + $0xc4] ss:$16 sps:$4 sm:$0xff]   ;;  %v15202_v53 = vld [vmem:[#allocation20 + $0xcc] ss:$16 sps:$4 sm:$0xff]   ;;  %v15200_v4 = vld [vmem:[#allocation20 + $0xc8] ss:$16 sps:$4 sm:$0xff]  }
 0x53a   :  { %9573 = vmatpush1.bf16.msra.mxu1 %v15146_v12  ;;  %9576 = vmatprep.mubr.bf16.mxu1 %v8380_v0  ;;  %v15197_v12 = vld [vmem:[#allocation20 + $0xc0] ss:$16 sps:$4 sm:$0xff]   ;;  %v15211_v0 = vld [vmem:[#allocation20 + $0x104] ss:$16 sps:$4 sm:$0xff]  }
 0x53b   :  { %9574 = vmatprep.subr.bf16.mxu1 %v15154_v48  ;;  %v15208_v48 = vld [vmem:[#allocation20 + $0xec] ss:$16 sps:$4 sm:$0xff]   ;;  %v15203_v42 = vld [vmem:[#allocation20 + $0xe0] ss:$16 sps:$4 sm:$0xff]  }
 0x53c   :  { %8287 = vmatpush1.bf16.msra.mxu0 %v15149_v16  ;;  %v15206_v16 = vld [vmem:[#allocation20 + $0xe8] ss:$16 sps:$4 sm:$0xff]  }
 0x53d   :  { %8288 = vmatprep.subr.bf16.mxu0 %v15157_v51  ;;  %v15214_v51 = vld [vmem:[#allocation20 + $0x10c] ss:$16 sps:$4 sm:$0xff]  }
 0x53e   :  { %9575 = vmatpush1.bf16.msra.mxu1 %v15152_v10  ;;  %v15209_v10 = vld [vmem:[#allocation20 + $0x100] ss:$16 sps:$4 sm:$0xff]  }
 0x53f   :  { %8250 = vmatmul.mubr.bf16.gmra.mrb[92].mxu0 %v7149_v21  ;;  %10789 = vmatprep.subr.bf16.mxu1 %v15166_v35  ;;  %v15212_v35 = vld [vmem:[#allocation20 + $0x108] ss:$16 sps:$4 sm:$0xff]   ;;  %v15215_v21 = vld [vmem:[#allocation20 + $0x120] ss:$16 sps:$4 sm:$0xff]  }
 0x540   :  { %8289 = vmatpush1.bf16.msra.mxu0 %v15155_v59  ;;  %8292 = vmatprep.mubr.bf16.mxu0 %v7096_v3  ;;  %v15217_v59 = vld [vmem:[#allocation20 + $0x124] ss:$16 sps:$4 sm:$0xff]  }
 0x541   :  { %9577 = vmatmul.mubr.bf16.vlgmr.msra.gmra.mrb[64].mxu1 %v8379_v58  ;;  %8290 = vmatprep.subr.bf16.mxu0 %v15160_v57  ;;  %v15220_v57 = vld [vmem:[#allocation20 + $0x12c] ss:$16 sps:$4 sm:$0xff]   ;;  %v15223_v3 = vld [vmem:[#allocation20 + $0x144] ss:$16 sps:$4 sm:$0xff]   ;;  %v15221_v58 = vld [vmem:[#allocation20 + $0x140] ss:$16 sps:$4 sm:$0xff]  }
 0x542   :  { %9586 = vmatprep.mubr.bf16.mxu1 %v8388_v46  ;;  %10790 = vmatpush1.bf16.msra.mxu1 %v15164_v55  ;;  %v15218_v55 = vld [vmem:[#allocation20 + $0x128] ss:$16 sps:$4 sm:$0xff]   ;;  %v15229_v46 = vld [vmem:[#allocation20 + $0x164] ss:$16 sps:$4 sm:$0xff]  }
 0x543   :  { %10791 = vmatprep.subr.bf16.mxu1 %v15172_v19  ;;  %v15226_v19 = vld [vmem:[#allocation20 + $0x14c] ss:$16 sps:$4 sm:$0xff]  }
 0x544   :  { %8291 = vmatpush1.bf16.msra.mxu0 %v15158_v34  ;;  %v15224_v34 = vld [vmem:[#allocation20 + $0x148] ss:$16 sps:$4 sm:$0xff]  }
 0x545   :  { %10596 = vmatprep.subr.bf16.mxu0 %v15163_v15  ;;  %v15232_v15 = vld [vmem:[#allocation20 + $0x16c] ss:$16 sps:$4 sm:$0xff]  }
 0x546   :  { %10792 = vmatpush1.bf16.msra.mxu1 %v15170_v32  ;;  %v15227_v32 = vld [vmem:[#allocation20 + $0x160] ss:$16 sps:$4 sm:$0xff]  }
 0x547   :  { %8293 = vmatmul.mubr.bf16.vlgmr.msra.gmra.mrb[64].mxu0 %v7095_v47  ;;  %10793 = vmatprep.subr.bf16.mxu1 %v15178_v36  ;;  %v15230_v36 = vld [vmem:[#allocation20 + $0x168] ss:$16 sps:$4 sm:$0xff]   ;;  %v15233_v47 = vld [vmem:[#allocation20 + $0x180] ss:$16 sps:$4 sm:$0xff]  }
 0x548   :  { %8302 = vmatprep.mubr.bf16.mxu0 %v7104_v49  ;;  %10597 = vmatpush1.bf16.msra.mxu0 %v15161_v27  ;;  %v15235_v27 = vld [vmem:[#allocation20 + $0x184] ss:$16 sps:$4 sm:$0xff]  }
 0x549   :  { %9587 = vmatmul.mubr.bf16.gmra.mrb[68].mxu1 %v8387_v44  ;;  %10598 = vmatprep.subr.bf16.mxu0 %v15169_v5  ;;  %v15238_v5 = vld [vmem:[#allocation20 + $0x18c] ss:$16 sps:$4 sm:$0xff]   ;;  %v15241_v49 = vld [vmem:[#allocation20 + $0x1a4] ss:$16 sps:$4 sm:$0xff]   ;;  %v15239_v44 = vld [vmem:[#allocation20 + $0x1a0] ss:$16 sps:$4 sm:$0xff]  }
 0x54a   :  { %9596 = vmatprep.mubr.bf16.mxu1 %v8396_v56  ;;  %10794 = vmatpush1.bf16.msra.mxu1 %v15176_v22  ;;  %v15236_v22 = vld [vmem:[#allocation20 + $0x188] ss:$16 sps:$4 sm:$0xff]   ;;  %v15247_v56 = vld [vmem:[#allocation20 + $0x1c4] ss:$16 sps:$4 sm:$0xff]  }
 0x54b   :  { %10795 = vmatprep.subr.bf16.mxu1 %v15184_v13  ;;  %v15244_v13 = vld [vmem:[#allocation20 + $0x1ac] ss:$16 sps:$4 sm:$0xff]  }
 0x54c   :  { %10599 = vmatpush1.bf16.msra.mxu0 %v15167_v63  ;;  %v15242_v63 = vld [vmem:[#allocation20 + $0x1a8] ss:$16 sps:$4 sm:$0xff]  }
 0x54d   :  { %10600 = vmatprep.subr.bf16.mxu0 %v15175_v52  ;;  %v15250_v52 = vld [vmem:[#allocation20 + $0x1cc] ss:$16 sps:$4 sm:$0xff]  }
 0x54e   :  { %10796 = vmatpush1.bf16.msra.mxu1 %v15182_v18  ;;  %v15245_v18 = vld [vmem:[#allocation20 + $0x1c0] ss:$16 sps:$4 sm:$0xff]  }
 0x54f   :  { %8303 = vmatmul.mubr.bf16.gmra.mrb[68].mxu0 %v17547_v20  ;;  %10797 = vmatprep.subr.bf16.mxu1 %v15190_v43  ;;  %v8403_v20 = vld [vmem:[#allocation4 + $0x170] sm:$0xff] }
 0x550   :  { %8312 = vmatprep.mubr.bf16.mxu0 %v17550_v37  ;;  %10601 = vmatpush1.bf16.msra.mxu0 %v15173_v29  ;;  %v15191_v37 = vld [vmem:[#allocation20 + $0xa0] ss:$16 sps:$4 sm:$0xff]   ;;  %v15248_v43 = vld [vmem:[#allocation20 + $0x1c8] ss:$16 sps:$4 sm:$0xff]   ;;  %v15253_v29 = vld [vmem:[#allocation20 + $0x1e4] ss:$16 sps:$4 sm:$0xff]  }
 0x551   :  { %9597 = vmatmul.mubr.bf16.gmra.mrb[72].mxu1 %v8395_v62  ;;  %10602 = vmatprep.subr.bf16.mxu0 %v15181_v39  ;;  %v15256_v39 = vld [vmem:[#allocation20 + $0x1ec] ss:$16 sps:$4 sm:$0xff]  }
 0x552   :  { %9606 = vmatprep.mubr.bf16.mxu1 %v8404_v17  ;;  %10798 = vmatpush1.bf16.msra.mxu1 %v15188_v60  ;;  %v15251_v60 = vld [vmem:[#allocation20 + $0x1e0] ss:$16 sps:$4 sm:$0xff]   ;;  %v7088_v62 = vld [vmem:[#allocation18] sm:$0x3] }
 0x553   :  { %10799 = vmatprep.subr.bf16.mxu1 %v15196_v11  ;;  %v15254_v11 = vld [vmem:[#allocation20 + $0x1e8] ss:$16 sps:$4 sm:$0xff]   ;;  %v17592_v17 = vrot.slane %v7088_v62, %v18381_v9 }
 0x554   :  { %10603 = vmatpush1.bf16.msra.mxu0 %v15179_v23  ;;  %v17589_v23 = vrot.slane %v7088_v62, %v18378_v1 }
 0x555   :  { %10604 = vmatprep.subr.bf16.mxu0 %v15187_v45 }
 0x556   :  { %10800 = vmatpush1.bf16.msra.mxu1 %v15194_v31 }
 0x557   :  { %8313 = vmatmul.mubr.bf16.gmra.mrb[72].mxu0 %v17553_v7  ;;  %v7136_v7 = vld [vmem:[#allocation4 + $0x218] sm:$0xff]  ;;  %10801 = vmatprep.subr.bf16.mxu1 %v15202_v53 }
 0x558   :  { %8322 = vmatprep.mubr.bf16.mxu0 %v17556_v6  ;;  %10605 = vmatpush1.bf16.msra.mxu0 %v15185_v8  ;;  %v8419_v6 = vld [vmem:[#allocation4 + $0x230] sm:$0xff] }
 0x559   :  { %9607 = vmatmul.mubr.bf16.gmra.mrb[76].mxu1 %v8403_v20  ;;  %10606 = vmatprep.subr.bf16.mxu0 %v15193_v50 }
 0x55a   :  { %9616 = vmatprep.mubr.bf16.mxu1 %v8412_v24  ;;  %10802 = vmatpush1.bf16.msra.mxu1 %v15200_v4 }
 0x55b   :  { %10803 = vmatprep.subr.bf16.mxu1 %v15208_v48 }
 0x55c   :  { %10607 = vmatpush1.bf16.msra.mxu0 %v15191_v37 }
 0x55d   :  { %10608 = vmatprep.subr.bf16.mxu0 %v15199_v26 }
 0x55e   :  { %10804 = vmatpush1.bf16.msra.mxu1 %v15206_v16 }
 0x55f   :  { %8323 = vmatmul.mubr.bf16.gmra.mrb[76].mxu0 %v17559_v61  ;;  %v8436_v61 = vld [vmem:[#allocation4 + $0x2f8] sm:$0xff]  ;;  %10805 = vmatprep.subr.bf16.mxu1 %v15214_v51 }
 0x560   :  { %8332 = vmatprep.mubr.bf16.mxu0 %v17562_v14  ;;  %v7143_v14 = vld [vmem:[#allocation4 + $0x270] sm:$0xff]  ;;  %10609 = vmatpush1.bf16.msra.mxu0 %v15197_v12 }
 0x561   :  { %9617 = vmatmul.mubr.bf16.gmra.mrb[80].mxu1 %v8411_v38 }
 0x562   :  { %9626 = vmatprep.mubr.bf16.mxu1 %v8420_v40  ;;  %10806 = vmatpush1.bf16.msra.mxu1 %v15212_v35 }
 0x563   :  { %10807 = vmatprep.subr.bf16.mxu1 %v15220_v57 }
 0x566   :  { %10808 = vmatpush1.bf16.msra.mxu1 %v15218_v55 }
 0x567   :  { %8333 = vmatmul.mubr.bf16.gmra.mrb[80].mxu0 %v17565_v2  ;;  %v7151_v2 = vld [vmem:[#allocation4 + $0x2d0] sm:$0xff]  ;;  %10809 = vmatprep.subr.bf16.mxu1 %v15226_v19 }
 0x568   :  { %8342 = vmatprep.mubr.bf16.mxu0 %v7136_v7 }
 0x569   :  { %9627 = vmatmul.mubr.bf16.gmra.mrb[84].mxu1 %v8419_v6 }
 0x56a   :  { %9636 = vmatprep.mubr.bf16.mxu1 %v8428_v41  ;;  %10810 = vmatpush1.bf16.msra.mxu1 %v15224_v34 }
 0x56b   :  { %10811 = vmatprep.subr.bf16.mxu1 %v15232_v15 }
 0x56e   :  { %10812 = vmatpush1.bf16.msra.mxu1 %v15230_v36 }
 0x56f   :  { %8343 = vmatmul.mubr.bf16.gmra.mrb[84].mxu0 %v17569_v54  ;;  %v15205_v54 = vld [vmem:[#allocation20 + $0xe4] ss:$16 sps:$4 sm:$0xff]   ;;  %10813 = vmatprep.subr.bf16.mxu1 %v15238_v5 }
 0x570   :  { %8352 = vmatprep.mubr.bf16.mxu0 %v7144_v33  ;;  %10610 = vmatprep.subr.bf16.mxu0 %v15205_v54 }
 0x571   :  { %9637 = vmatmul.mubr.bf16.gmra.mrb[88].mxu1 %v8427_v28  ;;  %10611 = vmatpush1.bf16.msra.mxu0 %v15203_v42 }
 0x572   :  { %9646 = vmatprep.mubr.bf16.mxu1 %v8436_v61  ;;  %10612 = vmatprep.subr.bf16.mxu0 %v15211_v0 }
 0x573   :  { %10814 = vmatpush1.bf16.msra.mxu1 %v15236_v22 }
 0x574   :  { %10815 = vmatprep.subr.bf16.mxu1 %v15244_v13 }
 0x575   :  { %10613 = vmatpush1.bf16.msra.mxu0 %v15209_v10 }
 0x576   :  { %10614 = vmatprep.subr.bf16.mxu0 %v15217_v59 }
 0x577   :  { %8353 = vmatmul.mubr.bf16.gmra.mrb[88].mxu0 %v7143_v14  ;;  %10816 = vmatpush1.bf16.msra.mxu1 %v15242_v63 }
 0x578   :  { %8362 = vmatprep.mubr.bf16.mxu0 %v7152_v30  ;;  %10817 = vmatprep.subr.bf16.mxu1 %v15250_v52 }
 0x579   :  { %9647 = vmatmul.mubr.bf16.gmra.mrb[92].mxu1 %v8435_v25  ;;  %10615 = vmatpush1.bf16.msra.mxu0 %v15215_v21 }
 0x57a   :  { %10616 = vmatprep.subr.bf16.mxu0 %v15223_v3 }
 0x57b   :  { %10818 = vmatpush1.bf16.msra.mxu1 %v15248_v43 }
 0x57c   :  { %10819 = vmatprep.subr.bf16.mxu1 %v15256_v39 }
 0x57d   :  { %10617 = vmatpush1.bf16.msra.mxu0 %v15221_v58 }
 0x57e   :  { %10618 = vmatprep.subr.bf16.mxu0 %v15229_v46 }
 0x57f   :  { %8363 = vmatmul.mubr.bf16.gmra.mrb[92].mxu0 %v7151_v2  ;;  %10820 = vmatpush1.bf16.msra.mxu1 %v15254_v11 }
 0x581   :  { %10619 = vmatpush1.bf16.msra.mxu0 %v15227_v32 }
 0x582   :  { %10620 = vmatprep.subr.bf16.mxu0 %v15235_v27 }
 0x585   :  { %10621 = vmatpush1.bf16.msra.mxu0 %v15233_v47 }
 0x586   :  { %10622 = vmatprep.subr.bf16.mxu0 %v15241_v49 }
 0x589   :  { %10623 = vmatpush1.bf16.msra.mxu0 %v15239_v44 }
 0x58a   :  { %10624 = vmatprep.subr.bf16.mxu0 %v15247_v56 }
 0x58d   :  { %10625 = vmatpush1.bf16.msra.mxu0 %v15245_v18 }
 0x58e   :  { %10626 = vmatprep.subr.bf16.mxu0 %v15253_v29 }
 0x591   :  { %10627 = vmatpush1.bf16.msra.mxu0 %v15251_v60 }
 0x614   :  { %v9578_v45 = vpop.f32.mrb[64].mxu1 }
 0x615   :  { %v9924_v31 = vadd.f32 %v17589_v23, %v9578_v45  ;;  %v9580_v8 = vpop.f32.mrb[65].mxu1 }
 0x616   :  { %v9925_v50 = vadd.f32 %v17592_v17, %v9580_v8  ;;  %v9582_v20 = vpop.f32.mrb[66].mxu1 }
 0x617   :  { %v13300_v37 = vmul.f32 -1.442695, %v9924_v31  ;;  %v9926_v24 = vadd.f32 %v17589_v23, %v9582_v20  ;;  %v9584_v38 = vpop.f32.mrb[67].mxu1 }
 0x618   :  { %v13301_v40 = vmul.f32 -1.442695, %v9925_v50  ;;  %v9927_v7 = vadd.f32 %v17592_v17, %v9584_v38 }
 0x619   :  { %15261 = vpow2.f32 %v13300_v37  ;;  %v13302_v1 = vmul.f32 -1.442695, %v9926_v24 }
 0x61a   :  { %15263 = vpow2.f32 %v13301_v40  ;;  %v13303_v6 = vmul.f32 -1.442695, %v9927_v7  ;;  %v8294_v9 = vpop.f32.mrb[64].mxu0 }
 0x61b   :  { %15265 = vpow2.f32 %v13302_v1  ;;  %v9668_v41 = vadd.f32 %v17589_v23, %v8294_v9  ;;  %v8296_v33 = vpop.f32.mrb[65].mxu0 }
 0x61c   :  { %15267 = vpow2.f32 %v13303_v6  ;;  %v9669_v28 = vadd.f32 %v17592_v17, %v8296_v33  ;;  %v9588_v61 = vpop.f32.mrb[68].mxu1  ;;  %v8298_v14 = vpop.f32.mrb[66].mxu0 }
 0x61d   :  { %v13268_v30 = vmul.f32 -1.442695, %v9668_v41  ;;  %v9928_v25 = vadd.f32 %v17589_v23, %v9588_v61  ;;  %v9670_v2 = vadd.f32 %v17589_v23, %v8298_v14  ;;  %v9590_v26 = vpop.f32.mrb[69].mxu1  ;;  %v8300_v53 = vpop.f32.mrb[67].mxu0 }
 0x61e   :  { %v13269_v12 = vmul.f32 -1.442695, %v9669_v28  ;;  %v9929_v4 = vadd.f32 %v17592_v17, %v9590_v26  ;;  %v9671_v54 = vadd.f32 %v17592_v17, %v8300_v53  ;;  %v9592_v48 = vpop.f32.mrb[70].mxu1 }
 0x61f   :  { %15269 = vpow2.f32 %v13268_v30  ;;  %v13304_v42 = vmul.f32 -1.442695, %v9928_v25  ;;  %v13270_v16 = vmul.f32 -1.442695, %v9670_v2  ;;  %v9930_v0 = vadd.f32 %v17589_v23, %v9592_v48  ;;  %v9594_v51 = vpop.f32.mrb[71].mxu1 }
 0x620   :  { %15271 = vpow2.f32 %v13269_v12  ;;  %v13305_v10 = vmul.f32 -1.442695, %v9929_v4  ;;  %v13271_v35 = vmul.f32 -1.442695, %v9671_v54  ;;  %v9931_v57 = vadd.f32 %v17592_v17, %v9594_v51 }
 0x621   :  { %15273 = vpow2.f32 %v13304_v42  ;;  %v13306_v59 = vmul.f32 -1.442695, %v9930_v0 }
 0x622   :  { %15275 = vpow2.f32 %v13270_v16  ;;  %v8304_v21 = vpop.f32.mrb[68].mxu0  ;;  %v13307_v49 = vmul.f32 -1.442695, %v9931_v57 }
 0x623   :  { %v15262_v55 = vpop.eup %15261  ;;  %15277 = vpow2.f32 %v13305_v10  ;;  %v9672_v3 = vadd.f32 %v17589_v23, %v8304_v21  ;;  %v8306_v19 = vpop.f32.mrb[69].mxu0 }
 0x624   :  { %v15264_v58 = vpop.eup %15263  ;;  %v10052_v34 = vadd.f32 1.0, %v15262_v55  ;;  %15279 = vpow2.f32 %v13271_v35  ;;  %v9598_v46 = vpop.f32.mrb[72].mxu1  ;;  %v9673_v11 = vadd.f32 %v17592_v17, %v8306_v19 }
 0x625   :  { %v8308_v15 = vpop.f32.mrb[70].mxu0  ;;  %v15266_v32 = vpop.eup %15265  ;;  %v10053_v36 = vadd.f32 1.0, %v15264_v58  ;;  %15281 = vpow2.f32 %v13306_v59  ;;  %v13272_v63 = vmul.f32 -1.442695, %v9672_v3  ;;  %v9932_v8 = vadd.f32 %v17589_v23, %v9598_v46 }
 0x626   :  { %v9600_v27 = vpop.f32.mrb[73].mxu1  ;;  %v8310_v5 = vpop.f32.mrb[71].mxu0  ;;  %15283 = vrcp.f32 %v10052_v34  ;;  %v10054_v22 = vadd.f32 1.0, %v15266_v32  ;;  %v9674_v38 = vadd.f32 %v17589_v23, %v8308_v15  ;;  %v13273_v61 = vmul.f32 -1.442695, %v9673_v11 }
 0x627   :  { %v15268_v47 = vpop.eup %15267  ;;  %v9602_v13 = vpop.f32.mrb[74].mxu1  ;;  %15285 = vrcp.f32 %v10053_v36  ;;  %v9933_v9 = vadd.f32 %v17592_v17, %v9600_v27  ;;  %v9675_v14 = vadd.f32 %v17592_v17, %v8310_v5  ;;  %v13308_v26 = vmul.f32 -1.442695, %v9932_v8 }
 0x628   :  { %v10055_v44 = vadd.f32 1.0, %v15268_v47  ;;  %v9604_v56 = vpop.f32.mrb[75].mxu1  ;;  %15287 = vrcp.f32 %v10054_v22  ;;  %v13274_v12 = vmul.f32 -1.442695, %v9674_v38  ;;  %v9934_v48 = vadd.f32 %v17589_v23, %v9602_v13 }
 0x629   :  { %v15270_v52 = vpop.eup %15269  ;;  %v13309_v54 = vmul.f32 -1.442695, %v9933_v9  ;;  %v13275_v0 = vmul.f32 -1.442695, %v9675_v14  ;;  %v9935_v51 = vadd.f32 %v17592_v17, %v9604_v56 }
 0x62a   :  { %15289 = vrcp.f32 %v10055_v44  ;;  %v15272_v18 = vpop.eup %15271  ;;  %v9796_v43 = vadd.f32 1.0, %v15270_v52  ;;  %v8314_v29 = vpop.f32.mrb[72].mxu0  ;;  %v13310_v5 = vmul.f32 -1.442695, %v9934_v48 }
 0x62b   :  { %15291 = vpow2.f32 %v13307_v49  ;;  %v15274_v39 = vpop.eup %15273  ;;  %v9797_v60 = vadd.f32 1.0, %v15272_v18  ;;  %v8316_v62 = vpop.f32.mrb[73].mxu0  ;;  %v9676_v59 = vadd.f32 %v17589_v23, %v8314_v29  ;;  %v13311_v13 = vmul.f32 -1.442695, %v9935_v51 }
 0x62c   :  { %15293 = vpow2.f32 %v13272_v63  ;;  %v15276_v45 = vpop.eup %15275  ;;  %v10056_v31 = vadd.f32 1.0, %v15274_v39  ;;  %v9608_v50 = vpop.f32.mrb[76].mxu1  ;;  %v9677_v34 = vadd.f32 %v17592_v17, %v8316_v62 }
 0x62d   :  { %15295 = vrcp.f32 %v9796_v43  ;;  %v8318_v20 = vpop.f32.mrb[74].mxu0  ;;  %v15278_v37 = vpop.eup %15277  ;;  %v9798_v24 = vadd.f32 1.0, %v15276_v45  ;;  %v9936_v47 = vadd.f32 %v17589_v23, %v9608_v50  ;;  %v13276_v18 = vmul.f32 -1.442695, %v9676_v59 }
 0x62e   :  { %15297 = vrcp.f32 %v9797_v60  ;;  %v17610_v40 = vpop.f32.mrb[77].mxu1  ;;  %v17612_v7 = vpop.f32.mrb[75].mxu0  ;;  %v10057_v6 = vadd.f32 1.0, %v15278_v37  ;;  %v9678_v44 = vadd.f32 %v17589_v23, %v8318_v20  ;;  %v13277_v60 = vmul.f32 -1.442695, %v9677_v34 }
 0x62f   :  { %v15280_v1 = vpop.eup %15279  ;;  %15299 = vrcp.f32 %v10056_v31  ;;  %v17615_v41 = vpop.f32.mrb[78].mxu1  ;;  %v13312_v62 = vmul.f32 -1.442695, %v9936_v47  ;;  %v9937_v20 = vadd.f32 %v17592_v17, %v17610_v40 }
 0x630   :  { %v15282_v33 = vpop.eup %15281  ;;  %15301 = vrcp.f32 %v9798_v24  ;;  %v9799_v28 = vadd.f32 1.0, %v15280_v1  ;;  %v17618_v30 = vpop.f32.mrb[79].mxu1  ;;  %v13278_v50 = vmul.f32 -1.442695, %v9678_v44  ;;  %v9679_v1 = vadd.f32 %v17592_v17, %v17612_v7 }
 0x631   :  { %v15284_v25 = vpop.eup %15283  ;;  %15303 = vrcp.f32 %v10057_v6  ;;  %v10058_v2 = vadd.f32 1.0, %v15282_v33  ;;  %v13313_v48 = vmul.f32 -1.442695, %v9937_v20 }
 0x632   :  { %v15286_v53 = vpop.eup %15285  ;;  %15305 = vrcp.f32 %v9799_v28  ;;  %v17621_v42 = vpop.f32.mrb[76].mxu0 }
 0x633   :  { %v15288_v4 = vpop.eup %15287  ;;  %15307 = vrcp.f32 %v10058_v2  ;;  %v17624_v10 = vpop.f32.mrb[77].mxu0 }
 0x634   :  { %v15290_v16 = vpop.eup %15289  ;;  %15309 = vpow2.f32 %v13273_v61  ;;  %v9618_v57 = vpop.f32.mrb[80].mxu1  ;;  %v17631_v3 = vpack.c.bf16 %v15288_v4, %v15284_v25 }
 0x635   :  { %v15292_v35 = vpop.eup %15291  ;;  %15311 = vpow2.f32 %v13308_v26  ;;  %v17627_v21 = vpop.f32.mrb[78].mxu0  ;;  %v17629_v55 = vpack.c.bf16 %v15290_v16, %v15286_v53  ;;  %v17635_v46 = vadd.f32 %v17589_v23, %v9618_v57 }
 0x636   :  { %v15294_v19 = vpop.eup %15293  ;;  %v10059_v58 = vadd.f32 1.0, %v15292_v35  ;;  %15313 = vpow2.f32 %v13274_v12  ;;  %v9620_v15 = vpop.f32.mrb[81].mxu1  ;;  %v13279_v35 = vmul.f32 -1.442695, %v9679_v1 }
 0x637   :  { %v17637_v32 = vpop.f32.mrb[79].mxu0  ;;  %v15296_v36 = vpop.eup %15295  ;;  %v9800_v27 = vadd.f32 1.0, %v15294_v19  ;;  %15315 = vpow2.f32 %v13309_v54  ;;  %v17642_v63 = vadd.f32 %v17592_v17, %v9620_v15 }
 0x638   :  { %v9622_v22 = vpop.f32.mrb[82].mxu1  ;;  %v15298_v49 = vpop.eup %15297  ;;  %15317 = vrcp.f32 %v10059_v58 }
 0x639   :  { %v9624_v56 = vpop.f32.mrb[83].mxu1  ;;  %v15300_v52 = vpop.eup %15299  ;;  %15319 = vrcp.f32 %v9800_v27  ;;  %v17645_v43 = vadd.f32 %v17589_v23, %v9622_v22 }
 0x63a   :  { %v17648_v29 = vadd.f32 %v17592_v17, %v9624_v56  ;;  %v15302_v39 = vpop.eup %15301  ;;  %15321 = vpow2.f32 %v13275_v0  ;;  %v8334_v45 = vpop.f32.mrb[80].mxu0 }
 0x63b   :  { %v15304_v11 = vpop.eup %15303  ;;  %15323 = vpow2.f32 %v13310_v5  ;;  %v9892_v31 = vpack.c.bf16 %v15302_v39, %v15296_v36  ;;  %v17653_v37 = vadd.f32 %v17589_v23, %v8334_v45  ;;  %v8336_v24 = vpop.f32.mrb[81].mxu0 }
 0x63c   :  { %v15306_v8 = vpop.eup %15305  ;;  %15325 = vpow2.f32 %v13311_v13  ;;  %v17658_v6 = vadd.f32 %v17592_v17, %v8336_v24  ;;  %v9628_v9 = vpop.f32.mrb[84].mxu1 }
 0x63d   :  { %v15308_v38 = vpop.eup %15307  ;;  %15327 = vpow2.f32 %v13276_v18  ;;  %v8338_v33 = vpop.f32.mrb[82].mxu0  ;;  %v9893_v28 = vpack.c.bf16 %v15306_v8, %v15298_v49  ;;  %v17661_v14 = vadd.f32 %v17589_v23, %v9628_v9 }
 0x63e   :  { %v15310_v61 = vpop.eup %15309  ;;  %15329 = vpow2.f32 %v13277_v60  ;;  %v17664_v40 = vadd.f32 %v17589_v23, %v8338_v33  ;;  %v9630_v25 = vpop.f32.mrb[85].mxu1  ;;  %v17684_v5 = vpack.c.bf16 %v15308_v38, %v15300_v52  ;;  %v9938_v52 = vadd.f32 %v17589_v23, %v17615_v41 }
 0x63f   :  { %v8340_v2 = vpop.f32.mrb[83].mxu0  ;;  %v15312_v26 = vpop.eup %15311  ;;  %v9801_v53 = vadd.f32 1.0, %v15310_v61  ;;  %15331 = vpow2.f32 %v13312_v62  ;;  %v17667_v7 = vadd.f32 %v17592_v17, %v9630_v25  ;;  %10628 = vmatprep.mubr.bf16.mxu0 %v9893_v28  ;;  %10821 = vmatprep.mubr.bf16.mxu1 %v9893_v28  ;;  %v9680_v41 = vadd.f32 %v17589_v23, %v17621_v42 }
 0x640   :  { %v9632_v12 = vpop.f32.mrb[86].mxu1  ;;  %v15314_v4 = vpop.eup %15313  ;;  %v10060_v54 = vadd.f32 1.0, %v15312_v26  ;;  %15333 = vpow2.f32 %v13278_v50  ;;  %10629 = vmatmul.mubr.bf16.vlgmr.msra.gmra.mrb[96].mxu0 %v9892_v31  ;;  %10822 = vmatmul.mubr.bf16.vlgmr.msra.gmra.mrb[96].mxu1 %v9892_v31  ;;  %v17670_v59 = vadd.f32 %v17592_v17, %v8340_v2  ;;  %v9939_v50 = vadd.f32 %v17592_v17, %v17618_v30 }
 0x641   :  { %v9634_v16 = vpop.f32.mrb[87].mxu1  ;;  %v15316_v0 = vpop.eup %15315  ;;  %15335 = vrcp.f32 %v9801_v53  ;;  %v9802_v51 = vadd.f32 1.0, %v15314_v4  ;;  %10638 = vmatprep.mubr.bf16.mxu0 %v17629_v55  ;;  %10831 = vmatprep.mubr.bf16.mxu1 %v17629_v55  ;;  %v17675_v58 = vadd.f32 %v17589_v23, %v9632_v12  ;;  %v9681_v61 = vadd.f32 %v17592_v17, %v17624_v10 }
 0x642   :  { %v15318_v57 = vpop.eup %15317  ;;  %15337 = vrcp.f32 %v10060_v54  ;;  %v10061_v19 = vadd.f32 1.0, %v15316_v0  ;;  %v17678_v34 = vadd.f32 %v17592_v17, %v9634_v16  ;;  %v8344_v36 = vpop.f32.mrb[84].mxu0  ;;  %v13314_v26 = vmul.f32 -1.442695, %v9938_v52 }
 0x643   :  { %v17680_v15 = vpop.eup %15319  ;;  %15339 = vrcp.f32 %v9802_v51  ;;  %v17682_v27 = vpack.c.bf16 %v15318_v57, %v15304_v11  ;;  %v17687_v55 = vadd.f32 %v17589_v23, %v8344_v36  ;;  %v8346_v22 = vpop.f32.mrb[85].mxu0  ;;  %v13315_v4 = vmul.f32 -1.442695, %v9939_v50 }
 0x644   :  { %v15322_v47 = vpop.eup %15321  ;;  %15341 = vrcp.f32 %v10061_v19  ;;  %v17690_v44 = vadd.f32 %v17592_v17, %v8346_v22  ;;  %v9638_v56 = vpop.f32.mrb[88].mxu1  ;;  %v13280_v10 = vmul.f32 -1.442695, %v9680_v41  ;;  %v13281_v57 = vmul.f32 -1.442695, %v9681_v61 }
 0x645   :  { %v15324_v49 = vpop.eup %15323  ;;  %v9803_v13 = vadd.f32 1.0, %v15322_v47  ;;  %15343 = vpow2.f32 %v13313_v48  ;;  %v8348_v18 = vpop.f32.mrb[86].mxu0  ;;  %v17695_v11 = vadd.f32 %v17589_v23, %v9638_v56  ;;  %v9682_v19 = vadd.f32 %v17589_v23, %v17627_v21 }
 0x646   :  { %v15326_v39 = vpop.eup %15325  ;;  %v10062_v60 = vadd.f32 1.0, %v15324_v49  ;;  %15345 = vpow2.f32 %v13279_v35  ;;  %v9640_v62 = vpop.f32.mrb[89].mxu1  ;;  %v17700_v20 = vadd.f32 %v17589_v23, %v8348_v18  ;;  %v9683_v21 = vadd.f32 %v17592_v17, %v17637_v32 }
 0x647   :  { %v8350_v45 = vpop.f32.mrb[87].mxu0  ;;  %v15328_v31 = vpop.eup %15327  ;;  %15347 = vrcp.f32 %v9803_v13  ;;  %v10063_v8 = vadd.f32 1.0, %v15326_v39  ;;  %v17705_v9 = vadd.f32 %v17592_v17, %v9640_v62  ;;  %v13316_v50 = vmul.f32 -1.442695, %v17635_v46 }
 0x648   :  { %v9642_v24 = vpop.f32.mrb[90].mxu1  ;;  %v15330_v38 = vpop.eup %15329  ;;  %15349 = vrcp.f32 %v10062_v60  ;;  %v9804_v1 = vadd.f32 1.0, %v15328_v31  ;;  %10639 = vmatmul.mubr.bf16.gmra.mrb[100].mxu0 %v17631_v3  ;;  %10832 = vmatmul.mubr.bf16.gmra.mrb[100].mxu1 %v17631_v3  ;;  %v17712_v25 = vadd.f32 %v17592_v17, %v8350_v45  ;;  %v13282_v41 = vmul.f32 -1.442695, %v9682_v19 }
 0x649   :  { %v9644_v33 = vpop.f32.mrb[91].mxu1  ;;  %v15332_v28 = vpop.eup %15331  ;;  %15351 = vrcp.f32 %v10063_v8  ;;  %v9805_v30 = vadd.f32 1.0, %v15330_v38  ;;  %v17715_v53 = vadd.f32 %v17589_v23, %v9642_v24 }
 0x64a   :  { %v15334_v2 = vpop.eup %15333  ;;  %15353 = vrcp.f32 %v9804_v1  ;;  %v10064_v42 = vadd.f32 1.0, %v15332_v28  ;;  %v17718_v54 = vadd.f32 %v17592_v17, %v9644_v33  ;;  %v8354_v48 = vpop.f32.mrb[88].mxu0  ;;  %v13317_v33 = vmul.f32 -1.442695, %v17642_v63 }
 0x64b   :  { %v15336_v12 = vpop.eup %15335  ;;  %15355 = vrcp.f32 %v9805_v30  ;;  %v9806_v3 = vadd.f32 1.0, %v15334_v2  ;;  %v17721_v0 = vadd.f32 %v17589_v23, %v8354_v48  ;;  %v8356_v51 = vpop.f32.mrb[89].mxu0  ;;  %v13318_v63 = vmul.f32 -1.442695, %v17645_v43 }
 0x64c   :  { %v15338_v16 = vpop.eup %15337  ;;  %15357 = vrcp.f32 %v10064_v42  ;;  %v17726_v36 = vadd.f32 %v17592_v17, %v8356_v51  ;;  %v9648_v47 = vpop.f32.mrb[92].mxu1  ;;  %v13283_v42 = vmul.f32 -1.442695, %v9683_v21  ;;  %v13319_v51 = vmul.f32 -1.442695, %v17648_v29 }
 0x64d   :  { %v15340_v35 = vpop.eup %15339  ;;  %15359 = vrcp.f32 %v9806_v3  ;;  %v8358_v22 = vpop.f32.mrb[90].mxu0  ;;  %v17729_v13 = vadd.f32 %v17589_v23, %v9648_v47  ;;  %v13284_v43 = vmul.f32 -1.442695, %v17653_v37 }
 0x64e   :  { %v15342_v49 = vpop.eup %15341  ;;  %15361 = vpow2.f32 %v13314_v26  ;;  %v17732_v56 = vadd.f32 %v17589_v23, %v8358_v22  ;;  %v9650_v18 = vpop.f32.mrb[93].mxu1  ;;  %v9894_v61 = vpack.c.bf16 %v15340_v35, %v17680_v15 }
 0x64f   :  { %v8360_v39 = vpop.f32.mrb[91].mxu0  ;;  %v15344_v60 = vpop.eup %15343  ;;  %15363 = vpow2.f32 %v13315_v4  ;;  %v17737_v52 = vadd.f32 %v17592_v17, %v9650_v18 }
 0x650   :  { %v17740_v62 = vadd.f32 %v17592_v17, %v8360_v39  ;;  %v9652_v45 = vpop.f32.mrb[94].mxu1  ;;  %v15346_v31 = vpop.eup %15345  ;;  %v10065_v8 = vadd.f32 1.0, %v15344_v60  ;;  %15365 = vpow2.f32 %v13280_v10 }
 0x651   :  { %v9654_v24 = vpop.f32.mrb[95].mxu1  ;;  %v15348_v38 = vpop.eup %15347  ;;  %v9807_v1 = vadd.f32 1.0, %v15346_v31  ;;  %15367 = vpow2.f32 %v13281_v57  ;;  %v17745_v30 = vadd.f32 %v17589_v23, %v9652_v45 }
 0x652   :  { %v15350_v32 = vpop.eup %15349  ;;  %15369 = vrcp.f32 %v10065_v8  ;;  %v9895_v28 = vpack.c.bf16 %v15348_v38, %v15336_v12  ;;  %v17749_v46 = vadd.f32 %v17592_v17, %v9654_v24  ;;  %v8364_v26 = vpop.f32.mrb[92].mxu0 }
 0x653   :  { %v15352_v2 = vpop.eup %15351  ;;  %15371 = vrcp.f32 %v9807_v1  ;;  %v17751_v3 = vpack.c.bf16 %v15350_v32, %v15338_v16  ;;  %v17755_v12 = vadd.f32 %v17589_v23, %v8364_v26  ;;  %v8366_v48 = vpop.f32.mrb[93].mxu0 }
 0x654   :  { %v15354_v4 = vpop.eup %15353  ;;  %15373 = vpow2.f32 %v13316_v50  ;;  %10648 = vmatprep.mubr.bf16.mxu0 %v9895_v28  ;;  %10841 = vmatprep.mubr.bf16.mxu1 %v9895_v28  ;;  %v17757_v15 = vpack.c.bf16 %v15352_v2, %v15342_v49  ;;  %v17761_v16 = vadd.f32 %v17592_v17, %v8366_v48  ;;  %v8368_v35 = vpop.f32.mrb[94].mxu0 }
 0x655   :  { %v15356_v10 = vpop.eup %15355  ;;  %15375 = vpow2.f32 %v13282_v41  ;;  %10649 = vmatmul.mubr.bf16.gmra.mrb[104].mxu0 %v9894_v61  ;;  %10842 = vmatmul.mubr.bf16.gmra.mrb[104].mxu1 %v9894_v61  ;;  %v17769_v19 = vadd.f32 %v17589_v23, %v8368_v35  ;;  %v8370_v47 = vpop.f32.mrb[95].mxu0  ;;  %v13285_v23 = vmul.f32 -1.442695, %v17658_v6  ;;  %v13287_v35 = vmul.f32 -1.442695, %v17670_v59 }
 0x656   :  { %v17763_v57 = vpop.eup %15357  ;;  %15377 = vpow2.f32 %v13317_v33  ;;  %10658 = vmatprep.mubr.bf16.mxu0 %v17682_v27  ;;  %10851 = vmatprep.mubr.bf16.mxu1 %v17682_v27  ;;  %v17772_v22 = vadd.f32 %v17592_v17, %v8370_v47  ;;  %v13320_v17 = vmul.f32 -1.442695, %v17661_v14  ;;  %v13323_v59 = vmul.f32 -1.442695, %v17678_v34 }
 0x657   :  { %v15360_v29 = vpop.eup %15359  ;;  %15379 = vpow2.f32 %v13283_v42  ;;  %v13290_v34 = vmul.f32 -1.442695, %v17700_v20 }
 0x658   :  { %v15362_v49 = vpop.eup %15361  ;;  %15381 = vpow2.f32 %v13318_v63  ;;  %v9896_v18 = vpack.c.bf16 %v15360_v29, %v15354_v4  ;;  %v13286_v4 = vmul.f32 -1.442695, %v17664_v40  ;;  %v13322_v40 = vmul.f32 -1.442695, %v17675_v58 }
 0x659   :  { %v15364_v39 = vpop.eup %15363  ;;  %v10066_v60 = vadd.f32 1.0, %v15362_v49  ;;  %15383 = vpow2.f32 %v13319_v51 }
 0x65a   :  { %v15366_v37 = vpop.eup %15365  ;;  %v10067_v21 = vadd.f32 1.0, %v15364_v39  ;;  %15385 = vpow2.f32 %v13284_v43 }
 0x65b   :  { %v15368_v45 = vpop.eup %15367  ;;  %15387 = vrcp.f32 %v10066_v60  ;;  %v9808_v27 = vadd.f32 1.0, %v15366_v37 }
 0x65c   :  { %v15370_v31 = vpop.eup %15369  ;;  %15389 = vrcp.f32 %v10067_v21  ;;  %v9809_v8 = vadd.f32 1.0, %v15368_v45  ;;  %v13289_v21 = vmul.f32 -1.442695, %v17690_v44  ;;  %v13324_v45 = vmul.f32 -1.442695, %v17695_v11 }
 0x65d   :  { %v15372_v50 = vpop.eup %15371  ;;  %15391 = vrcp.f32 %v9808_v27  ;;  %10659 = vmatmul.mubr.bf16.gmra.mrb[108].mxu0 %v17684_v5  ;;  %10852 = vmatmul.mubr.bf16.gmra.mrb[108].mxu1 %v17684_v5  ;;  %v13291_v44 = vmul.f32 -1.442695, %v17712_v25  ;;  %v13326_v25 = vmul.f32 -1.442695, %v17715_v53 }
 0x65e   :  { %v15374_v24 = vpop.eup %15373  ;;  %15393 = vrcp.f32 %v9809_v8  ;;  %v9897_v38 = vpack.c.bf16 %v15372_v50, %v15356_v10  ;;  %v13321_v10 = vmul.f32 -1.442695, %v17667_v7 }
 0x65f   :  { %v15376_v1 = vpop.eup %15375  ;;  %v10068_v41 = vadd.f32 1.0, %v15374_v24  ;;  %15395 = vpow2.f32 %v13285_v23 }
 0x660   :  { %v15378_v33 = vpop.eup %15377  ;;  %v9810_v32 = vadd.f32 1.0, %v15376_v1  ;;  %15397 = vpow2.f32 %v13320_v17  ;;  %10668 = vmatprep.mubr.bf16.mxu0 %v9897_v38  ;;  %10861 = vmatprep.mubr.bf16.mxu1 %v9897_v38 }
 0x661   :  { %v15380_v6 = vpop.eup %15379  ;;  %15399 = vrcp.f32 %v10068_v41  ;;  %v10069_v14 = vadd.f32 1.0, %v15378_v33 }
 0x662   :  { %v15382_v28 = vpop.eup %15381  ;;  %15401 = vrcp.f32 %v9810_v32  ;;  %v9811_v61 = vadd.f32 1.0, %v15380_v6 }
 0x663   :  { %v15384_v2 = vpop.eup %15383  ;;  %15403 = vrcp.f32 %v10069_v14  ;;  %v10070_v5 = vadd.f32 1.0, %v15382_v28  ;;  %v13327_v14 = vmul.f32 -1.442695, %v17718_v54 }
 0x664   :  { %v15386_v42 = vpop.eup %15385  ;;  %15405 = vrcp.f32 %v9811_v61  ;;  %v10071_v26 = vadd.f32 1.0, %v15384_v2 }
 0x665   :  { %v15388_v63 = vpop.eup %15387  ;;  %15407 = vrcp.f32 %v10070_v5  ;;  %v9812_v48 = vadd.f32 1.0, %v15386_v42  ;;  %10669 = vmatmul.mubr.bf16.gmra.mrb[112].mxu0 %v9896_v18  ;;  %10862 = vmatmul.mubr.bf16.gmra.mrb[112].mxu1 %v9896_v18 }
 0x666   :  { %v15390_v51 = vpop.eup %15389  ;;  %15409 = vrcp.f32 %v10071_v26  ;;  %10678 = vmatprep.mubr.bf16.mxu0 %v17757_v15  ;;  %10871 = vmatprep.mubr.bf16.mxu1 %v17757_v15  ;;  %v17784_v43 = vpack.c.bf16 %v15388_v63, %v17763_v57  ;;  %v13288_v15 = vmul.f32 -1.442695, %v17687_v55  ;;  %v13325_v55 = vmul.f32 -1.442695, %v17705_v9 }
 0x667   :  { %v15392_v47 = vpop.eup %15391  ;;  %15411 = vrcp.f32 %v9812_v48  ;;  %v10155_v29 = vpack.c.bf16 %v15390_v51, %v15370_v31 }
 0x668   :  { %v15394_v49 = vpop.eup %15393  ;;  %15413 = vpow2.f32 %v13286_v4 }
 0x669   :  { %v15396_v7 = vpop.eup %15395  ;;  %15415 = vpow2.f32 %v13321_v10 }
 0x66a   :  { %v15398_v18 = vpop.eup %15397  ;;  %v9813_v39 = vadd.f32 1.0, %v15396_v7  ;;  %15417 = vpow2.f32 %v13287_v35 }
 0x66b   :  { %v15400_v60 = vpop.eup %15399  ;;  %v10072_v37 = vadd.f32 1.0, %v15398_v18  ;;  %15419 = vpow2.f32 %v13322_v40  ;;  %v13328_v18 = vmul.f32 -1.442695, %v17729_v13 }
 0x66c   :  { %v15402_v57 = vpop.eup %15401  ;;  %15421 = vrcp.f32 %v9813_v39 }
 0x66d   :  { %v15404_v58 = vpop.eup %15403  ;;  %15423 = vrcp.f32 %v10072_v37  ;;  %10679 = vmatmul.mubr.bf16.gmra.mrb[116].mxu0 %v17751_v3  ;;  %10872 = vmatmul.mubr.bf16.gmra.mrb[116].mxu1 %v17751_v3  ;;  %v9898_v27 = vpack.c.bf16 %v15402_v57, %v15392_v47  ;;  %v13292_v47 = vmul.f32 -1.442695, %v17721_v0 }
 0x66e   :  { %v15406_v23 = vpop.eup %15405  ;;  %15425 = vpow2.f32 %v13323_v59 }
 0x66f   :  { %v15408_v31 = vpop.eup %15407  ;;  %15427 = vpow2.f32 %v13288_v15  ;;  %v9899_v8 = vpack.c.bf16 %v15406_v23, %v15394_v49  ;;  %v13293_v49 = vmul.f32 -1.442695, %v17726_v36  ;;  %v13329_v36 = vmul.f32 -1.442695, %v17737_v52 }
 0x670   :  { %v15410_v17 = vpop.eup %15409  ;;  %15429 = vpow2.f32 %v13289_v21  ;;  %v17796_v50 = vpack.c.bf16 %v15408_v31, %v15400_v60  ;;  %v13294_v60 = vmul.f32 -1.442695, %v17732_v56  ;;  %v13331_v52 = vmul.f32 -1.442695, %v17749_v46 }
 0x671   :  { %v15412_v11 = vpop.eup %15411  ;;  %15431 = vpow2.f32 %v13324_v45  ;;  %10688 = vmatprep.mubr.bf16.mxu0 %v9899_v8  ;;  %10881 = vmatprep.mubr.bf16.mxu1 %v9899_v8  ;;  %v17798_v3 = vpack.c.bf16 %v15410_v17, %v15404_v58  ;;  %v13295_v45 = vmul.f32 -1.442695, %v17740_v62  ;;  %v13297_v8 = vmul.f32 -1.442695, %v17761_v16 }
 0x672   :  { %v15414_v24 = vpop.eup %15413  ;;  %15433 = vpow2.f32 %v13290_v34 }
 0x673   :  { %v15416_v20 = vpop.eup %15415  ;;  %v9814_v38 = vadd.f32 1.0, %v15414_v24  ;;  %15435 = vpow2.f32 %v13325_v55  ;;  %v13296_v55 = vmul.f32 -1.442695, %v17755_v12 }
 0x674   :  { %v15418_v1 = vpop.eup %15417  ;;  %v10073_v9 = vadd.f32 1.0, %v15416_v20  ;;  %15437 = vpow2.f32 %v13291_v44 }
 0x675   :  { %v15420_v41 = vpop.eup %15419  ;;  %15439 = vrcp.f32 %v9814_v38  ;;  %v9815_v33 = vadd.f32 1.0, %v15418_v1  ;;  %10689 = vmatmul.mubr.bf16.gmra.mrb[120].mxu0 %v9898_v27  ;;  %10882 = vmatmul.mubr.bf16.gmra.mrb[120].mxu1 %v9898_v27  ;;  %v13330_v27 = vmul.f32 -1.442695, %v17745_v30  ;;  %v13298_v30 = vmul.f32 -1.442695, %v17769_v19 }
 0x676   :  { %v15422_v32 = vpop.eup %15421  ;;  %15441 = vrcp.f32 %v10073_v9  ;;  %v10074_v6 = vadd.f32 1.0, %v15420_v41  ;;  %10698 = vmatprep.mubr.bf16.mxu0 %v10155_v29  ;;  %10891 = vmatprep.mubr.bf16.mxu1 %v10155_v29  ;;  %v13299_v19 = vmul.f32 -1.442695, %v17772_v22 }
 0x677   :  { %v15424_v28 = vpop.eup %15423  ;;  %15443 = vrcp.f32 %v9815_v33 }
 0x678   :  { %v15426_v61 = vpop.eup %15425  ;;  %15445 = vrcp.f32 %v10074_v6 }
 0x679   :  { %v15428_v2 = vpop.eup %15427  ;;  %v10075_v5 = vadd.f32 1.0, %v15426_v61  ;;  %15447 = vpow2.f32 %v13326_v25 }
 0x67a   :  { %v15430_v42 = vpop.eup %15429  ;;  %v9816_v26 = vadd.f32 1.0, %v15428_v2  ;;  %15449 = vpow2.f32 %v13327_v14 }
 0x67b   :  { %v15432_v53 = vpop.eup %15431  ;;  %15451 = vrcp.f32 %v10075_v5  ;;  %v9817_v4 = vadd.f32 1.0, %v15430_v42 }
 0x67c   :  { %v15434_v63 = vpop.eup %15433  ;;  %15453 = vrcp.f32 %v9816_v26  ;;  %v10076_v48 = vadd.f32 1.0, %v15432_v53 }
 0x67d   :  { %v15436_v10 = vpop.eup %15435  ;;  %15455 = vrcp.f32 %v9817_v4  ;;  %v9818_v54 = vadd.f32 1.0, %v15434_v63  ;;  %10699 = vmatmul.mubr.bf16.gmra.mrb[124].mxu0 %v17784_v43  ;;  %10892 = vmatmul.mubr.bf16.gmra.mrb[124].mxu1 %v17784_v43 }
 0x67e   :  { %v15438_v51 = vpop.eup %15437  ;;  %15457 = vrcp.f32 %v10076_v48  ;;  %v10077_v35 = vadd.f32 1.0, %v15436_v10 }
 0x67f   :  { %v15440_v40 = vpop.eup %15439  ;;  %15459 = vrcp.f32 %v9818_v54  ;;  %v9819_v29 = vadd.f32 1.0, %v15438_v51 }
 0x680   :  { %v15442_v7 = vpop.eup %15441  ;;  %15461 = vrcp.f32 %v10077_v35  ;;  %v9900_v39 = vpack.c.bf16 %v15440_v40, %v15412_v11 }
 0x681   :  { %v15444_v59 = vpop.eup %15443  ;;  %15463 = vrcp.f32 %v9819_v29 }
 0x682   :  { %v15446_v43 = vpop.eup %15445  ;;  %15465 = vpow2.f32 %v13292_v47  ;;  %v9901_v37 = vpack.c.bf16 %v15444_v59, %v15422_v32 }
 0x683   :  { %v15448_v15 = vpop.eup %15447  ;;  %15467 = vpow2.f32 %v13293_v49  ;;  %v17808_v0 = vpack.c.bf16 %v15446_v43, %v15424_v28 }
 0x684   :  { %v15450_v57 = vpop.eup %15449  ;;  %v10078_v21 = vadd.f32 1.0, %v15448_v15  ;;  %15469 = vpow2.f32 %v13328_v18  ;;  %10708 = vmatprep.mubr.bf16.mxu0 %v9901_v37  ;;  %10901 = vmatprep.mubr.bf16.mxu1 %v9901_v37 }
 0x685   :  { %v15452_v13 = vpop.eup %15451  ;;  %v10079_v58 = vadd.f32 1.0, %v15450_v57  ;;  %15471 = vpow2.f32 %v13294_v60  ;;  %10709 = vmatmul.mubr.bf16.gmra.mrb[128].mxu0 %v9900_v39  ;;  %10902 = vmatmul.mubr.bf16.gmra.mrb[128].mxu1 %v9900_v39 }
 0x686   :  { %v15454_v56 = vpop.eup %15453  ;;  %15473 = vrcp.f32 %v10078_v21  ;;  %10718 = vmatprep.mubr.bf16.mxu0 %v17798_v3  ;;  %10911 = vmatprep.mubr.bf16.mxu1 %v17798_v3  ;;  %v10159_v23 = vpack.c.bf16 %v15452_v13, %v15442_v7  ;;  %v18388_v13 = vmov 0  }
 0x687   :  { %v15456_v34 = vpop.eup %15455  ;;  %15475 = vrcp.f32 %v10079_v58 }
 0x688   :  { %v15458_v31 = vpop.eup %15457  ;;  %15477 = vpow2.f32 %v13329_v36 }
 0x689   :  { %v15460_v62 = vpop.eup %15459  ;;  %15479 = vpow2.f32 %v13295_v45 }
 0x68a   :  { %v15462_v17 = vpop.eup %15461  ;;  %15481 = vpow2.f32 %v13330_v27  ;;  %v9902_v44 = vpack.c.bf16 %v15460_v62, %v15454_v56 }
 0x68b   :  { %v15464_v11 = vpop.eup %15463  ;;  %15483 = vpow2.f32 %v13331_v52 }
 0x68c   :  { %v15466_v3 = vpop.eup %15465  ;;  %15485 = vpow2.f32 %v13296_v55  ;;  %v9903_v24 = vpack.c.bf16 %v15464_v11, %v15456_v34 }
 0x68d   :  { %v15468_v20 = vpop.eup %15467  ;;  %v9820_v46 = vadd.f32 1.0, %v15466_v3  ;;  %15487 = vpow2.f32 %v13297_v8  ;;  %10719 = vmatmul.mubr.bf16.gmra.mrb[132].mxu0 %v17796_v50  ;;  %10912 = vmatmul.mubr.bf16.gmra.mrb[132].mxu1 %v17796_v50 }
 0x68e   :  { %v15470_v12 = vpop.eup %15469  ;;  %v9821_v38 = vadd.f32 1.0, %v15468_v20  ;;  %15489 = vpow2.f32 %v13298_v30  ;;  %10728 = vmatprep.mubr.bf16.mxu0 %v9903_v24  ;;  %10921 = vmatprep.mubr.bf16.mxu1 %v9903_v24 }
 0x68f   :  { %v15472_v16 = vpop.eup %15471  ;;  %15491 = vrcp.f32 %v9820_v46  ;;  %v10080_v9 = vadd.f32 1.0, %v15470_v12 }
 0x690   :  { %v15474_v1 = vpop.eup %15473  ;;  %v9822_v41 = vadd.f32 1.0, %v15472_v16  ;;  %15493 = vrcp.f32 %v9821_v38 }
 0x691   :  { %v15476_v33 = vpop.eup %15475  ;;  %v10160_v25 = vpack.c.bf16 %v15474_v1, %v15458_v31 }
 0x692   :  { %v15478_v32 = vpop.eup %15477  ;;  %15495 = vrcp.f32 %v9822_v41  ;;  %v10161_v6 = vpack.c.bf16 %v15476_v33, %v15462_v17 }
 0x693   :  { %v15480_v14 = vpop.eup %15479  ;;  %v10081_v50 = vadd.f32 1.0, %v15478_v32  ;;  %15497 = vpow2.f32 %v13299_v19 }
 0x694   :  { %v15482_v28 = vpop.eup %15481  ;;  %15499 = vrcp.f32 %v10080_v9  ;;  %v9823_v61 = vadd.f32 1.0, %v15480_v14  ;;  %v17829_v9 = vld [vmem:[%s18321_s9] sm:$0xff]  }
 0x695   :  { %v15484_v2 = vpop.eup %15483  ;;  %15501 = vrcp.f32 %v10081_v50  ;;  %v10082_v5 = vadd.f32 1.0, %v15482_v28  ;;  %10729 = vmatmul.mubr.bf16.gmra.mrb[136].mxu0 %v9902_v44  ;;  %10922 = vmatmul.mubr.bf16.gmra.mrb[136].mxu1 %v9902_v44 }
 0x696   :  { %v15486_v22 = vpop.eup %15485  ;;  %15503 = vrcp.f32 %v9823_v61  ;;  %v10083_v42 = vadd.f32 1.0, %v15484_v2  ;;  %10738 = vmatprep.mubr.bf16.mxu0 %v10159_v23  ;;  %10931 = vmatprep.mubr.bf16.mxu1 %v10159_v23 }
 0x697   :  { %v15488_v26 = vpop.eup %15487  ;;  %15505 = vrcp.f32 %v10082_v5  ;;  %v9824_v53 = vadd.f32 1.0, %v15486_v22 }
 0x698   :  { %v15490_v4 = vpop.eup %15489  ;;  %15507 = vrcp.f32 %v10083_v42  ;;  %v9825_v54 = vadd.f32 1.0, %v15488_v26 }
 0x699   :  { %v9826_v63 = vadd.f32 1.0, %v15490_v4  ;;  %v15492_v48 = vpop.eup %15491  ;;  %15509 = vrcp.f32 %v9824_v53 }
 0x69a   :  { %v15494_v10 = vpop.eup %15493 }
 0x69b   :  { %15511 = vrcp.f32 %v9826_v63 }
 0x69c   :  { %v15496_v51 = vpop.eup %15495  ;;  %15513 = vrcp.f32 %v9825_v54 }
 0x69d   :  { %v15498_v35 = vpop.eup %15497  ;;  %10739 = vmatmul.mubr.bf16.gmra.mrb[140].mxu0 %v17808_v0  ;;  %10932 = vmatmul.mubr.bf16.gmra.mrb[140].mxu1 %v17808_v0  ;;  %v9904_v47 = vpack.c.bf16 %v15496_v51, %v15492_v48  ;;  %v17851_v48 = vld [vmem:[%s18321_s9 + $0x10] sm:$0xff]  }
 0x69e   :  { %v15500_v40 = vpop.eup %15499  ;;  %v9827_v29 = vadd.f32 1.0, %v15498_v35 }
 0x69f   :  { %v15502_v49 = vpop.eup %15501 }
 0x6a0   :  { %v15504_v7 = vpop.eup %15503  ;;  %15515 = vrcp.f32 %v9827_v29 }
 0x6a1   :  { %v15506_v18 = vpop.eup %15505  ;;  %v9905_v39 = vpack.c.bf16 %v15504_v7, %v15494_v10 }
 0x6a2   :  { %v15508_v59 = vpop.eup %15507  ;;  %v10162_v60 = vpack.c.bf16 %v15506_v18, %v15500_v40 }
 0x6a3   :  { %10748 = vmatprep.mubr.bf16.mxu0 %v9905_v39  ;;  %10941 = vmatprep.mubr.bf16.mxu1 %v9905_v39  ;;  %v10163_v43 = vpack.c.bf16 %v15508_v59, %v15502_v49  ;;  %v15510_v37 = vpop.eup %15509 }
 0x6a5   :  { %v15512_v15 = vpop.eup %15511  ;;  %10749 = vmatmul.mubr.bf16.gmra.mrb[144].mxu0 %v9904_v47  ;;  %10942 = vmatmul.mubr.bf16.gmra.mrb[144].mxu1 %v9904_v47 }
 0x6a6   :  { %10758 = vmatprep.mubr.bf16.mxu0 %v10161_v6  ;;  %10951 = vmatprep.mubr.bf16.mxu1 %v10161_v6  ;;  %v9906_v0 = vpack.c.bf16 %v15512_v15, %v15510_v37  ;;  %v15514_v57 = vpop.eup %15513  ;;  %v17840_v6 = vld [vmem:[%s18321_s9 + $0x8] sm:$0xff]  }
 0x6aa   :  { %v15516_v21 = vpop.eup %15515 }
 0x6ab   :  { %v9907_v36 = vpack.c.bf16 %v15516_v21, %v15514_v57 }
 0x6ad   :  { %10759 = vmatmul.mubr.bf16.gmra.mrb[148].mxu0 %v10160_v25  ;;  %10952 = vmatmul.mubr.bf16.gmra.mrb[148].mxu1 %v10160_v25 }
 0x6ae   :  { %10768 = vmatprep.mubr.bf16.mxu0 %v9907_v36  ;;  %10961 = vmatprep.mubr.bf16.mxu1 %v9907_v36 }
 0x6b5   :  { %10769 = vmatmul.mubr.bf16.gmra.mrb[152].mxu0 %v9906_v0  ;;  %10962 = vmatmul.mubr.bf16.gmra.mrb[152].mxu1 %v9906_v0 }
 0x6b6   :  { %10778 = vmatprep.mubr.bf16.mxu0 %v10163_v43  ;;  %10971 = vmatprep.mubr.bf16.mxu1 %v10163_v43 }
 0x6bd   :  { %10779 = vmatmul.mubr.bf16.gmra.mrb[156].mxu0 %v10162_v60  ;;  %10972 = vmatmul.mubr.bf16.gmra.mrb[156].mxu1 %v10162_v60  ;;  %v17862_v60 = vld [vmem:[%s18321_s9 + $0x18] sm:$0xff]   ;;  %s15763_s9 = smov [#allocation21]  }
 0x6be   :  { %11119 = vmatprep.mubr.bf16.mxu0 %v18388_v13  ;;  %11192 = vmatprep.mubr.bf16.mxu1 %v18388_v13  ;;  %s12516_s25 = sshll.u32 %s15763_s9, 4  ;;  %s12517_s25 = int_to_ptr.vmem [resolvable:$true] %s12516_s25 }
 0x6bf   :  { %s15715_s5 = scalar_lea.vmem %s12517_s25, 32768  ;;  %p15720_p3 = scmp.lt.s32.totalorder %s12517_s25, %s12517_s25 }
 0x6c0   :  { %p15716_p2 = scmp.ne.s32.totalorder %s12517_s25, %s15715_s5  ;;  %p15721_p4 = scmp.lt.s32.totalorder %s15715_s5, %s15715_s5 }
 0x6c2   :  { %p15722_p5 = por %p15721_p4, %p15720_p3 }
 0x6c4   :  { %p15723_p6 = pnand %p15722_p5, %p15716_p2 }
 0x713   :  { %v10630_v58 = vpop.f32.mrb[96].mxu0  ;;  %v10823_v45 = vpop.f32.mrb[96].mxu1 }
 0x714   :  { %v10632_v56 = vpop.f32.mrb[97].mxu0  ;;  %v10825_v27 = vpop.f32.mrb[97].mxu1 }
 0x715   :  { %v10634_v23 = vpop.f32.mrb[98].mxu0  ;;  %v10827_v34 = vpop.f32.mrb[98].mxu1 }
 0x716   :  { %v10982_v52 = vpack.c.bf16 %v10634_v23, %v10630_v58  ;;  %v10984_v31 = vpack.c.bf16 %v10827_v34, %v10823_v45  ;;  %v10636_v55 = vpop.f32.mrb[99].mxu0  ;;  %v10829_v62 = vpop.f32.mrb[99].mxu1 }
 0x717   :  { %v10983_v8 = vpack.c.bf16 %v10636_v55, %v10632_v56  ;;  %v10985_v17 = vpack.c.bf16 %v10829_v62, %v10825_v27 }
 0x719   :  { %11087 = vmatprep.subr.bf16.mxu0 %v10983_v8  ;;  %11160 = vmatprep.subr.bf16.mxu1 %v10985_v17 }
 0x71a   :  { %11088 = vmatpush1.bf16.msra.mxu0 %v10982_v52  ;;  %11161 = vmatpush1.bf16.msra.mxu1 %v10984_v31 }
 0x71b   :  { %v10640_v30 = vpop.f32.mrb[100].mxu0  ;;  %v10833_v44 = vpop.f32.mrb[100].mxu1 }
 0x71c   :  { %v10642_v11 = vpop.f32.mrb[101].mxu0  ;;  %v10835_v3 = vpop.f32.mrb[101].mxu1 }
 0x71d   :  { %v10644_v24 = vpop.f32.mrb[102].mxu0  ;;  %v10837_v20 = vpop.f32.mrb[102].mxu1 }
 0x71e   :  { %v10986_v46 = vpack.c.bf16 %v10644_v24, %v10640_v30  ;;  %v10988_v12 = vpack.c.bf16 %v10837_v20, %v10833_v44  ;;  %v10646_v38 = vpop.f32.mrb[103].mxu0  ;;  %v10839_v16 = vpop.f32.mrb[103].mxu1 }
 0x71f   :  { %v10987_v19 = vpack.c.bf16 %v10646_v38, %v10642_v11  ;;  %v10989_v1 = vpack.c.bf16 %v10839_v16, %v10835_v3 }
 0x721   :  { %11089 = vmatprep.subr.bf16.mxu0 %v10987_v19  ;;  %11162 = vmatprep.subr.bf16.mxu1 %v10989_v1 }
 0x722   :  { %11090 = vmatpush1.bf16.msra.mxu0 %v10986_v46  ;;  %11163 = vmatpush1.bf16.msra.mxu1 %v10988_v12 }
 0x725   :  { %13400 = vmatmul.mubr.msk.bf16.vlgmr.msra.gmra.mrb[160].mxu0 %vm11074_vm11, %v17829_v9  ;;  %13404 = vmatmul.mubr.msk.bf16.vlgmr.msra.gmra.mrb[160].mxu1 %vm11074_vm11, %v17829_v9 }
 0x726   :  { %11129 = vmatprep.mubr.bf16.mxu0 %v18388_v13  ;;  %11202 = vmatprep.mubr.bf16.mxu1 %v18388_v13 }
 0x728   :  { %v10650_v41 = vpop.f32.mrb[104].mxu0  ;;  %v10843_v33 = vpop.f32.mrb[104].mxu1 }
 0x729   :  { %v10652_v25 = vpop.f32.mrb[105].mxu0  ;;  %v10845_v32 = vpop.f32.mrb[105].mxu1 }
 0x72a   :  { %v10654_v14 = vpop.f32.mrb[106].mxu0  ;;  %v10847_v50 = vpop.f32.mrb[106].mxu1 }
 0x72b   :  { %v10990_v28 = vpack.c.bf16 %v10654_v14, %v10650_v41  ;;  %v10992_v61 = vpack.c.bf16 %v10847_v50, %v10843_v33  ;;  %v10656_v2 = vpop.f32.mrb[107].mxu0  ;;  %v10849_v5 = vpop.f32.mrb[107].mxu1 }
 0x72c   :  { %v10991_v22 = vpack.c.bf16 %v10656_v2, %v10652_v25  ;;  %v10993_v42 = vpack.c.bf16 %v10849_v5, %v10845_v32 }
 0x72d   :  { %13401 = vmatmul.mubr.msk.bf16.gmra.mrb[164].mxu0 %vm11074_vm11, %v17840_v6  ;;  %13405 = vmatmul.mubr.msk.bf16.gmra.mrb[164].mxu1 %vm11074_vm11, %v17840_v6 }
 0x72e   :  { %11233 = vmatprep.subr.bf16.mxu0 %v10991_v22  ;;  %11306 = vmatprep.subr.bf16.mxu1 %v10993_v42 }
 0x72f   :  { %11234 = vmatpush1.bf16.msra.mxu0 %v10990_v28  ;;  %11307 = vmatpush1.bf16.msra.mxu1 %v10992_v61 }
 0x730   :  { %v10660_v26 = vpop.f32.mrb[108].mxu0  ;;  %v10853_v53 = vpop.f32.mrb[108].mxu1  ;;  %11139 = vmatprep.mubr.bf16.mxu0 %v18388_v13  ;;  %11212 = vmatprep.mubr.bf16.mxu1 %v18388_v13 }
 0x731   :  { %v10662_v4 = vpop.f32.mrb[109].mxu0  ;;  %v10855_v63 = vpop.f32.mrb[109].mxu1 }
 0x732   :  { %v10664_v10 = vpop.f32.mrb[110].mxu0  ;;  %v10857_v54 = vpop.f32.mrb[110].mxu1 }
 0x733   :  { %v10994_v51 = vpack.c.bf16 %v10664_v10, %v10660_v26  ;;  %v10996_v35 = vpack.c.bf16 %v10857_v54, %v10853_v53  ;;  %v10666_v47 = vpop.f32.mrb[111].mxu0  ;;  %v10859_v40 = vpop.f32.mrb[111].mxu1 }
 0x734   :  { %v10995_v29 = vpack.c.bf16 %v10666_v47, %v10662_v4  ;;  %v10997_v49 = vpack.c.bf16 %v10859_v40, %v10855_v63 }
 0x735   :  { %13402 = vmatmul.mubr.msk.bf16.gmra.mrb[168].mxu0 %vm11074_vm11, %v17851_v48  ;;  %13406 = vmatmul.mubr.msk.bf16.gmra.mrb[168].mxu1 %vm11074_vm11, %v17851_v48 }
 0x736   :  { %11235 = vmatprep.subr.bf16.mxu0 %v10995_v29  ;;  %11308 = vmatprep.subr.bf16.mxu1 %v10997_v49 }
 0x737   :  { %11236 = vmatpush1.bf16.msra.mxu0 %v10994_v51  ;;  %11309 = vmatpush1.bf16.msra.mxu1 %v10996_v35 }
 0x738   :  { %v10670_v7 = vpop.f32.mrb[112].mxu0  ;;  %v10863_v18 = vpop.f32.mrb[112].mxu1  ;;  %11149 = vmatprep.mubr.bf16.mxu0 %v18388_v13  ;;  %11222 = vmatprep.mubr.bf16.mxu1 %v18388_v13 }
 0x739   :  { %v10672_v39 = vpop.f32.mrb[113].mxu0  ;;  %v10865_v59 = vpop.f32.mrb[113].mxu1 }
 0x73a   :  { %v10674_v43 = vpop.f32.mrb[114].mxu0  ;;  %v10867_v37 = vpop.f32.mrb[114].mxu1 }
 0x73b   :  { %v10998_v15 = vpack.c.bf16 %v10674_v43, %v10670_v7  ;;  %v11000_v0 = vpack.c.bf16 %v10867_v37, %v10863_v18  ;;  %v10676_v57 = vpop.f32.mrb[115].mxu0  ;;  %v10869_v21 = vpop.f32.mrb[115].mxu1 }
 0x73c   :  { %v10999_v36 = vpack.c.bf16 %v10676_v57, %v10672_v39  ;;  %v11001_v58 = vpack.c.bf16 %v10869_v21, %v10865_v59 }
 0x73d   :  { %13403 = vmatmul.mubr.msk.bf16.gmra.mrb[172].mxu0 %vm11074_vm11, %v17862_v60  ;;  %13407 = vmatmul.mubr.msk.bf16.gmra.mrb[172].mxu1 %vm11074_vm11, %v17862_v60 }
 0x73e   :  { %11379 = vmatprep.subr.bf16.mxu0 %v10999_v36  ;;  %11452 = vmatprep.subr.bf16.mxu1 %v11001_v58 }
 0x73f   :  { %11265 = vmatprep.mubr.bf16.mxu0 %v18388_v13  ;;  %11338 = vmatprep.mubr.bf16.mxu1 %v18388_v13 }
 0x740   :  { %v10680_v45 = vpop.f32.mrb[116].mxu0  ;;  %v10873_v56 = vpop.f32.mrb[116].mxu1 }
 0x741   :  { %v10682_v27 = vpop.f32.mrb[117].mxu0  ;;  %v10875_v23 = vpop.f32.mrb[117].mxu1 }
 0x742   :  { %v10684_v34 = vpop.f32.mrb[118].mxu0  ;;  %v10877_v52 = vpop.f32.mrb[118].mxu1 }
 0x743   :  { %v11002_v31 = vpack.c.bf16 %v10684_v34, %v10680_v45  ;;  %v11004_v55 = vpack.c.bf16 %v10877_v52, %v10873_v56  ;;  %v10686_v62 = vpop.f32.mrb[119].mxu0  ;;  %v10879_v8 = vpop.f32.mrb[119].mxu1 }
 0x744   :  { %v11003_v17 = vpack.c.bf16 %v10686_v62, %v10682_v27  ;;  %v11005_v30 = vpack.c.bf16 %v10879_v8, %v10875_v23 }
 0x745   :  { %13408 = vmatmul.mubr.msk.bf16.vlgmr.msra.gmra.mrb[176].mxu0 %vm11074_vm11, %v17829_v9  ;;  %13412 = vmatmul.mubr.msk.bf16.vlgmr.msra.gmra.mrb[176].mxu1 %vm11074_vm11, %v17829_v9 }
 0x746   :  { %11380 = vmatpush1.bf16.msra.mxu0 %v10998_v15  ;;  %11453 = vmatpush1.bf16.msra.mxu1 %v11000_v0 }
 0x747   :  { %11381 = vmatprep.subr.bf16.mxu0 %v11003_v17  ;;  %11454 = vmatprep.subr.bf16.mxu1 %v11005_v30 }
 0x748   :  { %v17874_v44 = vpop.f32.mrb[120].mxu0  ;;  %v17876_v11 = vpop.f32.mrb[120].mxu1  ;;  %11275 = vmatprep.mubr.bf16.mxu0 %v18388_v13  ;;  %11348 = vmatprep.mubr.bf16.mxu1 %v18388_v13 }
 0x749   :  { %v10692_v3 = vpop.f32.mrb[121].mxu0  ;;  %v10885_v24 = vpop.f32.mrb[121].mxu1 }
 0x74a   :  { %v10694_v20 = vpop.f32.mrb[122].mxu0  ;;  %v10887_v46 = vpop.f32.mrb[122].mxu1  ;;  %11382 = vmatpush1.bf16.msra.mxu0 %v11002_v31  ;;  %11455 = vmatpush1.bf16.msra.mxu1 %v11004_v55 }
 0x74b   :  { %v11006_v12 = vpack.c.bf16 %v10694_v20, %v17874_v44  ;;  %v11008_v38 = vpack.c.bf16 %v10887_v46, %v17876_v11  ;;  %v10696_v16 = vpop.f32.mrb[123].mxu0  ;;  %v10889_v19 = vpop.f32.mrb[123].mxu1 }
 0x74c   :  { %v11007_v1 = vpack.c.bf16 %v10696_v16, %v10692_v3  ;;  %v11009_v41 = vpack.c.bf16 %v10889_v19, %v10885_v24 }
 0x74d   :  { %13409 = vmatmul.mubr.msk.bf16.gmra.mrb[180].mxu0 %vm11074_vm11, %v17840_v6  ;;  %13413 = vmatmul.mubr.msk.bf16.gmra.mrb[180].mxu1 %vm11074_vm11, %v17840_v6 }
 0x74e   :  { %11525 = vmatprep.subr.bf16.mxu0 %v11007_v1  ;;  %11598 = vmatprep.subr.bf16.mxu1 %v11009_v41 }
 0x74f   :  { %11285 = vmatprep.mubr.bf16.mxu0 %v18388_v13  ;;  %11358 = vmatprep.mubr.bf16.mxu1 %v18388_v13 }
 0x750   :  { %v10700_v33 = vpop.f32.mrb[124].mxu0  ;;  %v10893_v25 = vpop.f32.mrb[124].mxu1 }
 0x751   :  { %v10702_v32 = vpop.f32.mrb[125].mxu0  ;;  %v10895_v14 = vpop.f32.mrb[125].mxu1 }
 0x752   :  { %v10704_v50 = vpop.f32.mrb[126].mxu0  ;;  %v10897_v28 = vpop.f32.mrb[126].mxu1 }
 0x753   :  { %v11010_v61 = vpack.c.bf16 %v10704_v50, %v10700_v33  ;;  %v11012_v2 = vpack.c.bf16 %v10897_v28, %v10893_v25  ;;  %v10706_v5 = vpop.f32.mrb[127].mxu0  ;;  %v10899_v22 = vpop.f32.mrb[127].mxu1 }
 0x754   :  { %v11011_v42 = vpack.c.bf16 %v10706_v5, %v10702_v32  ;;  %v11013_v26 = vpack.c.bf16 %v10899_v22, %v10895_v14 }
 0x755   :  { %13410 = vmatmul.mubr.msk.bf16.gmra.mrb[184].mxu0 %vm11074_vm11, %v17851_v48  ;;  %13414 = vmatmul.mubr.msk.bf16.gmra.mrb[184].mxu1 %vm11074_vm11, %v17851_v48 }
 0x756   :  { %11295 = vmatprep.mubr.bf16.mxu0 %v18388_v13  ;;  %11368 = vmatprep.mubr.bf16.mxu1 %v18388_v13 }
 0x758   :  { %v17894_v53 = vpop.f32.mrb[128].mxu0  ;;  %v17896_v4 = vpop.f32.mrb[128].mxu1 }
 0x759   :  { %v10712_v63 = vpop.f32.mrb[129].mxu0  ;;  %v10905_v10 = vpop.f32.mrb[129].mxu1 }
 0x75a   :  { %v17898_v54 = vpop.f32.mrb[130].mxu0  ;;  %v17900_v51 = vpop.f32.mrb[130].mxu1 }
 0x75b   :  { %v11014_v35 = vpack.c.bf16 %v17898_v54, %v17894_v53  ;;  %v11016_v47 = vpack.c.bf16 %v17900_v51, %v17896_v4  ;;  %v10716_v40 = vpop.f32.mrb[131].mxu0  ;;  %v10909_v29 = vpop.f32.mrb[131].mxu1 }
 0x75c   :  { %v11015_v49 = vpack.c.bf16 %v10716_v40, %v10712_v63  ;;  %v11017_v7 = vpack.c.bf16 %v10909_v29, %v10905_v10 }
 0x75d   :  { %13411 = vmatmul.mubr.msk.bf16.gmra.mrb[188].mxu0 %vm11074_vm11, %v17862_v60  ;;  %13415 = vmatmul.mubr.msk.bf16.gmra.mrb[188].mxu1 %vm11074_vm11, %v17862_v60 }
 0x75e   :  { %11411 = vmatprep.mubr.bf16.mxu0 %v18388_v13  ;;  %11484 = vmatprep.mubr.bf16.mxu1 %v18388_v13 }
 0x760   :  { %v17912_v18 = vpop.f32.mrb[132].mxu0  ;;  %v17914_v39 = vpop.f32.mrb[132].mxu1 }
 0x761   :  { %v17916_v59 = vpop.f32.mrb[133].mxu0  ;;  %v17918_v43 = vpop.f32.mrb[133].mxu1 }
 0x762   :  { %v17920_v37 = vpop.f32.mrb[134].mxu0  ;;  %v17922_v15 = vpop.f32.mrb[134].mxu1 }
 0x763   :  { %v11018_v0 = vpack.c.bf16 %v17920_v37, %v17912_v18  ;;  %v11020_v57 = vpack.c.bf16 %v17922_v15, %v17914_v39  ;;  %v17928_v21 = vpop.f32.mrb[135].mxu0  ;;  %v17930_v36 = vpop.f32.mrb[135].mxu1 }
 0x764   :  { %v11019_v58 = vpack.c.bf16 %v17928_v21, %v17916_v59  ;;  %v11021_v45 = vpack.c.bf16 %v17930_v36, %v17918_v43 }
 0x765   :  { %13416 = vmatmul.mubr.msk.bf16.vlgmr.msra.gmra.mrb[192].mxu0 %vm11074_vm11, %v17829_v9  ;;  %13420 = vmatmul.mubr.msk.bf16.vlgmr.msra.gmra.mrb[192].mxu1 %vm11074_vm11, %v17829_v9 }
 0x766   :  { %11526 = vmatpush1.bf16.msra.mxu0 %v11006_v12  ;;  %11599 = vmatpush1.bf16.msra.mxu1 %v11008_v38 }
 0x767   :  { %11527 = vmatprep.subr.bf16.mxu0 %v11011_v42  ;;  %11600 = vmatprep.subr.bf16.mxu1 %v11013_v26 }
 0x768   :  { %v17940_v56 = vpop.f32.mrb[136].mxu0  ;;  %v17942_v27 = vpop.f32.mrb[136].mxu1  ;;  %11421 = vmatprep.mubr.bf16.mxu0 %v18388_v13  ;;  %11494 = vmatprep.mubr.bf16.mxu1 %v18388_v13 }
 0x769   :  { %v17946_v23 = vpop.f32.mrb[137].mxu0  ;;  %v17948_v34 = vpop.f32.mrb[137].mxu1 }
 0x76a   :  { %v17950_v52 = vpop.f32.mrb[138].mxu0  ;;  %v17952_v31 = vpop.f32.mrb[138].mxu1  ;;  %11528 = vmatpush1.bf16.msra.mxu0 %v11010_v61  ;;  %11601 = vmatpush1.bf16.msra.mxu1 %v11012_v2 }
 0x76b   :  { %v11022_v55 = vpack.c.bf16 %v17950_v52, %v17940_v56  ;;  %v11024_v62 = vpack.c.bf16 %v17952_v31, %v17942_v27  ;;  %v17958_v8 = vpop.f32.mrb[139].mxu0  ;;  %v17960_v17 = vpop.f32.mrb[139].mxu1  ;;  %11671 = vmatprep.subr.bf16.mxu0 %v11015_v49  ;;  %11744 = vmatprep.subr.bf16.mxu1 %v11017_v7 }
 0x76c   :  { %v11023_v30 = vpack.c.bf16 %v17958_v8, %v17946_v23  ;;  %v11025_v44 = vpack.c.bf16 %v17960_v17, %v17948_v34 }
 0x76d   :  { %13417 = vmatmul.mubr.msk.bf16.gmra.mrb[196].mxu0 %vm11074_vm11, %v17840_v6  ;;  %13421 = vmatmul.mubr.msk.bf16.gmra.mrb[196].mxu1 %vm11074_vm11, %v17840_v6 }
 0x76e   :  { %11431 = vmatprep.mubr.bf16.mxu0 %v18388_v13  ;;  %11504 = vmatprep.mubr.bf16.mxu1 %v18388_v13 }
 0x770   :  { %v17972_v11 = vpop.f32.mrb[140].mxu0  ;;  %v17974_v3 = vpop.f32.mrb[140].mxu1 }
 0x771   :  { %v17976_v24 = vpop.f32.mrb[141].mxu0  ;;  %v17978_v20 = vpop.f32.mrb[141].mxu1 }
 0x772   :  { %v17980_v46 = vpop.f32.mrb[142].mxu0  ;;  %v17982_v12 = vpop.f32.mrb[142].mxu1 }
 0x773   :  { %v17988_v19 = vpop.f32.mrb[143].mxu0  ;;  %v17990_v1 = vpop.f32.mrb[143].mxu1  ;;  %v18390_v56 = vpack.c.bf16 %v17980_v46, %v17972_v11  ;;  %v18391_v27 = vpack.c.bf16 %v17982_v12, %v17974_v3 }
 0x774   :  { %v11027_v41 = vpack.c.bf16 %v17988_v19, %v17976_v24 }
 0x775   :  { %13418 = vmatmul.mubr.msk.bf16.gmra.mrb[200].mxu0 %vm11074_vm11, %v17851_v48  ;;  %13422 = vmatmul.mubr.msk.bf16.gmra.mrb[200].mxu1 %vm11074_vm11, %v17851_v48 }
 0x776   :  { %11441 = vmatprep.mubr.bf16.mxu0 %v18388_v13  ;;  %11514 = vmatprep.mubr.bf16.mxu1 %v18388_v13 }
 0x778   :  { %v18002_v25 = vpop.f32.mrb[144].mxu0  ;;  %v18004_v32 = vpop.f32.mrb[144].mxu1 }
 0x779   :  { %v18006_v14 = vpop.f32.mrb[145].mxu0  ;;  %v18008_v50 = vpop.f32.mrb[145].mxu1 }
 0x77a   :  { %v18010_v28 = vpop.f32.mrb[146].mxu0  ;;  %v18012_v61 = vpop.f32.mrb[146].mxu1 }
 0x77b   :  { %v18018_v22 = vpop.f32.mrb[147].mxu0  ;;  %v18020_v42 = vpop.f32.mrb[147].mxu1 }
 0x77c   :  { %v18392_v52 = vpack.c.bf16 %v18018_v22, %v18006_v14  ;;  %v18393_v31 = vpack.c.bf16 %v18020_v42, %v18008_v50 }
 0x77d   :  { %13419 = vmatmul.mubr.msk.bf16.gmra.mrb[204].mxu0 %vm11074_vm11, %v17862_v60  ;;  %13423 = vmatmul.mubr.msk.bf16.gmra.mrb[204].mxu1 %vm11074_vm11, %v17862_v60 }
 0x77e   :  { %11557 = vmatprep.mubr.bf16.mxu0 %v18388_v13  ;;  %11630 = vmatprep.mubr.bf16.mxu1 %v18388_v13 }
 0x780   :  { %v18032_v10 = vpop.f32.mrb[148].mxu0  ;;  %v18034_v40 = vpop.f32.mrb[148].mxu1 }
 0x781   :  { %v18036_v29 = vpop.f32.mrb[149].mxu0  ;;  %v18038_v49 = vpop.f32.mrb[149].mxu1 }
 0x782   :  { %v18040_v7 = vpop.f32.mrb[150].mxu0  ;;  %v18042_v5 = vpop.f32.mrb[150].mxu1 }
 0x783   :  { %v18048_v26 = vpop.f32.mrb[151].mxu0  ;;  %v18050_v16 = vpop.f32.mrb[151].mxu1  ;;  %v18397_v11 = vpack.c.bf16 %v18042_v5, %v18034_v40 }
 0x784   :  { %v11035_v38 = vpack.c.bf16 %v18048_v26, %v18036_v29  ;;  %v11037_v33 = vpack.c.bf16 %v18050_v16, %v18038_v49 }
 0x785   :  { %13424 = vmatmul.mubr.msk.bf16.vlgmr.msra.gmra.mrb[208].mxu0 %vm11074_vm11, %v17829_v9  ;;  %13428 = vmatmul.mubr.msk.bf16.vlgmr.msra.gmra.mrb[208].mxu1 %vm11074_vm11, %v17829_v9 }
 0x786   :  { %11672 = vmatpush1.bf16.msra.mxu0 %v11014_v35  ;;  %11745 = vmatpush1.bf16.msra.mxu1 %v11016_v47 }
 0x787   :  { %11673 = vmatprep.subr.bf16.mxu0 %v11019_v58  ;;  %11746 = vmatprep.subr.bf16.mxu1 %v11021_v45 }
 0x788   :  { %v18072_v63 = vpop.f32.mrb[152].mxu0  ;;  %v18074_v2 = vpop.f32.mrb[152].mxu1  ;;  %11567 = vmatprep.mubr.bf16.mxu0 %v18388_v13  ;;  %11640 = vmatprep.mubr.bf16.mxu1 %v18388_v13 }
 0x789   :  { %v18078_v53 = vpop.f32.mrb[153].mxu0  ;;  %v18080_v4 = vpop.f32.mrb[153].mxu1 }
 0x78a   :  { %v18082_v54 = vpop.f32.mrb[154].mxu0  ;;  %v18084_v51 = vpop.f32.mrb[154].mxu1  ;;  %11674 = vmatpush1.bf16.msra.mxu0 %v11018_v0  ;;  %11747 = vmatpush1.bf16.msra.mxu1 %v11020_v57 }
 0x78b   :  { %v11038_v35 = vpack.c.bf16 %v18082_v54, %v18072_v63  ;;  %v11040_v47 = vpack.c.bf16 %v18084_v51, %v18074_v2  ;;  %v18096_v59 = vpop.f32.mrb[155].mxu0  ;;  %v18098_v43 = vpop.f32.mrb[155].mxu1  ;;  %11817 = vmatprep.subr.bf16.mxu0 %v11023_v30  ;;  %11890 = vmatprep.subr.bf16.mxu1 %v11025_v44  ;;  %v18389_v30 = vpack.c.bf16 %v17990_v1, %v17978_v20 }
 0x78c   :  { %v11039_v18 = vpack.c.bf16 %v18096_v59, %v18078_v53  ;;  %v11041_v39 = vpack.c.bf16 %v18098_v43, %v18080_v4  ;;  %v18396_v44 = vpack.c.bf16 %v18040_v7, %v18032_v10 }
 0x78d   :  { %13425 = vmatmul.mubr.msk.bf16.gmra.mrb[212].mxu0 %vm11074_vm11, %v17840_v6  ;;  %13429 = vmatmul.mubr.msk.bf16.gmra.mrb[212].mxu1 %vm11074_vm11, %v17840_v6 }
 0x78e   :  { %11577 = vmatprep.mubr.bf16.mxu0 %v18388_v13  ;;  %11650 = vmatprep.mubr.bf16.mxu1 %v18388_v13 }
 0x790   :  { %v18116_v37 = vpop.f32.mrb[156].mxu0  ;;  %v18118_v15 = vpop.f32.mrb[156].mxu1 }
 0x791   :  { %v18120_v0 = vpop.f32.mrb[157].mxu0  ;;  %v18122_v57 = vpop.f32.mrb[157].mxu1 }
 0x792   :  { %v18124_v21 = vpop.f32.mrb[158].mxu0  ;;  %v18126_v36 = vpop.f32.mrb[158].mxu1 }
 0x793   :  { %v11042_v58 = vpack.c.bf16 %v18124_v21, %v18116_v37  ;;  %v11044_v45 = vpack.c.bf16 %v18126_v36, %v18118_v15  ;;  %v18132_v23 = vpop.f32.mrb[159].mxu0  ;;  %v18134_v34 = vpop.f32.mrb[159].mxu1 }
 0x794   :  { %v11043_v8 = vpack.c.bf16 %v18132_v23, %v18120_v0  ;;  %v11045_v17 = vpack.c.bf16 %v18134_v34, %v18122_v57 }
 0x795   :  { %13426 = vmatmul.mubr.msk.bf16.gmra.mrb[216].mxu0 %vm11074_vm11, %v17851_v48  ;;  %13430 = vmatmul.mubr.msk.bf16.gmra.mrb[216].mxu1 %vm11074_vm11, %v17851_v48 }
 0x796   :  { %11587 = vmatprep.mubr.bf16.mxu0 %v18388_v13  ;;  %11660 = vmatprep.mubr.bf16.mxu1 %v18388_v13 }
 0x79d   :  { %13427 = vmatmul.mubr.msk.bf16.gmra.mrb[220].mxu0 %vm11074_vm11, %v17862_v60  ;;  %13431 = vmatmul.mubr.msk.bf16.gmra.mrb[220].mxu1 %vm11074_vm11, %v17862_v60 }
 0x79e   :  { %11703 = vmatprep.mubr.bf16.mxu0 %v18388_v13  ;;  %11776 = vmatprep.mubr.bf16.mxu1 %v18388_v13 }
 0x7a5   :  { %13432 = vmatmul.mubr.msk.bf16.vlgmr.msra.gmra.mrb[224].mxu0 %vm11074_vm11, %v17829_v9  ;;  %13436 = vmatmul.mubr.msk.bf16.vlgmr.msra.gmra.mrb[224].mxu1 %vm11074_vm11, %v17829_v9 }
 0x7a6   :  { %11818 = vmatpush1.bf16.msra.mxu0 %v11022_v55  ;;  %11891 = vmatpush1.bf16.msra.mxu1 %v11024_v62  ;;  %v18394_v55 = vpack.c.bf16 %v18010_v28, %v18002_v25  ;;  %v18395_v62 = vpack.c.bf16 %v18012_v61, %v18004_v32 }
 0x7a7   :  { %11819 = vmatprep.subr.bf16.mxu0 %v11027_v41  ;;  %11892 = vmatprep.subr.bf16.mxu1 %v18389_v30 }
 0x7a8   :  { %11713 = vmatprep.mubr.bf16.mxu0 %v18388_v13  ;;  %11786 = vmatprep.mubr.bf16.mxu1 %v18388_v13 }
 0x7aa   :  { %11820 = vmatpush1.bf16.msra.mxu0 %v18390_v56  ;;  %11893 = vmatpush1.bf16.msra.mxu1 %v18391_v27 }
 0x7ab   :  { %11963 = vmatprep.subr.bf16.mxu0 %v18392_v52  ;;  %12036 = vmatprep.subr.bf16.mxu1 %v18393_v31 }
 0x7ad   :  { %13433 = vmatmul.mubr.msk.bf16.gmra.mrb[228].mxu0 %vm11074_vm11, %v17840_v6  ;;  %13437 = vmatmul.mubr.msk.bf16.gmra.mrb[228].mxu1 %vm11074_vm11, %v17840_v6 }
 0x7ae   :  { %11723 = vmatprep.mubr.bf16.mxu0 %v18388_v13  ;;  %11796 = vmatprep.mubr.bf16.mxu1 %v18388_v13 }
 0x7b5   :  { %13434 = vmatmul.mubr.msk.bf16.gmra.mrb[232].mxu0 %vm11074_vm11, %v17851_v48  ;;  %13438 = vmatmul.mubr.msk.bf16.gmra.mrb[232].mxu1 %vm11074_vm11, %v17851_v48 }
 0x7b6   :  { %11733 = vmatprep.mubr.bf16.mxu0 %v18388_v13  ;;  %11806 = vmatprep.mubr.bf16.mxu1 %v18388_v13 }
 0x7bd   :  { %13435 = vmatmul.mubr.msk.bf16.gmra.mrb[236].mxu0 %vm11074_vm11, %v17862_v60  ;;  %13439 = vmatmul.mubr.msk.bf16.gmra.mrb[236].mxu1 %vm11074_vm11, %v17862_v60 }
 0x7be   :  { %11849 = vmatprep.mubr.bf16.mxu0 %v18388_v13  ;;  %11922 = vmatprep.mubr.bf16.mxu1 %v18388_v13 }
 0x7c5   :  { %13440 = vmatmul.mubr.msk.bf16.vlgmr.msra.gmra.mrb[240].mxu0 %vm11074_vm11, %v17829_v9  ;;  %13444 = vmatmul.mubr.msk.bf16.vlgmr.msra.gmra.mrb[240].mxu1 %vm11074_vm11, %v17829_v9 }
 0x7c6   :  { %11964 = vmatpush1.bf16.msra.mxu0 %v18394_v55  ;;  %12037 = vmatpush1.bf16.msra.mxu1 %v18395_v62 }
 0x7c7   :  { %11965 = vmatprep.subr.bf16.mxu0 %v11035_v38  ;;  %12038 = vmatprep.subr.bf16.mxu1 %v11037_v33 }
 0x7c8   :  { %11859 = vmatprep.mubr.bf16.mxu0 %v18388_v13  ;;  %11932 = vmatprep.mubr.bf16.mxu1 %v18388_v13 }
 0x7ca   :  { %11966 = vmatpush1.bf16.msra.mxu0 %v18396_v44  ;;  %12039 = vmatpush1.bf16.msra.mxu1 %v18397_v11 }
 0x7cb   :  { %12109 = vmatprep.subr.bf16.mxu0 %v11039_v18  ;;  %12182 = vmatprep.subr.bf16.mxu1 %v11041_v39 }
 0x7cd   :  { %13441 = vmatmul.mubr.msk.bf16.gmra.mrb[244].mxu0 %vm11074_vm11, %v17840_v6  ;;  %13445 = vmatmul.mubr.msk.bf16.gmra.mrb[244].mxu1 %vm11074_vm11, %v17840_v6 }
 0x7ce   :  { %11869 = vmatprep.mubr.bf16.mxu0 %v18388_v13  ;;  %11942 = vmatprep.mubr.bf16.mxu1 %v18388_v13 }
 0x7d5   :  { %13442 = vmatmul.mubr.msk.bf16.gmra.mrb[248].mxu0 %vm11074_vm11, %v17851_v48  ;;  %13446 = vmatmul.mubr.msk.bf16.gmra.mrb[248].mxu1 %vm11074_vm11, %v17851_v48 }
 0x7d6   :  { %11879 = vmatprep.mubr.bf16.mxu0 %v18388_v13  ;;  %11952 = vmatprep.mubr.bf16.mxu1 %v18388_v13 }
 0x7dd   :  { %13443 = vmatmul.mubr.msk.bf16.gmra.mrb[252].mxu0 %vm11074_vm11, %v17862_v60  ;;  %13447 = vmatmul.mubr.msk.bf16.gmra.mrb[252].mxu1 %vm11074_vm11, %v17862_v60 }
 0x7de   :  { %11995 = vmatprep.mubr.bf16.mxu0 %v18388_v13  ;;  %12068 = vmatprep.mubr.bf16.mxu1 %v18388_v13 }
 0x7e5   :  { %13448 = vmatmul.mubr.msk.bf16.vlgmr.msra.gmra.mrb[0].mxu0 %vm11074_vm11, %v17829_v9  ;;  %13452 = vmatmul.mubr.msk.bf16.vlgmr.msra.gmra.mrb[0].mxu1 %vm11074_vm11, %v17829_v9 }
 0x7e6   :  { %12110 = vmatpush1.bf16.msra.mxu0 %v11038_v35  ;;  %12183 = vmatpush1.bf16.msra.mxu1 %v11040_v47 }
 0x7e7   :  { %12111 = vmatprep.subr.bf16.mxu0 %v11043_v8  ;;  %12184 = vmatprep.subr.bf16.mxu1 %v11045_v17 }
 0x7e8   :  { %12005 = vmatprep.mubr.bf16.mxu0 %v18388_v13  ;;  %12078 = vmatprep.mubr.bf16.mxu1 %v18388_v13 }
 0x7ea   :  { %12112 = vmatpush1.bf16.msra.mxu0 %v11042_v58  ;;  %12185 = vmatpush1.bf16.msra.mxu1 %v11044_v45 }
 0x7ed   :  { %13449 = vmatmul.mubr.msk.bf16.gmra.mrb[4].mxu0 %vm11074_vm11, %v17840_v6  ;;  %13453 = vmatmul.mubr.msk.bf16.gmra.mrb[4].mxu1 %vm11074_vm11, %v17840_v6 }
 0x7ee   :  { %12015 = vmatprep.mubr.bf16.mxu0 %v18388_v13  ;;  %12088 = vmatprep.mubr.bf16.mxu1 %v18388_v13 }
 0x7f5   :  { %13450 = vmatmul.mubr.msk.bf16.gmra.mrb[8].mxu0 %vm11074_vm11, %v17851_v48  ;;  %13454 = vmatmul.mubr.msk.bf16.gmra.mrb[8].mxu1 %vm11074_vm11, %v17851_v48 }
 0x7f6   :  { %12025 = vmatprep.mubr.bf16.mxu0 %v18388_v13  ;;  %12098 = vmatprep.mubr.bf16.mxu1 %v18388_v13 }
 0x7f8   :  { %v11121_v3 = vpop.f32.mrb[160].mxu0  ;;  %v11194_v24 = vpop.f32.mrb[160].mxu1 }
 0x7f9   :  { %12255 = vst [vmem:[#allocation21] sm:$0xff] %v11121_v3  ;;  %12257 = vst [vmem:[#allocation21 + $0x10] sm:$0xff] %v11194_v24  ;;  %v11123_v20 = vpop.f32.mrb[161].mxu0  ;;  %v11196_v46 = vpop.f32.mrb[161].mxu1 }
 0x7fa   :  { %12256 = vst [vmem:[#allocation21 + $0x8] sm:$0xff] %v11123_v20  ;;  %12258 = vst [vmem:[#allocation21 + $0x18] sm:$0xff] %v11196_v46  ;;  %v11125_v12 = vpop.f32.mrb[162].mxu0  ;;  %v11198_v38 = vpop.f32.mrb[162].mxu1 }
 0x7fb   :  { %12259 = vst [vmem:[#allocation21 + $0x20] sm:$0xff] %v11125_v12  ;;  %12261 = vst [vmem:[#allocation21 + $0x30] sm:$0xff] %v11198_v38  ;;  %v11127_v16 = vpop.f32.mrb[163].mxu0  ;;  %v11200_v19 = vpop.f32.mrb[163].mxu1 }
 0x7fc   :  { %12260 = vst [vmem:[#allocation21 + $0x28] sm:$0xff] %v11127_v16  ;;  %12262 = vst [vmem:[#allocation21 + $0x38] sm:$0xff] %v11200_v19 }
 0x7fd   :  { %13451 = vmatmul.mubr.msk.bf16.gmra.mrb[12].mxu0 %vm11074_vm11, %v17862_v60  ;;  %13455 = vmatmul.mubr.msk.bf16.gmra.mrb[12].mxu1 %vm11074_vm11, %v17862_v60 }
 0x7fe   :  { %12141 = vmatprep.mubr.bf16.mxu0 %v18388_v13  ;;  %12214 = vmatprep.mubr.bf16.mxu1 %v18388_v13 }
 0x800   :  { %v11131_v1 = vpop.f32.mrb[164].mxu0  ;;  %v11204_v41 = vpop.f32.mrb[164].mxu1 }
 0x801   :  { %12263 = vst [vmem:[#allocation21 + $0x40] sm:$0xff] %v11131_v1  ;;  %12265 = vst [vmem:[#allocation21 + $0x50] sm:$0xff] %v11204_v41  ;;  %v11133_v33 = vpop.f32.mrb[165].mxu0  ;;  %v11206_v25 = vpop.f32.mrb[165].mxu1 }
 0x802   :  { %12264 = vst [vmem:[#allocation21 + $0x48] sm:$0xff] %v11133_v33  ;;  %12266 = vst [vmem:[#allocation21 + $0x58] sm:$0xff] %v11206_v25  ;;  %v11135_v32 = vpop.f32.mrb[166].mxu0  ;;  %v11208_v14 = vpop.f32.mrb[166].mxu1 }
 0x803   :  { %12267 = vst [vmem:[#allocation21 + $0x60] sm:$0xff] %v11135_v32  ;;  %12269 = vst [vmem:[#allocation21 + $0x70] sm:$0xff] %v11208_v14  ;;  %v11137_v50 = vpop.f32.mrb[167].mxu0  ;;  %v11210_v28 = vpop.f32.mrb[167].mxu1 }
 0x804   :  { %12268 = vst [vmem:[#allocation21 + $0x68] sm:$0xff] %v11137_v50  ;;  %12270 = vst [vmem:[#allocation21 + $0x78] sm:$0xff] %v11210_v28 }
 0x805   :  { %13456 = vmatmul.mubr.msk.bf16.vlgmr.msra.gmra.mrb[16].mxu0 %vm11074_vm11, %v17829_v9  ;;  %13460 = vmatmul.mubr.msk.bf16.vlgmr.msra.gmra.mrb[16].mxu1 %vm11074_vm11, %v17829_v9 }
 0x806   :  { %12151 = vmatprep.mubr.bf16.mxu0 %v18388_v13  ;;  %12224 = vmatprep.mubr.bf16.mxu1 %v18388_v13 }
 0x808   :  { %v11141_v61 = vpop.f32.mrb[168].mxu0  ;;  %v11214_v2 = vpop.f32.mrb[168].mxu1 }
 0x809   :  { %12271 = vst [vmem:[#allocation21 + $0x80] sm:$0xff] %v11141_v61  ;;  %12273 = vst [vmem:[#allocation21 + $0x90] sm:$0xff] %v11214_v2  ;;  %v11143_v5 = vpop.f32.mrb[169].mxu0  ;;  %v11216_v22 = vpop.f32.mrb[169].mxu1 }
 0x80a   :  { %12272 = vst [vmem:[#allocation21 + $0x88] sm:$0xff] %v11143_v5  ;;  %12274 = vst [vmem:[#allocation21 + $0x98] sm:$0xff] %v11216_v22  ;;  %v11145_v42 = vpop.f32.mrb[170].mxu0  ;;  %v11218_v26 = vpop.f32.mrb[170].mxu1 }
 0x80b   :  { %12275 = vst [vmem:[#allocation21 + $0xa0] sm:$0xff] %v11145_v42  ;;  %12277 = vst [vmem:[#allocation21 + $0xb0] sm:$0xff] %v11218_v26  ;;  %v11147_v63 = vpop.f32.mrb[171].mxu0  ;;  %v11220_v10 = vpop.f32.mrb[171].mxu1 }
 0x80c   :  { %12276 = vst [vmem:[#allocation21 + $0xa8] sm:$0xff] %v11147_v63  ;;  %12278 = vst [vmem:[#allocation21 + $0xb8] sm:$0xff] %v11220_v10 }
 0x80d   :  { %13457 = vmatmul.mubr.msk.bf16.gmra.mrb[20].mxu0 %vm11074_vm11, %v17840_v6  ;;  %13461 = vmatmul.mubr.msk.bf16.gmra.mrb[20].mxu1 %vm11074_vm11, %v17840_v6 }
 0x80e   :  { %12161 = vmatprep.mubr.bf16.mxu0 %v18388_v13  ;;  %12234 = vmatprep.mubr.bf16.mxu1 %v18388_v13 }
 0x810   :  { %v11151_v9 = vpop.f32.mrb[172].mxu0  ;;  %v11224_v40 = vpop.f32.mrb[172].mxu1 }
 0x811   :  { %12279 = vst [vmem:[#allocation21 + $0xc0] sm:$0xff] %v11151_v9  ;;  %12281 = vst [vmem:[#allocation21 + $0xd0] sm:$0xff] %v11224_v40  ;;  %v11153_v29 = vpop.f32.mrb[173].mxu0  ;;  %v11226_v49 = vpop.f32.mrb[173].mxu1 }
 0x812   :  { %12280 = vst [vmem:[#allocation21 + $0xc8] sm:$0xff] %v11153_v29  ;;  %12282 = vst [vmem:[#allocation21 + $0xd8] sm:$0xff] %v11226_v49  ;;  %v11155_v7 = vpop.f32.mrb[174].mxu0  ;;  %v11228_v53 = vpop.f32.mrb[174].mxu1 }
 0x813   :  { %12283 = vst [vmem:[#allocation21 + $0xe0] sm:$0xff] %v11155_v7  ;;  %12285 = vst [vmem:[#allocation21 + $0xf0] sm:$0xff] %v11228_v53  ;;  %v11157_v4 = vpop.f32.mrb[175].mxu0  ;;  %v11230_v54 = vpop.f32.mrb[175].mxu1 }
 0x814   :  { %12284 = vst [vmem:[#allocation21 + $0xe8] sm:$0xff] %v11157_v4  ;;  %12286 = vst [vmem:[#allocation21 + $0xf8] sm:$0xff] %v11230_v54 }
 0x815   :  { %13458 = vmatmul.mubr.msk.bf16.gmra.mrb[24].mxu0 %vm11074_vm11, %v17851_v48  ;;  %13462 = vmatmul.mubr.msk.bf16.gmra.mrb[24].mxu1 %vm11074_vm11, %v17851_v48 }
 0x816   :  { %12171 = vmatprep.mubr.bf16.mxu0 %v18388_v13  ;;  %12244 = vmatprep.mubr.bf16.mxu1 %v18388_v13 }
 0x818   :  { %v11267_v6 = vpop.f32.mrb[176].mxu0  ;;  %v11340_v51 = vpop.f32.mrb[176].mxu1 }
 0x819   :  { %12287 = vst [vmem:[#allocation21 + $0x100] sm:$0xff] %v11267_v6  ;;  %12289 = vst [vmem:[#allocation21 + $0x110] sm:$0xff] %v11340_v51  ;;  %v11269_v35 = vpop.f32.mrb[177].mxu0  ;;  %v11342_v47 = vpop.f32.mrb[177].mxu1 }
 0x81a   :  { %12288 = vst [vmem:[#allocation21 + $0x108] sm:$0xff] %v11269_v35  ;;  %12290 = vst [vmem:[#allocation21 + $0x118] sm:$0xff] %v11342_v47  ;;  %v11271_v59 = vpop.f32.mrb[178].mxu0  ;;  %v11344_v43 = vpop.f32.mrb[178].mxu1 }
 0x81b   :  { %12291 = vst [vmem:[#allocation21 + $0x120] sm:$0xff] %v11271_v59  ;;  %12293 = vst [vmem:[#allocation21 + $0x130] sm:$0xff] %v11344_v43  ;;  %v11273_v18 = vpop.f32.mrb[179].mxu0  ;;  %v11346_v39 = vpop.f32.mrb[179].mxu1 }
 0x81c   :  { %12292 = vst [vmem:[#allocation21 + $0x128] sm:$0xff] %v11273_v18  ;;  %12294 = vst [vmem:[#allocation21 + $0x138] sm:$0xff] %v11346_v39 }
 0x81d   :  { %13459 = vmatmul.mubr.msk.bf16.gmra.mrb[28].mxu0 %vm11074_vm11, %v17862_v60  ;;  %13463 = vmatmul.mubr.msk.bf16.gmra.mrb[28].mxu1 %vm11074_vm11, %v17862_v60 }
 0x820   :  { %v11277_v13 = vpop.f32.mrb[180].mxu0  ;;  %v11350_v48 = vpop.f32.mrb[180].mxu1 }
 0x821   :  { %12295 = vst [vmem:[#allocation21 + $0x140] sm:$0xff] %v11277_v13  ;;  %12297 = vst [vmem:[#allocation21 + $0x150] sm:$0xff] %v11350_v48  ;;  %v11279_v37 = vpop.f32.mrb[181].mxu0  ;;  %v11352_v15 = vpop.f32.mrb[181].mxu1 }
 0x822   :  { %12296 = vst [vmem:[#allocation21 + $0x148] sm:$0xff] %v11279_v37  ;;  %12298 = vst [vmem:[#allocation21 + $0x158] sm:$0xff] %v11352_v15  ;;  %v11281_v0 = vpop.f32.mrb[182].mxu0  ;;  %v11354_v57 = vpop.f32.mrb[182].mxu1 }
 0x823   :  { %12299 = vst [vmem:[#allocation21 + $0x160] sm:$0xff] %v11281_v0  ;;  %12301 = vst [vmem:[#allocation21 + $0x170] sm:$0xff] %v11354_v57  ;;  %v11283_v21 = vpop.f32.mrb[183].mxu0  ;;  %v11356_v36 = vpop.f32.mrb[183].mxu1 }
 0x824   :  { %12300 = vst [vmem:[#allocation21 + $0x168] sm:$0xff] %v11283_v21  ;;  %12302 = vst [vmem:[#allocation21 + $0x178] sm:$0xff] %v11356_v36 }
 0x828   :  { %v11287_v58 = vpop.f32.mrb[184].mxu0  ;;  %v11360_v45 = vpop.f32.mrb[184].mxu1 }
 0x829   :  { %12303 = vst [vmem:[#allocation21 + $0x180] sm:$0xff] %v11287_v58  ;;  %12305 = vst [vmem:[#allocation21 + $0x190] sm:$0xff] %v11360_v45  ;;  %v11289_v60 = vpop.f32.mrb[185].mxu0  ;;  %v11362_v23 = vpop.f32.mrb[185].mxu1 }
 0x82a   :  { %12304 = vst [vmem:[#allocation21 + $0x188] sm:$0xff] %v11289_v60  ;;  %12306 = vst [vmem:[#allocation21 + $0x198] sm:$0xff] %v11362_v23  ;;  %v11291_v34 = vpop.f32.mrb[186].mxu0  ;;  %v11364_v8 = vpop.f32.mrb[186].mxu1 }
 0x82b   :  { %12307 = vst [vmem:[#allocation21 + $0x1a0] sm:$0xff] %v11291_v34  ;;  %12309 = vst [vmem:[#allocation21 + $0x1b0] sm:$0xff] %v11364_v8  ;;  %v11293_v17 = vpop.f32.mrb[187].mxu0  ;;  %v11366_v30 = vpop.f32.mrb[187].mxu1 }
 0x82c   :  { %12308 = vst [vmem:[#allocation21 + $0x1a8] sm:$0xff] %v11293_v17  ;;  %12310 = vst [vmem:[#allocation21 + $0x1b8] sm:$0xff] %v11366_v30 }
 0x830   :  { %v11297_v56 = vpop.f32.mrb[188].mxu0  ;;  %v11370_v27 = vpop.f32.mrb[188].mxu1 }
 0x831   :  { %12311 = vst [vmem:[#allocation21 + $0x1c0] sm:$0xff] %v11297_v56  ;;  %12313 = vst [vmem:[#allocation21 + $0x1d0] sm:$0xff] %v11370_v27  ;;  %v11299_v52 = vpop.f32.mrb[189].mxu0  ;;  %v11372_v31 = vpop.f32.mrb[189].mxu1 }
 0x832   :  { %12312 = vst [vmem:[#allocation21 + $0x1c8] sm:$0xff] %v11299_v52  ;;  %12314 = vst [vmem:[#allocation21 + $0x1d8] sm:$0xff] %v11372_v31  ;;  %v11301_v55 = vpop.f32.mrb[190].mxu0  ;;  %v11374_v62 = vpop.f32.mrb[190].mxu1 }
 0x833   :  { %12315 = vst [vmem:[#allocation21 + $0x1e0] sm:$0xff] %v11301_v55  ;;  %12317 = vst [vmem:[#allocation21 + $0x1f0] sm:$0xff] %v11374_v62  ;;  %v11303_v44 = vpop.f32.mrb[191].mxu0  ;;  %v11376_v11 = vpop.f32.mrb[191].mxu1 }
 0x834   :  { %12316 = vst [vmem:[#allocation21 + $0x1e8] sm:$0xff] %v11303_v44  ;;  %12318 = vst [vmem:[#allocation21 + $0x1f8] sm:$0xff] %v11376_v11 }
 0x838   :  { %v11413_v3 = vpop.f32.mrb[192].mxu0  ;;  %v11486_v24 = vpop.f32.mrb[192].mxu1 }
 0x839   :  { %12319 = vst [vmem:[#allocation21 + $0x200] sm:$0xff] %v11413_v3  ;;  %12321 = vst [vmem:[#allocation21 + $0x210] sm:$0xff] %v11486_v24  ;;  %v11415_v20 = vpop.f32.mrb[193].mxu0  ;;  %v11488_v46 = vpop.f32.mrb[193].mxu1 }
 0x83a   :  { %12320 = vst [vmem:[#allocation21 + $0x208] sm:$0xff] %v11415_v20  ;;  %12322 = vst [vmem:[#allocation21 + $0x218] sm:$0xff] %v11488_v46  ;;  %v11417_v12 = vpop.f32.mrb[194].mxu0  ;;  %v11490_v38 = vpop.f32.mrb[194].mxu1 }
 0x83b   :  { %12323 = vst [vmem:[#allocation21 + $0x220] sm:$0xff] %v11417_v12  ;;  %12325 = vst [vmem:[#allocation21 + $0x230] sm:$0xff] %v11490_v38  ;;  %v11419_v16 = vpop.f32.mrb[195].mxu0  ;;  %v11492_v19 = vpop.f32.mrb[195].mxu1 }
 0x83c   :  { %12324 = vst [vmem:[#allocation21 + $0x228] sm:$0xff] %v11419_v16  ;;  %12326 = vst [vmem:[#allocation21 + $0x238] sm:$0xff] %v11492_v19 }
 0x840   :  { %v11423_v1 = vpop.f32.mrb[196].mxu0  ;;  %v11496_v41 = vpop.f32.mrb[196].mxu1 }
 0x841   :  { %12327 = vst [vmem:[#allocation21 + $0x240] sm:$0xff] %v11423_v1  ;;  %12329 = vst [vmem:[#allocation21 + $0x250] sm:$0xff] %v11496_v41  ;;  %v11425_v33 = vpop.f32.mrb[197].mxu0  ;;  %v11498_v25 = vpop.f32.mrb[197].mxu1 }
 0x842   :  { %12328 = vst [vmem:[#allocation21 + $0x248] sm:$0xff] %v11425_v33  ;;  %12330 = vst [vmem:[#allocation21 + $0x258] sm:$0xff] %v11498_v25  ;;  %v11427_v32 = vpop.f32.mrb[198].mxu0  ;;  %v11500_v14 = vpop.f32.mrb[198].mxu1 }
 0x843   :  { %12331 = vst [vmem:[#allocation21 + $0x260] sm:$0xff] %v11427_v32  ;;  %12333 = vst [vmem:[#allocation21 + $0x270] sm:$0xff] %v11500_v14  ;;  %v11429_v50 = vpop.f32.mrb[199].mxu0  ;;  %v11502_v28 = vpop.f32.mrb[199].mxu1 }
 0x844   :  { %12332 = vst [vmem:[#allocation21 + $0x268] sm:$0xff] %v11429_v50  ;;  %12334 = vst [vmem:[#allocation21 + $0x278] sm:$0xff] %v11502_v28 }
 0x848   :  { %v11433_v61 = vpop.f32.mrb[200].mxu0  ;;  %v11506_v2 = vpop.f32.mrb[200].mxu1 }
 0x849   :  { %12335 = vst [vmem:[#allocation21 + $0x280] sm:$0xff] %v11433_v61  ;;  %12337 = vst [vmem:[#allocation21 + $0x290] sm:$0xff] %v11506_v2  ;;  %v11435_v5 = vpop.f32.mrb[201].mxu0  ;;  %v11508_v22 = vpop.f32.mrb[201].mxu1 }
 0x84a   :  { %12336 = vst [vmem:[#allocation21 + $0x288] sm:$0xff] %v11435_v5  ;;  %12338 = vst [vmem:[#allocation21 + $0x298] sm:$0xff] %v11508_v22  ;;  %v11437_v42 = vpop.f32.mrb[202].mxu0  ;;  %v11510_v26 = vpop.f32.mrb[202].mxu1 }
 0x84b   :  { %12339 = vst [vmem:[#allocation21 + $0x2a0] sm:$0xff] %v11437_v42  ;;  %12341 = vst [vmem:[#allocation21 + $0x2b0] sm:$0xff] %v11510_v26  ;;  %v11439_v63 = vpop.f32.mrb[203].mxu0  ;;  %v11512_v10 = vpop.f32.mrb[203].mxu1 }
 0x84c   :  { %12340 = vst [vmem:[#allocation21 + $0x2a8] sm:$0xff] %v11439_v63  ;;  %12342 = vst [vmem:[#allocation21 + $0x2b8] sm:$0xff] %v11512_v10 }
 0x850   :  { %v11443_v9 = vpop.f32.mrb[204].mxu0  ;;  %v11516_v40 = vpop.f32.mrb[204].mxu1 }
 0x851   :  { %12343 = vst [vmem:[#allocation21 + $0x2c0] sm:$0xff] %v11443_v9  ;;  %12345 = vst [vmem:[#allocation21 + $0x2d0] sm:$0xff] %v11516_v40  ;;  %v11445_v29 = vpop.f32.mrb[205].mxu0  ;;  %v11518_v49 = vpop.f32.mrb[205].mxu1 }
 0x852   :  { %12344 = vst [vmem:[#allocation21 + $0x2c8] sm:$0xff] %v11445_v29  ;;  %12346 = vst [vmem:[#allocation21 + $0x2d8] sm:$0xff] %v11518_v49  ;;  %v11447_v7 = vpop.f32.mrb[206].mxu0  ;;  %v11520_v53 = vpop.f32.mrb[206].mxu1 }
 0x853   :  { %12347 = vst [vmem:[#allocation21 + $0x2e0] sm:$0xff] %v11447_v7  ;;  %12349 = vst [vmem:[#allocation21 + $0x2f0] sm:$0xff] %v11520_v53  ;;  %v11449_v4 = vpop.f32.mrb[207].mxu0  ;;  %v11522_v54 = vpop.f32.mrb[207].mxu1 }
 0x854   :  { %12348 = vst [vmem:[#allocation21 + $0x2e8] sm:$0xff] %v11449_v4  ;;  %12350 = vst [vmem:[#allocation21 + $0x2f8] sm:$0xff] %v11522_v54 }
 0x858   :  { %v11559_v6 = vpop.f32.mrb[208].mxu0  ;;  %v11632_v51 = vpop.f32.mrb[208].mxu1 }
 0x859   :  { %12351 = vst [vmem:[#allocation21 + $0x300] sm:$0xff] %v11559_v6  ;;  %12353 = vst [vmem:[#allocation21 + $0x310] sm:$0xff] %v11632_v51  ;;  %v11561_v35 = vpop.f32.mrb[209].mxu0  ;;  %v11634_v47 = vpop.f32.mrb[209].mxu1 }
 0x85a   :  { %12352 = vst [vmem:[#allocation21 + $0x308] sm:$0xff] %v11561_v35  ;;  %12354 = vst [vmem:[#allocation21 + $0x318] sm:$0xff] %v11634_v47  ;;  %v11563_v59 = vpop.f32.mrb[210].mxu0  ;;  %v11636_v43 = vpop.f32.mrb[210].mxu1 }
 0x85b   :  { %12355 = vst [vmem:[#allocation21 + $0x320] sm:$0xff] %v11563_v59  ;;  %12357 = vst [vmem:[#allocation21 + $0x330] sm:$0xff] %v11636_v43  ;;  %v11565_v18 = vpop.f32.mrb[211].mxu0  ;;  %v11638_v39 = vpop.f32.mrb[211].mxu1 }
 0x85c   :  { %12356 = vst [vmem:[#allocation21 + $0x328] sm:$0xff] %v11565_v18  ;;  %12358 = vst [vmem:[#allocation21 + $0x338] sm:$0xff] %v11638_v39 }
 0x860   :  { %v11569_v13 = vpop.f32.mrb[212].mxu0  ;;  %v11642_v48 = vpop.f32.mrb[212].mxu1 }
 0x861   :  { %12359 = vst [vmem:[#allocation21 + $0x340] sm:$0xff] %v11569_v13  ;;  %12361 = vst [vmem:[#allocation21 + $0x350] sm:$0xff] %v11642_v48  ;;  %v11571_v37 = vpop.f32.mrb[213].mxu0  ;;  %v11644_v15 = vpop.f32.mrb[213].mxu1 }
 0x862   :  { %12360 = vst [vmem:[#allocation21 + $0x348] sm:$0xff] %v11571_v37  ;;  %12362 = vst [vmem:[#allocation21 + $0x358] sm:$0xff] %v11644_v15  ;;  %v11573_v0 = vpop.f32.mrb[214].mxu0  ;;  %v11646_v57 = vpop.f32.mrb[214].mxu1 }
 0x863   :  { %12363 = vst [vmem:[#allocation21 + $0x360] sm:$0xff] %v11573_v0  ;;  %12365 = vst [vmem:[#allocation21 + $0x370] sm:$0xff] %v11646_v57  ;;  %v11575_v21 = vpop.f32.mrb[215].mxu0  ;;  %v11648_v36 = vpop.f32.mrb[215].mxu1 }
 0x864   :  { %12364 = vst [vmem:[#allocation21 + $0x368] sm:$0xff] %v11575_v21  ;;  %12366 = vst [vmem:[#allocation21 + $0x378] sm:$0xff] %v11648_v36 }
 0x868   :  { %v11579_v58 = vpop.f32.mrb[216].mxu0  ;;  %v11652_v45 = vpop.f32.mrb[216].mxu1 }
 0x869   :  { %12367 = vst [vmem:[#allocation21 + $0x380] sm:$0xff] %v11579_v58  ;;  %12369 = vst [vmem:[#allocation21 + $0x390] sm:$0xff] %v11652_v45  ;;  %v11581_v60 = vpop.f32.mrb[217].mxu0  ;;  %v11654_v23 = vpop.f32.mrb[217].mxu1 }
 0x86a   :  { %12368 = vst [vmem:[#allocation21 + $0x388] sm:$0xff] %v11581_v60  ;;  %12370 = vst [vmem:[#allocation21 + $0x398] sm:$0xff] %v11654_v23  ;;  %v11583_v34 = vpop.f32.mrb[218].mxu0  ;;  %v11656_v8 = vpop.f32.mrb[218].mxu1 }
 0x86b   :  { %12371 = vst [vmem:[#allocation21 + $0x3a0] sm:$0xff] %v11583_v34  ;;  %12373 = vst [vmem:[#allocation21 + $0x3b0] sm:$0xff] %v11656_v8  ;;  %v11585_v17 = vpop.f32.mrb[219].mxu0  ;;  %v11658_v30 = vpop.f32.mrb[219].mxu1 }
 0x86c   :  { %12372 = vst [vmem:[#allocation21 + $0x3a8] sm:$0xff] %v11585_v17  ;;  %12374 = vst [vmem:[#allocation21 + $0x3b8] sm:$0xff] %v11658_v30 }
 0x870   :  { %v11589_v56 = vpop.f32.mrb[220].mxu0  ;;  %v11662_v27 = vpop.f32.mrb[220].mxu1 }
 0x871   :  { %12375 = vst [vmem:[#allocation21 + $0x3c0] sm:$0xff] %v11589_v56  ;;  %12377 = vst [vmem:[#allocation21 + $0x3d0] sm:$0xff] %v11662_v27  ;;  %v11591_v52 = vpop.f32.mrb[221].mxu0  ;;  %v11664_v31 = vpop.f32.mrb[221].mxu1 }
 0x872   :  { %12376 = vst [vmem:[#allocation21 + $0x3c8] sm:$0xff] %v11591_v52  ;;  %12378 = vst [vmem:[#allocation21 + $0x3d8] sm:$0xff] %v11664_v31  ;;  %v11593_v55 = vpop.f32.mrb[222].mxu0  ;;  %v11666_v62 = vpop.f32.mrb[222].mxu1 }
 0x873   :  { %12379 = vst [vmem:[#allocation21 + $0x3e0] sm:$0xff] %v11593_v55  ;;  %12381 = vst [vmem:[#allocation21 + $0x3f0] sm:$0xff] %v11666_v62  ;;  %v11595_v44 = vpop.f32.mrb[223].mxu0  ;;  %v11668_v11 = vpop.f32.mrb[223].mxu1 }
 0x874   :  { %12380 = vst [vmem:[#allocation21 + $0x3e8] sm:$0xff] %v11595_v44  ;;  %12382 = vst [vmem:[#allocation21 + $0x3f8] sm:$0xff] %v11668_v11 }
 0x878   :  { %v11705_v3 = vpop.f32.mrb[224].mxu0  ;;  %v11778_v24 = vpop.f32.mrb[224].mxu1 }
 0x879   :  { %12383 = vst [vmem:[#allocation21 + $0x400] sm:$0xff] %v11705_v3  ;;  %12385 = vst [vmem:[#allocation21 + $0x410] sm:$0xff] %v11778_v24  ;;  %v11707_v20 = vpop.f32.mrb[225].mxu0  ;;  %v11780_v46 = vpop.f32.mrb[225].mxu1 }
 0x87a   :  { %12384 = vst [vmem:[#allocation21 + $0x408] sm:$0xff] %v11707_v20  ;;  %12386 = vst [vmem:[#allocation21 + $0x418] sm:$0xff] %v11780_v46  ;;  %v11709_v12 = vpop.f32.mrb[226].mxu0  ;;  %v11782_v38 = vpop.f32.mrb[226].mxu1 }
 0x87b   :  { %12387 = vst [vmem:[#allocation21 + $0x420] sm:$0xff] %v11709_v12  ;;  %12389 = vst [vmem:[#allocation21 + $0x430] sm:$0xff] %v11782_v38  ;;  %v11711_v16 = vpop.f32.mrb[227].mxu0  ;;  %v11784_v19 = vpop.f32.mrb[227].mxu1 }
 0x87c   :  { %12388 = vst [vmem:[#allocation21 + $0x428] sm:$0xff] %v11711_v16  ;;  %12390 = vst [vmem:[#allocation21 + $0x438] sm:$0xff] %v11784_v19 }
 0x880   :  { %v11715_v1 = vpop.f32.mrb[228].mxu0  ;;  %v11788_v41 = vpop.f32.mrb[228].mxu1 }
 0x881   :  { %12391 = vst [vmem:[#allocation21 + $0x440] sm:$0xff] %v11715_v1  ;;  %12393 = vst [vmem:[#allocation21 + $0x450] sm:$0xff] %v11788_v41  ;;  %v11717_v33 = vpop.f32.mrb[229].mxu0  ;;  %v11790_v25 = vpop.f32.mrb[229].mxu1 }
 0x882   :  { %12392 = vst [vmem:[#allocation21 + $0x448] sm:$0xff] %v11717_v33  ;;  %12394 = vst [vmem:[#allocation21 + $0x458] sm:$0xff] %v11790_v25  ;;  %v11719_v32 = vpop.f32.mrb[230].mxu0  ;;  %v11792_v14 = vpop.f32.mrb[230].mxu1 }
 0x883   :  { %12395 = vst [vmem:[#allocation21 + $0x460] sm:$0xff] %v11719_v32  ;;  %12397 = vst [vmem:[#allocation21 + $0x470] sm:$0xff] %v11792_v14  ;;  %v11721_v50 = vpop.f32.mrb[231].mxu0  ;;  %v11794_v28 = vpop.f32.mrb[231].mxu1 }
 0x884   :  { %12396 = vst [vmem:[#allocation21 + $0x468] sm:$0xff] %v11721_v50  ;;  %12398 = vst [vmem:[#allocation21 + $0x478] sm:$0xff] %v11794_v28 }
 0x888   :  { %v11725_v61 = vpop.f32.mrb[232].mxu0  ;;  %v11798_v2 = vpop.f32.mrb[232].mxu1 }
 0x889   :  { %12399 = vst [vmem:[#allocation21 + $0x480] sm:$0xff] %v11725_v61  ;;  %12401 = vst [vmem:[#allocation21 + $0x490] sm:$0xff] %v11798_v2  ;;  %v11727_v5 = vpop.f32.mrb[233].mxu0  ;;  %v11800_v22 = vpop.f32.mrb[233].mxu1 }
 0x88a   :  { %12400 = vst [vmem:[#allocation21 + $0x488] sm:$0xff] %v11727_v5  ;;  %12402 = vst [vmem:[#allocation21 + $0x498] sm:$0xff] %v11800_v22  ;;  %v11729_v42 = vpop.f32.mrb[234].mxu0  ;;  %v11802_v26 = vpop.f32.mrb[234].mxu1 }
 0x88b   :  { %12403 = vst [vmem:[#allocation21 + $0x4a0] sm:$0xff] %v11729_v42  ;;  %12405 = vst [vmem:[#allocation21 + $0x4b0] sm:$0xff] %v11802_v26  ;;  %v11731_v63 = vpop.f32.mrb[235].mxu0  ;;  %v11804_v10 = vpop.f32.mrb[235].mxu1 }
 0x88c   :  { %12404 = vst [vmem:[#allocation21 + $0x4a8] sm:$0xff] %v11731_v63  ;;  %12406 = vst [vmem:[#allocation21 + $0x4b8] sm:$0xff] %v11804_v10 }
 0x890   :  { %v11735_v9 = vpop.f32.mrb[236].mxu0  ;;  %v11808_v40 = vpop.f32.mrb[236].mxu1 }
 0x891   :  { %12407 = vst [vmem:[#allocation21 + $0x4c0] sm:$0xff] %v11735_v9  ;;  %12409 = vst [vmem:[#allocation21 + $0x4d0] sm:$0xff] %v11808_v40  ;;  %v11737_v29 = vpop.f32.mrb[237].mxu0  ;;  %v11810_v49 = vpop.f32.mrb[237].mxu1 }
 0x892   :  { %12408 = vst [vmem:[#allocation21 + $0x4c8] sm:$0xff] %v11737_v29  ;;  %12410 = vst [vmem:[#allocation21 + $0x4d8] sm:$0xff] %v11810_v49  ;;  %v11739_v7 = vpop.f32.mrb[238].mxu0  ;;  %v11812_v53 = vpop.f32.mrb[238].mxu1 }
 0x893   :  { %12411 = vst [vmem:[#allocation21 + $0x4e0] sm:$0xff] %v11739_v7  ;;  %12413 = vst [vmem:[#allocation21 + $0x4f0] sm:$0xff] %v11812_v53  ;;  %v11741_v4 = vpop.f32.mrb[239].mxu0  ;;  %v11814_v54 = vpop.f32.mrb[239].mxu1 }
 0x894   :  { %12412 = vst [vmem:[#allocation21 + $0x4e8] sm:$0xff] %v11741_v4  ;;  %12414 = vst [vmem:[#allocation21 + $0x4f8] sm:$0xff] %v11814_v54 }
 0x898   :  { %v11851_v6 = vpop.f32.mrb[240].mxu0  ;;  %v11924_v51 = vpop.f32.mrb[240].mxu1 }
 0x899   :  { %12415 = vst [vmem:[#allocation21 + $0x500] sm:$0xff] %v11851_v6  ;;  %12417 = vst [vmem:[#allocation21 + $0x510] sm:$0xff] %v11924_v51  ;;  %v11853_v35 = vpop.f32.mrb[241].mxu0  ;;  %v11926_v47 = vpop.f32.mrb[241].mxu1 }
 0x89a   :  { %12416 = vst [vmem:[#allocation21 + $0x508] sm:$0xff] %v11853_v35  ;;  %12418 = vst [vmem:[#allocation21 + $0x518] sm:$0xff] %v11926_v47  ;;  %v11855_v59 = vpop.f32.mrb[242].mxu0  ;;  %v11928_v43 = vpop.f32.mrb[242].mxu1 }
 0x89b   :  { %12419 = vst [vmem:[#allocation21 + $0x520] sm:$0xff] %v11855_v59  ;;  %12421 = vst [vmem:[#allocation21 + $0x530] sm:$0xff] %v11928_v43  ;;  %v11857_v18 = vpop.f32.mrb[243].mxu0  ;;  %v11930_v39 = vpop.f32.mrb[243].mxu1 }
 0x89c   :  { %12420 = vst [vmem:[#allocation21 + $0x528] sm:$0xff] %v11857_v18  ;;  %12422 = vst [vmem:[#allocation21 + $0x538] sm:$0xff] %v11930_v39 }
 0x8a0   :  { %v11861_v13 = vpop.f32.mrb[244].mxu0  ;;  %v11934_v48 = vpop.f32.mrb[244].mxu1 }
 0x8a1   :  { %12423 = vst [vmem:[#allocation21 + $0x540] sm:$0xff] %v11861_v13  ;;  %12425 = vst [vmem:[#allocation21 + $0x550] sm:$0xff] %v11934_v48  ;;  %v11863_v37 = vpop.f32.mrb[245].mxu0  ;;  %v11936_v15 = vpop.f32.mrb[245].mxu1 }
 0x8a2   :  { %12424 = vst [vmem:[#allocation21 + $0x548] sm:$0xff] %v11863_v37  ;;  %12426 = vst [vmem:[#allocation21 + $0x558] sm:$0xff] %v11936_v15  ;;  %v11865_v0 = vpop.f32.mrb[246].mxu0  ;;  %v11938_v57 = vpop.f32.mrb[246].mxu1 }
 0x8a3   :  { %12427 = vst [vmem:[#allocation21 + $0x560] sm:$0xff] %v11865_v0  ;;  %12429 = vst [vmem:[#allocation21 + $0x570] sm:$0xff] %v11938_v57  ;;  %v11867_v21 = vpop.f32.mrb[247].mxu0  ;;  %v11940_v36 = vpop.f32.mrb[247].mxu1 }
 0x8a4   :  { %12428 = vst [vmem:[#allocation21 + $0x568] sm:$0xff] %v11867_v21  ;;  %12430 = vst [vmem:[#allocation21 + $0x578] sm:$0xff] %v11940_v36 }
 0x8a8   :  { %v11871_v58 = vpop.f32.mrb[248].mxu0  ;;  %v11944_v45 = vpop.f32.mrb[248].mxu1 }
 0x8a9   :  { %12431 = vst [vmem:[#allocation21 + $0x580] sm:$0xff] %v11871_v58  ;;  %12433 = vst [vmem:[#allocation21 + $0x590] sm:$0xff] %v11944_v45  ;;  %v11873_v60 = vpop.f32.mrb[249].mxu0  ;;  %v11946_v23 = vpop.f32.mrb[249].mxu1 }
 0x8aa   :  { %12432 = vst [vmem:[#allocation21 + $0x588] sm:$0xff] %v11873_v60  ;;  %12434 = vst [vmem:[#allocation21 + $0x598] sm:$0xff] %v11946_v23  ;;  %v11875_v34 = vpop.f32.mrb[250].mxu0  ;;  %v11948_v8 = vpop.f32.mrb[250].mxu1 }
 0x8ab   :  { %12435 = vst [vmem:[#allocation21 + $0x5a0] sm:$0xff] %v11875_v34  ;;  %12437 = vst [vmem:[#allocation21 + $0x5b0] sm:$0xff] %v11948_v8  ;;  %v11877_v17 = vpop.f32.mrb[251].mxu0  ;;  %v11950_v30 = vpop.f32.mrb[251].mxu1 }
 0x8ac   :  { %12436 = vst [vmem:[#allocation21 + $0x5a8] sm:$0xff] %v11877_v17  ;;  %12438 = vst [vmem:[#allocation21 + $0x5b8] sm:$0xff] %v11950_v30 }
 0x8b0   :  { %v11881_v56 = vpop.f32.mrb[252].mxu0  ;;  %v11954_v27 = vpop.f32.mrb[252].mxu1 }
 0x8b1   :  { %12439 = vst [vmem:[#allocation21 + $0x5c0] sm:$0xff] %v11881_v56  ;;  %12441 = vst [vmem:[#allocation21 + $0x5d0] sm:$0xff] %v11954_v27  ;;  %v11883_v52 = vpop.f32.mrb[253].mxu0  ;;  %v11956_v31 = vpop.f32.mrb[253].mxu1 }
 0x8b2   :  { %12440 = vst [vmem:[#allocation21 + $0x5c8] sm:$0xff] %v11883_v52  ;;  %12442 = vst [vmem:[#allocation21 + $0x5d8] sm:$0xff] %v11956_v31  ;;  %v11885_v55 = vpop.f32.mrb[254].mxu0  ;;  %v11958_v62 = vpop.f32.mrb[254].mxu1 }
 0x8b3   :  { %12443 = vst [vmem:[#allocation21 + $0x5e0] sm:$0xff] %v11885_v55  ;;  %12445 = vst [vmem:[#allocation21 + $0x5f0] sm:$0xff] %v11958_v62  ;;  %v11887_v44 = vpop.f32.mrb[255].mxu0  ;;  %v11960_v11 = vpop.f32.mrb[255].mxu1 }
 0x8b4   :  { %12444 = vst [vmem:[#allocation21 + $0x5e8] sm:$0xff] %v11887_v44  ;;  %12446 = vst [vmem:[#allocation21 + $0x5f8] sm:$0xff] %v11960_v11 }
 0x8b8   :  { %v11997_v3 = vpop.f32.mrb[0].mxu0  ;;  %v12070_v24 = vpop.f32.mrb[0].mxu1 }
 0x8b9   :  { %12447 = vst [vmem:[#allocation21 + $0x600] sm:$0xff] %v11997_v3  ;;  %12449 = vst [vmem:[#allocation21 + $0x610] sm:$0xff] %v12070_v24  ;;  %v11999_v20 = vpop.f32.mrb[1].mxu0  ;;  %v12072_v46 = vpop.f32.mrb[1].mxu1 }
 0x8ba   :  { %12448 = vst [vmem:[#allocation21 + $0x608] sm:$0xff] %v11999_v20  ;;  %12450 = vst [vmem:[#allocation21 + $0x618] sm:$0xff] %v12072_v46  ;;  %v12001_v12 = vpop.f32.mrb[2].mxu0  ;;  %v12074_v38 = vpop.f32.mrb[2].mxu1 }
 0x8bb   :  { %12451 = vst [vmem:[#allocation21 + $0x620] sm:$0xff] %v12001_v12  ;;  %12453 = vst [vmem:[#allocation21 + $0x630] sm:$0xff] %v12074_v38  ;;  %v12003_v16 = vpop.f32.mrb[3].mxu0  ;;  %v12076_v19 = vpop.f32.mrb[3].mxu1 }
 0x8bc   :  { %12452 = vst [vmem:[#allocation21 + $0x628] sm:$0xff] %v12003_v16  ;;  %12454 = vst [vmem:[#allocation21 + $0x638] sm:$0xff] %v12076_v19 }
 0x8c0   :  { %v12007_v1 = vpop.f32.mrb[4].mxu0  ;;  %v12080_v41 = vpop.f32.mrb[4].mxu1 }
 0x8c1   :  { %12455 = vst [vmem:[#allocation21 + $0x640] sm:$0xff] %v12007_v1  ;;  %12457 = vst [vmem:[#allocation21 + $0x650] sm:$0xff] %v12080_v41  ;;  %v12009_v33 = vpop.f32.mrb[5].mxu0  ;;  %v12082_v25 = vpop.f32.mrb[5].mxu1 }
 0x8c2   :  { %12456 = vst [vmem:[#allocation21 + $0x648] sm:$0xff] %v12009_v33  ;;  %12458 = vst [vmem:[#allocation21 + $0x658] sm:$0xff] %v12082_v25  ;;  %v12011_v32 = vpop.f32.mrb[6].mxu0  ;;  %v12084_v14 = vpop.f32.mrb[6].mxu1 }
 0x8c3   :  { %12459 = vst [vmem:[#allocation21 + $0x660] sm:$0xff] %v12011_v32  ;;  %12461 = vst [vmem:[#allocation21 + $0x670] sm:$0xff] %v12084_v14  ;;  %v12013_v50 = vpop.f32.mrb[7].mxu0  ;;  %v12086_v28 = vpop.f32.mrb[7].mxu1 }
 0x8c4   :  { %12460 = vst [vmem:[#allocation21 + $0x668] sm:$0xff] %v12013_v50  ;;  %12462 = vst [vmem:[#allocation21 + $0x678] sm:$0xff] %v12086_v28 }
 0x8c8   :  { %v12017_v61 = vpop.f32.mrb[8].mxu0  ;;  %v12090_v2 = vpop.f32.mrb[8].mxu1 }
 0x8c9   :  { %12463 = vst [vmem:[#allocation21 + $0x680] sm:$0xff] %v12017_v61  ;;  %12465 = vst [vmem:[#allocation21 + $0x690] sm:$0xff] %v12090_v2  ;;  %v12019_v5 = vpop.f32.mrb[9].mxu0  ;;  %v12092_v22 = vpop.f32.mrb[9].mxu1 }
 0x8ca   :  { %12464 = vst [vmem:[#allocation21 + $0x688] sm:$0xff] %v12019_v5  ;;  %12466 = vst [vmem:[#allocation21 + $0x698] sm:$0xff] %v12092_v22  ;;  %v12021_v42 = vpop.f32.mrb[10].mxu0  ;;  %v12094_v26 = vpop.f32.mrb[10].mxu1 }
 0x8cb   :  { %12467 = vst [vmem:[#allocation21 + $0x6a0] sm:$0xff] %v12021_v42  ;;  %12469 = vst [vmem:[#allocation21 + $0x6b0] sm:$0xff] %v12094_v26  ;;  %v12023_v63 = vpop.f32.mrb[11].mxu0  ;;  %v12096_v10 = vpop.f32.mrb[11].mxu1 }
 0x8cc   :  { %12468 = vst [vmem:[#allocation21 + $0x6a8] sm:$0xff] %v12023_v63  ;;  %12470 = vst [vmem:[#allocation21 + $0x6b8] sm:$0xff] %v12096_v10 }
 0x8d0   :  { %v12027_v9 = vpop.f32.mrb[12].mxu0  ;;  %v12100_v40 = vpop.f32.mrb[12].mxu1 }
 0x8d1   :  { %12471 = vst [vmem:[#allocation21 + $0x6c0] sm:$0xff] %v12027_v9  ;;  %12473 = vst [vmem:[#allocation21 + $0x6d0] sm:$0xff] %v12100_v40  ;;  %v12029_v29 = vpop.f32.mrb[13].mxu0  ;;  %v12102_v49 = vpop.f32.mrb[13].mxu1 }
 0x8d2   :  { %12472 = vst [vmem:[#allocation21 + $0x6c8] sm:$0xff] %v12029_v29  ;;  %12474 = vst [vmem:[#allocation21 + $0x6d8] sm:$0xff] %v12102_v49  ;;  %v12031_v7 = vpop.f32.mrb[14].mxu0  ;;  %v12104_v53 = vpop.f32.mrb[14].mxu1 }
 0x8d3   :  { %12475 = vst [vmem:[#allocation21 + $0x6e0] sm:$0xff] %v12031_v7  ;;  %12477 = vst [vmem:[#allocation21 + $0x6f0] sm:$0xff] %v12104_v53  ;;  %v12033_v4 = vpop.f32.mrb[15].mxu0  ;;  %v12106_v54 = vpop.f32.mrb[15].mxu1 }
 0x8d4   :  { %12476 = vst [vmem:[#allocation21 + $0x6e8] sm:$0xff] %v12033_v4  ;;  %12478 = vst [vmem:[#allocation21 + $0x6f8] sm:$0xff] %v12106_v54 }
 0x8d8   :  { %v12143_v6 = vpop.f32.mrb[16].mxu0  ;;  %v12216_v51 = vpop.f32.mrb[16].mxu1 }
 0x8d9   :  { %12479 = vst [vmem:[#allocation21 + $0x700] sm:$0xff] %v12143_v6  ;;  %12481 = vst [vmem:[#allocation21 + $0x710] sm:$0xff] %v12216_v51  ;;  %v12145_v35 = vpop.f32.mrb[17].mxu0  ;;  %v12218_v47 = vpop.f32.mrb[17].mxu1 }
 0x8da   :  { %12480 = vst [vmem:[#allocation21 + $0x708] sm:$0xff] %v12145_v35  ;;  %12482 = vst [vmem:[#allocation21 + $0x718] sm:$0xff] %v12218_v47  ;;  %v12147_v59 = vpop.f32.mrb[18].mxu0  ;;  %v12220_v43 = vpop.f32.mrb[18].mxu1 }
 0x8db   :  { %12483 = vst [vmem:[#allocation21 + $0x720] sm:$0xff] %v12147_v59  ;;  %12485 = vst [vmem:[#allocation21 + $0x730] sm:$0xff] %v12220_v43  ;;  %v12149_v18 = vpop.f32.mrb[19].mxu0  ;;  %v12222_v39 = vpop.f32.mrb[19].mxu1 }
 0x8dc   :  { %12484 = vst [vmem:[#allocation21 + $0x728] sm:$0xff] %v12149_v18  ;;  %12486 = vst [vmem:[#allocation21 + $0x738] sm:$0xff] %v12222_v39 }
 0x8e0   :  { %v12153_v13 = vpop.f32.mrb[20].mxu0  ;;  %v12226_v48 = vpop.f32.mrb[20].mxu1 }
 0x8e1   :  { %12487 = vst [vmem:[#allocation21 + $0x740] sm:$0xff] %v12153_v13  ;;  %12489 = vst [vmem:[#allocation21 + $0x750] sm:$0xff] %v12226_v48  ;;  %v12155_v37 = vpop.f32.mrb[21].mxu0  ;;  %v12228_v15 = vpop.f32.mrb[21].mxu1 }
 0x8e2   :  { %12488 = vst [vmem:[#allocation21 + $0x748] sm:$0xff] %v12155_v37  ;;  %12490 = vst [vmem:[#allocation21 + $0x758] sm:$0xff] %v12228_v15  ;;  %v12157_v0 = vpop.f32.mrb[22].mxu0  ;;  %v12230_v57 = vpop.f32.mrb[22].mxu1 }
 0x8e3   :  { %12491 = vst [vmem:[#allocation21 + $0x760] sm:$0xff] %v12157_v0  ;;  %12493 = vst [vmem:[#allocation21 + $0x770] sm:$0xff] %v12230_v57  ;;  %v12159_v21 = vpop.f32.mrb[23].mxu0  ;;  %v12232_v36 = vpop.f32.mrb[23].mxu1 }
 0x8e4   :  { %12492 = vst [vmem:[#allocation21 + $0x768] sm:$0xff] %v12159_v21  ;;  %12494 = vst [vmem:[#allocation21 + $0x778] sm:$0xff] %v12232_v36 }
 0x8e8   :  { %v12163_v58 = vpop.f32.mrb[24].mxu0  ;;  %v12236_v45 = vpop.f32.mrb[24].mxu1 }
 0x8e9   :  { %12495 = vst [vmem:[#allocation21 + $0x780] sm:$0xff] %v12163_v58  ;;  %12497 = vst [vmem:[#allocation21 + $0x790] sm:$0xff] %v12236_v45  ;;  %v12165_v60 = vpop.f32.mrb[25].mxu0  ;;  %v12238_v23 = vpop.f32.mrb[25].mxu1 }
 0x8ea   :  { %12496 = vst [vmem:[#allocation21 + $0x788] sm:$0xff] %v12165_v60  ;;  %12498 = vst [vmem:[#allocation21 + $0x798] sm:$0xff] %v12238_v23  ;;  %v12167_v34 = vpop.f32.mrb[26].mxu0  ;;  %v12240_v8 = vpop.f32.mrb[26].mxu1 }
 0x8eb   :  { %12499 = vst [vmem:[#allocation21 + $0x7a0] sm:$0xff] %v12167_v34  ;;  %12501 = vst [vmem:[#allocation21 + $0x7b0] sm:$0xff] %v12240_v8  ;;  %v12169_v17 = vpop.f32.mrb[27].mxu0  ;;  %v12242_v30 = vpop.f32.mrb[27].mxu1 }
 0x8ec   :  { %12500 = vst [vmem:[#allocation21 + $0x7a8] sm:$0xff] %v12169_v17  ;;  %12502 = vst [vmem:[#allocation21 + $0x7b8] sm:$0xff] %v12242_v30 }
 0x8f0   :  { %v12173_v56 = vpop.f32.mrb[28].mxu0  ;;  %v12246_v27 = vpop.f32.mrb[28].mxu1 }
 0x8f1   :  { %12503 = vst [vmem:[#allocation21 + $0x7c0] sm:$0xff] %v12173_v56  ;;  %12505 = vst [vmem:[#allocation21 + $0x7d0] sm:$0xff] %v12246_v27  ;;  %v12175_v52 = vpop.f32.mrb[29].mxu0  ;;  %v12248_v31 = vpop.f32.mrb[29].mxu1 }
 0x8f2   :  { %12504 = vst [vmem:[#allocation21 + $0x7c8] sm:$0xff] %v12175_v52  ;;  %12506 = vst [vmem:[#allocation21 + $0x7d8] sm:$0xff] %v12248_v31  ;;  %v12177_v55 = vpop.f32.mrb[30].mxu0  ;;  %v12250_v62 = vpop.f32.mrb[30].mxu1 }
 0x8f3   :  { %12507 = vst [vmem:[#allocation21 + $0x7e0] sm:$0xff] %v12177_v55  ;;  %12509 = vst [vmem:[#allocation21 + $0x7f0] sm:$0xff] %v12250_v62  ;;  %v12179_v44 = vpop.f32.mrb[31].mxu0  ;;  %v12252_v11 = vpop.f32.mrb[31].mxu1 }
 0x8f4   :  { %12508 = vst [vmem:[#allocation21 + $0x7e8] sm:$0xff] %v12179_v44  ;;  %12510 = vst [vmem:[#allocation21 + $0x7f8] sm:$0xff] %v12252_v11 }
 0x8f5   :  { %15726 = shalt.err (!%p15723_p6)
}
 0x8f6   :  { %s15727_s29 = scalar_lea.hbm %s18322_s10, 32768 }
 0x8f7   :  { %p15728_p7 = scmp.ne.s32.totalorder %s18322_s10, %s15727_s29  ;;  %p15731_p8 = scmp.lt.u32.totalorder %s15727_s29, %s18322_s10 }
 0x8f9   :  { %p15733_p9 = pnand %p15731_p8, %p15728_p7 }
 0x8fb   :  { %15736 = shalt.err (!%p15733_p9)
}
 0x8fc   :  { %s15764_s3 = smov 512   ;;  %s15765_s13 = smov 32  }
 0x8fd   :  { %12522 = dma.vmem_to_hbm [thread:$0]  %s12517_s25, 32768, %s18322_s10, [#allocation8], %s15764_s3, %s15764_s3, %s15765_s13  }
 0x8fe   :  { %15747 = dma.done.wait [#allocation8], 32768  }
 0x8ff   :  { %15748 = vsyncadd [#allocation8], 4294934528 }
 0x900   :  { %12526 = vsyncpa [#allocation7], 1 }
 0x901   :  { %12527 = vsyncpa [#allocation10], 1 }
 0x902   :  { %12528 = vsyncpa [#allocation13], 1 }
 0x903   :  { %12529 = vsyncpa [#allocation16], 1 }
 0x904   :  { %12530 = vsyncpa [#allocation19], 1 }
 0x905   :  { %12531 = vsyncpa [#allocation8], 1 }

</bundles_post_ra>
